<compile_context>
chip_gen: v6e
topology: v6e:2x2x1
jax: 0.10.0
libtpu: 0.0.40
codegen_flags: <defaults>
</compile_context>

<pallas_src>
import functools

import jax
import jax.numpy as jnp
from jax.experimental import pallas as pl
from jax.experimental.pallas import tpu as pltpu


# ----------------------------------------------------------------------------
# Kernel
# ----------------------------------------------------------------------------
def _row_rotate(x, shift):
    """out[i] = x[(i + shift) % N] along axis 0 (static shift -> 2 slices + concat)."""
    n = x.shape[0]
    t = shift % n
    if t == 0:
        return x
    return jnp.concatenate([x[t:], x[:t]], axis=0)


def _conv3d_block_kernel(x0_ref, x1_ref, x2_ref, w_ref, mask_ref, bias_ref,
                         alpha_ref, o_ref, col_ref, *, W, mxu_dtype):
    """One (batch, output-depth-slice) step of PReLU(BN(Conv3d_3x3x3(x))).

    x{0,1,2}_ref : (1, 1, H*W, Cin)  depth taps kd = 0, 1, 2 (bf16 from HBM)
    w_ref        : (27*Cin, Cout)    BN-folded conv weight, VMEM resident
    mask_ref     : (H*W, 9)          in-plane (kh, kw) validity mask, resident
    bias_ref     : (1, Cout)         BN-folded bias (f32), resident
    alpha_ref    : (1, Cout)         PReLU slope (f32), resident
    o_ref        : (1, 1, H*W, Cout) f32 output slice
    col_ref      : (H*W, 27*Cin)     f32 scratch -- the in-VMEM im2col matrix
    """
    cin = x0_ref.shape[-1]
    masks = mask_ref[...]                                    # (H*W, 9) f32
    tap_idx = 0
    for x_ref in (x0_ref, x1_ref, x2_ref):                   # kd = 0, 1, 2
        plane = x_ref[0, 0].astype(jnp.float32)              # (H*W, Cin)
        for kh, dh in enumerate((-1, 0, 1)):                  # kh taps
            for kw, dw in enumerate((-1, 0, 1)):              # kw taps
                t = kh * 3 + kw
                tap = _row_rotate(plane, dh * W + dw)         # shifted window
                tap = tap * masks[:, t:t + 1]                 # zero invalid (h, w)
                col_ref[:, tap_idx * cin:(tap_idx + 1) * cin] = tap
                tap_idx += 1
    col = col_ref[...].astype(mxu_dtype)                      # (H*W, 27*Cin)
    acc = jnp.dot(col, w_ref[...], preferred_element_type=jnp.float32)
    acc = acc + bias_ref[...]                                 # conv + BN (folded)
    out = jnp.where(acc >= 0.0, acc, alpha_ref[...] * acc)    # PReLU epilogue
    o_ref[0, 0] = out.astype(o_ref.dtype)


# ----------------------------------------------------------------------------
# Wrapper
# ----------------------------------------------------------------------------
def _fold_bn(w, b, gamma, beta, mean, var, eps=1e-5):
    """Fold eval-mode BatchNorm3d into the conv weight / bias (float32)."""
    scale = gamma * jax.lax.rsqrt(var + eps)                  # (Cout,)
    w_f = w * scale[:, None, None, None, None]                # (Cout, Cin, 3, 3, 3)
    b_f = (b - mean) * scale + beta
    return w_f, b_f


def _boundary_mask(H, W):
    """(H*W, 9) float32 mask: 1 where the (kh, kw) tap lies inside the plane."""
    h = jnp.arange(H)
    w = jnp.arange(W)
    d = jnp.array([-1, 0, 1])
    ok_h = ((h[:, None] + d[None, :]) >= 0) & ((h[:, None] + d[None, :]) < H)  # (H, 3)
    ok_w = ((w[:, None] + d[None, :]) >= 0) & ((w[:, None] + d[None, :]) < W)  # (W, 3)
    valid = ok_h[:, None, :, None] & ok_w[None, :, None, :]                    # (H, W, 3, 3)
    return valid.reshape(H * W, 9).astype(jnp.float32)


@functools.partial(jax.jit, static_argnames=("compute_dtype",))
def conv3d_block_forward(x, params, compute_dtype=jnp.bfloat16):
    """Conv3dBlock forward.  x: (B, Cin, D, H, W) float32 (NCDHW, like PyTorch)."""
    B, Cin, D, H, W = x.shape
    Cout = params["w"].shape[0]
    HW = H * W
    K = 27 * Cin

    # ---- fold BatchNorm3d (eval) into the conv -------------------------------
    w_f, b_f = _fold_bn(params["w"], params["b"], params["gamma"],
                        params["beta"], params["mean"], params["var"])
    # (Cout, Cin, kd, kh, kw) -> (kd, kh, kw, Cin, Cout) -> (27*Cin, Cout)
    w2d = jnp.transpose(w_f, (2, 3, 4, 1, 0)).reshape(K, Cout).astype(compute_dtype)
    bias = b_f.reshape(1, Cout).astype(jnp.float32)
    alpha = jnp.broadcast_to(params["alpha"].astype(jnp.float32).reshape(-1),
                             (Cout,)).reshape(1, Cout)

    # ---- channels-last, pad depth ONCE, flatten each plane to (H*W, Cin) -----
    x_cl = jnp.transpose(x, (0, 2, 3, 4, 1))                          # (B, D, H, W, Cin)
    xp = jnp.pad(x_cl, ((0, 0), (1, 1), (0, 0), (0, 0), (0, 0)))      # depth halo only
    xp = xp.reshape(B, D + 2, HW, Cin).astype(compute_dtype)

    mask = _boundary_mask(H, W)

    def plane_spec(kd):
        return pl.BlockSpec((1, 1, HW, Cin), lambda b, d: (b, d + kd, 0, 0))

    def const_spec(shape):
        return pl.BlockSpec(shape, lambda b, d: (0, 0))

    out = pl.pallas_call(
        functools.partial(_conv3d_block_kernel, W=W, mxu_dtype=compute_dtype),
        out_shape=jax.ShapeDtypeStruct((B, D, HW, Cout), jnp.float32),
        grid=(B, D),
        in_specs=[
            plane_spec(0), plane_spec(1), plane_spec(2),  # depth-shifted views of xp
            const_spec((K, Cout)),                        # folded weight (resident)
            const_spec((HW, 9)),                          # boundary mask (resident)
            const_spec((1, Cout)),                        # folded bias  (resident)
            const_spec((1, Cout)),                        # PReLU slope  (resident)
        ],
        out_specs=pl.BlockSpec((1, 1, HW, Cout), lambda b, d: (b, d, 0, 0)),
        scratch_shapes=[pltpu.VMEM((HW, K), jnp.float32)],            # in-VMEM im2col
        compiler_params=pltpu.CompilerParams(
            dimension_semantics=("parallel", "parallel")),
    )(xp, xp, xp, w2d, mask, bias, alpha)

    out = out.reshape(B, D, H, W, Cout)
    return jnp.transpose(out, (0, 4, 1, 2, 3))                        # back to NCDHW


# ----------------------------------------------------------------------------
# Pure-JAX reference (float32) for correctness checking
# ----------------------------------------------------------------------------
def _reference_forward(x, params, eps=1e-5):
    y = jax.lax.conv_general_dilated(
        x, params["w"], window_strides=(1, 1, 1),
        padding=((1, 1), (1, 1), (1, 1)),
        dimension_numbers=("NCDHW", "OIDHW", "NCDHW"),
        precision=jax.lax.Precision.HIGHEST)
    c = y.shape[1]
    y = y + params["b"].reshape(1, c, 1, 1, 1)
    scale = params["gamma"] * jax.lax.rsqrt(params["var"] + eps)
    y = (y - params["mean"].reshape(1, c, 1, 1, 1)) * scale.reshape(1, c, 1, 1, 1) \
        + params["beta"].reshape(1, c, 1, 1, 1)
    alpha = jnp.broadcast_to(params["alpha"].reshape(-1), (c,)).reshape(1, c, 1, 1, 1)
    return jnp.where(y >= 0, y, alpha * y)


# ----------------------------------------------------------------------------
if __name__ == "__main__":
    B, CIN, COUT, D, H, W = 2, 4, 32, 16, 16, 16

    key = jax.random.PRNGKey(0)
    kx, kw, kb, kg, kbe, km, kv = jax.random.split(key, 7)
    fan_in = CIN * 27
    x = jax.random.normal(kx, (B, CIN, D, H, W), jnp.float32)
    params = {
        "w": jax.random.normal(kw, (COUT, CIN, 3, 3, 3), jnp.float32) / jnp.sqrt(fan_in),
        "b": 0.05 * jax.random.normal(kb, (COUT,), jnp.float32),
        "gamma": 1.0 + 0.1 * jax.random.normal(kg, (COUT,), jnp.float32),
        "beta": 0.1 * jax.random.normal(kbe, (COUT,), jnp.float32),
        "mean": 0.1 * jax.random.normal(km, (COUT,), jnp.float32),
        "var": jax.random.uniform(kv, (COUT,), jnp.float32, minval=0.5, maxval=1.5),
        "alpha": jnp.full((COUT,), 0.25, jnp.float32),   # PyTorch nn.PReLU() default slope
    }

    out = conv3d_block_forward(x, params, compute_dtype=jnp.bfloat16)
    out = jax.block_until_ready(out)
    assert out.shape == (B, COUT, D, H, W), out.shape
    assert bool(jnp.all(jnp.isfinite(out)))

    ref = _reference_forward(x, params)
    rel_err = float(jnp.max(jnp.abs(out - ref)) / (jnp.max(jnp.abs(ref)) + 1e-6))
    assert rel_err < 3e-2, f"mismatch vs reference: rel_err={rel_err}"

    print("KERNEL_OK")
</pallas_src>

<mosaic_0001>
module attributes {stable_mosaic.version = 11 : i64} {
  func.func @_conv3d_block_kernel(%arg0: i32, %arg1: i32, %arg2: memref<1x1x256x4xbf16, #tpu.memory_space<vmem>>, %arg3: memref<1x1x256x4xbf16, #tpu.memory_space<vmem>>, %arg4: memref<1x1x256x4xbf16, #tpu.memory_space<vmem>>, %arg5: memref<108x32xbf16, #tpu.memory_space<vmem>>, %arg6: memref<256x9xf32, #tpu.memory_space<vmem>>, %arg7: memref<1x32xf32, #tpu.memory_space<vmem>>, %arg8: memref<1x32xf32, #tpu.memory_space<vmem>>, %arg9: memref<1x1x256x32xf32, #tpu.memory_space<vmem>>, %arg10: memref<256x108xf32, #tpu.memory_space<vmem>>) attributes {dimension_semantics = [#tpu.dimension_semantics<parallel>, #tpu.dimension_semantics<parallel>], iteration_bounds = array<i64: 2, 16>, scalar_prefetch = 0 : i64, scratch_operands = 1 : i64, tpu.core_type = #tpu.core_type<tc>, window_params = [{transform_indices = @transform_0, window_bounds = array<i64: 1, 1, 256, 4>}, {transform_indices = @transform_1, window_bounds = array<i64: 1, 1, 256, 4>}, {transform_indices = @transform_2, window_bounds = array<i64: 1, 1, 256, 4>}, {pipeline_mode = #tpu.pipeline_mode<synchronous>, transform_indices = @transform_3, window_bounds = array<i64: 108, 32>}, {pipeline_mode = #tpu.pipeline_mode<synchronous>, transform_indices = @transform_4, window_bounds = array<i64: 256, 9>}, {pipeline_mode = #tpu.pipeline_mode<synchronous>, transform_indices = @transform_5, window_bounds = array<i64: 1, 32>}, {pipeline_mode = #tpu.pipeline_mode<synchronous>, transform_indices = @transform_6, window_bounds = array<i64: 1, 32>}, {transform_indices = @transform_7, window_bounds = array<i64: 1, 1, 256, 32>}]} {
    %c0 = arith.constant 0 : index
    %c0_0 = arith.constant 0 : index
    %0 = vector.load %arg6[%c0, %c0_0] : memref<256x9xf32, #tpu.memory_space<vmem>>, vector<256x9xf32>
    %c0_1 = arith.constant 0 : index
    %c0_2 = arith.constant 0 : index
    %c0_3 = arith.constant 0 : index
    %c0_4 = arith.constant 0 : index
    %1 = vector.load %arg2[%c0_1, %c0_2, %c0_3, %c0_4] : memref<1x1x256x4xbf16, #tpu.memory_space<vmem>>, vector<1x1x256x4xbf16>
    %2 = vector.shape_cast %1 : vector<1x1x256x4xbf16> to vector<256x4xbf16>
    %3 = arith.extf %2 : vector<256x4xbf16> to vector<256x4xf32>
    %4 = vector.extract_strided_slice %3 {offsets = [239, 0], sizes = [17, 4], strides = [1, 1]} : vector<256x4xf32> to vector<17x4xf32>
    %5 = vector.extract_strided_slice %3 {offsets = [0, 0], sizes = [239, 4], strides = [1, 1]} : vector<256x4xf32> to vector<239x4xf32>
    %6 = tpu.concatenate %4, %5 in 0 : vector<17x4xf32>, vector<239x4xf32> -> vector<256x4xf32>
    %7 = vector.extract_strided_slice %0 {offsets = [0, 0], sizes = [256, 1], strides = [1, 1]} : vector<256x9xf32> to vector<256x1xf32>
    %8 = vector.broadcast %7 : vector<256x1xf32> to vector<256x4xf32>
    %9 = arith.mulf %6, %8 : vector<256x4xf32>
    %c0_5 = arith.constant 0 : index
    %c0_6 = arith.constant 0 : index
    %10 = vector.load %arg10[%c0_5, %c0_6] : memref<256x108xf32, #tpu.memory_space<vmem>>, vector<256x4xf32>
    tpu.vector_store %arg10[%c0_5, %c0_6], %9 {strides = array<i32>} : memref<256x108xf32, #tpu.memory_space<vmem>>, vector<256x4xf32>,
    %11 = vector.extract_strided_slice %3 {offsets = [240, 0], sizes = [16, 4], strides = [1, 1]} : vector<256x4xf32> to vector<16x4xf32>
    %12 = vector.extract_strided_slice %3 {offsets = [0, 0], sizes = [240, 4], strides = [1, 1]} : vector<256x4xf32> to vector<240x4xf32>
    %13 = tpu.concatenate %11, %12 in 0 : vector<16x4xf32>, vector<240x4xf32> -> vector<256x4xf32>
    %14 = vector.extract_strided_slice %0 {offsets = [0, 1], sizes = [256, 1], strides = [1, 1]} : vector<256x9xf32> to vector<256x1xf32>
    %15 = vector.broadcast %14 : vector<256x1xf32> to vector<256x4xf32>
    %16 = arith.mulf %13, %15 : vector<256x4xf32>
    %c0_7 = arith.constant 0 : index
    %c4 = arith.constant 4 : index
    %17 = vector.load %arg10[%c0_7, %c4] : memref<256x108xf32, #tpu.memory_space<vmem>>, vector<256x4xf32>
    tpu.vector_store %arg10[%c0_7, %c4], %16 {strides = array<i32>} : memref<256x108xf32, #tpu.memory_space<vmem>>, vector<256x4xf32>,
    %18 = vector.extract_strided_slice %3 {offsets = [241, 0], sizes = [15, 4], strides = [1, 1]} : vector<256x4xf32> to vector<15x4xf32>
    %19 = vector.extract_strided_slice %3 {offsets = [0, 0], sizes = [241, 4], strides = [1, 1]} : vector<256x4xf32> to vector<241x4xf32>
    %20 = tpu.concatenate %18, %19 in 0 : vector<15x4xf32>, vector<241x4xf32> -> vector<256x4xf32>
    %21 = vector.extract_strided_slice %0 {offsets = [0, 2], sizes = [256, 1], strides = [1, 1]} : vector<256x9xf32> to vector<256x1xf32>
    %22 = vector.broadcast %21 : vector<256x1xf32> to vector<256x4xf32>
    %23 = arith.mulf %20, %22 : vector<256x4xf32>
    %c0_8 = arith.constant 0 : index
    %c8 = arith.constant 8 : index
    %24 = vector.load %arg10[%c0_8, %c8] : memref<256x108xf32, #tpu.memory_space<vmem>>, vector<256x4xf32>
    tpu.vector_store %arg10[%c0_8, %c8], %23 {strides = array<i32>} : memref<256x108xf32, #tpu.memory_space<vmem>>, vector<256x4xf32>,
    %25 = vector.extract_strided_slice %3 {offsets = [255, 0], sizes = [1, 4], strides = [1, 1]} : vector<256x4xf32> to vector<1x4xf32>
    %26 = vector.extract_strided_slice %3 {offsets = [0, 0], sizes = [255, 4], strides = [1, 1]} : vector<256x4xf32> to vector<255x4xf32>
    %27 = tpu.concatenate %25, %26 in 0 : vector<1x4xf32>, vector<255x4xf32> -> vector<256x4xf32>
    %28 = vector.extract_strided_slice %0 {offsets = [0, 3], sizes = [256, 1], strides = [1, 1]} : vector<256x9xf32> to vector<256x1xf32>
    %29 = vector.broadcast %28 : vector<256x1xf32> to vector<256x4xf32>
    %30 = arith.mulf %27, %29 : vector<256x4xf32>
    %c0_9 = arith.constant 0 : index
    %c12 = arith.constant 12 : index
    %31 = vector.load %arg10[%c0_9, %c12] : memref<256x108xf32, #tpu.memory_space<vmem>>, vector<256x4xf32>
    tpu.vector_store %arg10[%c0_9, %c12], %30 {strides = array<i32>} : memref<256x108xf32, #tpu.memory_space<vmem>>, vector<256x4xf32>,
    %32 = vector.extract_strided_slice %0 {offsets = [0, 4], sizes = [256, 1], strides = [1, 1]} : vector<256x9xf32> to vector<256x1xf32>
    %33 = vector.broadcast %32 : vector<256x1xf32> to vector<256x4xf32>
    %34 = arith.mulf %3, %33 : vector<256x4xf32>
    %c0_10 = arith.constant 0 : index
    %c16 = arith.constant 16 : index
    %35 = vector.load %arg10[%c0_10, %c16] : memref<256x108xf32, #tpu.memory_space<vmem>>, vector<256x4xf32>
    tpu.vector_store %arg10[%c0_10, %c16], %34 {strides = array<i32>} : memref<256x108xf32, #tpu.memory_space<vmem>>, vector<256x4xf32>,
    %36 = vector.extract_strided_slice %3 {offsets = [1, 0], sizes = [255, 4], strides = [1, 1]} : vector<256x4xf32> to vector<255x4xf32>
    %37 = vector.extract_strided_slice %3 {offsets = [0, 0], sizes = [1, 4], strides = [1, 1]} : vector<256x4xf32> to vector<1x4xf32>
    %38 = tpu.concatenate %36, %37 in 0 : vector<255x4xf32>, vector<1x4xf32> -> vector<256x4xf32>
    %39 = vector.extract_strided_slice %0 {offsets = [0, 5], sizes = [256, 1], strides = [1, 1]} : vector<256x9xf32> to vector<256x1xf32>
    %40 = vector.broadcast %39 : vector<256x1xf32> to vector<256x4xf32>
    %41 = arith.mulf %38, %40 : vector<256x4xf32>
    %c0_11 = arith.constant 0 : index
    %c20 = arith.constant 20 : index
    %42 = vector.load %arg10[%c0_11, %c20] : memref<256x108xf32, #tpu.memory_space<vmem>>, vector<256x4xf32>
    tpu.vector_store %arg10[%c0_11, %c20], %41 {strides = array<i32>} : memref<256x108xf32, #tpu.memory_space<vmem>>, vector<256x4xf32>,
    %43 = vector.extract_strided_slice %3 {offsets = [15, 0], sizes = [241, 4], strides = [1, 1]} : vector<256x4xf32> to vector<241x4xf32>
    %44 = vector.extract_strided_slice %3 {offsets = [0, 0], sizes = [15, 4], strides = [1, 1]} : vector<256x4xf32> to vector<15x4xf32>
    %45 = tpu.concatenate %43, %44 in 0 : vector<241x4xf32>, vector<15x4xf32> -> vector<256x4xf32>
    %46 = vector.extract_strided_slice %0 {offsets = [0, 6], sizes = [256, 1], strides = [1, 1]} : vector<256x9xf32> to vector<256x1xf32>
    %47 = vector.broadcast %46 : vector<256x1xf32> to vector<256x4xf32>
    %48 = arith.mulf %45, %47 : vector<256x4xf32>
    %c0_12 = arith.constant 0 : index
    %c24 = arith.constant 24 : index
    %49 = vector.load %arg10[%c0_12, %c24] : memref<256x108xf32, #tpu.memory_space<vmem>>, vector<256x4xf32>
    tpu.vector_store %arg10[%c0_12, %c24], %48 {strides = array<i32>} : memref<256x108xf32, #tpu.memory_space<vmem>>, vector<256x4xf32>,
    %50 = vector.extract_strided_slice %3 {offsets = [16, 0], sizes = [240, 4], strides = [1, 1]} : vector<256x4xf32> to vector<240x4xf32>
    %51 = vector.extract_strided_slice %3 {offsets = [0, 0], sizes = [16, 4], strides = [1, 1]} : vector<256x4xf32> to vector<16x4xf32>
    %52 = tpu.concatenate %50, %51 in 0 : vector<240x4xf32>, vector<16x4xf32> -> vector<256x4xf32>
    %53 = vector.extract_strided_slice %0 {offsets = [0, 7], sizes = [256, 1], strides = [1, 1]} : vector<256x9xf32> to vector<256x1xf32>
    %54 = vector.broadcast %53 : vector<256x1xf32> to vector<256x4xf32>
    %55 = arith.mulf %52, %54 : vector<256x4xf32>
    %c0_13 = arith.constant 0 : index
    %c28 = arith.constant 28 : index
    %56 = vector.load %arg10[%c0_13, %c28] : memref<256x108xf32, #tpu.memory_space<vmem>>, vector<256x4xf32>
    tpu.vector_store %arg10[%c0_13, %c28], %55 {strides = array<i32>} : memref<256x108xf32, #tpu.memory_space<vmem>>, vector<256x4xf32>,
    %57 = vector.extract_strided_slice %3 {offsets = [17, 0], sizes = [239, 4], strides = [1, 1]} : vector<256x4xf32> to vector<239x4xf32>
    %58 = vector.extract_strided_slice %3 {offsets = [0, 0], sizes = [17, 4], strides = [1, 1]} : vector<256x4xf32> to vector<17x4xf32>
    %59 = tpu.concatenate %57, %58 in 0 : vector<239x4xf32>, vector<17x4xf32> -> vector<256x4xf32>
    %60 = vector.extract_strided_slice %0 {offsets = [0, 8], sizes = [256, 1], strides = [1, 1]} : vector<256x9xf32> to vector<256x1xf32>
    %61 = vector.broadcast %60 : vector<256x1xf32> to vector<256x4xf32>
    %62 = arith.mulf %59, %61 : vector<256x4xf32>
    %c0_14 = arith.constant 0 : index
    %c32 = arith.constant 32 : index
    %63 = vector.load %arg10[%c0_14, %c32] : memref<256x108xf32, #tpu.memory_space<vmem>>, vector<256x4xf32>
    tpu.vector_store %arg10[%c0_14, %c32], %62 {strides = array<i32>} : memref<256x108xf32, #tpu.memory_space<vmem>>, vector<256x4xf32>,
    %c0_15 = arith.constant 0 : index
    %c0_16 = arith.constant 0 : index
    %c0_17 = arith.constant 0 : index
    %c0_18 = arith.constant 0 : index
    %64 = vector.load %arg3[%c0_15, %c0_16, %c0_17, %c0_18] : memref<1x1x256x4xbf16, #tpu.memory_space<vmem>>, vector<1x1x256x4xbf16>
    %65 = vector.shape_cast %64 : vector<1x1x256x4xbf16> to vector<256x4xbf16>
    %66 = arith.extf %65 : vector<256x4xbf16> to vector<256x4xf32>
    %67 = vector.extract_strided_slice %66 {offsets = [239, 0], sizes = [17, 4], strides = [1, 1]} : vector<256x4xf32> to vector<17x4xf32>
    %68 = vector.extract_strided_slice %66 {offsets = [0, 0], sizes = [239, 4], strides = [1, 1]} : vector<256x4xf32> to vector<239x4xf32>
    %69 = tpu.concatenate %67, %68 in 0 : vector<17x4xf32>, vector<239x4xf32> -> vector<256x4xf32>
    %70 = vector.extract_strided_slice %0 {offsets = [0, 0], sizes = [256, 1], strides = [1, 1]} : vector<256x9xf32> to vector<256x1xf32>
    %71 = vector.broadcast %70 : vector<256x1xf32> to vector<256x4xf32>
    %72 = arith.mulf %69, %71 : vector<256x4xf32>
    %c0_19 = arith.constant 0 : index
    %c36 = arith.constant 36 : index
    %73 = vector.load %arg10[%c0_19, %c36] : memref<256x108xf32, #tpu.memory_space<vmem>>, vector<256x4xf32>
    tpu.vector_store %arg10[%c0_19, %c36], %72 {strides = array<i32>} : memref<256x108xf32, #tpu.memory_space<vmem>>, vector<256x4xf32>,
    %74 = vector.extract_strided_slice %66 {offsets = [240, 0], sizes = [16, 4], strides = [1, 1]} : vector<256x4xf32> to vector<16x4xf32>
    %75 = vector.extract_strided_slice %66 {offsets = [0, 0], sizes = [240, 4], strides = [1, 1]} : vector<256x4xf32> to vector<240x4xf32>
    %76 = tpu.concatenate %74, %75 in 0 : vector<16x4xf32>, vector<240x4xf32> -> vector<256x4xf32>
    %77 = vector.extract_strided_slice %0 {offsets = [0, 1], sizes = [256, 1], strides = [1, 1]} : vector<256x9xf32> to vector<256x1xf32>
    %78 = vector.broadcast %77 : vector<256x1xf32> to vector<256x4xf32>
    %79 = arith.mulf %76, %78 : vector<256x4xf32>
    %c0_20 = arith.constant 0 : index
    %c40 = arith.constant 40 : index
    %80 = vector.load %arg10[%c0_20, %c40] : memref<256x108xf32, #tpu.memory_space<vmem>>, vector<256x4xf32>
    tpu.vector_store %arg10[%c0_20, %c40], %79 {strides = array<i32>} : memref<256x108xf32, #tpu.memory_space<vmem>>, vector<256x4xf32>,
    %81 = vector.extract_strided_slice %66 {offsets = [241, 0], sizes = [15, 4], strides = [1, 1]} : vector<256x4xf32> to vector<15x4xf32>
    %82 = vector.extract_strided_slice %66 {offsets = [0, 0], sizes = [241, 4], strides = [1, 1]} : vector<256x4xf32> to vector<241x4xf32>
    %83 = tpu.concatenate %81, %82 in 0 : vector<15x4xf32>, vector<241x4xf32> -> vector<256x4xf32>
    %84 = vector.extract_strided_slice %0 {offsets = [0, 2], sizes = [256, 1], strides = [1, 1]} : vector<256x9xf32> to vector<256x1xf32>
    %85 = vector.broadcast %84 : vector<256x1xf32> to vector<256x4xf32>
    %86 = arith.mulf %83, %85 : vector<256x4xf32>
    %c0_21 = arith.constant 0 : index
    %c44 = arith.constant 44 : index
    %87 = vector.load %arg10[%c0_21, %c44] : memref<256x108xf32, #tpu.memory_space<vmem>>, vector<256x4xf32>
    tpu.vector_store %arg10[%c0_21, %c44], %86 {strides = array<i32>} : memref<256x108xf32, #tpu.memory_space<vmem>>, vector<256x4xf32>,
    %88 = vector.extract_strided_slice %66 {offsets = [255, 0], sizes = [1, 4], strides = [1, 1]} : vector<256x4xf32> to vector<1x4xf32>
    %89 = vector.extract_strided_slice %66 {offsets = [0, 0], sizes = [255, 4], strides = [1, 1]} : vector<256x4xf32> to vector<255x4xf32>
    %90 = tpu.concatenate %88, %89 in 0 : vector<1x4xf32>, vector<255x4xf32> -> vector<256x4xf32>
    %91 = vector.extract_strided_slice %0 {offsets = [0, 3], sizes = [256, 1], strides = [1, 1]} : vector<256x9xf32> to vector<256x1xf32>
    %92 = vector.broadcast %91 : vector<256x1xf32> to vector<256x4xf32>
    %93 = arith.mulf %90, %92 : vector<256x4xf32>
    %c0_22 = arith.constant 0 : index
    %c48 = arith.constant 48 : index
    %94 = vector.load %arg10[%c0_22, %c48] : memref<256x108xf32, #tpu.memory_space<vmem>>, vector<256x4xf32>
    tpu.vector_store %arg10[%c0_22, %c48], %93 {strides = array<i32>} : memref<256x108xf32, #tpu.memory_space<vmem>>, vector<256x4xf32>,
    %95 = vector.extract_strided_slice %0 {offsets = [0, 4], sizes = [256, 1], strides = [1, 1]} : vector<256x9xf32> to vector<256x1xf32>
    %96 = vector.broadcast %95 : vector<256x1xf32> to vector<256x4xf32>
    %97 = arith.mulf %66, %96 : vector<256x4xf32>
    %c0_23 = arith.constant 0 : index
    %c52 = arith.constant 52 : index
    %98 = vector.load %arg10[%c0_23, %c52] : memref<256x108xf32, #tpu.memory_space<vmem>>, vector<256x4xf32>
    tpu.vector_store %arg10[%c0_23, %c52], %97 {strides = array<i32>} : memref<256x108xf32, #tpu.memory_space<vmem>>, vector<256x4xf32>,
    %99 = vector.extract_strided_slice %66 {offsets = [1, 0], sizes = [255, 4], strides = [1, 1]} : vector<256x4xf32> to vector<255x4xf32>
    %100 = vector.extract_strided_slice %66 {offsets = [0, 0], sizes = [1, 4], strides = [1, 1]} : vector<256x4xf32> to vector<1x4xf32>
    %101 = tpu.concatenate %99, %100 in 0 : vector<255x4xf32>, vector<1x4xf32> -> vector<256x4xf32>
    %102 = vector.extract_strided_slice %0 {offsets = [0, 5], sizes = [256, 1], strides = [1, 1]} : vector<256x9xf32> to vector<256x1xf32>
    %103 = vector.broadcast %102 : vector<256x1xf32> to vector<256x4xf32>
    %104 = arith.mulf %101, %103 : vector<256x4xf32>
    %c0_24 = arith.constant 0 : index
    %c56 = arith.constant 56 : index
    %105 = vector.load %arg10[%c0_24, %c56] : memref<256x108xf32, #tpu.memory_space<vmem>>, vector<256x4xf32>
    tpu.vector_store %arg10[%c0_24, %c56], %104 {strides = array<i32>} : memref<256x108xf32, #tpu.memory_space<vmem>>, vector<256x4xf32>,
    %106 = vector.extract_strided_slice %66 {offsets = [15, 0], sizes = [241, 4], strides = [1, 1]} : vector<256x4xf32> to vector<241x4xf32>
    %107 = vector.extract_strided_slice %66 {offsets = [0, 0], sizes = [15, 4], strides = [1, 1]} : vector<256x4xf32> to vector<15x4xf32>
    %108 = tpu.concatenate %106, %107 in 0 : vector<241x4xf32>, vector<15x4xf32> -> vector<256x4xf32>
    %109 = vector.extract_strided_slice %0 {offsets = [0, 6], sizes = [256, 1], strides = [1, 1]} : vector<256x9xf32> to vector<256x1xf32>
    %110 = vector.broadcast %109 : vector<256x1xf32> to vector<256x4xf32>
    %111 = arith.mulf %108, %110 : vector<256x4xf32>
    %c0_25 = arith.constant 0 : index
    %c60 = arith.constant 60 : index
    %112 = vector.load %arg10[%c0_25, %c60] : memref<256x108xf32, #tpu.memory_space<vmem>>, vector<256x4xf32>
    tpu.vector_store %arg10[%c0_25, %c60], %111 {strides = array<i32>} : memref<256x108xf32, #tpu.memory_space<vmem>>, vector<256x4xf32>,
    %113 = vector.extract_strided_slice %66 {offsets = [16, 0], sizes = [240, 4], strides = [1, 1]} : vector<256x4xf32> to vector<240x4xf32>
    %114 = vector.extract_strided_slice %66 {offsets = [0, 0], sizes = [16, 4], strides = [1, 1]} : vector<256x4xf32> to vector<16x4xf32>
    %115 = tpu.concatenate %113, %114 in 0 : vector<240x4xf32>, vector<16x4xf32> -> vector<256x4xf32>
    %116 = vector.extract_strided_slice %0 {offsets = [0, 7], sizes = [256, 1], strides = [1, 1]} : vector<256x9xf32> to vector<256x1xf32>
    %117 = vector.broadcast %116 : vector<256x1xf32> to vector<256x4xf32>
    %118 = arith.mulf %115, %117 : vector<256x4xf32>
    %c0_26 = arith.constant 0 : index
    %c64 = arith.constant 64 : index
    %119 = vector.load %arg10[%c0_26, %c64] : memref<256x108xf32, #tpu.memory_space<vmem>>, vector<256x4xf32>
    tpu.vector_store %arg10[%c0_26, %c64], %118 {strides = array<i32>} : memref<256x108xf32, #tpu.memory_space<vmem>>, vector<256x4xf32>,
    %120 = vector.extract_strided_slice %66 {offsets = [17, 0], sizes = [239, 4], strides = [1, 1]} : vector<256x4xf32> to vector<239x4xf32>
    %121 = vector.extract_strided_slice %66 {offsets = [0, 0], sizes = [17, 4], strides = [1, 1]} : vector<256x4xf32> to vector<17x4xf32>
    %122 = tpu.concatenate %120, %121 in 0 : vector<239x4xf32>, vector<17x4xf32> -> vector<256x4xf32>
    %123 = vector.extract_strided_slice %0 {offsets = [0, 8], sizes = [256, 1], strides = [1, 1]} : vector<256x9xf32> to vector<256x1xf32>
    %124 = vector.broadcast %123 : vector<256x1xf32> to vector<256x4xf32>
    %125 = arith.mulf %122, %124 : vector<256x4xf32>
    %c0_27 = arith.constant 0 : index
    %c68 = arith.constant 68 : index
    %126 = vector.load %arg10[%c0_27, %c68] : memref<256x108xf32, #tpu.memory_space<vmem>>, vector<256x4xf32>
    tpu.vector_store %arg10[%c0_27, %c68], %125 {strides = array<i32>} : memref<256x108xf32, #tpu.memory_space<vmem>>, vector<256x4xf32>,
    %c0_28 = arith.constant 0 : index
    %c0_29 = arith.constant 0 : index
    %c0_30 = arith.constant 0 : index
    %c0_31 = arith.constant 0 : index
    %127 = vector.load %arg4[%c0_28, %c0_29, %c0_30, %c0_31] : memref<1x1x256x4xbf16, #tpu.memory_space<vmem>>, vector<1x1x256x4xbf16>
    %128 = vector.shape_cast %127 : vector<1x1x256x4xbf16> to vector<256x4xbf16>
    %129 = arith.extf %128 : vector<256x4xbf16> to vector<256x4xf32>
    %130 = vector.extract_strided_slice %129 {offsets = [239, 0], sizes = [17, 4], strides = [1, 1]} : vector<256x4xf32> to vector<17x4xf32>
    %131 = vector.extract_strided_slice %129 {offsets = [0, 0], sizes = [239, 4], strides = [1, 1]} : vector<256x4xf32> to vector<239x4xf32>
    %132 = tpu.concatenate %130, %131 in 0 : vector<17x4xf32>, vector<239x4xf32> -> vector<256x4xf32>
    %133 = vector.extract_strided_slice %0 {offsets = [0, 0], sizes = [256, 1], strides = [1, 1]} : vector<256x9xf32> to vector<256x1xf32>
    %134 = vector.broadcast %133 : vector<256x1xf32> to vector<256x4xf32>
    %135 = arith.mulf %132, %134 : vector<256x4xf32>
    %c0_32 = arith.constant 0 : index
    %c72 = arith.constant 72 : index
    %136 = vector.load %arg10[%c0_32, %c72] : memref<256x108xf32, #tpu.memory_space<vmem>>, vector<256x4xf32>
    tpu.vector_store %arg10[%c0_32, %c72], %135 {strides = array<i32>} : memref<256x108xf32, #tpu.memory_space<vmem>>, vector<256x4xf32>,
    %137 = vector.extract_strided_slice %129 {offsets = [240, 0], sizes = [16, 4], strides = [1, 1]} : vector<256x4xf32> to vector<16x4xf32>
    %138 = vector.extract_strided_slice %129 {offsets = [0, 0], sizes = [240, 4], strides = [1, 1]} : vector<256x4xf32> to vector<240x4xf32>
    %139 = tpu.concatenate %137, %138 in 0 : vector<16x4xf32>, vector<240x4xf32> -> vector<256x4xf32>
    %140 = vector.extract_strided_slice %0 {offsets = [0, 1], sizes = [256, 1], strides = [1, 1]} : vector<256x9xf32> to vector<256x1xf32>
    %141 = vector.broadcast %140 : vector<256x1xf32> to vector<256x4xf32>
    %142 = arith.mulf %139, %141 : vector<256x4xf32>
    %c0_33 = arith.constant 0 : index
    %c76 = arith.constant 76 : index
    %143 = vector.load %arg10[%c0_33, %c76] : memref<256x108xf32, #tpu.memory_space<vmem>>, vector<256x4xf32>
    tpu.vector_store %arg10[%c0_33, %c76], %142 {strides = array<i32>} : memref<256x108xf32, #tpu.memory_space<vmem>>, vector<256x4xf32>,
    %144 = vector.extract_strided_slice %129 {offsets = [241, 0], sizes = [15, 4], strides = [1, 1]} : vector<256x4xf32> to vector<15x4xf32>
    %145 = vector.extract_strided_slice %129 {offsets = [0, 0], sizes = [241, 4], strides = [1, 1]} : vector<256x4xf32> to vector<241x4xf32>
    %146 = tpu.concatenate %144, %145 in 0 : vector<15x4xf32>, vector<241x4xf32> -> vector<256x4xf32>
    %147 = vector.extract_strided_slice %0 {offsets = [0, 2], sizes = [256, 1], strides = [1, 1]} : vector<256x9xf32> to vector<256x1xf32>
    %148 = vector.broadcast %147 : vector<256x1xf32> to vector<256x4xf32>
    %149 = arith.mulf %146, %148 : vector<256x4xf32>
    %c0_34 = arith.constant 0 : index
    %c80 = arith.constant 80 : index
    %150 = vector.load %arg10[%c0_34, %c80] : memref<256x108xf32, #tpu.memory_space<vmem>>, vector<256x4xf32>
    tpu.vector_store %arg10[%c0_34, %c80], %149 {strides = array<i32>} : memref<256x108xf32, #tpu.memory_space<vmem>>, vector<256x4xf32>,
    %151 = vector.extract_strided_slice %129 {offsets = [255, 0], sizes = [1, 4], strides = [1, 1]} : vector<256x4xf32> to vector<1x4xf32>
    %152 = vector.extract_strided_slice %129 {offsets = [0, 0], sizes = [255, 4], strides = [1, 1]} : vector<256x4xf32> to vector<255x4xf32>
    %153 = tpu.concatenate %151, %152 in 0 : vector<1x4xf32>, vector<255x4xf32> -> vector<256x4xf32>
    %154 = vector.extract_strided_slice %0 {offsets = [0, 3], sizes = [256, 1], strides = [1, 1]} : vector<256x9xf32> to vector<256x1xf32>
    %155 = vector.broadcast %154 : vector<256x1xf32> to vector<256x4xf32>
    %156 = arith.mulf %153, %155 : vector<256x4xf32>
    %c0_35 = arith.constant 0 : index
    %c84 = arith.constant 84 : index
    %157 = vector.load %arg10[%c0_35, %c84] : memref<256x108xf32, #tpu.memory_space<vmem>>, vector<256x4xf32>
    tpu.vector_store %arg10[%c0_35, %c84], %156 {strides = array<i32>} : memref<256x108xf32, #tpu.memory_space<vmem>>, vector<256x4xf32>,
    %158 = vector.extract_strided_slice %0 {offsets = [0, 4], sizes = [256, 1], strides = [1, 1]} : vector<256x9xf32> to vector<256x1xf32>
    %159 = vector.broadcast %158 : vector<256x1xf32> to vector<256x4xf32>
    %160 = arith.mulf %129, %159 : vector<256x4xf32>
    %c0_36 = arith.constant 0 : index
    %c88 = arith.constant 88 : index
    %161 = vector.load %arg10[%c0_36, %c88] : memref<256x108xf32, #tpu.memory_space<vmem>>, vector<256x4xf32>
    tpu.vector_store %arg10[%c0_36, %c88], %160 {strides = array<i32>} : memref<256x108xf32, #tpu.memory_space<vmem>>, vector<256x4xf32>,
    %162 = vector.extract_strided_slice %129 {offsets = [1, 0], sizes = [255, 4], strides = [1, 1]} : vector<256x4xf32> to vector<255x4xf32>
    %163 = vector.extract_strided_slice %129 {offsets = [0, 0], sizes = [1, 4], strides = [1, 1]} : vector<256x4xf32> to vector<1x4xf32>
    %164 = tpu.concatenate %162, %163 in 0 : vector<255x4xf32>, vector<1x4xf32> -> vector<256x4xf32>
    %165 = vector.extract_strided_slice %0 {offsets = [0, 5], sizes = [256, 1], strides = [1, 1]} : vector<256x9xf32> to vector<256x1xf32>
    %166 = vector.broadcast %165 : vector<256x1xf32> to vector<256x4xf32>
    %167 = arith.mulf %164, %166 : vector<256x4xf32>
    %c0_37 = arith.constant 0 : index
    %c92 = arith.constant 92 : index
    %168 = vector.load %arg10[%c0_37, %c92] : memref<256x108xf32, #tpu.memory_space<vmem>>, vector<256x4xf32>
    tpu.vector_store %arg10[%c0_37, %c92], %167 {strides = array<i32>} : memref<256x108xf32, #tpu.memory_space<vmem>>, vector<256x4xf32>,
    %169 = vector.extract_strided_slice %129 {offsets = [15, 0], sizes = [241, 4], strides = [1, 1]} : vector<256x4xf32> to vector<241x4xf32>
    %170 = vector.extract_strided_slice %129 {offsets = [0, 0], sizes = [15, 4], strides = [1, 1]} : vector<256x4xf32> to vector<15x4xf32>
    %171 = tpu.concatenate %169, %170 in 0 : vector<241x4xf32>, vector<15x4xf32> -> vector<256x4xf32>
    %172 = vector.extract_strided_slice %0 {offsets = [0, 6], sizes = [256, 1], strides = [1, 1]} : vector<256x9xf32> to vector<256x1xf32>
    %173 = vector.broadcast %172 : vector<256x1xf32> to vector<256x4xf32>
    %174 = arith.mulf %171, %173 : vector<256x4xf32>
    %c0_38 = arith.constant 0 : index
    %c96 = arith.constant 96 : index
    %175 = vector.load %arg10[%c0_38, %c96] : memref<256x108xf32, #tpu.memory_space<vmem>>, vector<256x4xf32>
    tpu.vector_store %arg10[%c0_38, %c96], %174 {strides = array<i32>} : memref<256x108xf32, #tpu.memory_space<vmem>>, vector<256x4xf32>,
    %176 = vector.extract_strided_slice %129 {offsets = [16, 0], sizes = [240, 4], strides = [1, 1]} : vector<256x4xf32> to vector<240x4xf32>
    %177 = vector.extract_strided_slice %129 {offsets = [0, 0], sizes = [16, 4], strides = [1, 1]} : vector<256x4xf32> to vector<16x4xf32>
    %178 = tpu.concatenate %176, %177 in 0 : vector<240x4xf32>, vector<16x4xf32> -> vector<256x4xf32>
    %179 = vector.extract_strided_slice %0 {offsets = [0, 7], sizes = [256, 1], strides = [1, 1]} : vector<256x9xf32> to vector<256x1xf32>
    %180 = vector.broadcast %179 : vector<256x1xf32> to vector<256x4xf32>
    %181 = arith.mulf %178, %180 : vector<256x4xf32>
    %c0_39 = arith.constant 0 : index
    %c100 = arith.constant 100 : index
    %182 = vector.load %arg10[%c0_39, %c100] : memref<256x108xf32, #tpu.memory_space<vmem>>, vector<256x4xf32>
    tpu.vector_store %arg10[%c0_39, %c100], %181 {strides = array<i32>} : memref<256x108xf32, #tpu.memory_space<vmem>>, vector<256x4xf32>,
    %183 = vector.extract_strided_slice %129 {offsets = [17, 0], sizes = [239, 4], strides = [1, 1]} : vector<256x4xf32> to vector<239x4xf32>
    %184 = vector.extract_strided_slice %129 {offsets = [0, 0], sizes = [17, 4], strides = [1, 1]} : vector<256x4xf32> to vector<17x4xf32>
    %185 = tpu.concatenate %183, %184 in 0 : vector<239x4xf32>, vector<17x4xf32> -> vector<256x4xf32>
    %186 = vector.extract_strided_slice %0 {offsets = [0, 8], sizes = [256, 1], strides = [1, 1]} : vector<256x9xf32> to vector<256x1xf32>
    %187 = vector.broadcast %186 : vector<256x1xf32> to vector<256x4xf32>
    %188 = arith.mulf %185, %187 : vector<256x4xf32>
    %c0_40 = arith.constant 0 : index
    %c104 = arith.constant 104 : index
    %189 = vector.load %arg10[%c0_40, %c104] : memref<256x108xf32, #tpu.memory_space<vmem>>, vector<256x4xf32>
    tpu.vector_store %arg10[%c0_40, %c104], %188 {strides = array<i32>} : memref<256x108xf32, #tpu.memory_space<vmem>>, vector<256x4xf32>,
    %c0_41 = arith.constant 0 : index
    %c0_42 = arith.constant 0 : index
    %190 = vector.load %arg10[%c0_41, %c0_42] : memref<256x108xf32, #tpu.memory_space<vmem>>, vector<256x108xf32>
    %191 = arith.truncf %190 : vector<256x108xf32> to vector<256x108xbf16>
    %c0_43 = arith.constant 0 : index
    %c0_44 = arith.constant 0 : index
    %192 = vector.load %arg5[%c0_43, %c0_44] : memref<108x32xbf16, #tpu.memory_space<vmem>>, vector<108x32xbf16>
    %cst = arith.constant dense<0.000000e+00> : vector<256x32xf32>
    %193 = tpu.matmul %191, %192, %cst {dimension_numbers = #tpu.dot_dimension_numbers<[1], [0], [0], [1], [0, 0, 1, 1], [], []>} : vector<256x108xbf16>, vector<108x32xbf16>, vector<256x32xf32> -> vector<256x32xf32>
    %c0_45 = arith.constant 0 : index
    %c0_46 = arith.constant 0 : index
    %194 = vector.load %arg7[%c0_45, %c0_46] : memref<1x32xf32, #tpu.memory_space<vmem>>, vector<1x32xf32>
    %195 = vector.broadcast %194 : vector<1x32xf32> to vector<256x32xf32>
    %196 = arith.addf %193, %195 : vector<256x32xf32>
    %cst_47 = arith.constant 0.000000e+00 : f32
    %197 = vector.broadcast %cst_47 : f32 to vector<256x32xf32>
    %198 = arith.cmpf oge, %196, %197 : vector<256x32xf32>
    %c0_48 = arith.constant 0 : index
    %c0_49 = arith.constant 0 : index
    %199 = vector.load %arg8[%c0_48, %c0_49] : memref<1x32xf32, #tpu.memory_space<vmem>>, vector<1x32xf32>
    %200 = vector.broadcast %199 : vector<1x32xf32> to vector<256x32xf32>
    %201 = arith.mulf %200, %196 : vector<256x32xf32>
    %202 = arith.select %198, %196, %201 : vector<256x32xi1>, vector<256x32xf32>
    %c0_50 = arith.constant 0 : index
    %c0_51 = arith.constant 0 : index
    %c0_52 = arith.constant 0 : index
    %c0_53 = arith.constant 0 : index
    %203 = vector.load %arg9[%c0_50, %c0_51, %c0_52, %c0_53] : memref<1x1x256x32xf32, #tpu.memory_space<vmem>>, vector<1x1x256x32xf32>
    %204 = vector.shape_cast %203 : vector<1x1x256x32xf32> to vector<256x32xf32>
    %205 = vector.shape_cast %202 : vector<256x32xf32> to vector<1x1x256x32xf32>
    tpu.vector_store %arg9[%c0_50, %c0_51, %c0_52, %c0_53], %205 {strides = array<i32>} : memref<1x1x256x32xf32, #tpu.memory_space<vmem>>, vector<1x1x256x32xf32>,
    return
  }
  func.func @transform_0(%arg0: i32, %arg1: i32) -> (i32, i32, i32, i32) {
    %c0_i32 = arith.constant 0 : i32
    %0 = arith.addi %arg1, %c0_i32 : i32
    %c0_i32_0 = arith.constant 0 : i32
    %c0_i32_1 = arith.constant 0 : i32
    %c0_i32_2 = arith.constant 0 : i32
    return %arg0, %0, %c0_i32_0, %c0_i32_1 : i32, i32, i32, i32
  }
  func.func @transform_1(%arg0: i32, %arg1: i32) -> (i32, i32, i32, i32) {
    %c1_i32 = arith.constant 1 : i32
    %0 = arith.addi %arg1, %c1_i32 : i32
    %c0_i32 = arith.constant 0 : i32
    %c0_i32_0 = arith.constant 0 : i32
    %c0_i32_1 = arith.constant 0 : i32
    return %arg0, %0, %c0_i32, %c0_i32_0 : i32, i32, i32, i32
  }
  func.func @transform_2(%arg0: i32, %arg1: i32) -> (i32, i32, i32, i32) {
    %c2_i32 = arith.constant 2 : i32
    %0 = arith.addi %arg1, %c2_i32 : i32
    %c0_i32 = arith.constant 0 : i32
    %c0_i32_0 = arith.constant 0 : i32
    %c0_i32_1 = arith.constant 0 : i32
    return %arg0, %0, %c0_i32, %c0_i32_0 : i32, i32, i32, i32
  }
  func.func @transform_3(%arg0: i32, %arg1: i32) -> (i32, i32) {
    %c0_i32 = arith.constant 0 : i32
    %c0_i32_0 = arith.constant 0 : i32
    %c0_i32_1 = arith.constant 0 : i32
    return %c0_i32, %c0_i32_0 : i32, i32
  }
  func.func @transform_4(%arg0: i32, %arg1: i32) -> (i32, i32) {
    %c0_i32 = arith.constant 0 : i32
    %c0_i32_0 = arith.constant 0 : i32
    %c0_i32_1 = arith.constant 0 : i32
    return %c0_i32, %c0_i32_0 : i32, i32
  }
  func.func @transform_5(%arg0: i32, %arg1: i32) -> (i32, i32) {
    %c0_i32 = arith.constant 0 : i32
    %c0_i32_0 = arith.constant 0 : i32
    %c0_i32_1 = arith.constant 0 : i32
    return %c0_i32, %c0_i32_0 : i32, i32
  }
  func.func @transform_6(%arg0: i32, %arg1: i32) -> (i32, i32) {
    %c0_i32 = arith.constant 0 : i32
    %c0_i32_0 = arith.constant 0 : i32
    %c0_i32_1 = arith.constant 0 : i32
    return %c0_i32, %c0_i32_0 : i32, i32
  }
  func.func @transform_7(%arg0: i32, %arg1: i32) -> (i32, i32, i32, i32) {
    %c0_i32 = arith.constant 0 : i32
    %c0_i32_0 = arith.constant 0 : i32
    %c0_i32_1 = arith.constant 0 : i32
    return %arg0, %arg1, %c0_i32, %c0_i32_0 : i32, i32, i32, i32
  }
}

</mosaic_0001>

<bundles_post_ra>
// kernel: conv3d_block_forward.1
= control target key start
LH: loop header
LB: loop body
LE: loop exit
PB: predicated region body
PF: predicated region fallthrough
CT: control target
= control target key end

     0   :  { %12 = vsyncpa [#allocation4], 0  ;;  %s15051_s0 = inlined_call_operand.vmem [shape: bf16[2,18,256,4], index: 0, kind: input, shape index: {}, may-alias: {0,1,2}]   ;;  %s15052_s1 = inlined_call_operand.vmem [shape: bf16[2,18,256,4], index: 1, kind: input, shape index: {}, may-alias: {0,1,2}]   ;;  %s15053_s2 = inlined_call_operand.vmem [shape: bf16[2,18,256,4], index: 2, kind: input, shape index: {}, may-alias: {0,1,2}]   ;;  %s15054_s3 = inlined_call_operand.vmem [shape: bf16[108,32], index: 3, kind: input, shape index: {}]   ;;  %s15055_s4 = inlined_call_operand.vmem [shape: f32[256,9], index: 4, kind: input, shape index: {}]   ;;  %s15056_s5 = inlined_call_operand.vmem [shape: f32[1,32], index: 5, kind: input, shape index: {}]   ;;  %s15057_s6 = inlined_call_operand.vmem [shape: f32[1,32], index: 6, kind: input, shape index: {}]   ;;  %s15058_s7 = inlined_call_operand.hbm [shape: f32[2,16,256,32], index: 7, kind: output, shape index: {}]  }
   0x1   :  { %14 = vsyncpa [#allocation4 + $0x1], 0  ;;  %s8895_s24 = smov 0   ;;  %s8897_s25 = smov 0  }
   0x2   :  { %s8899_s26 = smov 0   ;;  %s8901_s27 = smov 0  }
   0x3   :  { %s8903_s28 = smov 0   ;;  %s8905_s29 = smov 0  }
   0x4   :  { %s8907_s30 = smov 0   ;;  %s8909_s8 = smov 0  }
   0x5 LB: > { %s8162_s9 = sadd.s32 4294967295, %s8816_s8   ;;  %s8163_s10 = sadd.s32 4294967294, %s8816_s8   ;;  %s8816_s8 = sphi %s8909_s8, %s20_s8   ;;  %s8812_s30 = sphi %s8907_s30, %s17422_s30   ;;  %s8808_s29 = sphi %s8905_s29, %s17421_s29   ;;  %s8804_s28 = sphi %s8903_s28, %s17420_s28   ;;  %s8800_s27 = sphi %s8901_s27, %s17419_s27   ;;  %s8796_s26 = sphi %s8899_s26, %s17418_s26   ;;  %s8792_s25 = sphi %s8897_s25, %s17417_s25   ;;  %s8788_s24 = sphi %s8895_s24, %s17416_s24  }
   0x6   : > { %s29_s11 = sadd.s32 1, %s8808_s29  ;;  %s32_s12 = sadd.s32 1, %s8812_s30 }
   0x7   : > { %p30_p0 = scmp.ge.s32.totalorder %s29_s11, 16  ;;  %p223_p1 = scmp.ne.s32.totalorder %s8796_s26, %s8792_s25 }
   0x8   : > { %p224_p2 = scmp.eq.s32.totalorder %s8162_s9, 31  ;;  %p229_p5 = scmp.ne.s32.totalorder %s8792_s25, %s8788_s24 }
   0x9   : > { %s17424_s11 = smov (%p30_p0, %s29_s11), 0  ;;  %s17426_s12 = smov (!%p30_p0, %s32_s12), %s8812_s30 }
   0xa   : > { %s209_s13 = ssub.s32 %s8808_s29, %s17424_s11  ;;  %p8946_p3 = por %p224_p2, %p223_p1 }
   0xb   : > { %p34_p4 = scmp.ge.s32.totalorder %s17426_s12, 2  ;;  %p230_p6 = scmp.eq.s32.totalorder %s8163_s10, 31 }
   0xc   : > { %p8166_p7 = scmp.ge.s32.totalorder %s8816_s8, 1  ;;  %p300_p9 = scmp.lt.s32.totalorder %s8816_s8, 33 }
   0xd   : > { %s17428_s12 = smov (%p34_p4, %s17426_s12), 0  ;;  %p8955_p8 = por %p230_p6, %p229_p5 }
   0xe   : > { %s208_s16 = ssub.s32 %s8812_s30, %s17428_s12  ;;  %s213_s17 = sadd.s32 1, %s8796_s26 }
   0xf   : > { %s210_s18 = sor.u32 %s209_s13, %s208_s16  ;;  %p301_p10 = pnand %p8166_p7, %p300_p9 }
  0x10   : > { %p211_p11 = scmp.eq.s32.totalorder %s210_s18, 0 }
  0x11   : > { %304 = sbr.rel (%p301_p10) target bundleno = 3116 (0xc2c), region = 48 }
  0x12   : > { %s8964_s19 = scalar_select %p211_p11, %s8796_s26, %s213_s17  }
  0x16   : > { %v8969_v0 = vld [vmem:[%s15055_s4 + $0x10] sm:$0xff]  ;;  %v8974_v1 = vld [vmem:[%s15055_s4] sm:$0xff]  ;;  %v8818_v2 = vmov 0   ;;  %v8981_v3 = vld [vmem:[%s15055_s4 + $0x18] sm:$0xff]  ;;  %v8819_v33 = vmov 1   ;;  %p356_p12 = scmp.lt.s32.totalorder %s8804_s28, 1 }
  0x17   : > { %8636 = vset.pattern.permute.xlu1 %v8818_v2  ;;  %8635 = vset.pattern.permute.xlu0 %v8818_v2  ;;  %v8986_v4 = vld [vmem:[%s15055_s4 + $0x8] sm:$0xff]  ;;  %v8998_v6 = vld [vmem:[%s15055_s4 + $0x20] sm:$0xff]  ;;  %v9005_v7 = vld [vmem:[%s15055_s4 + $0x38] sm:$0xff]  ;;  %p358_p13 = scmp.lt.s32.totalorder %s8800_s27, 17  ;;  %vm487_vm0 = vcmask 1040384   ;;  %vm806_vm1 = vcmask 31744  }
  0x18   : > { %626 = vperm.xlu1 %8636, %v8969_v0   ;;  %616 = vperm.xlu0 %8635, %v8974_v1   ;;  %v8993_v5 = vld [vmem:[%s15055_s4 + $0x28] sm:$0xff]  ;;  %v9010_v8 = vld [vmem:[%s15055_s4 + $0x30] sm:$0xff]  ;;  %v9022_v10 = vld [vmem:[%s15055_s4 + $0x40] sm:$0xff]  ;;  %s357_s9 = scalar_select %p356_p12, %s8804_s28, 1  ;;  %vm1127_vm2 = vcmask 64544   ;;  %vm1160_vm3 = vcmask 1046528  }
  0x19   : > { %v9017_v9 = vld [vmem:[%s15055_s4 + $0x48] sm:$0xff]  ;;  %v9029_v11 = vld [vmem:[%s15055_s4 + $0x58] sm:$0xff]  ;;  %v9034_v12 = vld [vmem:[%s15055_s4 + $0x50] sm:$0xff]  ;;  %s359_s10 = scalar_select %p358_p13, %s8800_s27, 17  ;;  %vm1546_vm4 = vcmask 97344   ;;  %vm1867_vm5 = vcmask 130144  }
  0x1a   : > { %v9041_v13 = vld [vmem:[%s15055_s4 + $0x68] sm:$0xff]  ;;  %v9046_v14 = vld [vmem:[%s15055_s4 + $0x60] sm:$0xff]  ;;  %v9053_v15 = vld [vmem:[%s15055_s4 + $0x78] sm:$0xff]  ;;  %s9180_s13 = smul.u32 576, %s357_s9  ;;  %s8821_s23 = smov 4   ;;  %vm2188_vm6 = vcmask 162944  }
  0x1b   : > { %v9058_v16 = vld [vmem:[%s15055_s4 + $0x70] sm:$0xff]  ;;  %v9065_v17 = vld [vmem:[%s15055_s4 + $0x88] sm:$0xff]  ;;  %v9070_v18 = vld [vmem:[%s15055_s4 + $0x80] sm:$0xff]  ;;  %s8168_s16 = sshll.u32 %s359_s10, 5  ;;  %s16015_s9 = smov 8   ;;  %vm2509_vm7 = vcmask 195744  }
  0x1c   : > { %631 = vperm.xlu1 %8636, %v8981_v3   ;;  %621 = vperm.xlu0 %8635, %v8986_v4   ;;  %16018 = vst [vmem:[#allocation6_spill] sm:$0xff] %v9065_v17  ;;  %v9077_v19 = vld [vmem:[%s15055_s4 + $0x98] sm:$0xff]  ;;  %v9082_v20 = vld [vmem:[%s15055_s4 + $0x90] sm:$0xff]  ;;  %v9089_v21 = vld [vmem:[%s15055_s4 + $0xa8] sm:$0xff]  ;;  %s362_s17 = sadd.s32 %s9180_s13, %s8168_s16  ;;  %s8825_s10 = smov 12   ;;  %vm2830_vm8 = vcmask 228544  }
  0x1d   : > { %16019 = vst [vmem:[#allocation7_spill] sm:$0xff] %v9077_v19  ;;  %16020 = vst [vmem:[#allocation8_spill] sm:$0xff] %v9089_v21  ;;  %v9094_v22 = vld [vmem:[%s15055_s4 + $0xa0] sm:$0xff]  ;;  %v9101_v23 = vld [vmem:[%s15055_s4 + $0xb8] sm:$0xff]  ;;  %s8169_s18 = sshll.u32 %s362_s17, 2  ;;  %s8827_s16 = smov 16  }
  0x1e   : > { %16021 = vst [vmem:[#allocation9_spill] sm:$0xff] %v9094_v22  ;;  %16022 = vst [vmem:[#allocation10_spill] sm:$0xff] %v9101_v23  ;;  %v9106_v24 = vld [vmem:[%s15055_s4 + $0xb0] sm:$0xff]  ;;  %v9113_v25 = vld [vmem:[%s15055_s4 + $0xc8] sm:$0xff]  ;;  %s9190_s22 = scalar_lea.vmem %s15051_s0, %s8169_s18  ;;  %s8829_s17 = smov 20   ;;  %vm3151_vm9 = vcmask 261344  }
  0x1f   : > { %16023 = vst [vmem:[#allocation11_spill] sm:$0xff] %v9106_v24  ;;  %16024 = vst [vmem:[#allocation12_spill] sm:$0xff] %v9113_v25  ;;  %v9118_v26 = vld [vmem:[%s15055_s4 + $0xc0] sm:$0xff]  ;;  %v9125_v27 = vld [vmem:[%s15055_s4 + $0xd8] sm:$0xff]  ;;  %s8831_s18 = smov 24   ;;  %s8833_s20 = smov 28  }
  0x20   : > { %641 = vperm.xlu1 %8636, %v8993_v5   ;;  %636 = vperm.xlu0 %8635, %v8998_v6   ;;  %16025 = vst [vmem:[#allocation13_spill] sm:$0xff] %v9118_v26  ;;  %16026 = vst [vmem:[#allocation14_spill] sm:$0xff] %v9125_v27  ;;  %v9130_v28 = vld [vmem:[%s15055_s4 + $0xd0] sm:$0xff]  ;;  %v9137_v29 = vld [vmem:[%s15055_s4 + $0xe8] sm:$0xff]  ;;  %s8834_s21 = smov 32   ;;  %vm3472_vm10 = vcmask 294144  }
  0x21   : > { %16027 = vst [vmem:[#allocation15_spill] sm:$0xff] %v9130_v28  ;;  %16028 = vst [vmem:[#allocation16_spill] sm:$0xff] %v9137_v29  ;;  %v9142_v30 = vld [vmem:[%s15055_s4 + $0xe0] sm:$0xff]  ;;  %v9149_v31 = vld [vmem:[%s15055_s4 + $0xf8] sm:$0xff]  ;;  %vm3858_vm11 = vcmask 326944   ;;  %vm4051_vm12 = vcmask 359744  }
  0x22   : > { %16029 = vst [vmem:[#allocation17_spill] sm:$0xff] %v9142_v30  ;;  %16030 = vst [vmem:[#allocation18_spill] sm:$0xff] %v9149_v31  ;;  %v9154_v32 = vld [vmem:[%s15055_s4 + $0xf0] sm:$0xff]  ;;  %v8206_v34 = vld [vmem:[%s9190_s22] sm:$0xff]   ;;  %vm4341_vm13 = vcmask 392544   ;;  %vm4534_vm14 = vcmask 425344  }
  0x23   : > { %16031 = vst [vmem:[#allocation19_spill] sm:$0xff] %v9154_v32  ;;  %v8411_v35 = vld [vmem:[%s9190_s22 + $0x78] sm:$0xff]   ;;  %v9197_v36 = vld [vmem:[%s9190_s22 + $0x70] sm:$0xff]   ;;  %v9201_v37 = vunpack.c.l.bf16 %v8206_v34  ;;  %v9210_v41 = vunpack.c.h.bf16 %v8206_v34  ;;  %v8397_v46 = vld [vmem:[%s9190_s22 + $0x8] sm:$0xff]   ;;  %vm4727_vm15 = vcmask 458144  }
  0x24   : > { %651 = vperm.xlu1 %8636, %v9005_v7   ;;  %646 = vperm.xlu0 %8635, %v9010_v8   ;;  %v9203_v38 = vunpack.c.h.bf16 %v8411_v35  ;;  %v9206_v39 = vunpack.c.h.bf16 %v9197_v36  ;;  %v9208_v40 = vunpack.c.l.bf16 %v8411_v35  ;;  %v9219_v47 = vunpack.c.l.bf16 %v8397_v46  ;;  %v8398_v52 = vld [vmem:[%s9190_s22 + $0x10] sm:$0xff]   ;;  %v8399_v63 = vld [vmem:[%s9190_s22 + $0x18] sm:$0xff]  }
  0x25   : > { %16032 = vst [vmem:[#allocation20_spill] sm:$0xff] %v9201_v37  ;;  %16036 = vst [vmem:[#allocation24_spill] sm:$0xff] %v9210_v41  ;;  %v525_v43 = vrot.slane %v9201_v37, 7  ;;  %v526_v50 = vrot.slane %v9210_v41, 7  ;;  %v9232_v51 = vunpack.c.h.bf16 %v8397_v46  ;;  %v9244_v58 = vunpack.c.l.bf16 %v8398_v52 }
  0x26   : > { %16033 = vst [vmem:[#allocation21_spill] sm:$0xff] %v9203_v38  ;;  %16034 = vst [vmem:[#allocation22_spill] sm:$0xff] %v9206_v39  ;;  %v491_v42 = vrot.slane %v9203_v38, 7  ;;  %v15059_v44 = vrot.slane %v9206_v39, 7  ;;  %v489_v45 = vrot.slane %v9208_v40, 7  ;;  %v528_v57 = vrot.slane %v9219_v47, 7 }
  0x27   : > { %16035 = vst [vmem:[#allocation23_spill] sm:$0xff] %v9208_v40  ;;  %v9249_v59 = vsel %vm487_vm0, %v525_v43, %v526_v50  ;;  %v530_v61 = vrot.slane %v9232_v51, 7  ;;  %v9255_v62 = vunpack.c.h.bf16 %v8398_v52  ;;  %v532_v52 = vrot.slane %v9244_v58, 7 }
  0x28   : > { %661 = vperm.xlu1 %8636, %v9017_v9   ;;  %656 = vperm.xlu0 %8635, %v9022_v10   ;;  %v9224_v48 = vsel %vm487_vm0, %v491_v42, %v525_v43  ;;  %v9229_v49 = vsel %vm487_vm0, %v15059_v44, %v489_v45  ;;  %16041 = vst [vmem:[#allocation29_spill] sm:$0xff] %v9249_v59  ;;  %v9270_v43 = vunpack.c.h.bf16 %v8399_v63  ;;  %v8400_v44 = vld [vmem:[%s9190_s22 + $0x20] sm:$0xff]  }
  0x29   : > { %16037 = vst [vmem:[#allocation25_spill] sm:$0xff] %v9224_v48  ;;  %16038 = vst [vmem:[#allocation26_spill] sm:$0xff] %v9229_v49  ;;  %v9252_v60 = vsel %vm487_vm0, %v489_v45, %v491_v42  ;;  %v9268_v42 = vunpack.c.l.bf16 %v8399_v63  ;;  %v9273_v45 = vsel %vm487_vm0, %v528_v57, %v530_v61  ;;  %v9276_v46 = vsel %vm487_vm0, %v526_v50, %v528_v57 }
  0x2a   : > { %16042 = vst [vmem:[#allocation30_spill] sm:$0xff] %v9252_v60  ;;  %16045 = vst [vmem:[#allocation33_spill] sm:$0xff] %v9273_v45 }
  0x2b   : > { %16046 = vst [vmem:[#allocation34_spill] sm:$0xff] %v9276_v46 }
  0x2c   : > { %671 = vperm.xlu1 %8636, %v9029_v11   ;;  %666 = vperm.xlu0 %8635, %v9034_v12  }
  0x30   : > { %681 = vperm.xlu1 %8636, %v9041_v13   ;;  %676 = vperm.xlu0 %8635, %v9046_v14  }
  0x34   : > { %691 = vperm.xlu1 %8636, %v9053_v15   ;;  %686 = vperm.xlu0 %8635, %v9058_v16  }
  0x38   : > { %701 = vperm.xlu1 %8636, %v9065_v17   ;;  %696 = vperm.xlu0 %8635, %v9070_v18  }
  0x3c   : > { %711 = vperm.xlu1 %8636, %v9077_v19   ;;  %706 = vperm.xlu0 %8635, %v9082_v20  }
  0x40   : > { %721 = vperm.xlu1 %8636, %v9089_v21   ;;  %716 = vperm.xlu0 %8635, %v9094_v22  }
  0x44   : > { %731 = vperm.xlu1 %8636, %v9101_v23   ;;  %726 = vperm.xlu0 %8635, %v9106_v24  }
  0x48   : > { %741 = vperm.xlu1 %8636, %v9113_v25   ;;  %736 = vperm.xlu0 %8635, %v9118_v26  }
  0x4c   : > { %751 = vperm.xlu1 %8636, %v9125_v27   ;;  %746 = vperm.xlu0 %8635, %v9130_v28  }
  0x50   : > { %761 = vperm.xlu1 %8636, %v9137_v29   ;;  %756 = vperm.xlu0 %8635, %v9142_v30  }
  0x54   : > { %771 = vperm.xlu1 %8636, %v9149_v31   ;;  %766 = vperm.xlu0 %8635, %v9154_v32  }
  0x58   : > { %8638 = vset.pattern.permute.xlu1 %v8819_v33  ;;  %8637 = vset.pattern.permute.xlu0 %v8819_v33 }
  0x59   : > { %844 = vperm.xlu1 %8638, %v8986_v4   ;;  %840 = vperm.xlu0 %8637, %v8974_v1  }
  0x5d   : > { %848 = vperm.xlu1 %8638, %v8969_v0   ;;  %852 = vperm.xlu0 %8637, %v8981_v3  }
  0x61   : > { %856 = vperm.xlu1 %8638, %v8998_v6   ;;  %860 = vperm.xlu0 %8637, %v8993_v5  }
  0x65   : > { %864 = vperm.xlu1 %8638, %v9010_v8   ;;  %868 = vperm.xlu0 %8637, %v9005_v7  }
  0x69   : > { %872 = vperm.xlu1 %8638, %v9022_v10   ;;  %876 = vperm.xlu0 %8637, %v9017_v9  }
  0x6d   : > { %880 = vperm.xlu1 %8638, %v9034_v12   ;;  %884 = vperm.xlu0 %8637, %v9029_v11  }
  0x71   : > { %888 = vperm.xlu1 %8638, %v9046_v14   ;;  %892 = vperm.xlu0 %8637, %v9041_v13  }
  0x75   : > { %896 = vperm.xlu1 %8638, %v9058_v16   ;;  %900 = vperm.xlu0 %8637, %v9053_v15  }
  0x79   : > { %904 = vperm.xlu1 %8638, %v9070_v18   ;;  %908 = vperm.xlu0 %8637, %v9065_v17   ;;  %v8409_v17 = vld [vmem:[%s9190_s22 + $0x68] sm:$0xff]  }
  0x7d   : > { %912 = vperm.xlu1 %8638, %v9082_v20   ;;  %916 = vperm.xlu0 %8637, %v9077_v19   ;;  %v8408_v19 = vld [vmem:[%s9190_s22 + $0x60] sm:$0xff]  }
  0x81   : > { %920 = vperm.xlu1 %8638, %v9094_v22   ;;  %924 = vperm.xlu0 %8637, %v9089_v21   ;;  %v8407_v21 = vld [vmem:[%s9190_s22 + $0x58] sm:$0xff]   ;;  %v9508_v22 = vunpack.c.h.bf16 %v8409_v17 }
  0x83   : > { %16102 = vst [vmem:[#allocation90_spill] sm:$0xff] %v9508_v22 }
  0x85   : > { %928 = vperm.xlu1 %8638, %v9106_v24   ;;  %932 = vperm.xlu0 %8637, %v9101_v23   ;;  %v8406_v23 = vld [vmem:[%s9190_s22 + $0x50] sm:$0xff]   ;;  %v9485_v24 = vunpack.c.h.bf16 %v8408_v19 }
  0x87   : > { %16096 = vst [vmem:[#allocation84_spill] sm:$0xff] %v9485_v24 }
  0x89   : > { %936 = vperm.xlu1 %8638, %v9118_v26   ;;  %940 = vperm.xlu0 %8637, %v9113_v25   ;;  %v8405_v25 = vld [vmem:[%s9190_s22 + $0x48] sm:$0xff]   ;;  %v9462_v26 = vunpack.c.h.bf16 %v8407_v21 }
  0x8b   : > { %16090 = vst [vmem:[#allocation78_spill] sm:$0xff] %v9462_v26 }
  0x8d   : > { %944 = vperm.xlu1 %8638, %v9130_v28   ;;  %948 = vperm.xlu0 %8637, %v9125_v27   ;;  %v8404_v27 = vld [vmem:[%s9190_s22 + $0x40] sm:$0xff]   ;;  %v9439_v28 = vunpack.c.h.bf16 %v8406_v23 }
  0x8f   : > { %16084 = vst [vmem:[#allocation72_spill] sm:$0xff] %v9439_v28 }
  0x91   : > { %952 = vperm.xlu1 %8638, %v9142_v30   ;;  %956 = vperm.xlu0 %8637, %v9137_v29   ;;  %v9416_v30 = vunpack.c.h.bf16 %v8405_v25 }
  0x93   : > { %v9235_v53 = vpop.permute.xlu1 %626  ;;  %v9237_v54 = vpop.permute.xlu0 %616  ;;  %16078 = vst [vmem:[#allocation66_spill] sm:$0xff] %v9416_v30 }
  0x94   : > { %16039 = vst [vmem:[#allocation27_spill] sm:$0xff] %v9235_v53  ;;  %16040 = vst [vmem:[#allocation28_spill] sm:$0xff] %v9237_v54  ;;  %v776_v55 = vmul.f32 %v9235_v53, %v9224_v48  ;;  %v774_v56 = vmul.f32 %v9237_v54, %v9229_v49  ;;  %v538_v53 = vrot.slane %v9270_v43, 7  ;;  %v9301_v54 = vunpack.c.h.bf16 %v8400_v44  ;;  %v8401_v49 = vld [vmem:[%s9190_s22 + $0x28] sm:$0xff]  }
  0x95   : > { %960 = vperm.xlu1 %8638, %v9154_v32   ;;  %964 = vperm.xlu0 %8637, %v9149_v31   ;;  %v8403_v31 = vld [vmem:[%s9190_s22 + $0x38] sm:$0xff]   ;;  %v9393_v32 = vunpack.c.h.bf16 %v8404_v27 }
  0x96   : > { %807 = vst.msk [vmem:[#allocation2] sm:$0xff] %vm806_vm1, %v774_v56  ;;  %809 = vst.msk [vmem:[#allocation2 + $0x10] sm:$0xff] %vm806_vm1, %v776_v55  ;;  %v534_v55 = vrot.slane %v9255_v62, 7  ;;  %v8820_v56 = vmov 2   ;;  %v9370_v29 = vunpack.c.h.bf16 %v8403_v31 }
  0x97   : > { %v9260_v2 = vpop.permute.xlu1 %631  ;;  %v9262_v33 = vpop.permute.xlu0 %621  ;;  %16072 = vst [vmem:[#allocation60_spill] sm:$0xff] %v9393_v32 }
  0x98   : > { %16043 = vst [vmem:[#allocation31_spill] sm:$0xff] %v9260_v2  ;;  %16044 = vst [vmem:[#allocation32_spill] sm:$0xff] %v9262_v33  ;;  %v777_v34 = vmul.f32 %v9260_v2, %v9249_v59  ;;  %v775_v35 = vmul.f32 %v9262_v33, %v9252_v60  ;;  %v536_v33 = vrot.slane %v9268_v42, 7  ;;  %v8402_v59 = vld [vmem:[%s9190_s22 + $0x30] sm:$0xff]   ;;  %s365_s22 = sadd.s32 1, %s8800_s27 }
  0x99   : > { %8639 = vset.pattern.permute.xlu1 %v8820_v56  ;;  %8640 = vset.pattern.permute.xlu0 %v8820_v56  ;;  %v9294_v56 = vsel %vm487_vm0, %v532_v52, %v534_v55  ;;  %v9347_v48 = vunpack.c.h.bf16 %v8402_v59  ;;  %16066 = vst [vmem:[#allocation54_spill] sm:$0xff] %v9370_v29  ;;  %p368_p0 = scmp.lt.s32.totalorder %s365_s22, 17 }
  0x9a   : > { %808 = vst.msk [vmem:[#allocation2 + $0x8] sm:$0xff] %vm806_vm1, %v775_v35  ;;  %810 = vst.msk [vmem:[#allocation2 + $0x18] sm:$0xff] %vm806_vm1, %v777_v34  ;;  %v9297_v35 = vsel %vm487_vm0, %v530_v61, %v532_v52  ;;  %v9299_v34 = vunpack.c.l.bf16 %v8400_v44  ;;  %v9315_v52 = vsel %vm487_vm0, %v536_v33, %v538_v53  ;;  %v9317_v44 = vunpack.c.l.bf16 %v8401_v49 }
  0x9b   : > { %v9283_v63 = vpop.permute.xlu1 %641  ;;  %v9285_v2 = vpop.permute.xlu0 %636  ;;  %16049 = vst [vmem:[#allocation37_spill] sm:$0xff] %v9294_v56  ;;  %16050 = vst [vmem:[#allocation38_spill] sm:$0xff] %v9297_v35  ;;  %s17430_s22 = smov (!%p368_p0, %s365_s22), 17 }
  0x9c   : > { %16047 = vst [vmem:[#allocation35_spill] sm:$0xff] %v9283_v63  ;;  %16048 = vst [vmem:[#allocation36_spill] sm:$0xff] %v9285_v2  ;;  %v779_v50 = vmul.f32 %v9283_v63, %v9273_v45  ;;  %v778_v57 = vmul.f32 %v9285_v2, %v9276_v46  ;;  %v9320_v46 = vsel %vm487_vm0, %v534_v55, %v536_v33  ;;  %v9324_v45 = vunpack.c.h.bf16 %v8401_v49 }
  0x9d   : > { %16053 = vst [vmem:[#allocation41_spill] sm:$0xff] %v9315_v52  ;;  %16054 = vst [vmem:[#allocation42_spill] sm:$0xff] %v9320_v46 }
  0x9e   : > { %811 = vst.msk [vmem:[#allocation2 + $0x20] sm:$0xff] %vm806_vm1, %v778_v57  ;;  %812 = vst.msk [vmem:[#allocation2 + $0x28] sm:$0xff] %vm806_vm1, %v779_v50  ;;  %v540_v50 = vrot.slane %v9299_v34, 7  ;;  %v542_v57 = vrot.slane %v9301_v54, 7 }
  0x9f   : > { %v9306_v63 = vpop.permute.xlu1 %651  ;;  %v9308_v2 = vpop.permute.xlu0 %646  ;;  %16060 = vst [vmem:[#allocation48_spill] sm:$0xff] %v9347_v48 }
  0xa0   : > { %16051 = vst [vmem:[#allocation39_spill] sm:$0xff] %v9306_v63  ;;  %16052 = vst [vmem:[#allocation40_spill] sm:$0xff] %v9308_v2  ;;  %v781_v60 = vmul.f32 %v9306_v63, %v9294_v56  ;;  %v780_v61 = vmul.f32 %v9308_v2, %v9297_v35  ;;  %v544_v35 = vrot.slane %v9317_v44, 7  ;;  %v9338_v56 = vunpack.c.l.bf16 %v8402_v59 }
  0xa1   : > { %v9341_v49 = vsel %vm487_vm0, %v540_v50, %v542_v57 }
  0xa2   : > { %813 = vst.msk [vmem:[#allocation2 + $0x30] sm:$0xff] %vm806_vm1, %v780_v61  ;;  %814 = vst.msk [vmem:[#allocation2 + $0x38] sm:$0xff] %vm806_vm1, %v781_v60  ;;  %v9344_v61 = vsel %vm487_vm0, %v538_v53, %v540_v50  ;;  %v546_v60 = vrot.slane %v9324_v45, 7  ;;  %v9361_v50 = vsel %vm487_vm0, %v542_v57, %v544_v35  ;;  %v548_v59 = vrot.slane %v9338_v56, 7 }
  0xa3   : > { %v9329_v63 = vpop.permute.xlu1 %661  ;;  %v9331_v2 = vpop.permute.xlu0 %656  ;;  %16057 = vst [vmem:[#allocation45_spill] sm:$0xff] %v9338_v56  ;;  %16058 = vst [vmem:[#allocation46_spill] sm:$0xff] %v9341_v49 }
  0xa4   : > { %16055 = vst [vmem:[#allocation43_spill] sm:$0xff] %v9329_v63  ;;  %16056 = vst [vmem:[#allocation44_spill] sm:$0xff] %v9331_v2  ;;  %v783_v33 = vmul.f32 %v9329_v63, %v9315_v52  ;;  %v782_v55 = vmul.f32 %v9331_v2, %v9320_v46  ;;  %v9365_v52 = vsel %vm487_vm0, %v544_v35, %v546_v60 }
  0xa5   : > { %16059 = vst [vmem:[#allocation47_spill] sm:$0xff] %v9344_v61  ;;  %16063 = vst [vmem:[#allocation51_spill] sm:$0xff] %v9361_v50 }
  0xa6   : > { %815 = vst.msk [vmem:[#allocation2 + $0x40] sm:$0xff] %vm806_vm1, %v782_v55  ;;  %816 = vst.msk [vmem:[#allocation2 + $0x48] sm:$0xff] %vm806_vm1, %v783_v33  ;;  %v550_v33 = vrot.slane %v9347_v48, 7  ;;  %v9368_v55 = vunpack.c.l.bf16 %v8403_v31  ;;  %v9386_v31 = vunpack.c.l.bf16 %v8404_v27 }
  0xa7   : > { %v9352_v63 = vpop.permute.xlu1 %671  ;;  %v9354_v2 = vpop.permute.xlu0 %666  ;;  %16064 = vst [vmem:[#allocation52_spill] sm:$0xff] %v9365_v52 }
  0xa8   : > { %16061 = vst [vmem:[#allocation49_spill] sm:$0xff] %v9352_v63  ;;  %16062 = vst [vmem:[#allocation50_spill] sm:$0xff] %v9354_v2  ;;  %v785_v46 = vmul.f32 %v9352_v63, %v9341_v49  ;;  %v784_v53 = vmul.f32 %v9354_v2, %v9344_v61  ;;  %v9384_v61 = vsel %vm487_vm0, %v546_v60, %v548_v59 }
  0xa9   : > { %16065 = vst [vmem:[#allocation53_spill] sm:$0xff] %v9368_v55  ;;  %16069 = vst [vmem:[#allocation57_spill] sm:$0xff] %v9384_v61  ;;  %v9389_v49 = vsel %vm487_vm0, %v548_v59, %v550_v33 }
  0xaa   : > { %817 = vst.msk [vmem:[#allocation2 + $0x50] sm:$0xff] %vm806_vm1, %v784_v53  ;;  %818 = vst.msk [vmem:[#allocation2 + $0x58] sm:$0xff] %vm806_vm1, %v785_v46  ;;  %v552_v46 = vrot.slane %v9368_v55, 7  ;;  %v554_v53 = vrot.slane %v9370_v29, 7 }
  0xab   : > { %v9375_v63 = vpop.permute.xlu1 %681  ;;  %v9377_v57 = vpop.permute.xlu0 %676  ;;  %16070 = vst [vmem:[#allocation58_spill] sm:$0xff] %v9386_v31  ;;  %16071 = vst [vmem:[#allocation59_spill] sm:$0xff] %v9389_v49 }
  0xac   : > { %16067 = vst [vmem:[#allocation55_spill] sm:$0xff] %v9375_v63  ;;  %16068 = vst [vmem:[#allocation56_spill] sm:$0xff] %v9377_v57  ;;  %v787_v35 = vmul.f32 %v9375_v63, %v9365_v52  ;;  %v786_v2 = vmul.f32 %v9377_v57, %v9361_v50  ;;  %v556_v50 = vrot.slane %v9386_v31, 7  ;;  %v9407_v52 = vunpack.c.l.bf16 %v8405_v25 }
  0xad   : > { %v9410_v27 = vsel %vm487_vm0, %v552_v46, %v554_v53 }
  0xae   : > { %819 = vst.msk [vmem:[#allocation2 + $0x60] sm:$0xff] %vm806_vm1, %v786_v2  ;;  %820 = vst.msk [vmem:[#allocation2 + $0x68] sm:$0xff] %vm806_vm1, %v787_v35  ;;  %v9413_v2 = vsel %vm487_vm0, %v550_v33, %v552_v46  ;;  %v558_v35 = vrot.slane %v9393_v32, 7  ;;  %v9430_v46 = vsel %vm487_vm0, %v554_v53, %v556_v50  ;;  %v560_v25 = vrot.slane %v9407_v52, 7 }
  0xaf   : > { %v9398_v63 = vpop.permute.xlu1 %691  ;;  %v9400_v60 = vpop.permute.xlu0 %686  ;;  %16075 = vst [vmem:[#allocation63_spill] sm:$0xff] %v9407_v52  ;;  %16076 = vst [vmem:[#allocation64_spill] sm:$0xff] %v9410_v27 }
  0xb0   : > { %16073 = vst [vmem:[#allocation61_spill] sm:$0xff] %v9398_v63  ;;  %16074 = vst [vmem:[#allocation62_spill] sm:$0xff] %v9400_v60  ;;  %v789_v59 = vmul.f32 %v9398_v63, %v9389_v49  ;;  %v788_v57 = vmul.f32 %v9400_v60, %v9384_v61  ;;  %v9434_v49 = vsel %vm487_vm0, %v556_v50, %v558_v35 }
  0xb1   : > { %16077 = vst [vmem:[#allocation65_spill] sm:$0xff] %v9413_v2  ;;  %16081 = vst [vmem:[#allocation69_spill] sm:$0xff] %v9430_v46 }
  0xb2   : > { %821 = vst.msk [vmem:[#allocation2 + $0x70] sm:$0xff] %vm806_vm1, %v788_v57  ;;  %822 = vst.msk [vmem:[#allocation2 + $0x78] sm:$0xff] %vm806_vm1, %v789_v59  ;;  %v562_v57 = vrot.slane %v9416_v30, 7  ;;  %v9437_v59 = vunpack.c.l.bf16 %v8406_v23  ;;  %v9455_v23 = vunpack.c.l.bf16 %v8407_v21 }
  0xb3   : > { %v9421_v63 = vpop.permute.xlu1 %701  ;;  %v9423_v60 = vpop.permute.xlu0 %696  ;;  %16082 = vst [vmem:[#allocation70_spill] sm:$0xff] %v9434_v49 }
  0xb4   : > { %16079 = vst [vmem:[#allocation67_spill] sm:$0xff] %v9421_v63  ;;  %16080 = vst [vmem:[#allocation68_spill] sm:$0xff] %v9423_v60  ;;  %v791_v61 = vmul.f32 %v9421_v63, %v9410_v27  ;;  %v790_v33 = vmul.f32 %v9423_v60, %v9413_v2  ;;  %v9453_v2 = vsel %vm487_vm0, %v558_v35, %v560_v25 }
  0xb5   : > { %16083 = vst [vmem:[#allocation71_spill] sm:$0xff] %v9437_v59  ;;  %16087 = vst [vmem:[#allocation75_spill] sm:$0xff] %v9453_v2  ;;  %v9458_v27 = vsel %vm487_vm0, %v560_v25, %v562_v57 }
  0xb6   : > { %823 = vst.msk [vmem:[#allocation2 + $0x80] sm:$0xff] %vm806_vm1, %v790_v33  ;;  %824 = vst.msk [vmem:[#allocation2 + $0x88] sm:$0xff] %vm806_vm1, %v791_v61  ;;  %v564_v61 = vrot.slane %v9437_v59, 7  ;;  %v566_v33 = vrot.slane %v9439_v28, 7 }
  0xb7   : > { %v9444_v63 = vpop.permute.xlu1 %711  ;;  %v9446_v53 = vpop.permute.xlu0 %706  ;;  %16088 = vst [vmem:[#allocation76_spill] sm:$0xff] %v9455_v23  ;;  %16089 = vst [vmem:[#allocation77_spill] sm:$0xff] %v9458_v27 }
  0xb8   : > { %16085 = vst [vmem:[#allocation73_spill] sm:$0xff] %v9444_v63  ;;  %16086 = vst [vmem:[#allocation74_spill] sm:$0xff] %v9446_v53  ;;  %v793_v50 = vmul.f32 %v9444_v63, %v9434_v49  ;;  %v792_v60 = vmul.f32 %v9446_v53, %v9430_v46  ;;  %v568_v46 = vrot.slane %v9455_v23, 7  ;;  %v9476_v49 = vunpack.c.l.bf16 %v8408_v19 }
  0xb9   : > { %v9479_v21 = vsel %vm487_vm0, %v564_v61, %v566_v33 }
  0xba   : > { %825 = vst.msk [vmem:[#allocation2 + $0x90] sm:$0xff] %vm806_vm1, %v792_v60  ;;  %826 = vst.msk [vmem:[#allocation2 + $0x98] sm:$0xff] %vm806_vm1, %v793_v50  ;;  %v9482_v60 = vsel %vm487_vm0, %v562_v57, %v564_v61  ;;  %v570_v50 = vrot.slane %v9462_v26, 7  ;;  %v9499_v61 = vsel %vm487_vm0, %v566_v33, %v568_v46  ;;  %v572_v19 = vrot.slane %v9476_v49, 7 }
  0xbb   : > { %v9467_v63 = vpop.permute.xlu1 %721  ;;  %v9469_v35 = vpop.permute.xlu0 %716  ;;  %16093 = vst [vmem:[#allocation81_spill] sm:$0xff] %v9476_v49  ;;  %16094 = vst [vmem:[#allocation82_spill] sm:$0xff] %v9479_v21 }
  0xbc   : > { %16091 = vst [vmem:[#allocation79_spill] sm:$0xff] %v9467_v63  ;;  %16092 = vst [vmem:[#allocation80_spill] sm:$0xff] %v9469_v35  ;;  %v795_v25 = vmul.f32 %v9467_v63, %v9458_v27  ;;  %v794_v53 = vmul.f32 %v9469_v35, %v9453_v2  ;;  %v9503_v27 = vsel %vm487_vm0, %v568_v46, %v570_v50 }
  0xbd   : > { %16095 = vst [vmem:[#allocation83_spill] sm:$0xff] %v9482_v60  ;;  %16099 = vst [vmem:[#allocation87_spill] sm:$0xff] %v9499_v61 }
  0xbe   : > { %827 = vst.msk [vmem:[#allocation2 + $0xa0] sm:$0xff] %vm806_vm1, %v794_v53  ;;  %828 = vst.msk [vmem:[#allocation2 + $0xa8] sm:$0xff] %vm806_vm1, %v795_v25  ;;  %v574_v53 = vrot.slane %v9485_v24, 7  ;;  %v9506_v25 = vunpack.c.l.bf16 %v8409_v17 }
  0xbf   : > { %v9490_v63 = vpop.permute.xlu1 %731  ;;  %v9492_v35 = vpop.permute.xlu0 %726  ;;  %16100 = vst [vmem:[#allocation88_spill] sm:$0xff] %v9503_v27 }
  0xc0   : > { %16097 = vst [vmem:[#allocation85_spill] sm:$0xff] %v9490_v63  ;;  %16098 = vst [vmem:[#allocation86_spill] sm:$0xff] %v9492_v35  ;;  %v797_v2 = vmul.f32 %v9490_v63, %v9479_v21  ;;  %v796_v57 = vmul.f32 %v9492_v35, %v9482_v60  ;;  %v9521_v60 = vsel %vm487_vm0, %v570_v50, %v572_v19  ;;  %v9529_v21 = vunpack.c.l.bf16 %v9197_v36 }
  0xc1   : > { %16101 = vst [vmem:[#allocation89_spill] sm:$0xff] %v9506_v25  ;;  %16105 = vst [vmem:[#allocation93_spill] sm:$0xff] %v9521_v60  ;;  %v9524_v17 = vsel %vm487_vm0, %v572_v19, %v574_v53 }
  0xc2   : > { %829 = vst.msk [vmem:[#allocation2 + $0xb0] sm:$0xff] %vm806_vm1, %v796_v57  ;;  %830 = vst.msk [vmem:[#allocation2 + $0xb8] sm:$0xff] %vm806_vm1, %v797_v2  ;;  %v576_v57 = vrot.slane %v9506_v25, 7  ;;  %v578_v2 = vrot.slane %v9508_v22, 7 }
  0xc3   : > { %v9512_v63 = vpop.permute.xlu1 %741  ;;  %v9514_v35 = vpop.permute.xlu0 %736  ;;  %16106 = vst [vmem:[#allocation94_spill] sm:$0xff] %v9529_v21 }
  0xc4   : > { %16103 = vst [vmem:[#allocation91_spill] sm:$0xff] %v9512_v63  ;;  %16104 = vst [vmem:[#allocation92_spill] sm:$0xff] %v9514_v35  ;;  %v799_v33 = vmul.f32 %v9512_v63, %v9503_v27  ;;  %v798_v46 = vmul.f32 %v9514_v35, %v9499_v61  ;;  %v9542_v61 = vsel %vm487_vm0, %v576_v57, %v578_v2 }
  0xc5   : > { %16109 = vst [vmem:[#allocation97_spill] sm:$0xff] %v9542_v61  ;;  %v9545_v36 = vsel %vm487_vm0, %v574_v53, %v576_v57 }
  0xc6   : > { %831 = vst.msk [vmem:[#allocation2 + $0xc0] sm:$0xff] %vm806_vm1, %v798_v46  ;;  %832 = vst.msk [vmem:[#allocation2 + $0xc8] sm:$0xff] %vm806_vm1, %v799_v33  ;;  %v580_v46 = vrot.slane %v9529_v21, 7 }
  0xc7   : > { %v9533_v63 = vpop.permute.xlu1 %751  ;;  %v9535_v35 = vpop.permute.xlu0 %746 }
  0xc8   : > { %16107 = vst [vmem:[#allocation95_spill] sm:$0xff] %v9533_v63  ;;  %16108 = vst [vmem:[#allocation96_spill] sm:$0xff] %v9535_v35  ;;  %v801_v50 = vmul.f32 %v9533_v63, %v9524_v17  ;;  %v800_v19 = vmul.f32 %v9535_v35, %v9521_v60  ;;  %v16112_v60 = vrot.slane %v9206_v39, 7  ;;  %v9564_v57 = vsel %vm487_vm0, %v578_v2, %v580_v46 }
  0xca   : > { %833 = vst.msk [vmem:[#allocation2 + $0xd0] sm:$0xff] %vm806_vm1, %v800_v19  ;;  %834 = vst.msk [vmem:[#allocation2 + $0xd8] sm:$0xff] %vm806_vm1, %v801_v50  ;;  %v9561_v53 = vsel %vm487_vm0, %v580_v46, %v16112_v60 }
  0xcb   : > { %v9550_v33 = vpop.permute.xlu1 %761  ;;  %v9552_v27 = vpop.permute.xlu0 %756 }
  0xcc   : > { %16110 = vst [vmem:[#allocation98_spill] sm:$0xff] %v9550_v33  ;;  %16111 = vst [vmem:[#allocation99_spill] sm:$0xff] %v9552_v27  ;;  %v803_v63 = vmul.f32 %v9550_v33, %v9542_v61  ;;  %v802_v35 = vmul.f32 %v9552_v27, %v9545_v36 }
  0xce   : > { %835 = vst.msk [vmem:[#allocation2 + $0xe0] sm:$0xff] %vm806_vm1, %v802_v35  ;;  %836 = vst.msk [vmem:[#allocation2 + $0xe8] sm:$0xff] %vm806_vm1, %v803_v63 }
  0xcf   : > { %v9568_v50 = vpop.permute.xlu1 %771  ;;  %v9570_v19 = vpop.permute.xlu0 %766 }
  0xd0   : > { %16113 = vst [vmem:[#allocation100_spill] sm:$0xff] %v9568_v50  ;;  %16114 = vst [vmem:[#allocation101_spill] sm:$0xff] %v9570_v19  ;;  %v805_v33 = vmul.f32 %v9568_v50, %v9561_v53  ;;  %v804_v27 = vmul.f32 %v9570_v19, %v9564_v57 }
  0xd2   : > { %837 = vst.msk [vmem:[#allocation2 + $0xf0] sm:$0xff] %vm806_vm1, %v804_v27  ;;  %838 = vst.msk [vmem:[#allocation2 + $0xf8] sm:$0xff] %vm806_vm1, %v805_v33  ;;  %vm4920_vm1 = vcmask 490944  }
  0xd4   : > { %v9578_v60 = vpop.permute.xlu1 %844  ;;  %v9580_v2 = vpop.permute.xlu0 %840 }
  0xd5   : > { %16115 = vst [vmem:[#allocation102_spill] sm:$0xff] %v9578_v60  ;;  %16116 = vst [vmem:[#allocation103_spill] sm:$0xff] %v9580_v2  ;;  %v968_v63 = vmul.f32 %v9203_v38, %v9578_v60  ;;  %v967_v35 = vmul.f32 %v9208_v40, %v9580_v2 }
  0xd7   : > { %1033 = vrot.lane.b32.xlu0 %v968_v63, %s8821_s23  ;;  %1031 = vrot.lane.b32.xlu1 %v967_v35, %s8821_s23 }
  0xd8   : > { %v9588_v46 = vpop.permute.xlu1 %848  ;;  %v9590_v27 = vpop.permute.xlu0 %852 }
  0xd9   : > { %16117 = vst [vmem:[#allocation104_spill] sm:$0xff] %v9588_v46  ;;  %16118 = vst [vmem:[#allocation105_spill] sm:$0xff] %v9590_v27  ;;  %v970_v33 = vmul.f32 %v9210_v41, %v9590_v27  ;;  %v969_v50 = vmul.f32 %v9201_v37, %v9588_v46 }
  0xdb   : > { %1037 = vrot.lane.b32.xlu0 %v970_v33, %s8821_s23  ;;  %1035 = vrot.lane.b32.xlu1 %v969_v50, %s8821_s23 }
  0xdc   : > { %v9598_v60 = vpop.permute.xlu1 %856  ;;  %v9600_v2 = vpop.permute.xlu0 %860 }
  0xdd   : > { %16119 = vst [vmem:[#allocation106_spill] sm:$0xff] %v9598_v60  ;;  %16120 = vst [vmem:[#allocation107_spill] sm:$0xff] %v9600_v2  ;;  %v972_v63 = vmul.f32 %v9232_v51, %v9600_v2  ;;  %v971_v35 = vmul.f32 %v9219_v47, %v9598_v60 }
  0xdf   : > { %1041 = vrot.lane.b32.xlu0 %v972_v63, %s8821_s23  ;;  %1039 = vrot.lane.b32.xlu1 %v971_v35, %s8821_s23 }
  0xe0   : > { %v9608_v27 = vpop.permute.xlu1 %864  ;;  %v9610_v46 = vpop.permute.xlu0 %868 }
  0xe1   : > { %16121 = vst [vmem:[#allocation108_spill] sm:$0xff] %v9608_v27  ;;  %16122 = vst [vmem:[#allocation109_spill] sm:$0xff] %v9610_v46  ;;  %v974_v50 = vmul.f32 %v9255_v62, %v9610_v46  ;;  %v973_v33 = vmul.f32 %v9244_v58, %v9608_v27 }
  0xe3   : > { %1045 = vrot.lane.b32.xlu0 %v974_v50, %s8821_s23  ;;  %1043 = vrot.lane.b32.xlu1 %v973_v33, %s8821_s23 }
  0xe4   : > { %v9618_v2 = vpop.permute.xlu1 %872  ;;  %v9620_v60 = vpop.permute.xlu0 %876 }
  0xe5   : > { %16123 = vst [vmem:[#allocation110_spill] sm:$0xff] %v9618_v2  ;;  %16124 = vst [vmem:[#allocation111_spill] sm:$0xff] %v9620_v60  ;;  %v976_v63 = vmul.f32 %v9270_v43, %v9620_v60  ;;  %v975_v35 = vmul.f32 %v9268_v42, %v9618_v2 }
  0xe7   : > { %1049 = vrot.lane.b32.xlu0 %v976_v63, %s8821_s23  ;;  %1047 = vrot.lane.b32.xlu1 %v975_v35, %s8821_s23 }
  0xe8   : > { %v9628_v46 = vpop.permute.xlu1 %880  ;;  %v9630_v27 = vpop.permute.xlu0 %884 }
  0xe9   : > { %16125 = vst [vmem:[#allocation112_spill] sm:$0xff] %v9628_v46  ;;  %16126 = vst [vmem:[#allocation113_spill] sm:$0xff] %v9630_v27  ;;  %v978_v50 = vmul.f32 %v9301_v54, %v9630_v27  ;;  %v977_v33 = vmul.f32 %v9299_v34, %v9628_v46 }
  0xeb   : > { %1053 = vrot.lane.b32.xlu0 %v978_v50, %s8821_s23  ;;  %1051 = vrot.lane.b32.xlu1 %v977_v33, %s8821_s23 }
  0xec   : > { %v9638_v60 = vpop.permute.xlu1 %888  ;;  %v9640_v2 = vpop.permute.xlu0 %892 }
  0xed   : > { %16127 = vst [vmem:[#allocation114_spill] sm:$0xff] %v9638_v60  ;;  %16128 = vst [vmem:[#allocation115_spill] sm:$0xff] %v9640_v2  ;;  %v980_v63 = vmul.f32 %v9324_v45, %v9640_v2  ;;  %v979_v35 = vmul.f32 %v9317_v44, %v9638_v60 }
  0xef   : > { %1057 = vrot.lane.b32.xlu0 %v980_v63, %s8821_s23  ;;  %1055 = vrot.lane.b32.xlu1 %v979_v35, %s8821_s23 }
  0xf0   : > { %v9648_v27 = vpop.permute.xlu1 %896  ;;  %v9650_v46 = vpop.permute.xlu0 %900 }
  0xf1   : > { %16129 = vst [vmem:[#allocation116_spill] sm:$0xff] %v9648_v27  ;;  %16130 = vst [vmem:[#allocation117_spill] sm:$0xff] %v9650_v46  ;;  %v982_v50 = vmul.f32 %v9347_v48, %v9650_v46  ;;  %v981_v33 = vmul.f32 %v9338_v56, %v9648_v27 }
  0xf3   : > { %1061 = vrot.lane.b32.xlu0 %v982_v50, %s8821_s23  ;;  %1059 = vrot.lane.b32.xlu1 %v981_v33, %s8821_s23 }
  0xf4   : > { %v9658_v2 = vpop.permute.xlu1 %904  ;;  %v9660_v60 = vpop.permute.xlu0 %908 }
  0xf5   : > { %16131 = vst [vmem:[#allocation118_spill] sm:$0xff] %v9658_v2  ;;  %16132 = vst [vmem:[#allocation119_spill] sm:$0xff] %v9660_v60  ;;  %v984_v63 = vmul.f32 %v9370_v29, %v9660_v60  ;;  %v983_v35 = vmul.f32 %v9368_v55, %v9658_v2 }
  0xf7   : > { %1065 = vrot.lane.b32.xlu0 %v984_v63, %s8821_s23  ;;  %1063 = vrot.lane.b32.xlu1 %v983_v35, %s8821_s23 }
  0xf8   : > { %v9668_v46 = vpop.permute.xlu1 %912  ;;  %v9670_v27 = vpop.permute.xlu0 %916 }
  0xf9   : > { %16133 = vst [vmem:[#allocation120_spill] sm:$0xff] %v9668_v46  ;;  %16134 = vst [vmem:[#allocation121_spill] sm:$0xff] %v9670_v27  ;;  %v986_v50 = vmul.f32 %v9393_v32, %v9670_v27  ;;  %v985_v33 = vmul.f32 %v9386_v31, %v9668_v46 }
  0xfb   : > { %1069 = vrot.lane.b32.xlu0 %v986_v50, %s8821_s23  ;;  %1067 = vrot.lane.b32.xlu1 %v985_v33, %s8821_s23 }
  0xfc   : > { %v9678_v60 = vpop.permute.xlu1 %920  ;;  %v9680_v2 = vpop.permute.xlu0 %924 }
  0xfd   : > { %16135 = vst [vmem:[#allocation122_spill] sm:$0xff] %v9678_v60  ;;  %16136 = vst [vmem:[#allocation123_spill] sm:$0xff] %v9680_v2  ;;  %v988_v63 = vmul.f32 %v9416_v30, %v9680_v2  ;;  %v987_v35 = vmul.f32 %v9407_v52, %v9678_v60 }
  0xff   : > { %1073 = vrot.lane.b32.xlu0 %v988_v63, %s8821_s23  ;;  %1071 = vrot.lane.b32.xlu1 %v987_v35, %s8821_s23 }
 0x100   : > { %v9688_v27 = vpop.permute.xlu1 %928  ;;  %v9690_v46 = vpop.permute.xlu0 %932 }
 0x101   : > { %16137 = vst [vmem:[#allocation124_spill] sm:$0xff] %v9688_v27  ;;  %16138 = vst [vmem:[#allocation125_spill] sm:$0xff] %v9690_v46  ;;  %v990_v50 = vmul.f32 %v9439_v28, %v9690_v46  ;;  %v989_v33 = vmul.f32 %v9437_v59, %v9688_v27 }
 0x103   : > { %1077 = vrot.lane.b32.xlu0 %v990_v50, %s8821_s23  ;;  %1075 = vrot.lane.b32.xlu1 %v989_v33, %s8821_s23 }
 0x104   : > { %v9698_v2 = vpop.permute.xlu1 %936  ;;  %v9700_v60 = vpop.permute.xlu0 %940 }
 0x105   : > { %16139 = vst [vmem:[#allocation126_spill] sm:$0xff] %v9698_v2  ;;  %16140 = vst [vmem:[#allocation127_spill] sm:$0xff] %v9700_v60  ;;  %v992_v63 = vmul.f32 %v9462_v26, %v9700_v60  ;;  %v991_v35 = vmul.f32 %v9455_v23, %v9698_v2 }
 0x107   : > { %1081 = vrot.lane.b32.xlu0 %v992_v63, %s8821_s23  ;;  %1079 = vrot.lane.b32.xlu1 %v991_v35, %s8821_s23 }
 0x108   : > { %v9708_v46 = vpop.permute.xlu1 %944  ;;  %v9710_v27 = vpop.permute.xlu0 %948 }
 0x109   : > { %16141 = vst [vmem:[#allocation128_spill] sm:$0xff] %v9708_v46  ;;  %16142 = vst [vmem:[#allocation129_spill] sm:$0xff] %v9710_v27  ;;  %v994_v50 = vmul.f32 %v9485_v24, %v9710_v27  ;;  %v993_v33 = vmul.f32 %v9476_v49, %v9708_v46 }
 0x10b   : > { %1085 = vrot.lane.b32.xlu0 %v994_v50, %s8821_s23  ;;  %1083 = vrot.lane.b32.xlu1 %v993_v33, %s8821_s23 }
 0x10c   : > { %v9718_v60 = vpop.permute.xlu1 %952  ;;  %v9720_v2 = vpop.permute.xlu0 %956 }
 0x10d   : > { %16143 = vst [vmem:[#allocation130_spill] sm:$0xff] %v9718_v60  ;;  %16144 = vst [vmem:[#allocation131_spill] sm:$0xff] %v9720_v2  ;;  %v996_v63 = vmul.f32 %v9508_v22, %v9720_v2  ;;  %v995_v35 = vmul.f32 %v9506_v25, %v9718_v60 }
 0x10f   : > { %1089 = vrot.lane.b32.xlu0 %v996_v63, %s8821_s23  ;;  %1087 = vrot.lane.b32.xlu1 %v995_v35, %s8821_s23  ;;  %v16159_v63 = vld [vmem:[#allocation16_spill] sm:$0xff]  ;;  %v8822_v35 = vmov 3  }
 0x110   : > { %v9728_v27 = vpop.permute.xlu1 %960  ;;  %v9730_v46 = vpop.permute.xlu0 %964 }
 0x111   : > { %16145 = vst [vmem:[#allocation132_spill] sm:$0xff] %v9728_v27  ;;  %16146 = vst [vmem:[#allocation133_spill] sm:$0xff] %v9730_v46  ;;  %v998_v50 = vmul.f32 %v9206_v39, %v9730_v46  ;;  %v997_v33 = vmul.f32 %v9529_v21, %v9728_v27 }
 0x113   : > { %1093 = vrot.lane.b32.xlu0 %v998_v50, %s8821_s23  ;;  %1091 = vrot.lane.b32.xlu1 %v997_v33, %s8821_s23  ;;  %s8170_s23 = sshll.u32 %s17430_s22, 5  ;;  %s8835_s22 = smov 36  }
 0x117   : > { %1263 = vperm.xlu0 %8640, %v8986_v4   ;;  %1259 = vperm.xlu1 %8639, %v8974_v1   ;;  %v16148_v1 = vld [vmem:[#allocation6_spill] sm:$0xff]  ;;  %v16150_v4 = vld [vmem:[#allocation7_spill] sm:$0xff] }
 0x11b   : > { %1275 = vperm.xlu0 %8640, %v8998_v6   ;;  %1267 = vperm.xlu1 %8639, %v8969_v0   ;;  %v16147_v0 = vld [vmem:[#allocation9_spill] sm:$0xff]  ;;  %v16152_v6 = vld [vmem:[#allocation8_spill] sm:$0xff] }
 0x11f   : > { %1283 = vperm.xlu0 %8640, %v9010_v8   ;;  %1271 = vperm.xlu1 %8639, %v8981_v3   ;;  %v16149_v3 = vld [vmem:[#allocation11_spill] sm:$0xff]  ;;  %v16154_v8 = vld [vmem:[#allocation10_spill] sm:$0xff] }
 0x123   : > { %1291 = vperm.xlu0 %8640, %v9022_v10   ;;  %1279 = vperm.xlu1 %8639, %v8993_v5   ;;  %v16151_v5 = vld [vmem:[#allocation13_spill] sm:$0xff] }
 0x127   : > { %1299 = vperm.xlu0 %8640, %v9034_v12   ;;  %1287 = vperm.xlu1 %8639, %v9005_v7   ;;  %v16153_v7 = vld [vmem:[#allocation15_spill] sm:$0xff]  ;;  %v16156_v12 = vld [vmem:[#allocation12_spill] sm:$0xff] }
 0x12b   : > { %1307 = vperm.xlu0 %8640, %v9046_v14   ;;  %1295 = vperm.xlu1 %8639, %v9017_v9  }
 0x12f   : > { %1315 = vperm.xlu0 %8640, %v9058_v16   ;;  %1303 = vperm.xlu1 %8639, %v9029_v11   ;;  %v16155_v11 = vld [vmem:[#allocation17_spill] sm:$0xff]  ;;  %v16158_v16 = vld [vmem:[#allocation14_spill] sm:$0xff] }
 0x133   : > { %1323 = vperm.xlu0 %8640, %v9070_v18   ;;  %1311 = vperm.xlu1 %8639, %v9041_v13  }
 0x137   : > { %1331 = vperm.xlu0 %8640, %v9082_v20   ;;  %1319 = vperm.xlu1 %8639, %v9053_v15   ;;  %v16157_v15 = vld [vmem:[#allocation19_spill] sm:$0xff] }
 0x13b   : > { %1339 = vperm.xlu0 %8640, %v16147_v0   ;;  %1327 = vperm.xlu1 %8639, %v16148_v1   ;;  %v16160_v0 = vld [vmem:[#allocation18_spill] sm:$0xff] }
 0x13f   : > { %1347 = vperm.xlu0 %8640, %v16149_v3   ;;  %1335 = vperm.xlu1 %8639, %v16150_v4  }
 0x143   : > { %1355 = vperm.xlu0 %8640, %v16151_v5   ;;  %1343 = vperm.xlu1 %8639, %v16152_v6  }
 0x147   : > { %1363 = vperm.xlu0 %8640, %v16153_v7   ;;  %1351 = vperm.xlu1 %8639, %v16154_v8  }
 0x149   : > { %v1034_v9 = vpop.permute.xlu0 %1033  ;;  %v1032_v10 = vpop.permute.xlu1 %1031 }
 0x14a   : > { %1129 = vst.msk [vmem:[#allocation2 + $0x8] sm:$0xff] %vm1127_vm2, %v1034_v9  ;;  %1128 = vst.msk [vmem:[#allocation2] sm:$0xff] %vm1127_vm2, %v1032_v10 }
 0x14b   : > { %1371 = vperm.xlu0 %8640, %v16155_v11   ;;  %1359 = vperm.xlu1 %8639, %v16156_v12  }
 0x14d   : > { %v1038_v13 = vpop.permute.xlu0 %1037  ;;  %v1036_v14 = vpop.permute.xlu1 %1035 }
 0x14e   : > { %1131 = vst.msk [vmem:[#allocation2 + $0x18] sm:$0xff] %vm1127_vm2, %v1038_v13  ;;  %1130 = vst.msk [vmem:[#allocation2 + $0x10] sm:$0xff] %vm1127_vm2, %v1036_v14 }
 0x14f   : > { %1379 = vperm.xlu0 %8640, %v16157_v15   ;;  %1367 = vperm.xlu1 %8639, %v16158_v16  }
 0x151   : > { %v1042_v18 = vpop.permute.xlu0 %1041  ;;  %v1040_v20 = vpop.permute.xlu1 %1039 }
 0x152   : > { %1133 = vst.msk [vmem:[#allocation2 + $0x28] sm:$0xff] %vm1127_vm2, %v1042_v18  ;;  %1132 = vst.msk [vmem:[#allocation2 + $0x20] sm:$0xff] %vm1127_vm2, %v1040_v20 }
 0x153   : > { %1375 = vperm.xlu1 %8639, %v16159_v63   ;;  %8641 = vset.pattern.permute.xlu0 %v8822_v35 }
 0x155   : > { %v1046_v50 = vpop.permute.xlu0 %1045  ;;  %v1044_v33 = vpop.permute.xlu1 %1043 }
 0x156   : > { %1135 = vst.msk [vmem:[#allocation2 + $0x38] sm:$0xff] %vm1127_vm2, %v1046_v50  ;;  %1134 = vst.msk [vmem:[#allocation2 + $0x30] sm:$0xff] %vm1127_vm2, %v1044_v33 }
 0x157   : > { %1383 = vperm.xlu1 %8639, %v16160_v0  }
 0x159   : > { %v1050_v1 = vpop.permute.xlu0 %1049  ;;  %v1048_v3 = vpop.permute.xlu1 %1047 }
 0x15a   : > { %1137 = vst.msk [vmem:[#allocation2 + $0x48] sm:$0xff] %vm1127_vm2, %v1050_v1  ;;  %1136 = vst.msk [vmem:[#allocation2 + $0x40] sm:$0xff] %vm1127_vm2, %v1048_v3 }
 0x15b   : > { %8642 = vset.pattern.permute.xlu1 %v8822_v35 }
 0x15d   : > { %v1054_v4 = vpop.permute.xlu0 %1053  ;;  %v1052_v5 = vpop.permute.xlu1 %1051 }
 0x15e   : > { %1139 = vst.msk [vmem:[#allocation2 + $0x58] sm:$0xff] %vm1127_vm2, %v1054_v4  ;;  %1138 = vst.msk [vmem:[#allocation2 + $0x50] sm:$0xff] %vm1127_vm2, %v1052_v5  ;;  %v1162_v4 = vrot.slane %v9203_v38, 1  ;;  %v1166_v5 = vrot.slane %v9201_v37, 1  ;;  %v10249_v38 = vld [vmem:[%s15055_s4 + $0xd8] sm:$0xff] }
 0x161   : > { %v1058_v6 = vpop.permute.xlu0 %1057  ;;  %v1056_v7 = vpop.permute.xlu1 %1055 }
 0x162   : > { %1141 = vst.msk [vmem:[#allocation2 + $0x68] sm:$0xff] %vm1127_vm2, %v1058_v6  ;;  %1140 = vst.msk [vmem:[#allocation2 + $0x60] sm:$0xff] %vm1127_vm2, %v1056_v7  ;;  %v15246_v6 = vrot.slane %v9208_v40, 1  ;;  %v9806_v7 = vsel %vm1160_vm3, %v1162_v4, %v1166_v5 }
 0x163   : > { %16161 = vst [vmem:[#allocation9_spill] sm:$0xff] %v9806_v7 }
 0x165   : > { %v1062_v8 = vpop.permute.xlu0 %1061  ;;  %v1060_v9 = vpop.permute.xlu1 %1059 }
 0x166   : > { %1143 = vst.msk [vmem:[#allocation2 + $0x78] sm:$0xff] %vm1127_vm2, %v1062_v8  ;;  %1142 = vst.msk [vmem:[#allocation2 + $0x70] sm:$0xff] %vm1127_vm2, %v1060_v9  ;;  %v9811_v8 = vsel %vm1160_vm3, %v15246_v6, %v1162_v4  ;;  %v1167_v9 = vrot.slane %v9210_v41, 1 }
 0x167   : > { %16162 = vst [vmem:[#allocation6_spill] sm:$0xff] %v9811_v8 }
 0x169   : > { %v1066_v10 = vpop.permute.xlu0 %1065  ;;  %v1064_v11 = vpop.permute.xlu1 %1063 }
 0x16a   : > { %1145 = vst.msk [vmem:[#allocation2 + $0x88] sm:$0xff] %vm1127_vm2, %v1066_v10  ;;  %1144 = vst.msk [vmem:[#allocation2 + $0x80] sm:$0xff] %vm1127_vm2, %v1064_v11 }
 0x16d   : > { %v1070_v12 = vpop.permute.xlu0 %1069  ;;  %v1068_v13 = vpop.permute.xlu1 %1067 }
 0x16e   : > { %1147 = vst.msk [vmem:[#allocation2 + $0x98] sm:$0xff] %vm1127_vm2, %v1070_v12  ;;  %1146 = vst.msk [vmem:[#allocation2 + $0x90] sm:$0xff] %vm1127_vm2, %v1068_v13 }
 0x171   : > { %v1074_v14 = vpop.permute.xlu0 %1073  ;;  %v1072_v15 = vpop.permute.xlu1 %1071 }
 0x172   : > { %1149 = vst.msk [vmem:[#allocation2 + $0xa8] sm:$0xff] %vm1127_vm2, %v1074_v14  ;;  %1148 = vst.msk [vmem:[#allocation2 + $0xa0] sm:$0xff] %vm1127_vm2, %v1072_v15  ;;  %v1169_v14 = vrot.slane %v9219_v47, 1  ;;  %v1171_v15 = vrot.slane %v9232_v51, 1 }
 0x175   : > { %v1078_v16 = vpop.permute.xlu0 %1077  ;;  %v1076_v18 = vpop.permute.xlu1 %1075 }
 0x176   : > { %1151 = vst.msk [vmem:[#allocation2 + $0xb8] sm:$0xff] %vm1127_vm2, %v1078_v16  ;;  %1150 = vst.msk [vmem:[#allocation2 + $0xb0] sm:$0xff] %vm1127_vm2, %v1076_v18  ;;  %v9825_v16 = vsel %vm1160_vm3, %v1166_v5, %v1167_v9 }
 0x177   : > { %16165 = vst [vmem:[#allocation13_spill] sm:$0xff] %v9825_v16 }
 0x179   : > { %v1082_v20 = vpop.permute.xlu0 %1081  ;;  %v1080_v63 = vpop.permute.xlu1 %1079 }
 0x17a   : > { %1153 = vst.msk [vmem:[#allocation2 + $0xc8] sm:$0xff] %vm1127_vm2, %v1082_v20  ;;  %1152 = vst.msk [vmem:[#allocation2 + $0xc0] sm:$0xff] %vm1127_vm2, %v1080_v63 }
 0x17d   : > { %v1086_v35 = vpop.permute.xlu0 %1085  ;;  %v1084_v50 = vpop.permute.xlu1 %1083 }
 0x17e   : > { %1155 = vst.msk [vmem:[#allocation2 + $0xd8] sm:$0xff] %vm1127_vm2, %v1086_v35  ;;  %1154 = vst.msk [vmem:[#allocation2 + $0xd0] sm:$0xff] %vm1127_vm2, %v1084_v50  ;;  %v9836_v35 = vsel %vm1160_vm3, %v1169_v14, %v1171_v15  ;;  %v1173_v50 = vrot.slane %v9244_v58, 1 }
 0x17f   : > { %16168 = vst [vmem:[#allocation10_spill] sm:$0xff] %v9836_v35 }
 0x181   : > { %v1090_v33 = vpop.permute.xlu0 %1089  ;;  %v1088_v0 = vpop.permute.xlu1 %1087 }
 0x182   : > { %1157 = vst.msk [vmem:[#allocation2 + $0xe8] sm:$0xff] %vm1127_vm2, %v1090_v33  ;;  %1156 = vst.msk [vmem:[#allocation2 + $0xe0] sm:$0xff] %vm1127_vm2, %v1088_v0  ;;  %v1175_v33 = vrot.slane %v9255_v62, 1  ;;  %v9841_v0 = vsel %vm1160_vm3, %v1167_v9, %v1169_v14  ;;  %v1179_v9 = vrot.slane %v9270_v43, 1  ;;  %v9858_v14 = vsel %vm1160_vm3, %v1171_v15, %v1173_v50 }
 0x183   : > { %16169 = vst [vmem:[#allocation17_spill] sm:$0xff] %v9841_v0  ;;  %16173 = vst [vmem:[#allocation16_spill] sm:$0xff] %v9858_v14  ;;  %v1181_v15 = vrot.slane %v9299_v34, 1 }
 0x185   : > { %v1094_v1 = vpop.permute.xlu0 %1093  ;;  %v1092_v3 = vpop.permute.xlu1 %1091 }
 0x186   : > { %1159 = vst.msk [vmem:[#allocation2 + $0xf8] sm:$0xff] %vm1127_vm2, %v1094_v1  ;;  %1158 = vst.msk [vmem:[#allocation2 + $0xf0] sm:$0xff] %vm1127_vm2, %v1092_v3  ;;  %vm5113_vm2 = vcmask 523744  }
 0x192   : > { %v9814_v10 = vpop.permute.xlu0 %1263  ;;  %v9816_v11 = vpop.permute.xlu1 %1259 }
 0x193   : > { %16163 = vst [vmem:[#allocation11_spill] sm:$0xff] %v9814_v10  ;;  %16164 = vst [vmem:[#allocation7_spill] sm:$0xff] %v9816_v11  ;;  %v1387_v12 = vmul.f32 %v9814_v10, %v9806_v7  ;;  %v1386_v13 = vmul.f32 %v9816_v11, %v9811_v8 }
 0x195   : > { %1450 = vrot.lane.b32.xlu0 %v1386_v13, %s16015_s9  ;;  %1452 = vrot.lane.b32.xlu1 %v1387_v12, %s16015_s9  ;;  %v9853_v12 = vsel %vm1160_vm3, %v1173_v50, %v1175_v33  ;;  %v1177_v13 = vrot.slane %v9268_v42, 1  ;;  %v1183_v50 = vrot.slane %v9301_v54, 1 }
 0x196   : > { %v9829_v18 = vpop.permute.xlu0 %1275  ;;  %v9831_v20 = vpop.permute.xlu1 %1267  ;;  %16172 = vst [vmem:[#allocation14_spill] sm:$0xff] %v9853_v12 }
 0x197   : > { %16166 = vst [vmem:[#allocation8_spill] sm:$0xff] %v9829_v18  ;;  %16167 = vst [vmem:[#allocation15_spill] sm:$0xff] %v9831_v20  ;;  %v1388_v63 = vmul.f32 %v9831_v20, %v9825_v16  ;;  %v1390_v4 = vmul.f32 %v9829_v18, %v9836_v35  ;;  %v9871_v20 = vsel %vm1160_vm3, %v1177_v13, %v1179_v9  ;;  %v10235_v35 = vld [vmem:[%s15055_s4 + $0xc8] sm:$0xff] }
 0x198   : > { %16176 = vst [vmem:[#allocation135_spill] sm:$0xff] %v9871_v20  ;;  %v9889_v11 = vsel %vm1160_vm3, %v1181_v15, %v1183_v50 }
 0x199   : > { %1454 = vrot.lane.b32.xlu0 %v1388_v63, %s16015_s9  ;;  %16180 = vst [vmem:[#allocation139_spill] sm:$0xff] %v9889_v11 }
 0x19a   : > { %v9844_v1 = vpop.permute.xlu0 %1283  ;;  %v9846_v3 = vpop.permute.xlu1 %1271 }
 0x19b   : > { %16170 = vst [vmem:[#allocation12_spill] sm:$0xff] %v9844_v1  ;;  %16171 = vst [vmem:[#allocation19_spill] sm:$0xff] %v9846_v3  ;;  %v1389_v5 = vmul.f32 %v9846_v3, %v9841_v0  ;;  %v1392_v3 = vmul.f32 %v9844_v1, %v9853_v12  ;;  %v10223_v12 = vld [vmem:[%s15055_s4 + $0xb8] sm:$0xff] }
 0x19d   : > { %1458 = vrot.lane.b32.xlu0 %v1390_v4, %s16015_s9  ;;  %1456 = vrot.lane.b32.xlu1 %v1389_v5, %s16015_s9  ;;  %v9876_v4 = vsel %vm1160_vm3, %v1175_v33, %v1177_v13  ;;  %v1185_v33 = vrot.slane %v9317_v44, 1  ;;  %v1187_v13 = vrot.slane %v9324_v45, 1 }
 0x19e   : > { %v9862_v63 = vpop.permute.xlu0 %1291  ;;  %v9864_v6 = vpop.permute.xlu1 %1279  ;;  %16177 = vst [vmem:[#allocation136_spill] sm:$0xff] %v9876_v4 }
 0x19f   : > { %16174 = vst [vmem:[#allocation18_spill] sm:$0xff] %v9862_v63  ;;  %16175 = vst [vmem:[#allocation134_spill] sm:$0xff] %v9864_v6  ;;  %v1391_v18 = vmul.f32 %v9864_v6, %v9858_v14  ;;  %v1394_v6 = vmul.f32 %v9862_v63, %v9871_v20  ;;  %v9907_v27 = vsel %vm1160_vm3, %v1185_v33, %v1187_v13  ;;  %v10211_v20 = vld [vmem:[%s15055_s4 + $0xa8] sm:$0xff]  ;;  %v10241_v14 = vld [vmem:[%s15055_s4 + $0xb0] sm:$0xff] }
 0x1a0   : > { %16184 = vst [vmem:[#allocation143_spill] sm:$0xff] %v9907_v27 }
 0x1a1   : > { %1462 = vrot.lane.b32.xlu0 %v1392_v3, %s16015_s9  ;;  %1460 = vrot.lane.b32.xlu1 %v1391_v18, %s16015_s9  ;;  %v9894_v3 = vsel %vm1160_vm3, %v1179_v9, %v1181_v15  ;;  %v1189_v9 = vrot.slane %v9338_v56, 1  ;;  %v1191_v15 = vrot.slane %v9347_v48, 1 }
 0x1a2   : > { %v9880_v5 = vpop.permute.xlu0 %1299  ;;  %v9882_v1 = vpop.permute.xlu1 %1287  ;;  %16181 = vst [vmem:[#allocation140_spill] sm:$0xff] %v9894_v3 }
 0x1a3   : > { %16178 = vst [vmem:[#allocation137_spill] sm:$0xff] %v9880_v5  ;;  %16179 = vst [vmem:[#allocation138_spill] sm:$0xff] %v9882_v1  ;;  %v1393_v10 = vmul.f32 %v9882_v1, %v9876_v4  ;;  %v1396_v1 = vmul.f32 %v9880_v5, %v9889_v11  ;;  %v9925_v60 = vsel %vm1160_vm3, %v1189_v9, %v1191_v15  ;;  %v10199_v11 = vld [vmem:[%s15055_s4 + $0x98] sm:$0xff]  ;;  %v10229_v4 = vld [vmem:[%s15055_s4 + $0xa0] sm:$0xff] }
 0x1a4   : > { %16188 = vst [vmem:[#allocation147_spill] sm:$0xff] %v9925_v60 }
 0x1a5   : > { %1466 = vrot.lane.b32.xlu0 %v1394_v6, %s16015_s9  ;;  %1464 = vrot.lane.b32.xlu1 %v1393_v10, %s16015_s9  ;;  %v9912_v6 = vsel %vm1160_vm3, %v1183_v50, %v1185_v33  ;;  %v1193_v50 = vrot.slane %v9368_v55, 1  ;;  %v1195_v33 = vrot.slane %v9370_v29, 1 }
 0x1a6   : > { %v9898_v18 = vpop.permute.xlu0 %1307  ;;  %v9900_v63 = vpop.permute.xlu1 %1295  ;;  %16185 = vst [vmem:[#allocation144_spill] sm:$0xff] %v9912_v6 }
 0x1a7   : > { %16182 = vst [vmem:[#allocation141_spill] sm:$0xff] %v9898_v18  ;;  %16183 = vst [vmem:[#allocation142_spill] sm:$0xff] %v9900_v63  ;;  %v1395_v46 = vmul.f32 %v9900_v63, %v9894_v3  ;;  %v1398_v63 = vmul.f32 %v9898_v18, %v9907_v27  ;;  %v9943_v8 = vsel %vm1160_vm3, %v1193_v50, %v1195_v33  ;;  %v10187_v27 = vld [vmem:[%s15055_s4 + $0x88] sm:$0xff]  ;;  %v10217_v3 = vld [vmem:[%s15055_s4 + $0x90] sm:$0xff] }
 0x1a8   : > { %16192 = vst [vmem:[#allocation151_spill] sm:$0xff] %v9943_v8 }
 0x1a9   : > { %1470 = vrot.lane.b32.xlu0 %v1396_v1, %s16015_s9  ;;  %1468 = vrot.lane.b32.xlu1 %v1395_v46, %s16015_s9  ;;  %v9930_v1 = vsel %vm1160_vm3, %v1187_v13, %v1189_v9  ;;  %v1197_v13 = vrot.slane %v9386_v31, 1  ;;  %v1199_v9 = vrot.slane %v9393_v32, 1 }
 0x1aa   : > { %v9916_v10 = vpop.permute.xlu0 %1315  ;;  %v9918_v5 = vpop.permute.xlu1 %1303  ;;  %16189 = vst [vmem:[#allocation148_spill] sm:$0xff] %v9930_v1 }
 0x1ab   : > { %16186 = vst [vmem:[#allocation145_spill] sm:$0xff] %v9916_v10  ;;  %16187 = vst [vmem:[#allocation146_spill] sm:$0xff] %v9918_v5  ;;  %v1397_v2 = vmul.f32 %v9918_v5, %v9912_v6  ;;  %v1400_v5 = vmul.f32 %v9916_v10, %v9925_v60  ;;  %v9961_v60 = vsel %vm1160_vm3, %v1197_v13, %v1199_v9  ;;  %v10205_v6 = vld [vmem:[%s15055_s4 + $0x80] sm:$0xff] }
 0x1ac   : > { %16196 = vst [vmem:[#allocation155_spill] sm:$0xff] %v9961_v60 }
 0x1ad   : > { %1474 = vrot.lane.b32.xlu0 %v1398_v63, %s16015_s9  ;;  %1472 = vrot.lane.b32.xlu1 %v1397_v2, %s16015_s9  ;;  %v9948_v63 = vsel %vm1160_vm3, %v1191_v15, %v1193_v50  ;;  %v1201_v15 = vrot.slane %v9407_v52, 1  ;;  %v1203_v50 = vrot.slane %v9416_v30, 1  ;;  %v16233_v52 = vld [vmem:[#allocation33_spill] sm:$0xff] }
 0x1ae   : > { %v9934_v46 = vpop.permute.xlu0 %1323  ;;  %v9936_v18 = vpop.permute.xlu1 %1311  ;;  %16193 = vst [vmem:[#allocation152_spill] sm:$0xff] %v9948_v63 }
 0x1af   : > { %16190 = vst [vmem:[#allocation149_spill] sm:$0xff] %v9934_v46  ;;  %16191 = vst [vmem:[#allocation150_spill] sm:$0xff] %v9936_v18  ;;  %v1399_v19 = vmul.f32 %v9936_v18, %v9930_v1  ;;  %v1402_v18 = vmul.f32 %v9934_v46, %v9943_v8  ;;  %v10193_v1 = vld [vmem:[%s15055_s4 + $0x70] sm:$0xff] }
 0x1b1   : > { %1478 = vrot.lane.b32.xlu0 %v1400_v5, %s16015_s9  ;;  %1476 = vrot.lane.b32.xlu1 %v1399_v19, %s16015_s9  ;;  %v9966_v5 = vsel %vm1160_vm3, %v1195_v33, %v1197_v13  ;;  %v1205_v33 = vrot.slane %v9437_v59, 1  ;;  %v1207_v13 = vrot.slane %v9439_v28, 1 }
 0x1b2   : > { %v9952_v2 = vpop.permute.xlu0 %1331  ;;  %v9954_v10 = vpop.permute.xlu1 %1319  ;;  %16197 = vst [vmem:[#allocation156_spill] sm:$0xff] %v9966_v5 }
 0x1b3   : > { %16194 = vst [vmem:[#allocation153_spill] sm:$0xff] %v9952_v2  ;;  %16195 = vst [vmem:[#allocation154_spill] sm:$0xff] %v9954_v10  ;;  %v1401_v7 = vmul.f32 %v9954_v10, %v9948_v63  ;;  %v1404_v10 = vmul.f32 %v9952_v2, %v9961_v60  ;;  %v9979_v63 = vsel %vm1160_vm3, %v1201_v15, %v1203_v50 }
 0x1b4   : > { %16200 = vst [vmem:[#allocation159_spill] sm:$0xff] %v9979_v63 }
 0x1b5   : > { %1482 = vrot.lane.b32.xlu0 %v1402_v18, %s16015_s9  ;;  %1480 = vrot.lane.b32.xlu1 %v1401_v7, %s16015_s9  ;;  %v9984_v18 = vsel %vm1160_vm3, %v1199_v9, %v1201_v15  ;;  %v1209_v9 = vrot.slane %v9455_v23, 1  ;;  %v1211_v15 = vrot.slane %v9462_v26, 1 }
 0x1b6   : > { %v9970_v19 = vpop.permute.xlu0 %1339  ;;  %v9972_v46 = vpop.permute.xlu1 %1327  ;;  %16201 = vst [vmem:[#allocation160_spill] sm:$0xff] %v9984_v18 }
 0x1b7   : > { %16198 = vst [vmem:[#allocation157_spill] sm:$0xff] %v9970_v19  ;;  %16199 = vst [vmem:[#allocation158_spill] sm:$0xff] %v9972_v46  ;;  %v1403_v8 = vmul.f32 %v9972_v46, %v9966_v5  ;;  %v1406_v46 = vmul.f32 %v9970_v19, %v9979_v63  ;;  %v9997_v5 = vsel %vm1160_vm3, %v1205_v33, %v1207_v13 }
 0x1b8   : > { %16204 = vst [vmem:[#allocation163_spill] sm:$0xff] %v9997_v5 }
 0x1b9   : > { %1486 = vrot.lane.b32.xlu0 %v1404_v10, %s16015_s9  ;;  %1484 = vrot.lane.b32.xlu1 %v1403_v8, %s16015_s9  ;;  %v10002_v10 = vsel %vm1160_vm3, %v1203_v50, %v1205_v33  ;;  %v1213_v50 = vrot.slane %v9476_v49, 1  ;;  %v1215_v33 = vrot.slane %v9485_v24, 1  ;;  %v10282_v24 = vld [vmem:[%s15055_s4 + $0xe0] sm:$0xff] }
 0x1ba   : > { %v9988_v7 = vpop.permute.xlu0 %1347  ;;  %v9990_v2 = vpop.permute.xlu1 %1335  ;;  %16205 = vst [vmem:[#allocation164_spill] sm:$0xff] %v10002_v10 }
 0x1bb   : > { %16202 = vst [vmem:[#allocation161_spill] sm:$0xff] %v9988_v7  ;;  %16203 = vst [vmem:[#allocation162_spill] sm:$0xff] %v9990_v2  ;;  %v1405_v60 = vmul.f32 %v9990_v2, %v9984_v18  ;;  %v1408_v2 = vmul.f32 %v9988_v7, %v9997_v5  ;;  %v10015_v18 = vsel %vm1160_vm3, %v1209_v9, %v1211_v15 }
 0x1bc   : > { %16208 = vst [vmem:[#allocation167_spill] sm:$0xff] %v10015_v18 }
 0x1bd   : > { %1490 = vrot.lane.b32.xlu0 %v1406_v46, %s16015_s9  ;;  %1488 = vrot.lane.b32.xlu1 %v1405_v60, %s16015_s9  ;;  %v10020_v46 = vsel %vm1160_vm3, %v1207_v13, %v1209_v9  ;;  %v1217_v13 = vrot.slane %v9506_v25, 1  ;;  %v1219_v9 = vrot.slane %v9508_v22, 1 }
 0x1be   : > { %v10006_v8 = vpop.permute.xlu0 %1355  ;;  %v10008_v19 = vpop.permute.xlu1 %1343  ;;  %16209 = vst [vmem:[#allocation168_spill] sm:$0xff] %v10020_v46 }
 0x1bf   : > { %16206 = vst [vmem:[#allocation165_spill] sm:$0xff] %v10006_v8  ;;  %16207 = vst [vmem:[#allocation166_spill] sm:$0xff] %v10008_v19  ;;  %v1407_v63 = vmul.f32 %v10008_v19, %v10002_v10  ;;  %v1410_v19 = vmul.f32 %v10006_v8, %v10015_v18  ;;  %v10033_v10 = vsel %vm1160_vm3, %v1213_v50, %v1215_v33 }
 0x1c0   : > { %16212 = vst [vmem:[#allocation171_spill] sm:$0xff] %v10033_v10 }
 0x1c1   : > { %1494 = vrot.lane.b32.xlu0 %v1408_v2, %s16015_s9  ;;  %1492 = vrot.lane.b32.xlu1 %v1407_v63, %s16015_s9  ;;  %v10038_v2 = vsel %vm1160_vm3, %v1211_v15, %v1213_v50  ;;  %v1221_v15 = vrot.slane %v9529_v21, 1  ;;  %v1223_v50 = vrot.slane %v9206_v39, 1  ;;  %v10255_v39 = vld [vmem:[%s15055_s4 + $0xc0] sm:$0xff] }
 0x1c2   : > { %v10024_v60 = vpop.permute.xlu0 %1363  ;;  %v10026_v7 = vpop.permute.xlu1 %1351  ;;  %16213 = vst [vmem:[#allocation172_spill] sm:$0xff] %v10038_v2 }
 0x1c3   : > { %16210 = vst [vmem:[#allocation169_spill] sm:$0xff] %v10024_v60  ;;  %16211 = vst [vmem:[#allocation170_spill] sm:$0xff] %v10026_v7  ;;  %v1409_v5 = vmul.f32 %v10026_v7, %v10020_v46  ;;  %v1412_v7 = vmul.f32 %v10024_v60, %v10033_v10  ;;  %v10051_v46 = vsel %vm1160_vm3, %v1217_v13, %v1219_v9 }
 0x1c4   : > { %16216 = vst [vmem:[#allocation175_spill] sm:$0xff] %v10051_v46  ;;  %v10067_v10 = vsel %vm1160_vm3, %v1221_v15, %v1223_v50 }
 0x1c5   : > { %1498 = vrot.lane.b32.xlu0 %v1410_v19, %s16015_s9  ;;  %1496 = vrot.lane.b32.xlu1 %v1409_v5, %s16015_s9  ;;  %v10056_v19 = vsel %vm1160_vm3, %v1215_v33, %v1217_v13  ;;  %16219 = vst [vmem:[#allocation178_spill] sm:$0xff] %v10067_v10  ;;  %v10072_v33 = vsel %vm1160_vm3, %v1219_v9, %v1221_v15  ;;  %v10096_v9 = vld [vmem:[%s15055_s4] sm:$0xff]  ;;  %v10103_v15 = vld [vmem:[%s15055_s4 + $0x18] sm:$0xff] }
 0x1c6   : > { %v10042_v63 = vpop.permute.xlu0 %1371  ;;  %v10044_v8 = vpop.permute.xlu1 %1359  ;;  %16217 = vst [vmem:[#allocation176_spill] sm:$0xff] %v10056_v19  ;;  %16221 = vst [vmem:[#allocation180_spill] sm:$0xff] %v10072_v33 }
 0x1c7   : > { %16214 = vst [vmem:[#allocation173_spill] sm:$0xff] %v10042_v63  ;;  %16215 = vst [vmem:[#allocation174_spill] sm:$0xff] %v10044_v8  ;;  %v1411_v18 = vmul.f32 %v10044_v8, %v10038_v2  ;;  %v1414_v60 = vmul.f32 %v10042_v63, %v10051_v46  ;;  %v10169_v46 = vld [vmem:[%s15055_s4 + $0x50] sm:$0xff] }
 0x1c9   : > { %1502 = vrot.lane.b32.xlu0 %v1412_v7, %s16015_s9  ;;  %1500 = vrot.lane.b32.xlu1 %v1411_v18, %s16015_s9 }
 0x1ca   : > { %v10060_v5 = vpop.permute.xlu1 %1367  ;;  %v10069_v2 = vpop.permute.xlu0 %1379 }
 0x1cb   : > { %16218 = vst [vmem:[#allocation177_spill] sm:$0xff] %v10060_v5  ;;  %v1413_v8 = vmul.f32 %v10060_v5, %v10056_v19  ;;  %16220 = vst [vmem:[#allocation179_spill] sm:$0xff] %v10069_v2  ;;  %v1416_v7 = vmul.f32 %v10069_v2, %v10067_v10  ;;  %v16223_v5 = vrot.slane %v9208_v40, 1  ;;  %v10151_v2 = vld [vmem:[%s15055_s4 + $0x58] sm:$0xff]  ;;  %v10157_v10 = vld [vmem:[%s15055_s4 + $0x40] sm:$0xff] }
 0x1cc   : > { %v10181_v19 = vld [vmem:[%s15055_s4 + $0x60] sm:$0xff] }
 0x1cd   : > { %1506 = vrot.lane.b32.xlu0 %v1414_v60, %s16015_s9  ;;  %1504 = vrot.lane.b32.xlu1 %v1413_v8, %s16015_s9  ;;  %v10085_v63 = vsel %vm1160_vm3, %v1223_v50, %v16223_v5  ;;  %v10109_v50 = vld [vmem:[%s15055_s4 + $0x8] sm:$0xff] }
 0x1ce   : > { %v10076_v18 = vpop.permute.xlu1 %1375  ;;  %16224 = vst [vmem:[#allocation182_spill] sm:$0xff] %v10085_v63  ;;  %v10115_v5 = vld [vmem:[%s15055_s4 + $0x28] sm:$0xff] }
 0x1cf   : > { %16222 = vst [vmem:[#allocation181_spill] sm:$0xff] %v10076_v18  ;;  %v1415_v13 = vmul.f32 %v10076_v18, %v10072_v33  ;;  %v10145_v18 = vld [vmem:[%s15055_s4 + $0x30] sm:$0xff]  ;;  %v10175_v33 = vld [vmem:[%s15055_s4 + $0x78] sm:$0xff] }
 0x1d1   : > { %1510 = vrot.lane.b32.xlu0 %v1416_v7, %s16015_s9  ;;  %1508 = vrot.lane.b32.xlu1 %v1415_v13, %s16015_s9  ;;  %v10121_v7 = vld [vmem:[%s15055_s4 + $0x10] sm:$0xff]  ;;  %v10127_v13 = vld [vmem:[%s15055_s4 + $0x38] sm:$0xff] }
 0x1d2   : > { %v10089_v60 = vpop.permute.xlu1 %1383 }
 0x1d3   : > { %16225 = vst [vmem:[#allocation183_spill] sm:$0xff] %v10089_v60  ;;  %v1417_v8 = vmul.f32 %v10089_v60, %v10085_v63  ;;  %v10139_v60 = vld [vmem:[%s15055_s4 + $0x48] sm:$0xff] }
 0x1d4   : > { %v10163_v63 = vld [vmem:[%s15055_s4 + $0x68] sm:$0xff] }
 0x1d5   : > { %1580 = vperm.xlu0 %8641, %v10096_v9   ;;  %1512 = vrot.lane.b32.xlu1 %v1417_v8, %s16015_s9  ;;  %v10133_v8 = vld [vmem:[%s15055_s4 + $0x20] sm:$0xff] }
 0x1d9   : > { %1592 = vperm.xlu0 %8641, %v10103_v15   ;;  %1584 = vperm.xlu1 %8642, %v10109_v50  }
 0x1dd   : > { %1600 = vperm.xlu0 %8641, %v10115_v5   ;;  %1588 = vperm.xlu1 %8642, %v10121_v7  }
 0x1e1   : > { %1608 = vperm.xlu0 %8641, %v10127_v13   ;;  %1596 = vperm.xlu1 %8642, %v10133_v8  }
 0x1e5   : > { %1616 = vperm.xlu0 %8641, %v10139_v60   ;;  %1604 = vperm.xlu1 %8642, %v10145_v18  }
 0x1e9   : > { %1624 = vperm.xlu0 %8641, %v10151_v2   ;;  %1612 = vperm.xlu1 %8642, %v10157_v10  }
 0x1ed   : > { %1632 = vperm.xlu0 %8641, %v10163_v63   ;;  %1620 = vperm.xlu1 %8642, %v10169_v46  }
 0x1f1   : > { %1640 = vperm.xlu0 %8641, %v10175_v33   ;;  %1628 = vperm.xlu1 %8642, %v10181_v19  }
 0x1f5   : > { %1648 = vperm.xlu0 %8641, %v10187_v27   ;;  %1636 = vperm.xlu1 %8642, %v10193_v1  }
 0x1f9   : > { %1656 = vperm.xlu0 %8641, %v10199_v11   ;;  %1644 = vperm.xlu1 %8642, %v10205_v6  }
 0x1fd   : > { %1664 = vperm.xlu0 %8641, %v10211_v20   ;;  %1652 = vperm.xlu1 %8642, %v10217_v3  }
 0x201   : > { %1672 = vperm.xlu0 %8641, %v10223_v12   ;;  %1660 = vperm.xlu1 %8642, %v10229_v4  }
 0x205   : > { %1680 = vperm.xlu0 %8641, %v10235_v35   ;;  %1668 = vperm.xlu1 %8642, %v10241_v14  }
 0x207   : > { %v1451_v0 = vpop.permute.xlu0 %1450  ;;  %v1453_v16 = vpop.permute.xlu1 %1452 }
 0x208   : > { %1547 = vst.msk [vmem:[#allocation2] sm:$0xff] %vm1546_vm4, %v1451_v0  ;;  %1548 = vst.msk [vmem:[#allocation2 + $0x8] sm:$0xff] %vm1546_vm4, %v1453_v16  ;;  %v10262_v16 = vld [vmem:[%s15055_s4 + $0xe8] sm:$0xff]  ;;  %v10268_v0 = vld [vmem:[%s15055_s4 + $0xd0] sm:$0xff] }
 0x209   : > { %1688 = vperm.xlu0 %8641, %v10249_v38   ;;  %1676 = vperm.xlu1 %8642, %v10255_v39  }
 0x20b   : > { %v1455_v40 = vpop.permute.xlu0 %1454 }
 0x20c   : > { %1549 = vst.msk [vmem:[#allocation2 + $0x10] sm:$0xff] %vm1546_vm4, %v1455_v40  ;;  %v10276_v40 = vld [vmem:[%s15055_s4 + $0xf8] sm:$0xff] }
 0x20d   : > { %1696 = vperm.xlu0 %8641, %v10262_v16   ;;  %1684 = vperm.xlu1 %8642, %v10268_v0  }
 0x20f   : > { %v1459_v22 = vpop.permute.xlu0 %1458  ;;  %v1457_v21 = vpop.permute.xlu1 %1456 }
 0x210   : > { %1551 = vst.msk [vmem:[#allocation2 + $0x20] sm:$0xff] %vm1546_vm4, %v1459_v22  ;;  %1550 = vst.msk [vmem:[#allocation2 + $0x18] sm:$0xff] %vm1546_vm4, %v1457_v21  ;;  %v10290_v22 = vld [vmem:[%s15055_s4 + $0xf0] sm:$0xff]  ;;  %v8824_v21 = vmov 4  }
 0x211   : > { %1704 = vperm.xlu0 %8641, %v10276_v40   ;;  %1692 = vperm.xlu1 %8642, %v10282_v24  }
 0x213   : > { %v1463_v25 = vpop.permute.xlu0 %1462  ;;  %v1461_v26 = vpop.permute.xlu1 %1460 }
 0x214   : > { %1553 = vst.msk [vmem:[#allocation2 + $0x30] sm:$0xff] %vm1546_vm4, %v1463_v25  ;;  %1552 = vst.msk [vmem:[#allocation2 + $0x28] sm:$0xff] %vm1546_vm4, %v1461_v26 }
 0x215   : > { %1700 = vperm.xlu1 %8642, %v10290_v22   ;;  %8644 = vset.pattern.permute.xlu0 %v8824_v21 }
 0x217   : > { %v1467_v49 = vpop.permute.xlu0 %1466  ;;  %v1465_v28 = vpop.permute.xlu1 %1464 }
 0x218   : > { %1555 = vst.msk [vmem:[#allocation2 + $0x40] sm:$0xff] %vm1546_vm4, %v1467_v49  ;;  %1554 = vst.msk [vmem:[#allocation2 + $0x38] sm:$0xff] %vm1546_vm4, %v1465_v28 }
 0x219   : > { %8643 = vset.pattern.permute.xlu1 %v8824_v21 }
 0x21b   : > { %v1471_v23 = vpop.permute.xlu0 %1470  ;;  %v1469_v25 = vpop.permute.xlu1 %1468 }
 0x21c   : > { %1557 = vst.msk [vmem:[#allocation2 + $0x50] sm:$0xff] %vm1546_vm4, %v1471_v23  ;;  %1556 = vst.msk [vmem:[#allocation2 + $0x48] sm:$0xff] %vm1546_vm4, %v1469_v25 }
 0x21f   : > { %v1475_v26 = vpop.permute.xlu0 %1474  ;;  %v1473_v30 = vpop.permute.xlu1 %1472 }
 0x220   : > { %1559 = vst.msk [vmem:[#allocation2 + $0x60] sm:$0xff] %vm1546_vm4, %v1475_v26  ;;  %1558 = vst.msk [vmem:[#allocation2 + $0x58] sm:$0xff] %vm1546_vm4, %v1473_v30 }
 0x223   : > { %v1479_v59 = vpop.permute.xlu0 %1478  ;;  %v1477_v32 = vpop.permute.xlu1 %1476 }
 0x224   : > { %1561 = vst.msk [vmem:[#allocation2 + $0x70] sm:$0xff] %vm1546_vm4, %v1479_v59  ;;  %1560 = vst.msk [vmem:[#allocation2 + $0x68] sm:$0xff] %vm1546_vm4, %v1477_v32 }
 0x227   : > { %v1483_v28 = vpop.permute.xlu0 %1482  ;;  %v1481_v49 = vpop.permute.xlu1 %1480 }
 0x228   : > { %1563 = vst.msk [vmem:[#allocation2 + $0x80] sm:$0xff] %vm1546_vm4, %v1483_v28  ;;  %1562 = vst.msk [vmem:[#allocation2 + $0x78] sm:$0xff] %vm1546_vm4, %v1481_v49 }
 0x22b   : > { %v1487_v23 = vpop.permute.xlu0 %1486  ;;  %v1485_v21 = vpop.permute.xlu1 %1484 }
 0x22c   : > { %1565 = vst.msk [vmem:[#allocation2 + $0x90] sm:$0xff] %vm1546_vm4, %v1487_v23  ;;  %1564 = vst.msk [vmem:[#allocation2 + $0x88] sm:$0xff] %vm1546_vm4, %v1485_v21 }
 0x22f   : > { %v1491_v25 = vpop.permute.xlu0 %1490  ;;  %v1489_v30 = vpop.permute.xlu1 %1488 }
 0x230   : > { %1567 = vst.msk [vmem:[#allocation2 + $0xa0] sm:$0xff] %vm1546_vm4, %v1491_v25  ;;  %1566 = vst.msk [vmem:[#allocation2 + $0x98] sm:$0xff] %vm1546_vm4, %v1489_v30 }
 0x233   : > { %v1495_v59 = vpop.permute.xlu0 %1494  ;;  %v1493_v32 = vpop.permute.xlu1 %1492 }
 0x234   : > { %1569 = vst.msk [vmem:[#allocation2 + $0xb0] sm:$0xff] %vm1546_vm4, %v1495_v59  ;;  %1568 = vst.msk [vmem:[#allocation2 + $0xa8] sm:$0xff] %vm1546_vm4, %v1493_v32 }
 0x237   : > { %v1499_v26 = vpop.permute.xlu0 %1498  ;;  %v1497_v28 = vpop.permute.xlu1 %1496 }
 0x238   : > { %1571 = vst.msk [vmem:[#allocation2 + $0xc0] sm:$0xff] %vm1546_vm4, %v1499_v26  ;;  %1570 = vst.msk [vmem:[#allocation2 + $0xb8] sm:$0xff] %vm1546_vm4, %v1497_v28  ;;  %v16227_v28 = vld [vmem:[#allocation25_spill] sm:$0xff] }
 0x23b   : > { %v1503_v49 = vpop.permute.xlu0 %1502  ;;  %v1501_v23 = vpop.permute.xlu1 %1500 }
 0x23c   : > { %1573 = vst.msk [vmem:[#allocation2 + $0xd0] sm:$0xff] %vm1546_vm4, %v1503_v49  ;;  %1572 = vst.msk [vmem:[#allocation2 + $0xc8] sm:$0xff] %vm1546_vm4, %v1501_v23 }
 0x23f   : > { %v1507_v21 = vpop.permute.xlu0 %1506  ;;  %v1505_v25 = vpop.permute.xlu1 %1504 }
 0x240   : > { %1575 = vst.msk [vmem:[#allocation2 + $0xe0] sm:$0xff] %vm1546_vm4, %v1507_v21  ;;  %1574 = vst.msk [vmem:[#allocation2 + $0xd8] sm:$0xff] %vm1546_vm4, %v1505_v25  ;;  %v16230_v25 = vld [vmem:[#allocation29_spill] sm:$0xff] }
 0x243   : > { %v1511_v30 = vpop.permute.xlu0 %1510  ;;  %v1509_v59 = vpop.permute.xlu1 %1508 }
 0x244   : > { %1577 = vst.msk [vmem:[#allocation2 + $0xf0] sm:$0xff] %vm1546_vm4, %v1511_v30  ;;  %1576 = vst.msk [vmem:[#allocation2 + $0xe8] sm:$0xff] %vm1546_vm4, %v1509_v59 }
 0x247   : > { %v1513_v32 = vpop.permute.xlu1 %1512 }
 0x248   : > { %1578 = vst.msk [vmem:[#allocation2 + $0xf8] sm:$0xff] %vm1546_vm4, %v1513_v32  ;;  %vm5306_vm4 = vcmask 556544  }
 0x250   : > { %v10318_v26 = vpop.permute.xlu0 %1580 }
 0x251   : > { %16226 = vst [vmem:[#allocation184_spill] sm:$0xff] %v10318_v26  ;;  %v1707_v49 = vmul.f32 %v10318_v26, %v16227_v28  ;;  %v16234_v26 = vld [vmem:[#allocation34_spill] sm:$0xff] }
 0x253   : > { %1771 = vrot.lane.b32.xlu1 %v1707_v49, %s8825_s10 }
 0x254   : > { %v10323_v23 = vpop.permute.xlu0 %1592  ;;  %v10325_v21 = vpop.permute.xlu1 %1584 }
 0x255   : > { %16228 = vst [vmem:[#allocation185_spill] sm:$0xff] %v10323_v23  ;;  %16229 = vst [vmem:[#allocation186_spill] sm:$0xff] %v10325_v21  ;;  %v1708_v30 = vmul.f32 %v10325_v21, %v16230_v25  ;;  %v1710_v29 = vmul.f32 %v10323_v23, %v16233_v52  ;;  %v16237_v21 = vld [vmem:[#allocation37_spill] sm:$0xff]  ;;  %v16238_v25 = vld [vmem:[#allocation38_spill] sm:$0xff] }
 0x256   : > { %v16242_v52 = vld [vmem:[#allocation42_spill] sm:$0xff] }
 0x257   : > { %1773 = vrot.lane.b32.xlu0 %v1708_v30, %s8825_s10 }
 0x258   : > { %v10330_v59 = vpop.permute.xlu0 %1600  ;;  %v10332_v32 = vpop.permute.xlu1 %1588 }
 0x259   : > { %16231 = vst [vmem:[#allocation187_spill] sm:$0xff] %v10330_v59  ;;  %16232 = vst [vmem:[#allocation188_spill] sm:$0xff] %v10332_v32  ;;  %v1709_v28 = vmul.f32 %v10332_v32, %v16234_v26  ;;  %v1712_v30 = vmul.f32 %v10330_v59, %v16237_v21  ;;  %v16246_v21 = vld [vmem:[#allocation47_spill] sm:$0xff] }
 0x25b   : > { %1775 = vrot.lane.b32.xlu1 %v1709_v28, %s8825_s10  ;;  %1777 = vrot.lane.b32.xlu0 %v1710_v29, %s8825_s10  ;;  %v16241_v28 = vld [vmem:[#allocation41_spill] sm:$0xff] }
 0x25c   : > { %v10340_v49 = vpop.permute.xlu0 %1608  ;;  %v10342_v31 = vpop.permute.xlu1 %1596 }
 0x25d   : > { %16235 = vst [vmem:[#allocation189_spill] sm:$0xff] %v10340_v49  ;;  %16236 = vst [vmem:[#allocation190_spill] sm:$0xff] %v10342_v31  ;;  %v1711_v48 = vmul.f32 %v10342_v31, %v16238_v25  ;;  %v1714_v29 = vmul.f32 %v10340_v49, %v16241_v28  ;;  %v16250_v28 = vld [vmem:[#allocation51_spill] sm:$0xff] }
 0x25f   : > { %1779 = vrot.lane.b32.xlu1 %v1711_v48, %s8825_s10  ;;  %1781 = vrot.lane.b32.xlu0 %v1712_v30, %s8825_s10  ;;  %v16245_v48 = vld [vmem:[#allocation46_spill] sm:$0xff] }
 0x260   : > { %v10350_v23 = vpop.permute.xlu0 %1616  ;;  %v10352_v32 = vpop.permute.xlu1 %1604 }
 0x261   : > { %16239 = vst [vmem:[#allocation191_spill] sm:$0xff] %v10350_v23  ;;  %16240 = vst [vmem:[#allocation192_spill] sm:$0xff] %v10352_v32  ;;  %v1713_v26 = vmul.f32 %v10352_v32, %v16242_v52  ;;  %v1716_v30 = vmul.f32 %v10350_v23, %v16245_v48  ;;  %v16254_v48 = vld [vmem:[#allocation57_spill] sm:$0xff] }
 0x263   : > { %1783 = vrot.lane.b32.xlu1 %v1713_v26, %s8825_s10  ;;  %1785 = vrot.lane.b32.xlu0 %v1714_v29, %s8825_s10  ;;  %v16249_v26 = vld [vmem:[#allocation52_spill] sm:$0xff] }
 0x264   : > { %v10360_v59 = vpop.permute.xlu0 %1624  ;;  %v10362_v31 = vpop.permute.xlu1 %1612 }
 0x265   : > { %16243 = vst [vmem:[#allocation193_spill] sm:$0xff] %v10360_v59  ;;  %16244 = vst [vmem:[#allocation194_spill] sm:$0xff] %v10362_v31  ;;  %v1715_v25 = vmul.f32 %v10362_v31, %v16246_v21  ;;  %v1718_v29 = vmul.f32 %v10360_v59, %v16249_v26  ;;  %v16258_v26 = vld [vmem:[#allocation65_spill] sm:$0xff] }
 0x267   : > { %1787 = vrot.lane.b32.xlu1 %v1715_v25, %s8825_s10  ;;  %1789 = vrot.lane.b32.xlu0 %v1716_v30, %s8825_s10  ;;  %v16253_v25 = vld [vmem:[#allocation59_spill] sm:$0xff] }
 0x268   : > { %v10370_v49 = vpop.permute.xlu0 %1632  ;;  %v10372_v32 = vpop.permute.xlu1 %1620 }
 0x269   : > { %16247 = vst [vmem:[#allocation195_spill] sm:$0xff] %v10370_v49  ;;  %16248 = vst [vmem:[#allocation196_spill] sm:$0xff] %v10372_v32  ;;  %v1717_v52 = vmul.f32 %v10372_v32, %v16250_v28  ;;  %v1720_v30 = vmul.f32 %v10370_v49, %v16253_v25  ;;  %v16262_v25 = vld [vmem:[#allocation69_spill] sm:$0xff] }
 0x26b   : > { %1791 = vrot.lane.b32.xlu1 %v1717_v52, %s8825_s10  ;;  %1793 = vrot.lane.b32.xlu0 %v1718_v29, %s8825_s10  ;;  %v16257_v52 = vld [vmem:[#allocation64_spill] sm:$0xff] }
 0x26c   : > { %v10380_v23 = vpop.permute.xlu0 %1640  ;;  %v10382_v31 = vpop.permute.xlu1 %1628 }
 0x26d   : > { %16251 = vst [vmem:[#allocation197_spill] sm:$0xff] %v10380_v23  ;;  %16252 = vst [vmem:[#allocation198_spill] sm:$0xff] %v10382_v31  ;;  %v1719_v21 = vmul.f32 %v10382_v31, %v16254_v48  ;;  %v1722_v29 = vmul.f32 %v10380_v23, %v16257_v52  ;;  %v16266_v52 = vld [vmem:[#allocation75_spill] sm:$0xff] }
 0x26f   : > { %1795 = vrot.lane.b32.xlu1 %v1719_v21, %s8825_s10  ;;  %1797 = vrot.lane.b32.xlu0 %v1720_v30, %s8825_s10  ;;  %v16261_v21 = vld [vmem:[#allocation70_spill] sm:$0xff] }
 0x270   : > { %v10390_v59 = vpop.permute.xlu0 %1648  ;;  %v10392_v32 = vpop.permute.xlu1 %1636 }
 0x271   : > { %16255 = vst [vmem:[#allocation199_spill] sm:$0xff] %v10390_v59  ;;  %16256 = vst [vmem:[#allocation200_spill] sm:$0xff] %v10392_v32  ;;  %v1721_v28 = vmul.f32 %v10392_v32, %v16258_v26  ;;  %v1724_v30 = vmul.f32 %v10390_v59, %v16261_v21  ;;  %v16270_v21 = vld [vmem:[#allocation83_spill] sm:$0xff] }
 0x273   : > { %1799 = vrot.lane.b32.xlu1 %v1721_v28, %s8825_s10  ;;  %1801 = vrot.lane.b32.xlu0 %v1722_v29, %s8825_s10  ;;  %v16265_v28 = vld [vmem:[#allocation77_spill] sm:$0xff] }
 0x274   : > { %v10400_v49 = vpop.permute.xlu0 %1656  ;;  %v10402_v31 = vpop.permute.xlu1 %1644 }
 0x275   : > { %16259 = vst [vmem:[#allocation201_spill] sm:$0xff] %v10400_v49  ;;  %16260 = vst [vmem:[#allocation202_spill] sm:$0xff] %v10402_v31  ;;  %v1723_v48 = vmul.f32 %v10402_v31, %v16262_v25  ;;  %v1726_v29 = vmul.f32 %v10400_v49, %v16265_v28  ;;  %v16274_v28 = vld [vmem:[#allocation87_spill] sm:$0xff] }
 0x277   : > { %1803 = vrot.lane.b32.xlu1 %v1723_v48, %s8825_s10  ;;  %1805 = vrot.lane.b32.xlu0 %v1724_v30, %s8825_s10  ;;  %v16269_v48 = vld [vmem:[#allocation82_spill] sm:$0xff] }
 0x278   : > { %v10410_v23 = vpop.permute.xlu0 %1664  ;;  %v10412_v32 = vpop.permute.xlu1 %1652 }
 0x279   : > { %16263 = vst [vmem:[#allocation203_spill] sm:$0xff] %v10410_v23  ;;  %16264 = vst [vmem:[#allocation204_spill] sm:$0xff] %v10412_v32  ;;  %v1725_v26 = vmul.f32 %v10412_v32, %v16266_v52  ;;  %v1728_v30 = vmul.f32 %v10410_v23, %v16269_v48 }
 0x27b   : > { %1807 = vrot.lane.b32.xlu1 %v1725_v26, %s8825_s10  ;;  %1809 = vrot.lane.b32.xlu0 %v1726_v29, %s8825_s10  ;;  %v16273_v26 = vld [vmem:[#allocation88_spill] sm:$0xff] }
 0x27c   : > { %v10420_v59 = vpop.permute.xlu0 %1672  ;;  %v10422_v31 = vpop.permute.xlu1 %1660 }
 0x27d   : > { %16267 = vst [vmem:[#allocation205_spill] sm:$0xff] %v10420_v59  ;;  %16268 = vst [vmem:[#allocation206_spill] sm:$0xff] %v10422_v31  ;;  %v1727_v25 = vmul.f32 %v10422_v31, %v16270_v21  ;;  %v1730_v29 = vmul.f32 %v10420_v59, %v16273_v26 }
 0x27f   : > { %1811 = vrot.lane.b32.xlu1 %v1727_v25, %s8825_s10  ;;  %1813 = vrot.lane.b32.xlu0 %v1728_v30, %s8825_s10  ;;  %v16277_v30 = vld [vmem:[#allocation93_spill] sm:$0xff] }
 0x280   : > { %v10430_v49 = vpop.permute.xlu0 %1680  ;;  %v10432_v32 = vpop.permute.xlu1 %1668 }
 0x281   : > { %16271 = vst [vmem:[#allocation83_spill] sm:$0xff] %v10430_v49  ;;  %16272 = vst [vmem:[#allocation207_spill] sm:$0xff] %v10432_v32  ;;  %v1729_v52 = vmul.f32 %v10432_v32, %v16274_v28  ;;  %v1732_v25 = vmul.f32 %v10430_v49, %v9524_v17 }
 0x283   : > { %1815 = vrot.lane.b32.xlu1 %v1729_v52, %s8825_s10  ;;  %1817 = vrot.lane.b32.xlu0 %v1730_v29, %s8825_s10 }
 0x284   : > { %v10440_v23 = vpop.permute.xlu0 %1688  ;;  %v10442_v31 = vpop.permute.xlu1 %1676 }
 0x285   : > { %16275 = vst [vmem:[#allocation88_spill] sm:$0xff] %v10440_v23  ;;  %16276 = vst [vmem:[#allocation87_spill] sm:$0xff] %v10442_v31  ;;  %v1731_v48 = vmul.f32 %v10442_v31, %v16277_v30  ;;  %v1734_v52 = vmul.f32 %v10440_v23, %v9542_v61 }
 0x287   : > { %1819 = vrot.lane.b32.xlu1 %v1731_v48, %s8825_s10  ;;  %1821 = vrot.lane.b32.xlu0 %v1732_v25, %s8825_s10 }
 0x288   : > { %v10450_v59 = vpop.permute.xlu0 %1696  ;;  %v10452_v32 = vpop.permute.xlu1 %1684 }
 0x289   : > { %16278 = vst [vmem:[#allocation93_spill] sm:$0xff] %v10450_v59  ;;  %16279 = vst [vmem:[#allocation208_spill] sm:$0xff] %v10452_v32  ;;  %v1733_v29 = vmul.f32 %v10452_v32, %v9545_v36  ;;  %v1736_v48 = vmul.f32 %v10450_v59, %v9561_v53  ;;  %v16283_v32 = vld [vmem:[#allocation30_spill] sm:$0xff] }
 0x28b   : > { %1823 = vrot.lane.b32.xlu1 %v1733_v29, %s8825_s10  ;;  %1825 = vrot.lane.b32.xlu0 %v1734_v52, %s8825_s10  ;;  %v16284_v52 = vld [vmem:[#allocation26_spill] sm:$0xff] }
 0x28c   : > { %v10460_v49 = vpop.permute.xlu1 %1692  ;;  %v10466_v31 = vpop.permute.xlu0 %1704 }
 0x28d   : > { %16280 = vst [vmem:[#allocation209_spill] sm:$0xff] %v10460_v49  ;;  %v1735_v25 = vmul.f32 %v10460_v49, %v9564_v57  ;;  %16281 = vst [vmem:[#allocation210_spill] sm:$0xff] %v10466_v31  ;;  %v1738_v29 = vmul.f32 %v10466_v31, %v16283_v32 }
 0x28f   : > { %1827 = vrot.lane.b32.xlu1 %v1735_v25, %s8825_s10  ;;  %1829 = vrot.lane.b32.xlu0 %v1736_v48, %s8825_s10 }
 0x290   : > { %v10470_v23 = vpop.permute.xlu1 %1700 }
 0x291   : > { %16282 = vst [vmem:[#allocation211_spill] sm:$0xff] %v10470_v23  ;;  %v1737_v61 = vmul.f32 %v10470_v23, %v16284_v52 }
 0x293   : > { %1831 = vrot.lane.b32.xlu1 %v1737_v61, %s8825_s10  ;;  %1833 = vrot.lane.b32.xlu0 %v1738_v29, %s8825_s10  ;;  %s372_s10 = sadd.s32 %s9180_s13, %s8170_s23  ;;  %s8837_s23 = smov 44  }
 0x297   : > { %1901 = vperm.xlu1 %8643, %v10096_v9   ;;  %1905 = vperm.xlu0 %8644, %v10109_v50  }
 0x29b   : > { %1909 = vperm.xlu1 %8643, %v10121_v7   ;;  %1917 = vperm.xlu0 %8644, %v10133_v8  }
 0x29f   : > { %1913 = vperm.xlu1 %8643, %v10103_v15   ;;  %1925 = vperm.xlu0 %8644, %v10145_v18  }
 0x2a3   : > { %1921 = vperm.xlu1 %8643, %v10115_v5   ;;  %1933 = vperm.xlu0 %8644, %v10157_v10  }
 0x2a7   : > { %1929 = vperm.xlu1 %8643, %v10127_v13   ;;  %1941 = vperm.xlu0 %8644, %v10169_v46  }
 0x2ab   : > { %1937 = vperm.xlu1 %8643, %v10139_v60   ;;  %1949 = vperm.xlu0 %8644, %v10181_v19  }
 0x2af   : > { %1945 = vperm.xlu1 %8643, %v10151_v2   ;;  %1957 = vperm.xlu0 %8644, %v10193_v1  }
 0x2b3   : > { %1953 = vperm.xlu1 %8643, %v10163_v63   ;;  %1965 = vperm.xlu0 %8644, %v10205_v6  }
 0x2b7   : > { %1961 = vperm.xlu1 %8643, %v10175_v33   ;;  %1973 = vperm.xlu0 %8644, %v10217_v3  }
 0x2bb   : > { %1969 = vperm.xlu1 %8643, %v10187_v27   ;;  %1981 = vperm.xlu0 %8644, %v10229_v4  }
 0x2bf   : > { %1977 = vperm.xlu1 %8643, %v10199_v11   ;;  %1989 = vperm.xlu0 %8644, %v10241_v14  }
 0x2c3   : > { %1985 = vperm.xlu1 %8643, %v10211_v20   ;;  %1997 = vperm.xlu0 %8644, %v10255_v39  }
 0x2c5   : > { %v1772_v61 = vpop.permute.xlu1 %1771 }
 0x2c6   : > { %1868 = vst.msk [vmem:[#allocation2] sm:$0xff] %vm1867_vm5, %v1772_v61 }
 0x2c7   : > { %1993 = vperm.xlu1 %8643, %v10223_v12   ;;  %2005 = vperm.xlu0 %8644, %v10268_v0  }
 0x2c9   : > { %v1774_v48 = vpop.permute.xlu0 %1773 }
 0x2ca   : > { %1869 = vst.msk [vmem:[#allocation2 + $0x8] sm:$0xff] %vm1867_vm5, %v1774_v48  ;;  %v8826_v48 = vmov 5  }
 0x2cb   : > { %2001 = vperm.xlu1 %8643, %v10235_v35   ;;  %2013 = vperm.xlu0 %8644, %v10282_v24  }
 0x2cd   : > { %v1776_v25 = vpop.permute.xlu1 %1775  ;;  %v1778_v29 = vpop.permute.xlu0 %1777 }
 0x2ce   : > { %1870 = vst.msk [vmem:[#allocation2 + $0x10] sm:$0xff] %vm1867_vm5, %v1776_v25  ;;  %1871 = vst.msk [vmem:[#allocation2 + $0x18] sm:$0xff] %vm1867_vm5, %v1778_v29 }
 0x2cf   : > { %2009 = vperm.xlu1 %8643, %v10249_v38   ;;  %2021 = vperm.xlu0 %8644, %v10290_v22  }
 0x2d1   : > { %v1780_v61 = vpop.permute.xlu1 %1779  ;;  %v1782_v31 = vpop.permute.xlu0 %1781 }
 0x2d2   : > { %1872 = vst.msk [vmem:[#allocation2 + $0x20] sm:$0xff] %vm1867_vm5, %v1780_v61  ;;  %1873 = vst.msk [vmem:[#allocation2 + $0x28] sm:$0xff] %vm1867_vm5, %v1782_v31 }
 0x2d3   : > { %2017 = vperm.xlu1 %8643, %v10262_v16   ;;  %8645 = vset.pattern.permute.xlu0 %v8826_v48 }
 0x2d5   : > { %v1784_v23 = vpop.permute.xlu1 %1783  ;;  %v1786_v59 = vpop.permute.xlu0 %1785 }
 0x2d6   : > { %1874 = vst.msk [vmem:[#allocation2 + $0x30] sm:$0xff] %vm1867_vm5, %v1784_v23  ;;  %1875 = vst.msk [vmem:[#allocation2 + $0x38] sm:$0xff] %vm1867_vm5, %v1786_v59 }
 0x2d7   : > { %2025 = vperm.xlu1 %8643, %v10276_v40  }
 0x2d9   : > { %v1788_v25 = vpop.permute.xlu1 %1787  ;;  %v1790_v29 = vpop.permute.xlu0 %1789 }
 0x2da   : > { %1876 = vst.msk [vmem:[#allocation2 + $0x40] sm:$0xff] %vm1867_vm5, %v1788_v25  ;;  %1877 = vst.msk [vmem:[#allocation2 + $0x48] sm:$0xff] %vm1867_vm5, %v1790_v29 }
 0x2db   : > { %8646 = vset.pattern.permute.xlu1 %v8826_v48 }
 0x2dd   : > { %v1792_v31 = vpop.permute.xlu1 %1791  ;;  %v1794_v61 = vpop.permute.xlu0 %1793 }
 0x2de   : > { %1878 = vst.msk [vmem:[#allocation2 + $0x50] sm:$0xff] %vm1867_vm5, %v1792_v31  ;;  %1879 = vst.msk [vmem:[#allocation2 + $0x58] sm:$0xff] %vm1867_vm5, %v1794_v61 }
 0x2e1   : > { %v1796_v49 = vpop.permute.xlu1 %1795  ;;  %v1798_v32 = vpop.permute.xlu0 %1797 }
 0x2e2   : > { %1880 = vst.msk [vmem:[#allocation2 + $0x60] sm:$0xff] %vm1867_vm5, %v1796_v49  ;;  %1881 = vst.msk [vmem:[#allocation2 + $0x68] sm:$0xff] %vm1867_vm5, %v1798_v32 }
 0x2e5   : > { %v1800_v23 = vpop.permute.xlu1 %1799  ;;  %v1802_v59 = vpop.permute.xlu0 %1801 }
 0x2e6   : > { %1882 = vst.msk [vmem:[#allocation2 + $0x70] sm:$0xff] %vm1867_vm5, %v1800_v23  ;;  %1883 = vst.msk [vmem:[#allocation2 + $0x78] sm:$0xff] %vm1867_vm5, %v1802_v59 }
 0x2e9   : > { %v1804_v25 = vpop.permute.xlu1 %1803  ;;  %v1806_v48 = vpop.permute.xlu0 %1805 }
 0x2ea   : > { %1884 = vst.msk [vmem:[#allocation2 + $0x80] sm:$0xff] %vm1867_vm5, %v1804_v25  ;;  %1885 = vst.msk [vmem:[#allocation2 + $0x88] sm:$0xff] %vm1867_vm5, %v1806_v48 }
 0x2ed   : > { %v1808_v29 = vpop.permute.xlu1 %1807  ;;  %v1810_v31 = vpop.permute.xlu0 %1809 }
 0x2ee   : > { %1886 = vst.msk [vmem:[#allocation2 + $0x90] sm:$0xff] %vm1867_vm5, %v1808_v29  ;;  %1887 = vst.msk [vmem:[#allocation2 + $0x98] sm:$0xff] %vm1867_vm5, %v1810_v31 }
 0x2f1   : > { %v1812_v49 = vpop.permute.xlu1 %1811  ;;  %v1814_v32 = vpop.permute.xlu0 %1813 }
 0x2f2   : > { %1888 = vst.msk [vmem:[#allocation2 + $0xa0] sm:$0xff] %vm1867_vm5, %v1812_v49  ;;  %1889 = vst.msk [vmem:[#allocation2 + $0xa8] sm:$0xff] %vm1867_vm5, %v1814_v32 }
 0x2f5   : > { %v1816_v61 = vpop.permute.xlu1 %1815  ;;  %v1818_v23 = vpop.permute.xlu0 %1817 }
 0x2f6   : > { %1890 = vst.msk [vmem:[#allocation2 + $0xb0] sm:$0xff] %vm1867_vm5, %v1816_v61  ;;  %1891 = vst.msk [vmem:[#allocation2 + $0xb8] sm:$0xff] %vm1867_vm5, %v1818_v23 }
 0x2f9   : > { %v1820_v59 = vpop.permute.xlu1 %1819  ;;  %v1822_v25 = vpop.permute.xlu0 %1821 }
 0x2fa   : > { %1892 = vst.msk [vmem:[#allocation2 + $0xc0] sm:$0xff] %vm1867_vm5, %v1820_v59  ;;  %1893 = vst.msk [vmem:[#allocation2 + $0xc8] sm:$0xff] %vm1867_vm5, %v1822_v25 }
 0x2fd   : > { %v1824_v48 = vpop.permute.xlu1 %1823  ;;  %v1826_v29 = vpop.permute.xlu0 %1825 }
 0x2fe   : > { %1894 = vst.msk [vmem:[#allocation2 + $0xd0] sm:$0xff] %vm1867_vm5, %v1824_v48  ;;  %1895 = vst.msk [vmem:[#allocation2 + $0xd8] sm:$0xff] %vm1867_vm5, %v1826_v29 }
 0x301   : > { %v1828_v31 = vpop.permute.xlu1 %1827  ;;  %v1830_v49 = vpop.permute.xlu0 %1829 }
 0x302   : > { %1896 = vst.msk [vmem:[#allocation2 + $0xe0] sm:$0xff] %vm1867_vm5, %v1828_v31  ;;  %1897 = vst.msk [vmem:[#allocation2 + $0xe8] sm:$0xff] %vm1867_vm5, %v1830_v49 }
 0x305   : > { %v1832_v32 = vpop.permute.xlu1 %1831  ;;  %v1834_v61 = vpop.permute.xlu0 %1833 }
 0x306   : > { %1898 = vst.msk [vmem:[#allocation2 + $0xf0] sm:$0xff] %vm1867_vm5, %v1832_v32  ;;  %1899 = vst.msk [vmem:[#allocation2 + $0xf8] sm:$0xff] %vm1867_vm5, %v1834_v61  ;;  %vm5499_vm5 = vcmask 589344  }
 0x312   : > { %v10542_v23 = vpop.permute.xlu1 %1901  ;;  %v10544_v59 = vpop.permute.xlu0 %1905 }
 0x313   : > { %16285 = vst [vmem:[#allocation26_spill] sm:$0xff] %v10542_v23  ;;  %16286 = vst [vmem:[#allocation212_spill] sm:$0xff] %v10544_v59  ;;  %v2028_v25 = vmul.f32 %v9201_v37, %v10542_v23  ;;  %v2029_v48 = vmul.f32 %v9210_v41, %v10544_v59  ;;  %v16305_v41 = vld [vmem:[#allocation54_spill] sm:$0xff] }
 0x315   : > { %2092 = vrot.lane.b32.xlu0 %v2028_v25, %s8827_s16  ;;  %2094 = vrot.lane.b32.xlu1 %v2029_v48, %s8827_s16 }
 0x316   : > { %v10552_v29 = vpop.permute.xlu1 %1909  ;;  %v10554_v31 = vpop.permute.xlu0 %1917 }
 0x317   : > { %16287 = vst [vmem:[#allocation213_spill] sm:$0xff] %v10552_v29  ;;  %16288 = vst [vmem:[#allocation214_spill] sm:$0xff] %v10554_v31  ;;  %v2030_v49 = vmul.f32 %v9219_v47, %v10552_v29  ;;  %v2032_v59 = vmul.f32 %v9244_v58, %v10554_v31 }
 0x319   : > { %2096 = vrot.lane.b32.xlu0 %v2030_v49, %s8827_s16 }
 0x31a   : > { %v10559_v32 = vpop.permute.xlu1 %1913  ;;  %v10561_v61 = vpop.permute.xlu0 %1925 }
 0x31b   : > { %16289 = vst [vmem:[#allocation215_spill] sm:$0xff] %v10559_v32  ;;  %16290 = vst [vmem:[#allocation216_spill] sm:$0xff] %v10561_v61  ;;  %v2031_v25 = vmul.f32 %v9232_v51, %v10559_v32  ;;  %v2034_v49 = vmul.f32 %v9268_v42, %v10561_v61 }
 0x31d   : > { %2098 = vrot.lane.b32.xlu1 %v2031_v25, %s8827_s16  ;;  %2100 = vrot.lane.b32.xlu0 %v2032_v59, %s8827_s16 }
 0x31e   : > { %v10569_v48 = vpop.permute.xlu1 %1921  ;;  %v10571_v23 = vpop.permute.xlu0 %1933 }
 0x31f   : > { %16291 = vst [vmem:[#allocation217_spill] sm:$0xff] %v10569_v48  ;;  %16292 = vst [vmem:[#allocation218_spill] sm:$0xff] %v10571_v23  ;;  %v2033_v29 = vmul.f32 %v9255_v62, %v10569_v48  ;;  %v2036_v59 = vmul.f32 %v9299_v34, %v10571_v23 }
 0x321   : > { %2102 = vrot.lane.b32.xlu1 %v2033_v29, %s8827_s16  ;;  %2104 = vrot.lane.b32.xlu0 %v2034_v49, %s8827_s16 }
 0x322   : > { %v10579_v31 = vpop.permute.xlu1 %1929  ;;  %v10581_v32 = vpop.permute.xlu0 %1941 }
 0x323   : > { %16293 = vst [vmem:[#allocation219_spill] sm:$0xff] %v10579_v31  ;;  %16294 = vst [vmem:[#allocation220_spill] sm:$0xff] %v10581_v32  ;;  %v2035_v25 = vmul.f32 %v9270_v43, %v10579_v31  ;;  %v2038_v29 = vmul.f32 %v9317_v44, %v10581_v32 }
 0x325   : > { %2106 = vrot.lane.b32.xlu1 %v2035_v25, %s8827_s16  ;;  %2108 = vrot.lane.b32.xlu0 %v2036_v59, %s8827_s16 }
 0x326   : > { %v10589_v61 = vpop.permute.xlu1 %1937  ;;  %v10591_v48 = vpop.permute.xlu0 %1949 }
 0x327   : > { %16295 = vst [vmem:[#allocation221_spill] sm:$0xff] %v10589_v61  ;;  %16296 = vst [vmem:[#allocation222_spill] sm:$0xff] %v10591_v48  ;;  %v2037_v49 = vmul.f32 %v9301_v54, %v10589_v61  ;;  %v2040_v59 = vmul.f32 %v9338_v56, %v10591_v48 }
 0x329   : > { %2110 = vrot.lane.b32.xlu1 %v2037_v49, %s8827_s16  ;;  %2112 = vrot.lane.b32.xlu0 %v2038_v29, %s8827_s16  ;;  %v16301_v49 = vld [vmem:[#allocation48_spill] sm:$0xff] }
 0x32a   : > { %v10599_v23 = vpop.permute.xlu1 %1945  ;;  %v10601_v31 = vpop.permute.xlu0 %1957 }
 0x32b   : > { %16297 = vst [vmem:[#allocation223_spill] sm:$0xff] %v10599_v23  ;;  %16298 = vst [vmem:[#allocation224_spill] sm:$0xff] %v10601_v31  ;;  %v2039_v25 = vmul.f32 %v9324_v45, %v10599_v23  ;;  %v2042_v29 = vmul.f32 %v9368_v55, %v10601_v31  ;;  %v16309_v55 = vld [vmem:[#allocation60_spill] sm:$0xff] }
 0x32d   : > { %2114 = vrot.lane.b32.xlu1 %v2039_v25, %s8827_s16  ;;  %2116 = vrot.lane.b32.xlu0 %v2040_v59, %s8827_s16  ;;  %v16304_v59 = vld [vmem:[#allocation58_spill] sm:$0xff] }
 0x32e   : > { %v10609_v32 = vpop.permute.xlu1 %1953  ;;  %v10611_v61 = vpop.permute.xlu0 %1965 }
 0x32f   : > { %16299 = vst [vmem:[#allocation225_spill] sm:$0xff] %v10609_v32  ;;  %16300 = vst [vmem:[#allocation226_spill] sm:$0xff] %v10611_v61  ;;  %v2041_v37 = vmul.f32 %v16301_v49, %v10609_v32  ;;  %v2044_v25 = vmul.f32 %v16304_v59, %v10611_v61  ;;  %v16313_v59 = vld [vmem:[#allocation66_spill] sm:$0xff] }
 0x331   : > { %2118 = vrot.lane.b32.xlu1 %v2041_v37, %s8827_s16  ;;  %2120 = vrot.lane.b32.xlu0 %v2042_v29, %s8827_s16  ;;  %v16308_v37 = vld [vmem:[#allocation63_spill] sm:$0xff] }
 0x332   : > { %v10619_v48 = vpop.permute.xlu1 %1961  ;;  %v10621_v23 = vpop.permute.xlu0 %1973 }
 0x333   : > { %16302 = vst [vmem:[#allocation227_spill] sm:$0xff] %v10619_v48  ;;  %16303 = vst [vmem:[#allocation228_spill] sm:$0xff] %v10621_v23  ;;  %v2043_v56 = vmul.f32 %v16305_v41, %v10619_v48  ;;  %v2046_v29 = vmul.f32 %v16308_v37, %v10621_v23  ;;  %v16317_v37 = vld [vmem:[#allocation72_spill] sm:$0xff] }
 0x335   : > { %2122 = vrot.lane.b32.xlu1 %v2043_v56, %s8827_s16  ;;  %2124 = vrot.lane.b32.xlu0 %v2044_v25, %s8827_s16  ;;  %v16312_v56 = vld [vmem:[#allocation71_spill] sm:$0xff] }
 0x336   : > { %v10629_v31 = vpop.permute.xlu1 %1969  ;;  %v10631_v32 = vpop.permute.xlu0 %1981 }
 0x337   : > { %16306 = vst [vmem:[#allocation229_spill] sm:$0xff] %v10629_v31  ;;  %16307 = vst [vmem:[#allocation230_spill] sm:$0xff] %v10631_v32  ;;  %v2045_v49 = vmul.f32 %v16309_v55, %v10629_v31  ;;  %v2048_v25 = vmul.f32 %v16312_v56, %v10631_v32  ;;  %v16321_v56 = vld [vmem:[#allocation78_spill] sm:$0xff] }
 0x339   : > { %2126 = vrot.lane.b32.xlu1 %v2045_v49, %s8827_s16  ;;  %2128 = vrot.lane.b32.xlu0 %v2046_v29, %s8827_s16  ;;  %v16316_v49 = vld [vmem:[#allocation76_spill] sm:$0xff] }
 0x33a   : > { %v10639_v61 = vpop.permute.xlu1 %1977  ;;  %v10641_v48 = vpop.permute.xlu0 %1989 }
 0x33b   : > { %16310 = vst [vmem:[#allocation231_spill] sm:$0xff] %v10639_v61  ;;  %16311 = vst [vmem:[#allocation232_spill] sm:$0xff] %v10641_v48  ;;  %v2047_v41 = vmul.f32 %v16313_v59, %v10639_v61  ;;  %v2050_v29 = vmul.f32 %v16316_v49, %v10641_v48  ;;  %v16325_v49 = vld [vmem:[#allocation84_spill] sm:$0xff] }
 0x33d   : > { %2130 = vrot.lane.b32.xlu1 %v2047_v41, %s8827_s16  ;;  %2132 = vrot.lane.b32.xlu0 %v2048_v25, %s8827_s16  ;;  %v16320_v41 = vld [vmem:[#allocation81_spill] sm:$0xff] }
 0x33e   : > { %v10649_v23 = vpop.permute.xlu1 %1985  ;;  %v10651_v31 = vpop.permute.xlu0 %1997 }
 0x33f   : > { %16314 = vst [vmem:[#allocation233_spill] sm:$0xff] %v10649_v23  ;;  %16315 = vst [vmem:[#allocation234_spill] sm:$0xff] %v10651_v31  ;;  %v2049_v55 = vmul.f32 %v16317_v37, %v10649_v23  ;;  %v2052_v25 = vmul.f32 %v16320_v41, %v10651_v31 }
 0x341   : > { %2134 = vrot.lane.b32.xlu1 %v2049_v55, %s8827_s16  ;;  %2136 = vrot.lane.b32.xlu0 %v2050_v29, %s8827_s16  ;;  %v16324_v55 = vld [vmem:[#allocation89_spill] sm:$0xff] }
 0x342   : > { %v10659_v32 = vpop.permute.xlu1 %1993  ;;  %v10661_v61 = vpop.permute.xlu0 %2005 }
 0x343   : > { %16318 = vst [vmem:[#allocation235_spill] sm:$0xff] %v10659_v32  ;;  %16319 = vst [vmem:[#allocation236_spill] sm:$0xff] %v10661_v61  ;;  %v2051_v59 = vmul.f32 %v16321_v56, %v10659_v32  ;;  %v2054_v29 = vmul.f32 %v16324_v55, %v10661_v61 }
 0x345   : > { %2138 = vrot.lane.b32.xlu1 %v2051_v59, %s8827_s16  ;;  %2140 = vrot.lane.b32.xlu0 %v2052_v25, %s8827_s16  ;;  %v16327_v59 = vld [vmem:[#allocation94_spill] sm:$0xff] }
 0x346   : > { %v10669_v48 = vpop.permute.xlu1 %2001  ;;  %v10671_v23 = vpop.permute.xlu0 %2013  ;;  %v16328_v25 = vld [vmem:[#allocation90_spill] sm:$0xff] }
 0x347   : > { %16322 = vst [vmem:[#allocation237_spill] sm:$0xff] %v10669_v48  ;;  %16323 = vst [vmem:[#allocation238_spill] sm:$0xff] %v10671_v23  ;;  %v2053_v37 = vmul.f32 %v16325_v49, %v10669_v48  ;;  %v2056_v32 = vmul.f32 %v16327_v59, %v10671_v23 }
 0x349   : > { %2142 = vrot.lane.b32.xlu1 %v2053_v37, %s8827_s16  ;;  %2144 = vrot.lane.b32.xlu0 %v2054_v29, %s8827_s16  ;;  %v16331_v37 = vld [vmem:[#allocation23_spill] sm:$0xff]  ;;  %v16332_v29 = vld [vmem:[#allocation22_spill] sm:$0xff] }
 0x34a   : > { %v10679_v31 = vpop.permute.xlu1 %2009  ;;  %v10685_v56 = vpop.permute.xlu0 %2021 }
 0x34b   : > { %16326 = vst [vmem:[#allocation239_spill] sm:$0xff] %v10679_v31  ;;  %v2055_v41 = vmul.f32 %v16328_v25, %v10679_v31  ;;  %16329 = vst [vmem:[#allocation240_spill] sm:$0xff] %v10685_v56  ;;  %v2058_v48 = vmul.f32 %v16331_v37, %v10685_v56  ;;  %v16334_v31 = vld [vmem:[#allocation21_spill] sm:$0xff] }
 0x34d   : > { %2146 = vrot.lane.b32.xlu1 %v2055_v41, %s8827_s16  ;;  %2148 = vrot.lane.b32.xlu0 %v2056_v32, %s8827_s16  ;;  %v16336_v41 = vld [vmem:[#allocation13_spill] sm:$0xff] }
 0x34e   : > { %v10689_v61 = vpop.permute.xlu1 %2017 }
 0x34f   : > { %16330 = vst [vmem:[#allocation241_spill] sm:$0xff] %v10689_v61  ;;  %v2057_v55 = vmul.f32 %v16332_v29, %v10689_v61 }
 0x351   : > { %2150 = vrot.lane.b32.xlu1 %v2057_v55, %s8827_s16  ;;  %2152 = vrot.lane.b32.xlu0 %v2058_v48, %s8827_s16 }
 0x352   : > { %v10697_v23 = vpop.permute.xlu1 %2025 }
 0x353   : > { %16333 = vst [vmem:[#allocation242_spill] sm:$0xff] %v10697_v23  ;;  %v2059_v59 = vmul.f32 %v16334_v31, %v10697_v23 }
 0x355   : > { %2154 = vrot.lane.b32.xlu1 %v2059_v59, %s8827_s16  ;;  %2222 = vperm.xlu0 %8645, %v10096_v9   ;;  %s8171_s16 = sshll.u32 %s372_s10, 2  ;;  %s8838_s10 = smov 48  }
 0x359   : > { %2226 = vperm.xlu1 %8646, %v10109_v50   ;;  %2234 = vperm.xlu0 %8645, %v10103_v15  }
 0x35d   : > { %2230 = vperm.xlu1 %8646, %v10121_v7   ;;  %2242 = vperm.xlu0 %8645, %v10115_v5  }
 0x361   : > { %2238 = vperm.xlu1 %8646, %v10133_v8   ;;  %2250 = vperm.xlu0 %8645, %v10127_v13  }
 0x365   : > { %2246 = vperm.xlu1 %8646, %v10145_v18   ;;  %2258 = vperm.xlu0 %8645, %v10139_v60  }
 0x369   : > { %2254 = vperm.xlu1 %8646, %v10157_v10   ;;  %2266 = vperm.xlu0 %8645, %v10151_v2  }
 0x36d   : > { %2262 = vperm.xlu1 %8646, %v10169_v46   ;;  %2274 = vperm.xlu0 %8645, %v10163_v63  }
 0x371   : > { %2270 = vperm.xlu1 %8646, %v10181_v19   ;;  %2282 = vperm.xlu0 %8645, %v10175_v33  }
 0x375   : > { %2278 = vperm.xlu1 %8646, %v10193_v1   ;;  %2290 = vperm.xlu0 %8645, %v10187_v27  }
 0x379   : > { %2286 = vperm.xlu1 %8646, %v10205_v6   ;;  %2298 = vperm.xlu0 %8645, %v10199_v11  }
 0x37d   : > { %2294 = vperm.xlu1 %8646, %v10217_v3   ;;  %2306 = vperm.xlu0 %8645, %v10211_v20  }
 0x381   : > { %2302 = vperm.xlu1 %8646, %v10229_v4   ;;  %2314 = vperm.xlu0 %8645, %v10223_v12  }
 0x385   : > { %2310 = vperm.xlu1 %8646, %v10241_v14   ;;  %2322 = vperm.xlu0 %8645, %v10235_v35  }
 0x387   : > { %v2093_v1 = vpop.permute.xlu0 %2092  ;;  %v2095_v10 = vpop.permute.xlu1 %2094 }
 0x388   : > { %2189 = vst.msk [vmem:[#allocation2] sm:$0xff] %vm2188_vm6, %v2093_v1  ;;  %2190 = vst.msk [vmem:[#allocation2 + $0x8] sm:$0xff] %vm2188_vm6, %v2095_v10  ;;  %v16339_v10 = vld [vmem:[#allocation17_spill] sm:$0xff] }
 0x389   : > { %2318 = vperm.xlu1 %8646, %v10255_v39   ;;  %2330 = vperm.xlu0 %8645, %v10249_v38   ;;  %v8828_v38 = vmov 6  }
 0x38b   : > { %v2097_v27 = vpop.permute.xlu0 %2096 }
 0x38c   : > { %2191 = vst.msk [vmem:[#allocation2 + $0x10] sm:$0xff] %vm2188_vm6, %v2097_v27 }
 0x38d   : > { %2326 = vperm.xlu1 %8646, %v10268_v0   ;;  %2338 = vperm.xlu0 %8645, %v10262_v16  }
 0x38f   : > { %v2099_v11 = vpop.permute.xlu1 %2098  ;;  %v2101_v20 = vpop.permute.xlu0 %2100 }
 0x390   : > { %2192 = vst.msk [vmem:[#allocation2 + $0x18] sm:$0xff] %vm2188_vm6, %v2099_v11  ;;  %2193 = vst.msk [vmem:[#allocation2 + $0x20] sm:$0xff] %vm2188_vm6, %v2101_v20 }
 0x391   : > { %2334 = vperm.xlu1 %8646, %v10282_v24   ;;  %2346 = vperm.xlu0 %8645, %v10276_v40  }
 0x393   : > { %v2103_v39 = vpop.permute.xlu1 %2102  ;;  %v2105_v35 = vpop.permute.xlu0 %2104 }
 0x394   : > { %2194 = vst.msk [vmem:[#allocation2 + $0x28] sm:$0xff] %vm2188_vm6, %v2103_v39  ;;  %2195 = vst.msk [vmem:[#allocation2 + $0x30] sm:$0xff] %vm2188_vm6, %v2105_v35  ;;  %v16342_v39 = vld [vmem:[#allocation16_spill] sm:$0xff] }
 0x395   : > { %2342 = vperm.xlu1 %8646, %v10290_v22   ;;  %8648 = vset.pattern.permute.xlu0 %v8828_v38 }
 0x397   : > { %v2107_v12 = vpop.permute.xlu1 %2106  ;;  %v2109_v14 = vpop.permute.xlu0 %2108 }
 0x398   : > { %2196 = vst.msk [vmem:[#allocation2 + $0x38] sm:$0xff] %vm2188_vm6, %v2107_v12  ;;  %2197 = vst.msk [vmem:[#allocation2 + $0x40] sm:$0xff] %vm2188_vm6, %v2109_v14 }
 0x399   : > { %8647 = vset.pattern.permute.xlu1 %v8828_v38  ;;  %v16343_v38 = vld [vmem:[#allocation10_spill] sm:$0xff] }
 0x39b   : > { %v2111_v24 = vpop.permute.xlu1 %2110  ;;  %v2113_v4 = vpop.permute.xlu0 %2112 }
 0x39c   : > { %2198 = vst.msk [vmem:[#allocation2 + $0x48] sm:$0xff] %vm2188_vm6, %v2111_v24  ;;  %2199 = vst.msk [vmem:[#allocation2 + $0x50] sm:$0xff] %vm2188_vm6, %v2113_v4  ;;  %v16346_v4 = vld [vmem:[#allocation136_spill] sm:$0xff] }
 0x39f   : > { %v2115_v3 = vpop.permute.xlu1 %2114  ;;  %v2117_v6 = vpop.permute.xlu0 %2116 }
 0x3a0   : > { %2200 = vst.msk [vmem:[#allocation2 + $0x58] sm:$0xff] %vm2188_vm6, %v2115_v3  ;;  %2201 = vst.msk [vmem:[#allocation2 + $0x60] sm:$0xff] %vm2188_vm6, %v2117_v6  ;;  %v16347_v6 = vld [vmem:[#allocation14_spill] sm:$0xff] }
 0x3a3   : > { %v2119_v46 = vpop.permute.xlu1 %2118  ;;  %v2121_v2 = vpop.permute.xlu0 %2120 }
 0x3a4   : > { %2202 = vst.msk [vmem:[#allocation2 + $0x68] sm:$0xff] %vm2188_vm6, %v2119_v46  ;;  %2203 = vst.msk [vmem:[#allocation2 + $0x70] sm:$0xff] %vm2188_vm6, %v2121_v2 }
 0x3a7   : > { %v2123_v63 = vpop.permute.xlu1 %2122  ;;  %v2125_v19 = vpop.permute.xlu0 %2124 }
 0x3a8   : > { %2204 = vst.msk [vmem:[#allocation2 + $0x78] sm:$0xff] %vm2188_vm6, %v2123_v63  ;;  %2205 = vst.msk [vmem:[#allocation2 + $0x80] sm:$0xff] %vm2188_vm6, %v2125_v19  ;;  %v16350_v19 = vld [vmem:[#allocation140_spill] sm:$0xff] }
 0x3ab   : > { %v2127_v33 = vpop.permute.xlu1 %2126  ;;  %v2129_v18 = vpop.permute.xlu0 %2128 }
 0x3ac   : > { %2206 = vst.msk [vmem:[#allocation2 + $0x88] sm:$0xff] %vm2188_vm6, %v2127_v33  ;;  %2207 = vst.msk [vmem:[#allocation2 + $0x90] sm:$0xff] %vm2188_vm6, %v2129_v18  ;;  %v16351_v18 = vld [vmem:[#allocation135_spill] sm:$0xff] }
 0x3af   : > { %v2131_v60 = vpop.permute.xlu1 %2130  ;;  %v2133_v9 = vpop.permute.xlu0 %2132 }
 0x3b0   : > { %2208 = vst.msk [vmem:[#allocation2 + $0x98] sm:$0xff] %vm2188_vm6, %v2131_v60  ;;  %2209 = vst.msk [vmem:[#allocation2 + $0xa0] sm:$0xff] %vm2188_vm6, %v2133_v9 }
 0x3b3   : > { %v2135_v15 = vpop.permute.xlu1 %2134  ;;  %v2137_v50 = vpop.permute.xlu0 %2136 }
 0x3b4   : > { %2210 = vst.msk [vmem:[#allocation2 + $0xa8] sm:$0xff] %vm2188_vm6, %v2135_v15  ;;  %2211 = vst.msk [vmem:[#allocation2 + $0xb0] sm:$0xff] %vm2188_vm6, %v2137_v50  ;;  %v16354_v50 = vld [vmem:[#allocation144_spill] sm:$0xff] }
 0x3b7   : > { %v2139_v5 = vpop.permute.xlu1 %2138  ;;  %v2141_v7 = vpop.permute.xlu0 %2140 }
 0x3b8   : > { %2212 = vst.msk [vmem:[#allocation2 + $0xb8] sm:$0xff] %vm2188_vm6, %v2139_v5  ;;  %2213 = vst.msk [vmem:[#allocation2 + $0xc0] sm:$0xff] %vm2188_vm6, %v2141_v7  ;;  %v16355_v7 = vld [vmem:[#allocation139_spill] sm:$0xff] }
 0x3bb   : > { %v2143_v13 = vpop.permute.xlu1 %2142  ;;  %v2145_v8 = vpop.permute.xlu0 %2144 }
 0x3bc   : > { %2214 = vst.msk [vmem:[#allocation2 + $0xc8] sm:$0xff] %vm2188_vm6, %v2143_v13  ;;  %2215 = vst.msk [vmem:[#allocation2 + $0xd0] sm:$0xff] %vm2188_vm6, %v2145_v8 }
 0x3bf   : > { %v2147_v16 = vpop.permute.xlu1 %2146  ;;  %v2149_v0 = vpop.permute.xlu0 %2148 }
 0x3c0   : > { %2216 = vst.msk [vmem:[#allocation2 + $0xd8] sm:$0xff] %vm2188_vm6, %v2147_v16  ;;  %2217 = vst.msk [vmem:[#allocation2 + $0xe0] sm:$0xff] %vm2188_vm6, %v2149_v0  ;;  %v16358_v0 = vld [vmem:[#allocation148_spill] sm:$0xff] }
 0x3c3   : > { %v2151_v40 = vpop.permute.xlu1 %2150  ;;  %v2153_v22 = vpop.permute.xlu0 %2152 }
 0x3c4   : > { %2218 = vst.msk [vmem:[#allocation2 + $0xe8] sm:$0xff] %vm2188_vm6, %v2151_v40  ;;  %2219 = vst.msk [vmem:[#allocation2 + $0xf0] sm:$0xff] %vm2188_vm6, %v2153_v22  ;;  %v16359_v22 = vld [vmem:[#allocation143_spill] sm:$0xff] }
 0x3c7   : > { %v2155_v32 = vpop.permute.xlu1 %2154 }
 0x3c8   : > { %2220 = vst.msk [vmem:[#allocation2 + $0xf8] sm:$0xff] %vm2188_vm6, %v2155_v32  ;;  %vm6078_vm6 = vcmask 654944  }
 0x3d0   : > { %v10766_v48 = vpop.permute.xlu0 %2222 }
 0x3d1   : > { %16335 = vst [vmem:[#allocation243_spill] sm:$0xff] %v10766_v48  ;;  %v2349_v55 = vmul.f32 %v10766_v48, %v16336_v41  ;;  %v10989_v41 = vld [vmem:[%s15055_s4 + $0x48] sm:$0xff] }
 0x3d3   : > { %2413 = vrot.lane.b32.xlu1 %v2349_v55, %s8829_s17 }
 0x3d4   : > { %v10771_v59 = vpop.permute.xlu1 %2226  ;;  %v10773_v1 = vpop.permute.xlu0 %2234 }
 0x3d5   : > { %16337 = vst [vmem:[#allocation244_spill] sm:$0xff] %v10771_v59  ;;  %16338 = vst [vmem:[#allocation245_spill] sm:$0xff] %v10773_v1  ;;  %v2350_v27 = vmul.f32 %v10771_v59, %v16339_v10  ;;  %v2352_v35 = vmul.f32 %v10773_v1, %v16342_v39  ;;  %v16387_v1 = vld [vmem:[#allocation171_spill] sm:$0xff]  ;;  %v10977_v10 = vld [vmem:[%s15055_s4 + $0x38] sm:$0xff] }
 0x3d6   : > { %v16391_v59 = vld [vmem:[#allocation175_spill] sm:$0xff] }
 0x3d7   : > { %2415 = vrot.lane.b32.xlu0 %v2350_v27, %s8829_s17 }
 0x3d8   : > { %v10778_v11 = vpop.permute.xlu1 %2230  ;;  %v10780_v20 = vpop.permute.xlu0 %2242 }
 0x3d9   : > { %16340 = vst [vmem:[#allocation246_spill] sm:$0xff] %v10778_v11  ;;  %16341 = vst [vmem:[#allocation247_spill] sm:$0xff] %v10780_v20  ;;  %v2351_v12 = vmul.f32 %v10778_v11, %v16343_v38  ;;  %v2354_v3 = vmul.f32 %v10780_v20, %v16346_v4  ;;  %v16383_v20 = vld [vmem:[#allocation167_spill] sm:$0xff] }
 0x3db   : > { %2417 = vrot.lane.b32.xlu1 %v2351_v12, %s8829_s17  ;;  %2419 = vrot.lane.b32.xlu0 %v2352_v35, %s8829_s17  ;;  %v16362_v35 = vld [vmem:[#allocation152_spill] sm:$0xff] }
 0x3dc   : > { %v10788_v14 = vpop.permute.xlu1 %2238  ;;  %v10790_v24 = vpop.permute.xlu0 %2250 }
 0x3dd   : > { %16344 = vst [vmem:[#allocation248_spill] sm:$0xff] %v10788_v14  ;;  %16345 = vst [vmem:[#allocation249_spill] sm:$0xff] %v10790_v24  ;;  %v2353_v46 = vmul.f32 %v10788_v14, %v16347_v6  ;;  %v2356_v33 = vmul.f32 %v10790_v24, %v16350_v19  ;;  %v16379_v24 = vld [vmem:[#allocation163_spill] sm:$0xff] }
 0x3df   : > { %2421 = vrot.lane.b32.xlu1 %v2353_v46, %s8829_s17  ;;  %2423 = vrot.lane.b32.xlu0 %v2354_v3, %s8829_s17  ;;  %v16363_v3 = vld [vmem:[#allocation147_spill] sm:$0xff] }
 0x3e0   : > { %v10798_v2 = vpop.permute.xlu1 %2246  ;;  %v10800_v63 = vpop.permute.xlu0 %2258 }
 0x3e1   : > { %16348 = vst [vmem:[#allocation250_spill] sm:$0xff] %v10798_v2  ;;  %16349 = vst [vmem:[#allocation251_spill] sm:$0xff] %v10800_v63  ;;  %v2355_v60 = vmul.f32 %v10798_v2, %v16351_v18  ;;  %v2358_v5 = vmul.f32 %v10800_v63, %v16354_v50  ;;  %v16375_v63 = vld [vmem:[#allocation159_spill] sm:$0xff]  ;;  %v11107_v50 = vld [vmem:[%s15055_s4 + $0xf0] sm:$0xff] }
 0x3e3   : > { %2425 = vrot.lane.b32.xlu1 %v2355_v60, %s8829_s17  ;;  %2427 = vrot.lane.b32.xlu0 %v2356_v33, %s8829_s17 }
 0x3e4   : > { %v10808_v9 = vpop.permute.xlu1 %2254  ;;  %v10810_v15 = vpop.permute.xlu0 %2266 }
 0x3e5   : > { %16352 = vst [vmem:[#allocation252_spill] sm:$0xff] %v10808_v9  ;;  %16353 = vst [vmem:[#allocation253_spill] sm:$0xff] %v10810_v15  ;;  %v2357_v13 = vmul.f32 %v10808_v9, %v16355_v7  ;;  %v2360_v40 = vmul.f32 %v10810_v15, %v16358_v0  ;;  %v16371_v15 = vld [vmem:[#allocation155_spill] sm:$0xff] }
 0x3e7   : > { %2429 = vrot.lane.b32.xlu1 %v2357_v13, %s8829_s17  ;;  %2431 = vrot.lane.b32.xlu0 %v2358_v5, %s8829_s17  ;;  %v16366_v5 = vld [vmem:[#allocation156_spill] sm:$0xff] }
 0x3e8   : > { %v10818_v8 = vpop.permute.xlu1 %2262  ;;  %v10820_v16 = vpop.permute.xlu0 %2274 }
 0x3e9   : > { %16356 = vst [vmem:[#allocation254_spill] sm:$0xff] %v10818_v8  ;;  %16357 = vst [vmem:[#allocation255_spill] sm:$0xff] %v10820_v16  ;;  %v2359_v32 = vmul.f32 %v10818_v8, %v16359_v22  ;;  %v2362_v12 = vmul.f32 %v10820_v16, %v16362_v35 }
 0x3eb   : > { %2433 = vrot.lane.b32.xlu1 %v2359_v32, %s8829_s17  ;;  %2435 = vrot.lane.b32.xlu0 %v2360_v40, %s8829_s17  ;;  %v16367_v40 = vld [vmem:[#allocation151_spill] sm:$0xff] }
 0x3ec   : > { %v10828_v55 = vpop.permute.xlu1 %2270  ;;  %v10830_v27 = vpop.permute.xlu0 %2282 }
 0x3ed   : > { %16360 = vst [vmem:[#allocation256_spill] sm:$0xff] %v10828_v55  ;;  %16361 = vst [vmem:[#allocation257_spill] sm:$0xff] %v10830_v27  ;;  %v2361_v46 = vmul.f32 %v10828_v55, %v16363_v3  ;;  %v2364_v13 = vmul.f32 %v10830_v27, %v16366_v5  ;;  %v11074_v5 = vld [vmem:[%s15055_s4 + $0xb8] sm:$0xff] }
 0x3ef   : > { %2437 = vrot.lane.b32.xlu1 %v2361_v46, %s8829_s17  ;;  %2439 = vrot.lane.b32.xlu0 %v2362_v12, %s8829_s17  ;;  %v16370_v46 = vld [vmem:[#allocation160_spill] sm:$0xff] }
 0x3f0   : > { %v10838_v33 = vpop.permute.xlu1 %2278  ;;  %v10840_v60 = vpop.permute.xlu0 %2290 }
 0x3f1   : > { %16364 = vst [vmem:[#allocation258_spill] sm:$0xff] %v10838_v33  ;;  %16365 = vst [vmem:[#allocation259_spill] sm:$0xff] %v10840_v60  ;;  %v2363_v32 = vmul.f32 %v10838_v33, %v16367_v40  ;;  %v2366_v12 = vmul.f32 %v10840_v60, %v16370_v46  ;;  %v11067_v46 = vld [vmem:[%s15055_s4 + $0xc0] sm:$0xff] }
 0x3f2   : > { %v11093_v40 = vld [vmem:[%s15055_s4 + $0xe0] sm:$0xff] }
 0x3f3   : > { %2441 = vrot.lane.b32.xlu1 %v2363_v32, %s8829_s17  ;;  %2443 = vrot.lane.b32.xlu0 %v2364_v13, %s8829_s17  ;;  %v16374_v32 = vld [vmem:[#allocation164_spill] sm:$0xff] }
 0x3f4   : > { %v10848_v16 = vpop.permute.xlu1 %2286  ;;  %v10850_v55 = vpop.permute.xlu0 %2298 }
 0x3f5   : > { %16368 = vst [vmem:[#allocation260_spill] sm:$0xff] %v10848_v16  ;;  %16369 = vst [vmem:[#allocation261_spill] sm:$0xff] %v10850_v55  ;;  %v2365_v8 = vmul.f32 %v10848_v16, %v16371_v15  ;;  %v2368_v13 = vmul.f32 %v10850_v55, %v16374_v32  ;;  %v11055_v32 = vld [vmem:[%s15055_s4 + $0xb0] sm:$0xff] }
 0x3f6   : > { %v11080_v15 = vld [vmem:[%s15055_s4 + $0xd0] sm:$0xff] }
 0x3f7   : > { %2445 = vrot.lane.b32.xlu1 %v2365_v8, %s8829_s17  ;;  %2447 = vrot.lane.b32.xlu0 %v2366_v12, %s8829_s17  ;;  %v16378_v8 = vld [vmem:[#allocation168_spill] sm:$0xff] }
 0x3f8   : > { %v10858_v27 = vpop.permute.xlu1 %2294  ;;  %v10860_v33 = vpop.permute.xlu0 %2306 }
 0x3f9   : > { %16372 = vst [vmem:[#allocation262_spill] sm:$0xff] %v10858_v27  ;;  %16373 = vst [vmem:[#allocation263_spill] sm:$0xff] %v10860_v33  ;;  %v2367_v9 = vmul.f32 %v10858_v27, %v16375_v63  ;;  %v2370_v12 = vmul.f32 %v10860_v33, %v16378_v8  ;;  %v11043_v8 = vld [vmem:[%s15055_s4 + $0xa0] sm:$0xff] }
 0x3fb   : > { %2449 = vrot.lane.b32.xlu1 %v2367_v9, %s8829_s17  ;;  %2451 = vrot.lane.b32.xlu0 %v2368_v13, %s8829_s17  ;;  %v16382_v9 = vld [vmem:[#allocation172_spill] sm:$0xff] }
 0x3fc   : > { %v10868_v60 = vpop.permute.xlu1 %2302  ;;  %v10870_v16 = vpop.permute.xlu0 %2314 }
 0x3fd   : > { %16376 = vst [vmem:[#allocation264_spill] sm:$0xff] %v10868_v60  ;;  %16377 = vst [vmem:[#allocation265_spill] sm:$0xff] %v10870_v16  ;;  %v2369_v2 = vmul.f32 %v10868_v60, %v16379_v24  ;;  %v2372_v13 = vmul.f32 %v10870_v16, %v16382_v9  ;;  %v11031_v9 = vld [vmem:[%s15055_s4 + $0x90] sm:$0xff]  ;;  %v11061_v24 = vld [vmem:[%s15055_s4 + $0xa8] sm:$0xff] }
 0x3ff   : > { %2453 = vrot.lane.b32.xlu1 %v2369_v2, %s8829_s17  ;;  %2455 = vrot.lane.b32.xlu0 %v2370_v12, %s8829_s17  ;;  %v16386_v2 = vld [vmem:[#allocation176_spill] sm:$0xff] }
 0x400   : > { %v10878_v55 = vpop.permute.xlu1 %2310  ;;  %v10880_v27 = vpop.permute.xlu0 %2322 }
 0x401   : > { %16380 = vst [vmem:[#allocation266_spill] sm:$0xff] %v10878_v55  ;;  %16381 = vst [vmem:[#allocation267_spill] sm:$0xff] %v10880_v27  ;;  %v2371_v14 = vmul.f32 %v10878_v55, %v16383_v20  ;;  %v2374_v12 = vmul.f32 %v10880_v27, %v16386_v2  ;;  %v11019_v2 = vld [vmem:[%s15055_s4 + $0x80] sm:$0xff]  ;;  %v11049_v20 = vld [vmem:[%s15055_s4 + $0x98] sm:$0xff] }
 0x403   : > { %2457 = vrot.lane.b32.xlu1 %v2371_v14, %s8829_s17  ;;  %2459 = vrot.lane.b32.xlu0 %v2372_v13, %s8829_s17  ;;  %v16390_v14 = vld [vmem:[#allocation180_spill] sm:$0xff] }
 0x404   : > { %v10888_v33 = vpop.permute.xlu1 %2318  ;;  %v10890_v60 = vpop.permute.xlu0 %2330 }
 0x405   : > { %16384 = vst [vmem:[#allocation268_spill] sm:$0xff] %v10888_v33  ;;  %16385 = vst [vmem:[#allocation269_spill] sm:$0xff] %v10890_v60  ;;  %v2373_v11 = vmul.f32 %v10888_v33, %v16387_v1  ;;  %v2376_v13 = vmul.f32 %v10890_v60, %v16390_v14  ;;  %v16393_v33 = vld [vmem:[#allocation182_spill] sm:$0xff]  ;;  %v11007_v14 = vld [vmem:[%s15055_s4 + $0x70] sm:$0xff] }
 0x406   : > { %v11037_v1 = vld [vmem:[%s15055_s4 + $0x88] sm:$0xff] }
 0x407   : > { %2461 = vrot.lane.b32.xlu1 %v2373_v11, %s8829_s17  ;;  %2463 = vrot.lane.b32.xlu0 %v2374_v12, %s8829_s17  ;;  %v16394_v12 = vld [vmem:[#allocation178_spill] sm:$0xff] }
 0x408   : > { %v10898_v16 = vpop.permute.xlu1 %2326  ;;  %v10900_v55 = vpop.permute.xlu0 %2338 }
 0x409   : > { %16388 = vst [vmem:[#allocation270_spill] sm:$0xff] %v10898_v16  ;;  %16389 = vst [vmem:[#allocation271_spill] sm:$0xff] %v10900_v55  ;;  %v2375_v48 = vmul.f32 %v10898_v16, %v16391_v59  ;;  %v2378_v11 = vmul.f32 %v10900_v55, %v16393_v33  ;;  %v16397_v16 = vld [vmem:[#allocation9_spill] sm:$0xff]  ;;  %v10929_v55 = vld [vmem:[%s15055_s4] sm:$0xff] }
 0x40a   : > { %v10995_v33 = vld [vmem:[%s15055_s4 + $0x60] sm:$0xff]  ;;  %v11025_v59 = vld [vmem:[%s15055_s4 + $0x78] sm:$0xff] }
 0x40b   : > { %2465 = vrot.lane.b32.xlu1 %v2375_v48, %s8829_s17  ;;  %2467 = vrot.lane.b32.xlu0 %v2376_v13, %s8829_s17  ;;  %v16398_v13 = vld [vmem:[#allocation6_spill] sm:$0xff] }
 0x40c   : > { %v10908_v27 = vpop.permute.xlu1 %2334  ;;  %v10914_v61 = vpop.permute.xlu0 %2346 }
 0x40d   : > { %16392 = vst [vmem:[#allocation272_spill] sm:$0xff] %v10908_v27  ;;  %v2377_v23 = vmul.f32 %v10908_v27, %v16394_v12  ;;  %16395 = vst [vmem:[#allocation273_spill] sm:$0xff] %v10914_v61  ;;  %v2380_v48 = vmul.f32 %v10914_v61, %v16397_v16  ;;  %v10959_v61 = vld [vmem:[%s15055_s4 + $0x30] sm:$0xff]  ;;  %v10971_v27 = vld [vmem:[%s15055_s4 + $0x40] sm:$0xff] }
 0x40e   : > { %v10983_v16 = vld [vmem:[%s15055_s4 + $0x50] sm:$0xff]  ;;  %v11013_v12 = vld [vmem:[%s15055_s4 + $0x68] sm:$0xff] }
 0x40f   : > { %2469 = vrot.lane.b32.xlu1 %v2377_v23, %s8829_s17  ;;  %2471 = vrot.lane.b32.xlu0 %v2378_v11, %s8829_s17  ;;  %v10935_v23 = vld [vmem:[%s15055_s4 + $0x8] sm:$0xff]  ;;  %v10947_v11 = vld [vmem:[%s15055_s4 + $0x20] sm:$0xff] }
 0x410   : > { %v10918_v60 = vpop.permute.xlu1 %2342 }
 0x411   : > { %16396 = vst [vmem:[#allocation274_spill] sm:$0xff] %v10918_v60  ;;  %v2379_v56 = vmul.f32 %v10918_v60, %v16398_v13  ;;  %v10965_v60 = vld [vmem:[%s15055_s4 + $0x28] sm:$0xff]  ;;  %v11001_v13 = vld [vmem:[%s15055_s4 + $0x58] sm:$0xff] }
 0x413   : > { %2473 = vrot.lane.b32.xlu1 %v2379_v56, %s8829_s17  ;;  %2475 = vrot.lane.b32.xlu0 %v2380_v48, %s8829_s17  ;;  %v10941_v56 = vld [vmem:[%s15055_s4 + $0x10] sm:$0xff]  ;;  %v10953_v48 = vld [vmem:[%s15055_s4 + $0x18] sm:$0xff]  ;;  %s8840_s17 = smov 56  }
 0x417   : > { %2543 = vperm.xlu1 %8647, %v10929_v55   ;;  %2547 = vperm.xlu0 %8648, %v10935_v23  }
 0x41b   : > { %2551 = vperm.xlu1 %8647, %v10941_v56   ;;  %2559 = vperm.xlu0 %8648, %v10947_v11  }
 0x41f   : > { %2555 = vperm.xlu1 %8647, %v10953_v48   ;;  %2567 = vperm.xlu0 %8648, %v10959_v61  }
 0x423   : > { %2563 = vperm.xlu1 %8647, %v10965_v60   ;;  %2575 = vperm.xlu0 %8648, %v10971_v27  }
 0x427   : > { %2571 = vperm.xlu1 %8647, %v10977_v10   ;;  %2583 = vperm.xlu0 %8648, %v10983_v16  }
 0x42b   : > { %2579 = vperm.xlu1 %8647, %v10989_v41   ;;  %2591 = vperm.xlu0 %8648, %v10995_v33  }
 0x42f   : > { %2587 = vperm.xlu1 %8647, %v11001_v13   ;;  %2599 = vperm.xlu0 %8648, %v11007_v14  }
 0x433   : > { %2595 = vperm.xlu1 %8647, %v11013_v12   ;;  %2607 = vperm.xlu0 %8648, %v11019_v2  }
 0x437   : > { %2603 = vperm.xlu1 %8647, %v11025_v59   ;;  %2615 = vperm.xlu0 %8648, %v11031_v9  }
 0x43b   : > { %2611 = vperm.xlu1 %8647, %v11037_v1   ;;  %2623 = vperm.xlu0 %8648, %v11043_v8  }
 0x43f   : > { %2619 = vperm.xlu1 %8647, %v11049_v20   ;;  %2631 = vperm.xlu0 %8648, %v11055_v32  }
 0x443   : > { %2627 = vperm.xlu1 %8647, %v11061_v24   ;;  %2639 = vperm.xlu0 %8648, %v11067_v46  }
 0x445   : > { %v2414_v63 = vpop.permute.xlu1 %2413 }
 0x446   : > { %2510 = vst.msk [vmem:[#allocation2] sm:$0xff] %vm2509_vm7, %v2414_v63  ;;  %v11087_v63 = vld [vmem:[%s15055_s4 + $0xc8] sm:$0xff] }
 0x447   : > { %2635 = vperm.xlu1 %8647, %v11074_v5   ;;  %2647 = vperm.xlu0 %8648, %v11080_v15  }
 0x449   : > { %v2416_v35 = vpop.permute.xlu0 %2415 }
 0x44a   : > { %2511 = vst.msk [vmem:[#allocation2 + $0x8] sm:$0xff] %vm2509_vm7, %v2416_v35  ;;  %v11101_v35 = vld [vmem:[%s15055_s4 + $0xd8] sm:$0xff] }
 0x44b   : > { %2643 = vperm.xlu1 %8647, %v11087_v63   ;;  %2655 = vperm.xlu0 %8648, %v11093_v40  }
 0x44d   : > { %v2418_v0 = vpop.permute.xlu1 %2417  ;;  %v2420_v3 = vpop.permute.xlu0 %2419 }
 0x44e   : > { %2512 = vst.msk [vmem:[#allocation2 + $0x10] sm:$0xff] %vm2509_vm7, %v2418_v0  ;;  %2513 = vst.msk [vmem:[#allocation2 + $0x18] sm:$0xff] %vm2509_vm7, %v2420_v3  ;;  %v11115_v0 = vld [vmem:[%s15055_s4 + $0xe8] sm:$0xff]  ;;  %v8830_v3 = vmov 7  }
 0x44f   : > { %2651 = vperm.xlu1 %8647, %v11101_v35   ;;  %2663 = vperm.xlu0 %8648, %v11107_v50  }
 0x451   : > { %v2422_v22 = vpop.permute.xlu1 %2421  ;;  %v2424_v19 = vpop.permute.xlu0 %2423 }
 0x452   : > { %2514 = vst.msk [vmem:[#allocation2 + $0x20] sm:$0xff] %vm2509_vm7, %v2422_v22  ;;  %2515 = vst.msk [vmem:[#allocation2 + $0x28] sm:$0xff] %vm2509_vm7, %v2424_v19  ;;  %v11123_v22 = vld [vmem:[%s15055_s4 + $0xf8] sm:$0xff] }
 0x453   : > { %2659 = vperm.xlu1 %8647, %v11115_v0   ;;  %8649 = vset.pattern.permute.xlu0 %v8830_v3 }
 0x455   : > { %v2426_v7 = vpop.permute.xlu1 %2425  ;;  %v2428_v4 = vpop.permute.xlu0 %2427 }
 0x456   : > { %2516 = vst.msk [vmem:[#allocation2 + $0x30] sm:$0xff] %vm2509_vm7, %v2426_v7  ;;  %2517 = vst.msk [vmem:[#allocation2 + $0x38] sm:$0xff] %vm2509_vm7, %v2428_v4 }
 0x457   : > { %2667 = vperm.xlu1 %8647, %v11123_v22  }
 0x459   : > { %v2430_v19 = vpop.permute.xlu1 %2429  ;;  %v2432_v18 = vpop.permute.xlu0 %2431 }
 0x45a   : > { %2518 = vst.msk [vmem:[#allocation2 + $0x40] sm:$0xff] %vm2509_vm7, %v2430_v19  ;;  %2519 = vst.msk [vmem:[#allocation2 + $0x48] sm:$0xff] %vm2509_vm7, %v2432_v18 }
 0x45b   : > { %8650 = vset.pattern.permute.xlu1 %v8830_v3 }
 0x45d   : > { %v2434_v6 = vpop.permute.xlu1 %2433  ;;  %v2436_v39 = vpop.permute.xlu0 %2435 }
 0x45e   : > { %2520 = vst.msk [vmem:[#allocation2 + $0x50] sm:$0xff] %vm2509_vm7, %v2434_v6  ;;  %2521 = vst.msk [vmem:[#allocation2 + $0x58] sm:$0xff] %vm2509_vm7, %v2436_v39 }
 0x461   : > { %v2438_v4 = vpop.permute.xlu1 %2437  ;;  %v2440_v7 = vpop.permute.xlu0 %2439 }
 0x462   : > { %2522 = vst.msk [vmem:[#allocation2 + $0x60] sm:$0xff] %vm2509_vm7, %v2438_v4  ;;  %2523 = vst.msk [vmem:[#allocation2 + $0x68] sm:$0xff] %vm2509_vm7, %v2440_v7 }
 0x465   : > { %v2442_v38 = vpop.permute.xlu1 %2441  ;;  %v2444_v37 = vpop.permute.xlu0 %2443 }
 0x466   : > { %2524 = vst.msk [vmem:[#allocation2 + $0x70] sm:$0xff] %vm2509_vm7, %v2442_v38  ;;  %2525 = vst.msk [vmem:[#allocation2 + $0x78] sm:$0xff] %vm2509_vm7, %v2444_v37 }
 0x469   : > { %v2446_v18 = vpop.permute.xlu1 %2445  ;;  %v2448_v3 = vpop.permute.xlu0 %2447 }
 0x46a   : > { %2526 = vst.msk [vmem:[#allocation2 + $0x80] sm:$0xff] %vm2509_vm7, %v2446_v18  ;;  %2527 = vst.msk [vmem:[#allocation2 + $0x88] sm:$0xff] %vm2509_vm7, %v2448_v3 }
 0x46d   : > { %v2450_v6 = vpop.permute.xlu1 %2449  ;;  %v2452_v39 = vpop.permute.xlu0 %2451 }
 0x46e   : > { %2528 = vst.msk [vmem:[#allocation2 + $0x90] sm:$0xff] %vm2509_vm7, %v2450_v6  ;;  %2529 = vst.msk [vmem:[#allocation2 + $0x98] sm:$0xff] %vm2509_vm7, %v2452_v39 }
 0x471   : > { %v2454_v19 = vpop.permute.xlu1 %2453  ;;  %v2456_v4 = vpop.permute.xlu0 %2455 }
 0x472   : > { %2530 = vst.msk [vmem:[#allocation2 + $0xa0] sm:$0xff] %vm2509_vm7, %v2454_v19  ;;  %2531 = vst.msk [vmem:[#allocation2 + $0xa8] sm:$0xff] %vm2509_vm7, %v2456_v4 }
 0x475   : > { %v2458_v38 = vpop.permute.xlu1 %2457  ;;  %v2460_v37 = vpop.permute.xlu0 %2459 }
 0x476   : > { %2532 = vst.msk [vmem:[#allocation2 + $0xb0] sm:$0xff] %vm2509_vm7, %v2458_v38  ;;  %2533 = vst.msk [vmem:[#allocation2 + $0xb8] sm:$0xff] %vm2509_vm7, %v2460_v37 }
 0x479   : > { %v2462_v7 = vpop.permute.xlu1 %2461  ;;  %v2464_v18 = vpop.permute.xlu0 %2463 }
 0x47a   : > { %2534 = vst.msk [vmem:[#allocation2 + $0xc0] sm:$0xff] %vm2509_vm7, %v2462_v7  ;;  %2535 = vst.msk [vmem:[#allocation2 + $0xc8] sm:$0xff] %vm2509_vm7, %v2464_v18  ;;  %v16401_v18 = vld [vmem:[#allocation34_spill] sm:$0xff] }
 0x47d   : > { %v2466_v3 = vpop.permute.xlu1 %2465  ;;  %v2468_v6 = vpop.permute.xlu0 %2467 }
 0x47e   : > { %2536 = vst.msk [vmem:[#allocation2 + $0xd0] sm:$0xff] %vm2509_vm7, %v2466_v3  ;;  %2537 = vst.msk [vmem:[#allocation2 + $0xd8] sm:$0xff] %vm2509_vm7, %v2468_v6  ;;  %v16402_v6 = vld [vmem:[#allocation33_spill] sm:$0xff] }
 0x481   : > { %v2470_v39 = vpop.permute.xlu1 %2469  ;;  %v2472_v19 = vpop.permute.xlu0 %2471 }
 0x482   : > { %2538 = vst.msk [vmem:[#allocation2 + $0xe0] sm:$0xff] %vm2509_vm7, %v2470_v39  ;;  %2539 = vst.msk [vmem:[#allocation2 + $0xe8] sm:$0xff] %vm2509_vm7, %v2472_v19 }
 0x485   : > { %v2474_v4 = vpop.permute.xlu1 %2473  ;;  %v2476_v38 = vpop.permute.xlu0 %2475 }
 0x486   : > { %2540 = vst.msk [vmem:[#allocation2 + $0xf0] sm:$0xff] %vm2509_vm7, %v2474_v4  ;;  %2541 = vst.msk [vmem:[#allocation2 + $0xf8] sm:$0xff] %vm2509_vm7, %v2476_v38  ;;  %v16405_v4 = vld [vmem:[#allocation38_spill] sm:$0xff]  ;;  %vm6561_vm7 = vcmask 720544  }
 0x492   : > { %v11150_v37 = vpop.permute.xlu1 %2543  ;;  %v11152_v7 = vpop.permute.xlu0 %2547 }
 0x493   : > { %16399 = vst [vmem:[#allocation275_spill] sm:$0xff] %v11150_v37  ;;  %16400 = vst [vmem:[#allocation276_spill] sm:$0xff] %v11152_v7  ;;  %v2670_v3 = vmul.f32 %v11150_v37, %v16401_v18  ;;  %v2671_v31 = vmul.f32 %v11152_v7, %v16402_v6  ;;  %v16408_v37 = vld [vmem:[#allocation42_spill] sm:$0xff]  ;;  %v16409_v7 = vld [vmem:[#allocation37_spill] sm:$0xff] }
 0x495   : > { %2734 = vrot.lane.b32.xlu0 %v2670_v3, %s8831_s18  ;;  %2736 = vrot.lane.b32.xlu1 %v2671_v31, %s8831_s18 }
 0x496   : > { %v11160_v39 = vpop.permute.xlu1 %2551  ;;  %v11162_v19 = vpop.permute.xlu0 %2559 }
 0x497   : > { %16403 = vst [vmem:[#allocation34_spill] sm:$0xff] %v11160_v39  ;;  %16404 = vst [vmem:[#allocation33_spill] sm:$0xff] %v11162_v19  ;;  %v2672_v38 = vmul.f32 %v11160_v39, %v16405_v4  ;;  %v2674_v6 = vmul.f32 %v11162_v19, %v16408_v37  ;;  %v16412_v4 = vld [vmem:[#allocation47_spill] sm:$0xff]  ;;  %v16413_v39 = vld [vmem:[#allocation41_spill] sm:$0xff] }
 0x499   : > { %2738 = vrot.lane.b32.xlu0 %v2672_v38, %s8831_s18 }
 0x49a   : > { %v11167_v29 = vpop.permute.xlu1 %2555  ;;  %v11169_v18 = vpop.permute.xlu0 %2567 }
 0x49b   : > { %16406 = vst [vmem:[#allocation38_spill] sm:$0xff] %v11167_v29  ;;  %16407 = vst [vmem:[#allocation277_spill] sm:$0xff] %v11169_v18  ;;  %v2673_v3 = vmul.f32 %v11167_v29, %v16409_v7  ;;  %v2676_v38 = vmul.f32 %v11169_v18, %v16412_v4  ;;  %v16417_v29 = vld [vmem:[#allocation46_spill] sm:$0xff] }
 0x49d   : > { %2740 = vrot.lane.b32.xlu1 %v2673_v3, %s8831_s18  ;;  %2742 = vrot.lane.b32.xlu0 %v2674_v6, %s8831_s18  ;;  %v16416_v3 = vld [vmem:[#allocation51_spill] sm:$0xff] }
 0x49e   : > { %v11177_v31 = vpop.permute.xlu1 %2563  ;;  %v11179_v25 = vpop.permute.xlu0 %2575 }
 0x49f   : > { %16410 = vst [vmem:[#allocation42_spill] sm:$0xff] %v11177_v31  ;;  %16411 = vst [vmem:[#allocation37_spill] sm:$0xff] %v11179_v25  ;;  %v2675_v49 = vmul.f32 %v11177_v31, %v16413_v39  ;;  %v2678_v6 = vmul.f32 %v11179_v25, %v16416_v3  ;;  %v16421_v31 = vld [vmem:[#allocation52_spill] sm:$0xff] }
 0x4a1   : > { %2744 = vrot.lane.b32.xlu1 %v2675_v49, %s8831_s18  ;;  %2746 = vrot.lane.b32.xlu0 %v2676_v38, %s8831_s18  ;;  %v16420_v49 = vld [vmem:[#allocation57_spill] sm:$0xff] }
 0x4a2   : > { %v11187_v37 = vpop.permute.xlu1 %2571  ;;  %v11189_v7 = vpop.permute.xlu0 %2583 }
 0x4a3   : > { %16414 = vst [vmem:[#allocation47_spill] sm:$0xff] %v11187_v37  ;;  %16415 = vst [vmem:[#allocation41_spill] sm:$0xff] %v11189_v7  ;;  %v2677_v19 = vmul.f32 %v11187_v37, %v16417_v29  ;;  %v2680_v38 = vmul.f32 %v11189_v7, %v16420_v49  ;;  %v16425_v37 = vld [vmem:[#allocation59_spill] sm:$0xff] }
 0x4a5   : > { %2748 = vrot.lane.b32.xlu1 %v2677_v19, %s8831_s18  ;;  %2750 = vrot.lane.b32.xlu0 %v2678_v6, %s8831_s18  ;;  %v16424_v19 = vld [vmem:[#allocation65_spill] sm:$0xff] }
 0x4a6   : > { %v11197_v4 = vpop.permute.xlu1 %2579  ;;  %v11199_v39 = vpop.permute.xlu0 %2591 }
 0x4a7   : > { %16418 = vst [vmem:[#allocation51_spill] sm:$0xff] %v11197_v4  ;;  %16419 = vst [vmem:[#allocation46_spill] sm:$0xff] %v11199_v39  ;;  %v2679_v18 = vmul.f32 %v11197_v4, %v16421_v31  ;;  %v2682_v6 = vmul.f32 %v11199_v39, %v16424_v19  ;;  %v16429_v4 = vld [vmem:[#allocation64_spill] sm:$0xff] }
 0x4a9   : > { %2752 = vrot.lane.b32.xlu1 %v2679_v18, %s8831_s18  ;;  %2754 = vrot.lane.b32.xlu0 %v2680_v38, %s8831_s18  ;;  %v16428_v18 = vld [vmem:[#allocation69_spill] sm:$0xff] }
 0x4aa   : > { %v11207_v3 = vpop.permute.xlu1 %2587  ;;  %v11209_v29 = vpop.permute.xlu0 %2599 }
 0x4ab   : > { %16422 = vst [vmem:[#allocation57_spill] sm:$0xff] %v11207_v3  ;;  %16423 = vst [vmem:[#allocation52_spill] sm:$0xff] %v11209_v29  ;;  %v2681_v25 = vmul.f32 %v11207_v3, %v16425_v37  ;;  %v2684_v38 = vmul.f32 %v11209_v29, %v16428_v18  ;;  %v16433_v3 = vld [vmem:[#allocation70_spill] sm:$0xff] }
 0x4ad   : > { %2756 = vrot.lane.b32.xlu1 %v2681_v25, %s8831_s18  ;;  %2758 = vrot.lane.b32.xlu0 %v2682_v6, %s8831_s18  ;;  %v16432_v25 = vld [vmem:[#allocation75_spill] sm:$0xff] }
 0x4ae   : > { %v11217_v49 = vpop.permute.xlu1 %2595  ;;  %v11219_v31 = vpop.permute.xlu0 %2607 }
 0x4af   : > { %16426 = vst [vmem:[#allocation65_spill] sm:$0xff] %v11217_v49  ;;  %16427 = vst [vmem:[#allocation59_spill] sm:$0xff] %v11219_v31  ;;  %v2683_v7 = vmul.f32 %v11217_v49, %v16429_v4  ;;  %v2686_v6 = vmul.f32 %v11219_v31, %v16432_v25 }
 0x4b1   : > { %2760 = vrot.lane.b32.xlu1 %v2683_v7, %s8831_s18  ;;  %2762 = vrot.lane.b32.xlu0 %v2684_v38, %s8831_s18  ;;  %v16436_v38 = vld [vmem:[#allocation77_spill] sm:$0xff] }
 0x4b2   : > { %v11227_v19 = vpop.permute.xlu1 %2603  ;;  %v11229_v37 = vpop.permute.xlu0 %2615 }
 0x4b3   : > { %16430 = vst [vmem:[#allocation69_spill] sm:$0xff] %v11227_v19  ;;  %16431 = vst [vmem:[#allocation64_spill] sm:$0xff] %v11229_v37  ;;  %v2685_v39 = vmul.f32 %v11227_v19, %v16433_v3  ;;  %v2688_v7 = vmul.f32 %v11229_v37, %v16270_v21 }
 0x4b5   : > { %2764 = vrot.lane.b32.xlu1 %v2685_v39, %s8831_s18  ;;  %2766 = vrot.lane.b32.xlu0 %v2686_v6, %s8831_s18  ;;  %v16439_v6 = vld [vmem:[#allocation82_spill] sm:$0xff] }
 0x4b6   : > { %v11237_v18 = vpop.permute.xlu1 %2611  ;;  %v11239_v4 = vpop.permute.xlu0 %2623 }
 0x4b7   : > { %16434 = vst [vmem:[#allocation75_spill] sm:$0xff] %v11237_v18  ;;  %16435 = vst [vmem:[#allocation70_spill] sm:$0xff] %v11239_v4  ;;  %v2687_v49 = vmul.f32 %v11237_v18, %v16436_v38  ;;  %v2690_v39 = vmul.f32 %v11239_v4, %v16274_v28  ;;  %v16608_v18 = vld [vmem:[#allocation80_spill] sm:$0xff] }
 0x4b9   : > { %2768 = vrot.lane.b32.xlu1 %v2687_v49, %s8831_s18  ;;  %2770 = vrot.lane.b32.xlu0 %v2688_v7, %s8831_s18 }
 0x4ba   : > { %v11247_v25 = vpop.permute.xlu1 %2619  ;;  %v11249_v3 = vpop.permute.xlu0 %2631 }
 0x4bb   : > { %16437 = vst [vmem:[#allocation77_spill] sm:$0xff] %v11247_v25  ;;  %16438 = vst [vmem:[#allocation278_spill] sm:$0xff] %v11249_v3  ;;  %v2689_v19 = vmul.f32 %v11247_v25, %v16439_v6  ;;  %v2692_v49 = vmul.f32 %v11249_v3, %v16277_v30 }
 0x4bd   : > { %2772 = vrot.lane.b32.xlu1 %v2689_v19, %s8831_s18  ;;  %2774 = vrot.lane.b32.xlu0 %v2690_v39, %s8831_s18 }
 0x4be   : > { %v11257_v21 = vpop.permute.xlu1 %2627  ;;  %v11259_v38 = vpop.permute.xlu0 %2639 }
 0x4bf   : > { %16440 = vst [vmem:[#allocation82_spill] sm:$0xff] %v11257_v21  ;;  %16441 = vst [vmem:[#allocation279_spill] sm:$0xff] %v11259_v38  ;;  %v2691_v7 = vmul.f32 %v11257_v21, %v16273_v26  ;;  %v2694_v19 = vmul.f32 %v11259_v38, %v9545_v36 }
 0x4c1   : > { %2776 = vrot.lane.b32.xlu1 %v2691_v7, %s8831_s18  ;;  %2778 = vrot.lane.b32.xlu0 %v2692_v49, %s8831_s18  ;;  %v16446_v7 = vld [vmem:[#allocation97_spill] sm:$0xff] }
 0x4c2   : > { %v11267_v28 = vpop.permute.xlu1 %2635  ;;  %v11269_v6 = vpop.permute.xlu0 %2647 }
 0x4c3   : > { %16442 = vst [vmem:[#allocation280_spill] sm:$0xff] %v11267_v28  ;;  %16443 = vst [vmem:[#allocation281_spill] sm:$0xff] %v11269_v6  ;;  %v2693_v39 = vmul.f32 %v11267_v28, %v9524_v17  ;;  %v2696_v49 = vmul.f32 %v11269_v6, %v9564_v57 }
 0x4c5   : > { %2780 = vrot.lane.b32.xlu1 %v2693_v39, %s8831_s18  ;;  %2782 = vrot.lane.b32.xlu0 %v2694_v19, %s8831_s18 }
 0x4c6   : > { %v11277_v30 = vpop.permute.xlu1 %2643  ;;  %v11279_v26 = vpop.permute.xlu0 %2655 }
 0x4c7   : > { %16444 = vst [vmem:[#allocation282_spill] sm:$0xff] %v11277_v30  ;;  %16445 = vst [vmem:[#allocation283_spill] sm:$0xff] %v11279_v26  ;;  %v2695_v21 = vmul.f32 %v11277_v30, %v16446_v7  ;;  %v2698_v17 = vmul.f32 %v11279_v26, %v16284_v52  ;;  %v16450_v7 = vld [vmem:[#allocation25_spill] sm:$0xff] }
 0x4c9   : > { %2784 = vrot.lane.b32.xlu1 %v2695_v21, %s8831_s18  ;;  %2786 = vrot.lane.b32.xlu0 %v2696_v49, %s8831_s18  ;;  %v16451_v49 = vld [vmem:[#allocation30_spill] sm:$0xff] }
 0x4ca   : > { %v11287_v36 = vpop.permute.xlu1 %2651  ;;  %v11293_v39 = vpop.permute.xlu0 %2663 }
 0x4cb   : > { %16447 = vst [vmem:[#allocation97_spill] sm:$0xff] %v11287_v36  ;;  %v2697_v19 = vmul.f32 %v11287_v36, %v9561_v53  ;;  %16448 = vst [vmem:[#allocation284_spill] sm:$0xff] %v11293_v39  ;;  %v2700_v21 = vmul.f32 %v11293_v39, %v16450_v7  ;;  %v16453_v53 = vld [vmem:[#allocation29_spill] sm:$0xff] }
 0x4cd   : > { %2788 = vrot.lane.b32.xlu1 %v2697_v19, %s8831_s18  ;;  %2790 = vrot.lane.b32.xlu0 %v2698_v17, %s8831_s18 }
 0x4ce   : > { %v11297_v57 = vpop.permute.xlu1 %2659 }
 0x4cf   : > { %16449 = vst [vmem:[#allocation285_spill] sm:$0xff] %v11297_v57  ;;  %v2699_v30 = vmul.f32 %v11297_v57, %v16451_v49 }
 0x4d1   : > { %2792 = vrot.lane.b32.xlu1 %v2699_v30, %s8831_s18  ;;  %2794 = vrot.lane.b32.xlu0 %v2700_v21, %s8831_s18 }
 0x4d2   : > { %v11305_v52 = vpop.permute.xlu1 %2667 }
 0x4d3   : > { %16452 = vst [vmem:[#allocation25_spill] sm:$0xff] %v11305_v52  ;;  %v2701_v36 = vmul.f32 %v11305_v52, %v16453_v53  ;;  %v8832_v53 = vmov 8  }
 0x4d5   : > { %2796 = vrot.lane.b32.xlu1 %v2701_v36, %s8831_s18  ;;  %2864 = vperm.xlu0 %8649, %v10929_v55   ;;  %s8841_s18 = smov 60  }
 0x4d9   : > { %2868 = vperm.xlu1 %8650, %v10935_v23   ;;  %2876 = vperm.xlu0 %8649, %v10953_v48  }
 0x4dd   : > { %2872 = vperm.xlu1 %8650, %v10941_v56   ;;  %2884 = vperm.xlu0 %8649, %v10965_v60  }
 0x4e1   : > { %2880 = vperm.xlu1 %8650, %v10947_v11   ;;  %2892 = vperm.xlu0 %8649, %v10977_v10  }
 0x4e5   : > { %2888 = vperm.xlu1 %8650, %v10959_v61   ;;  %2900 = vperm.xlu0 %8649, %v10989_v41  }
 0x4e9   : > { %2896 = vperm.xlu1 %8650, %v10971_v27   ;;  %2908 = vperm.xlu0 %8649, %v11001_v13  }
 0x4ed   : > { %2904 = vperm.xlu1 %8650, %v10983_v16   ;;  %2916 = vperm.xlu0 %8649, %v11013_v12  }
 0x4f1   : > { %2912 = vperm.xlu1 %8650, %v10995_v33   ;;  %2924 = vperm.xlu0 %8649, %v11025_v59  }
 0x4f5   : > { %2920 = vperm.xlu1 %8650, %v11007_v14   ;;  %2932 = vperm.xlu0 %8649, %v11037_v1  }
 0x4f9   : > { %2928 = vperm.xlu1 %8650, %v11019_v2   ;;  %2940 = vperm.xlu0 %8649, %v11049_v20  }
 0x4fd   : > { %2936 = vperm.xlu1 %8650, %v11031_v9   ;;  %2948 = vperm.xlu0 %8649, %v11061_v24  }
 0x501   : > { %2944 = vperm.xlu1 %8650, %v11043_v8   ;;  %2956 = vperm.xlu0 %8649, %v11074_v5  }
 0x505   : > { %2952 = vperm.xlu1 %8650, %v11055_v32   ;;  %2964 = vperm.xlu0 %8649, %v11087_v63  }
 0x507   : > { %v2735_v30 = vpop.permute.xlu0 %2734  ;;  %v2737_v36 = vpop.permute.xlu1 %2736 }
 0x508   : > { %2831 = vst.msk [vmem:[#allocation2] sm:$0xff] %vm2830_vm8, %v2735_v30  ;;  %2832 = vst.msk [vmem:[#allocation2 + $0x8] sm:$0xff] %vm2830_vm8, %v2737_v36 }
 0x509   : > { %2960 = vperm.xlu1 %8650, %v11067_v46   ;;  %2972 = vperm.xlu0 %8649, %v11101_v35  }
 0x50b   : > { %v2739_v17 = vpop.permute.xlu0 %2738 }
 0x50c   : > { %2833 = vst.msk [vmem:[#allocation2 + $0x10] sm:$0xff] %vm2830_vm8, %v2739_v17 }
 0x50d   : > { %2968 = vperm.xlu1 %8650, %v11080_v15   ;;  %2980 = vperm.xlu0 %8649, %v11115_v0  }
 0x50f   : > { %v2741_v19 = vpop.permute.xlu1 %2740  ;;  %v2743_v7 = vpop.permute.xlu0 %2742 }
 0x510   : > { %2834 = vst.msk [vmem:[#allocation2 + $0x18] sm:$0xff] %vm2830_vm8, %v2741_v19  ;;  %2835 = vst.msk [vmem:[#allocation2 + $0x20] sm:$0xff] %vm2830_vm8, %v2743_v7 }
 0x511   : > { %2976 = vperm.xlu1 %8650, %v11093_v40   ;;  %2988 = vperm.xlu0 %8649, %v11123_v22  }
 0x513   : > { %v2745_v21 = vpop.permute.xlu1 %2744  ;;  %v2747_v49 = vpop.permute.xlu0 %2746 }
 0x514   : > { %2836 = vst.msk [vmem:[#allocation2 + $0x28] sm:$0xff] %vm2830_vm8, %v2745_v21  ;;  %2837 = vst.msk [vmem:[#allocation2 + $0x30] sm:$0xff] %vm2830_vm8, %v2747_v49 }
 0x515   : > { %2984 = vperm.xlu1 %8650, %v11107_v50   ;;  %8652 = vset.pattern.permute.xlu0 %v8832_v53 }
 0x517   : > { %v2749_v30 = vpop.permute.xlu1 %2748  ;;  %v2751_v36 = vpop.permute.xlu0 %2750 }
 0x518   : > { %2838 = vst.msk [vmem:[#allocation2 + $0x38] sm:$0xff] %vm2830_vm8, %v2749_v30  ;;  %2839 = vst.msk [vmem:[#allocation2 + $0x40] sm:$0xff] %vm2830_vm8, %v2751_v36 }
 0x519   : > { %8651 = vset.pattern.permute.xlu1 %v8832_v53 }
 0x51b   : > { %v2753_v17 = vpop.permute.xlu1 %2752  ;;  %v2755_v19 = vpop.permute.xlu0 %2754 }
 0x51c   : > { %2840 = vst.msk [vmem:[#allocation2 + $0x48] sm:$0xff] %vm2830_vm8, %v2753_v17  ;;  %2841 = vst.msk [vmem:[#allocation2 + $0x50] sm:$0xff] %vm2830_vm8, %v2755_v19 }
 0x51f   : > { %v2757_v7 = vpop.permute.xlu1 %2756  ;;  %v2759_v21 = vpop.permute.xlu0 %2758 }
 0x520   : > { %2842 = vst.msk [vmem:[#allocation2 + $0x58] sm:$0xff] %vm2830_vm8, %v2757_v7  ;;  %2843 = vst.msk [vmem:[#allocation2 + $0x60] sm:$0xff] %vm2830_vm8, %v2759_v21 }
 0x523   : > { %v2761_v49 = vpop.permute.xlu1 %2760  ;;  %v2763_v52 = vpop.permute.xlu0 %2762 }
 0x524   : > { %2844 = vst.msk [vmem:[#allocation2 + $0x68] sm:$0xff] %vm2830_vm8, %v2761_v49  ;;  %2845 = vst.msk [vmem:[#allocation2 + $0x70] sm:$0xff] %vm2830_vm8, %v2763_v52 }
 0x527   : > { %v2765_v30 = vpop.permute.xlu1 %2764  ;;  %v2767_v53 = vpop.permute.xlu0 %2766 }
 0x528   : > { %2846 = vst.msk [vmem:[#allocation2 + $0x78] sm:$0xff] %vm2830_vm8, %v2765_v30  ;;  %2847 = vst.msk [vmem:[#allocation2 + $0x80] sm:$0xff] %vm2830_vm8, %v2767_v53 }
 0x52b   : > { %v2769_v36 = vpop.permute.xlu1 %2768  ;;  %v2771_v17 = vpop.permute.xlu0 %2770 }
 0x52c   : > { %2848 = vst.msk [vmem:[#allocation2 + $0x88] sm:$0xff] %vm2830_vm8, %v2769_v36  ;;  %2849 = vst.msk [vmem:[#allocation2 + $0x90] sm:$0xff] %vm2830_vm8, %v2771_v17 }
 0x52f   : > { %v2773_v19 = vpop.permute.xlu1 %2772  ;;  %v2775_v7 = vpop.permute.xlu0 %2774 }
 0x530   : > { %2850 = vst.msk [vmem:[#allocation2 + $0x98] sm:$0xff] %vm2830_vm8, %v2773_v19  ;;  %2851 = vst.msk [vmem:[#allocation2 + $0xa0] sm:$0xff] %vm2830_vm8, %v2775_v7 }
 0x533   : > { %v2777_v21 = vpop.permute.xlu1 %2776  ;;  %v2779_v52 = vpop.permute.xlu0 %2778 }
 0x534   : > { %2852 = vst.msk [vmem:[#allocation2 + $0xa8] sm:$0xff] %vm2830_vm8, %v2777_v21  ;;  %2853 = vst.msk [vmem:[#allocation2 + $0xb0] sm:$0xff] %vm2830_vm8, %v2779_v52 }
 0x537   : > { %v2781_v49 = vpop.permute.xlu1 %2780  ;;  %v2783_v30 = vpop.permute.xlu0 %2782 }
 0x538   : > { %2854 = vst.msk [vmem:[#allocation2 + $0xb8] sm:$0xff] %vm2830_vm8, %v2781_v49  ;;  %2855 = vst.msk [vmem:[#allocation2 + $0xc0] sm:$0xff] %vm2830_vm8, %v2783_v30 }
 0x53b   : > { %v2785_v53 = vpop.permute.xlu1 %2784  ;;  %v2787_v36 = vpop.permute.xlu0 %2786 }
 0x53c   : > { %2856 = vst.msk [vmem:[#allocation2 + $0xc8] sm:$0xff] %vm2830_vm8, %v2785_v53  ;;  %2857 = vst.msk [vmem:[#allocation2 + $0xd0] sm:$0xff] %vm2830_vm8, %v2787_v36 }
 0x53f   : > { %v2789_v17 = vpop.permute.xlu1 %2788  ;;  %v2791_v19 = vpop.permute.xlu0 %2790 }
 0x540   : > { %2858 = vst.msk [vmem:[#allocation2 + $0xd8] sm:$0xff] %vm2830_vm8, %v2789_v17  ;;  %2859 = vst.msk [vmem:[#allocation2 + $0xe0] sm:$0xff] %vm2830_vm8, %v2791_v19 }
 0x543   : > { %v2793_v7 = vpop.permute.xlu1 %2792  ;;  %v2795_v21 = vpop.permute.xlu0 %2794 }
 0x544   : > { %2860 = vst.msk [vmem:[#allocation2 + $0xe8] sm:$0xff] %vm2830_vm8, %v2793_v7  ;;  %2861 = vst.msk [vmem:[#allocation2 + $0xf0] sm:$0xff] %vm2830_vm8, %v2795_v21 }
 0x547   : > { %v2797_v52 = vpop.permute.xlu1 %2796 }
 0x548   : > { %2862 = vst.msk [vmem:[#allocation2 + $0xf8] sm:$0xff] %vm2830_vm8, %v2797_v52  ;;  %vm7718_vm8 = vcmask 1045504  }
 0x550   : > { %v11374_v49 = vpop.permute.xlu0 %2864 }
 0x551   : > { %16454 = vst [vmem:[#allocation30_spill] sm:$0xff] %v11374_v49  ;;  %v2991_v30 = vmul.f32 %v9219_v47, %v11374_v49 }
 0x553   : > { %3055 = vrot.lane.b32.xlu1 %v2991_v30, %s8833_s20 }
 0x554   : > { %v11379_v53 = vpop.permute.xlu1 %2868  ;;  %v11381_v36 = vpop.permute.xlu0 %2876 }
 0x555   : > { %16455 = vst [vmem:[#allocation29_spill] sm:$0xff] %v11379_v53  ;;  %16456 = vst [vmem:[#allocation286_spill] sm:$0xff] %v11381_v36  ;;  %v2992_v17 = vmul.f32 %v9232_v51, %v11379_v53  ;;  %v2994_v21 = vmul.f32 %v9255_v62, %v11381_v36 }
 0x557   : > { %3057 = vrot.lane.b32.xlu0 %v2992_v17, %s8833_s20 }
 0x558   : > { %v11386_v19 = vpop.permute.xlu1 %2872  ;;  %v11388_v7 = vpop.permute.xlu0 %2884 }
 0x559   : > { %16457 = vst [vmem:[#allocation287_spill] sm:$0xff] %v11386_v19  ;;  %16458 = vst [vmem:[#allocation288_spill] sm:$0xff] %v11388_v7  ;;  %v2993_v47 = vmul.f32 %v9244_v58, %v11386_v19  ;;  %v2996_v51 = vmul.f32 %v9270_v43, %v11388_v7  ;;  %v16598_v19 = vld [vmem:[#allocation62_spill] sm:$0xff] }
 0x55b   : > { %3059 = vrot.lane.b32.xlu1 %v2993_v47, %s8833_s20  ;;  %3061 = vrot.lane.b32.xlu0 %v2994_v21, %s8833_s20 }
 0x55c   : > { %v11396_v52 = vpop.permute.xlu1 %2880  ;;  %v11398_v30 = vpop.permute.xlu0 %2892 }
 0x55d   : > { %16459 = vst [vmem:[#allocation289_spill] sm:$0xff] %v11396_v52  ;;  %16460 = vst [vmem:[#allocation290_spill] sm:$0xff] %v11398_v30  ;;  %v2995_v17 = vmul.f32 %v9268_v42, %v11396_v52  ;;  %v2998_v21 = vmul.f32 %v9301_v54, %v11398_v30  ;;  %v16468_v30 = vld [vmem:[#allocation45_spill] sm:$0xff] }
 0x55f   : > { %3063 = vrot.lane.b32.xlu1 %v2995_v17, %s8833_s20  ;;  %3065 = vrot.lane.b32.xlu0 %v2996_v51, %s8833_s20 }
 0x560   : > { %v11406_v62 = vpop.permute.xlu1 %2888  ;;  %v11408_v58 = vpop.permute.xlu0 %2900 }
 0x561   : > { %16461 = vst [vmem:[#allocation291_spill] sm:$0xff] %v11406_v62  ;;  %16462 = vst [vmem:[#allocation292_spill] sm:$0xff] %v11408_v58  ;;  %v2997_v47 = vmul.f32 %v9299_v34, %v11406_v62  ;;  %v3000_v51 = vmul.f32 %v9324_v45, %v11408_v58  ;;  %v16472_v58 = vld [vmem:[#allocation53_spill] sm:$0xff] }
 0x563   : > { %3067 = vrot.lane.b32.xlu1 %v2997_v47, %s8833_s20  ;;  %3069 = vrot.lane.b32.xlu0 %v2998_v21, %s8833_s20  ;;  %v16467_v21 = vld [vmem:[#allocation48_spill] sm:$0xff] }
 0x564   : > { %v11416_v43 = vpop.permute.xlu1 %2896  ;;  %v11418_v42 = vpop.permute.xlu0 %2908 }
 0x565   : > { %16463 = vst [vmem:[#allocation293_spill] sm:$0xff] %v11416_v43  ;;  %16464 = vst [vmem:[#allocation294_spill] sm:$0xff] %v11418_v42  ;;  %v2999_v17 = vmul.f32 %v9317_v44, %v11416_v43  ;;  %v3002_v47 = vmul.f32 %v16467_v21, %v11418_v42  ;;  %v16476_v42 = vld [vmem:[#allocation58_spill] sm:$0xff] }
 0x567   : > { %3071 = vrot.lane.b32.xlu1 %v2999_v17, %s8833_s20  ;;  %3073 = vrot.lane.b32.xlu0 %v3000_v51, %s8833_s20  ;;  %v16471_v51 = vld [vmem:[#allocation54_spill] sm:$0xff] }
 0x568   : > { %v11426_v54 = vpop.permute.xlu1 %2904  ;;  %v11428_v34 = vpop.permute.xlu0 %2916 }
 0x569   : > { %16465 = vst [vmem:[#allocation295_spill] sm:$0xff] %v11426_v54  ;;  %16466 = vst [vmem:[#allocation296_spill] sm:$0xff] %v11428_v34  ;;  %v3001_v62 = vmul.f32 %v16468_v30, %v11426_v54  ;;  %v3004_v17 = vmul.f32 %v16471_v51, %v11428_v34  ;;  %v16480_v34 = vld [vmem:[#allocation63_spill] sm:$0xff] }
 0x56b   : > { %3075 = vrot.lane.b32.xlu1 %v3001_v62, %s8833_s20  ;;  %3077 = vrot.lane.b32.xlu0 %v3002_v47, %s8833_s20  ;;  %v16475_v62 = vld [vmem:[#allocation60_spill] sm:$0xff] }
 0x56c   : > { %v11436_v45 = vpop.permute.xlu1 %2912  ;;  %v11438_v44 = vpop.permute.xlu0 %2924 }
 0x56d   : > { %16469 = vst [vmem:[#allocation48_spill] sm:$0xff] %v11436_v45  ;;  %16470 = vst [vmem:[#allocation45_spill] sm:$0xff] %v11438_v44  ;;  %v3003_v43 = vmul.f32 %v16472_v58, %v11436_v45  ;;  %v3006_v47 = vmul.f32 %v16475_v62, %v11438_v44  ;;  %v16484_v44 = vld [vmem:[#allocation71_spill] sm:$0xff] }
 0x56f   : > { %3079 = vrot.lane.b32.xlu1 %v3003_v43, %s8833_s20  ;;  %3081 = vrot.lane.b32.xlu0 %v3004_v17, %s8833_s20  ;;  %v16479_v43 = vld [vmem:[#allocation66_spill] sm:$0xff] }
 0x570   : > { %v11446_v21 = vpop.permute.xlu1 %2920  ;;  %v11448_v30 = vpop.permute.xlu0 %2932 }
 0x571   : > { %16473 = vst [vmem:[#allocation54_spill] sm:$0xff] %v11446_v21  ;;  %16474 = vst [vmem:[#allocation53_spill] sm:$0xff] %v11448_v30  ;;  %v3005_v54 = vmul.f32 %v16476_v42, %v11446_v21  ;;  %v3008_v17 = vmul.f32 %v16479_v43, %v11448_v30  ;;  %v16488_v30 = vld [vmem:[#allocation76_spill] sm:$0xff] }
 0x573   : > { %3083 = vrot.lane.b32.xlu1 %v3005_v54, %s8833_s20  ;;  %3085 = vrot.lane.b32.xlu0 %v3006_v47, %s8833_s20  ;;  %v16483_v54 = vld [vmem:[#allocation72_spill] sm:$0xff] }
 0x574   : > { %v11456_v51 = vpop.permute.xlu1 %2928  ;;  %v11458_v58 = vpop.permute.xlu0 %2940 }
 0x575   : > { %16477 = vst [vmem:[#allocation60_spill] sm:$0xff] %v11456_v51  ;;  %16478 = vst [vmem:[#allocation58_spill] sm:$0xff] %v11458_v58  ;;  %v3007_v45 = vmul.f32 %v16480_v34, %v11456_v51  ;;  %v3010_v47 = vmul.f32 %v16483_v54, %v11458_v58  ;;  %v16492_v58 = vld [vmem:[#allocation81_spill] sm:$0xff] }
 0x577   : > { %3087 = vrot.lane.b32.xlu1 %v3007_v45, %s8833_s20  ;;  %3089 = vrot.lane.b32.xlu0 %v3008_v17, %s8833_s20  ;;  %v16487_v45 = vld [vmem:[#allocation78_spill] sm:$0xff] }
 0x578   : > { %v11466_v62 = vpop.permute.xlu1 %2936  ;;  %v11468_v42 = vpop.permute.xlu0 %2948 }
 0x579   : > { %16481 = vst [vmem:[#allocation66_spill] sm:$0xff] %v11466_v62  ;;  %16482 = vst [vmem:[#allocation63_spill] sm:$0xff] %v11468_v42  ;;  %v3009_v21 = vmul.f32 %v16484_v44, %v11466_v62  ;;  %v3012_v17 = vmul.f32 %v16487_v45, %v11468_v42  ;;  %v16496_v42 = vld [vmem:[#allocation89_spill] sm:$0xff] }
 0x57b   : > { %3091 = vrot.lane.b32.xlu1 %v3009_v21, %s8833_s20  ;;  %3093 = vrot.lane.b32.xlu0 %v3010_v47, %s8833_s20  ;;  %v16491_v21 = vld [vmem:[#allocation84_spill] sm:$0xff] }
 0x57c   : > { %v11476_v43 = vpop.permute.xlu1 %2944  ;;  %v11478_v34 = vpop.permute.xlu0 %2956 }
 0x57d   : > { %16485 = vst [vmem:[#allocation72_spill] sm:$0xff] %v11476_v43  ;;  %16486 = vst [vmem:[#allocation71_spill] sm:$0xff] %v11478_v34  ;;  %v3011_v51 = vmul.f32 %v16488_v30, %v11476_v43  ;;  %v3014_v47 = vmul.f32 %v16491_v21, %v11478_v34  ;;  %v16500_v34 = vld [vmem:[#allocation94_spill] sm:$0xff] }
 0x57f   : > { %3095 = vrot.lane.b32.xlu1 %v3011_v51, %s8833_s20  ;;  %3097 = vrot.lane.b32.xlu0 %v3012_v17, %s8833_s20  ;;  %v16495_v51 = vld [vmem:[#allocation90_spill] sm:$0xff] }
 0x580   : > { %v11486_v54 = vpop.permute.xlu1 %2952  ;;  %v11488_v44 = vpop.permute.xlu0 %2964 }
 0x581   : > { %16489 = vst [vmem:[#allocation78_spill] sm:$0xff] %v11486_v54  ;;  %16490 = vst [vmem:[#allocation76_spill] sm:$0xff] %v11488_v44  ;;  %v3013_v62 = vmul.f32 %v16492_v58, %v11486_v54  ;;  %v3016_v17 = vmul.f32 %v16495_v51, %v11488_v44 }
 0x583   : > { %3099 = vrot.lane.b32.xlu1 %v3013_v62, %s8833_s20  ;;  %3101 = vrot.lane.b32.xlu0 %v3014_v47, %s8833_s20  ;;  %v16499_v62 = vld [vmem:[#allocation22_spill] sm:$0xff] }
 0x584   : > { %v11496_v45 = vpop.permute.xlu1 %2960  ;;  %v11498_v30 = vpop.permute.xlu0 %2972 }
 0x585   : > { %16493 = vst [vmem:[#allocation84_spill] sm:$0xff] %v11496_v45  ;;  %16494 = vst [vmem:[#allocation81_spill] sm:$0xff] %v11498_v30  ;;  %v3015_v43 = vmul.f32 %v16496_v42, %v11496_v45  ;;  %v3018_v47 = vmul.f32 %v16499_v62, %v11498_v30  ;;  %v16502_v42 = vld [vmem:[#allocation21_spill] sm:$0xff] }
 0x587   : > { %3103 = vrot.lane.b32.xlu1 %v3015_v43, %s8833_s20  ;;  %3105 = vrot.lane.b32.xlu0 %v3016_v17, %s8833_s20  ;;  %v16503_v17 = vld [vmem:[#allocation23_spill] sm:$0xff] }
 0x588   : > { %v11506_v21 = vpop.permute.xlu1 %2968  ;;  %v11508_v58 = vpop.permute.xlu0 %2980 }
 0x589   : > { %16497 = vst [vmem:[#allocation90_spill] sm:$0xff] %v11506_v21  ;;  %16498 = vst [vmem:[#allocation89_spill] sm:$0xff] %v11508_v58  ;;  %v3017_v54 = vmul.f32 %v16500_v34, %v11506_v21  ;;  %v3020_v43 = vmul.f32 %v16502_v42, %v11508_v58  ;;  %v16506_v34 = vld [vmem:[#allocation24_spill] sm:$0xff]  ;;  %v16510_v42 = vld [vmem:[#allocation10_spill] sm:$0xff] }
 0x58b   : > { %3107 = vrot.lane.b32.xlu1 %v3017_v54, %s8833_s20  ;;  %3109 = vrot.lane.b32.xlu0 %v3018_v47, %s8833_s20  ;;  %v16507_v47 = vld [vmem:[#allocation20_spill] sm:$0xff] }
 0x58c   : > { %v11516_v51 = vpop.permute.xlu1 %2976  ;;  %v11522_v45 = vpop.permute.xlu0 %2988 }
 0x58d   : > { %16501 = vst [vmem:[#allocation22_spill] sm:$0xff] %v11516_v51  ;;  %v3019_v44 = vmul.f32 %v16503_v17, %v11516_v51  ;;  %16504 = vst [vmem:[#allocation94_spill] sm:$0xff] %v11522_v45  ;;  %v3022_v54 = vmul.f32 %v16506_v34, %v11522_v45  ;;  %v16511_v17 = vld [vmem:[#allocation16_spill] sm:$0xff] }
 0x58f   : > { %3111 = vrot.lane.b32.xlu1 %v3019_v44, %s8833_s20  ;;  %3113 = vrot.lane.b32.xlu0 %v3020_v43, %s8833_s20 }
 0x590   : > { %v11526_v62 = vpop.permute.xlu1 %2984 }
 0x591   : > { %16505 = vst [vmem:[#allocation21_spill] sm:$0xff] %v11526_v62  ;;  %v3021_v30 = vmul.f32 %v16507_v47, %v11526_v62 }
 0x593   : > { %3115 = vrot.lane.b32.xlu1 %v3021_v30, %s8833_s20  ;;  %3117 = vrot.lane.b32.xlu0 %v3022_v54, %s8833_s20  ;;  %s11720_s20 = scalar_lea.vmem %s15052_s1, %s8171_s16  ;;  %s8839_s16 = smov 52  }
 0x594   : > { %v8419_v51 = vld [vmem:[%s11720_s20 + $0x40] sm:$0xff]   ;;  %v8420_v36 = vld [vmem:[%s11720_s20 + $0x48] sm:$0xff]   ;;  %v8421_v57 = vld [vmem:[%s11720_s20 + $0x50] sm:$0xff]  }
 0x595   : > { %v11948_v26 = vunpack.c.h.bf16 %v8420_v36  ;;  %v8422_v28 = vld [vmem:[%s11720_s20 + $0x58] sm:$0xff]   ;;  %v11973_v25 = vunpack.c.h.bf16 %v8421_v57  ;;  %v8423_v4 = vld [vmem:[%s11720_s20 + $0x60] sm:$0xff]  }
 0x596   : > { %v11995_v29 = vunpack.c.l.bf16 %v8423_v4 }
 0x597   : > { %3185 = vperm.xlu1 %8651, %v10929_v55   ;;  %3189 = vperm.xlu0 %8652, %v10935_v23   ;;  %v3650_v37 = vrot.slane %v11973_v25, 7 }
 0x59b   : > { %3193 = vperm.xlu1 %8651, %v10941_v56   ;;  %3201 = vperm.xlu0 %8652, %v10947_v11  }
 0x59f   : > { %3197 = vperm.xlu1 %8651, %v10953_v48   ;;  %3209 = vperm.xlu0 %8652, %v10959_v61  }
 0x5a3   : > { %3205 = vperm.xlu1 %8651, %v10965_v60   ;;  %3217 = vperm.xlu0 %8652, %v10971_v27  }
 0x5a7   : > { %3213 = vperm.xlu1 %8651, %v10977_v10   ;;  %3225 = vperm.xlu0 %8652, %v10983_v16  }
 0x5ab   : > { %3221 = vperm.xlu1 %8651, %v10989_v41   ;;  %3233 = vperm.xlu0 %8652, %v10995_v33  }
 0x5af   : > { %3229 = vperm.xlu1 %8651, %v11001_v13   ;;  %3241 = vperm.xlu0 %8652, %v11007_v14  }
 0x5b3   : > { %3237 = vperm.xlu1 %8651, %v11013_v12   ;;  %3249 = vperm.xlu0 %8652, %v11019_v2  }
 0x5b7   : > { %3245 = vperm.xlu1 %8651, %v11025_v59   ;;  %3257 = vperm.xlu0 %8652, %v11031_v9  }
 0x5bb   : > { %3253 = vperm.xlu1 %8651, %v11037_v1   ;;  %3265 = vperm.xlu0 %8652, %v11043_v8  }
 0x5bf   : > { %3261 = vperm.xlu1 %8651, %v11049_v20   ;;  %3273 = vperm.xlu0 %8652, %v11055_v32  }
 0x5c3   : > { %3269 = vperm.xlu1 %8651, %v11061_v24   ;;  %3281 = vperm.xlu0 %8652, %v11067_v46  }
 0x5c5   : > { %v3056_v61 = vpop.permute.xlu1 %3055 }
 0x5c6   : > { %3152 = vst.msk [vmem:[#allocation2] sm:$0xff] %vm3151_vm9, %v3056_v61  ;;  %v16514_v61 = vld [vmem:[#allocation14_spill] sm:$0xff] }
 0x5c7   : > { %3277 = vperm.xlu1 %8651, %v11074_v5   ;;  %3289 = vperm.xlu0 %8652, %v11080_v15  }
 0x5c9   : > { %v3058_v41 = vpop.permute.xlu0 %3057 }
 0x5ca   : > { %3153 = vst.msk [vmem:[#allocation2 + $0x8] sm:$0xff] %vm3151_vm9, %v3058_v41 }
 0x5cb   : > { %3285 = vperm.xlu1 %8651, %v11087_v63   ;;  %3297 = vperm.xlu0 %8652, %v11093_v40  }
 0x5cd   : > { %v3060_v59 = vpop.permute.xlu1 %3059  ;;  %v3062_v1 = vpop.permute.xlu0 %3061 }
 0x5ce   : > { %3154 = vst.msk [vmem:[#allocation2 + $0x10] sm:$0xff] %vm3151_vm9, %v3060_v59  ;;  %3155 = vst.msk [vmem:[#allocation2 + $0x18] sm:$0xff] %vm3151_vm9, %v3062_v1 }
 0x5cf   : > { %3293 = vperm.xlu1 %8651, %v11101_v35   ;;  %3305 = vperm.xlu0 %8652, %v11107_v50  }
 0x5d1   : > { %v3064_v10 = vpop.permute.xlu1 %3063  ;;  %v3066_v20 = vpop.permute.xlu0 %3065 }
 0x5d2   : > { %3156 = vst.msk [vmem:[#allocation2 + $0x20] sm:$0xff] %vm3151_vm9, %v3064_v10  ;;  %3157 = vst.msk [vmem:[#allocation2 + $0x28] sm:$0xff] %vm3151_vm9, %v3066_v20  ;;  %v16517_v10 = vld [vmem:[#allocation135_spill] sm:$0xff] }
 0x5d3   : > { %3301 = vperm.xlu1 %8651, %v11115_v0  }
 0x5d5   : > { %v3068_v24 = vpop.permute.xlu1 %3067  ;;  %v3070_v15 = vpop.permute.xlu0 %3069 }
 0x5d6   : > { %3158 = vst.msk [vmem:[#allocation2 + $0x30] sm:$0xff] %vm3151_vm9, %v3068_v24  ;;  %3159 = vst.msk [vmem:[#allocation2 + $0x38] sm:$0xff] %vm3151_vm9, %v3070_v15  ;;  %v16518_v24 = vld [vmem:[#allocation136_spill] sm:$0xff] }
 0x5d7   : > { %3309 = vperm.xlu1 %8651, %v11123_v22  }
 0x5d9   : > { %v3072_v16 = vpop.permute.xlu1 %3071  ;;  %v3074_v55 = vpop.permute.xlu0 %3073 }
 0x5da   : > { %3160 = vst.msk [vmem:[#allocation2 + $0x40] sm:$0xff] %vm3151_vm9, %v3072_v16  ;;  %3161 = vst.msk [vmem:[#allocation2 + $0x48] sm:$0xff] %vm3151_vm9, %v3074_v55 }
 0x5dd   : > { %v3076_v50 = vpop.permute.xlu1 %3075  ;;  %v3078_v27 = vpop.permute.xlu0 %3077 }
 0x5de   : > { %3162 = vst.msk [vmem:[#allocation2 + $0x50] sm:$0xff] %vm3151_vm9, %v3076_v50  ;;  %3163 = vst.msk [vmem:[#allocation2 + $0x58] sm:$0xff] %vm3151_vm9, %v3078_v27  ;;  %v16521_v50 = vld [vmem:[#allocation139_spill] sm:$0xff] }
 0x5e1   : > { %v3080_v33 = vpop.permute.xlu1 %3079  ;;  %v3082_v60 = vpop.permute.xlu0 %3081 }
 0x5e2   : > { %3164 = vst.msk [vmem:[#allocation2 + $0x60] sm:$0xff] %vm3151_vm9, %v3080_v33  ;;  %3165 = vst.msk [vmem:[#allocation2 + $0x68] sm:$0xff] %vm3151_vm9, %v3082_v60  ;;  %v16522_v33 = vld [vmem:[#allocation140_spill] sm:$0xff] }
 0x5e5   : > { %v3084_v5 = vpop.permute.xlu1 %3083  ;;  %v3086_v40 = vpop.permute.xlu0 %3085 }
 0x5e6   : > { %3166 = vst.msk [vmem:[#allocation2 + $0x70] sm:$0xff] %vm3151_vm9, %v3084_v5  ;;  %3167 = vst.msk [vmem:[#allocation2 + $0x78] sm:$0xff] %vm3151_vm9, %v3086_v40 }
 0x5e9   : > { %v3088_v46 = vpop.permute.xlu1 %3087  ;;  %v3090_v32 = vpop.permute.xlu0 %3089 }
 0x5ea   : > { %3168 = vst.msk [vmem:[#allocation2 + $0x80] sm:$0xff] %vm3151_vm9, %v3088_v46  ;;  %3169 = vst.msk [vmem:[#allocation2 + $0x88] sm:$0xff] %vm3151_vm9, %v3090_v32  ;;  %v16525_v46 = vld [vmem:[#allocation143_spill] sm:$0xff] }
 0x5ed   : > { %v3092_v8 = vpop.permute.xlu1 %3091  ;;  %v3094_v9 = vpop.permute.xlu0 %3093 }
 0x5ee   : > { %3170 = vst.msk [vmem:[#allocation2 + $0x90] sm:$0xff] %vm3151_vm9, %v3092_v8  ;;  %3171 = vst.msk [vmem:[#allocation2 + $0x98] sm:$0xff] %vm3151_vm9, %v3094_v9  ;;  %v16526_v8 = vld [vmem:[#allocation144_spill] sm:$0xff] }
 0x5f1   : > { %v3096_v2 = vpop.permute.xlu1 %3095  ;;  %v3098_v14 = vpop.permute.xlu0 %3097 }
 0x5f2   : > { %3172 = vst.msk [vmem:[#allocation2 + $0xa0] sm:$0xff] %vm3151_vm9, %v3096_v2  ;;  %3173 = vst.msk [vmem:[#allocation2 + $0xa8] sm:$0xff] %vm3151_vm9, %v3098_v14 }
 0x5f5   : > { %v3100_v12 = vpop.permute.xlu1 %3099  ;;  %v3102_v13 = vpop.permute.xlu0 %3101 }
 0x5f6   : > { %3174 = vst.msk [vmem:[#allocation2 + $0xb0] sm:$0xff] %vm3151_vm9, %v3100_v12  ;;  %3175 = vst.msk [vmem:[#allocation2 + $0xb8] sm:$0xff] %vm3151_vm9, %v3102_v13  ;;  %v16529_v12 = vld [vmem:[#allocation147_spill] sm:$0xff] }
 0x5f9   : > { %v3104_v23 = vpop.permute.xlu1 %3103  ;;  %v3106_v56 = vpop.permute.xlu0 %3105 }
 0x5fa   : > { %3176 = vst.msk [vmem:[#allocation2 + $0xc0] sm:$0xff] %vm3151_vm9, %v3104_v23  ;;  %3177 = vst.msk [vmem:[#allocation2 + $0xc8] sm:$0xff] %vm3151_vm9, %v3106_v56  ;;  %v16530_v23 = vld [vmem:[#allocation148_spill] sm:$0xff] }
 0x5fd   : > { %v3108_v11 = vpop.permute.xlu1 %3107  ;;  %v3110_v48 = vpop.permute.xlu0 %3109 }
 0x5fe   : > { %3178 = vst.msk [vmem:[#allocation2 + $0xd0] sm:$0xff] %vm3151_vm9, %v3108_v11  ;;  %3179 = vst.msk [vmem:[#allocation2 + $0xd8] sm:$0xff] %vm3151_vm9, %v3110_v48 }
 0x601   : > { %v3112_v63 = vpop.permute.xlu1 %3111  ;;  %v3114_v35 = vpop.permute.xlu0 %3113 }
 0x602   : > { %3180 = vst.msk [vmem:[#allocation2 + $0xe0] sm:$0xff] %vm3151_vm9, %v3112_v63  ;;  %3181 = vst.msk [vmem:[#allocation2 + $0xe8] sm:$0xff] %vm3151_vm9, %v3114_v35  ;;  %v16533_v63 = vld [vmem:[#allocation151_spill] sm:$0xff] }
 0x605   : > { %v3116_v0 = vpop.permute.xlu1 %3115  ;;  %v3118_v22 = vpop.permute.xlu0 %3117 }
 0x606   : > { %3182 = vst.msk [vmem:[#allocation2 + $0xf0] sm:$0xff] %vm3151_vm9, %v3116_v0  ;;  %3183 = vst.msk [vmem:[#allocation2 + $0xf8] sm:$0xff] %vm3151_vm9, %v3118_v22  ;;  %v16534_v0 = vld [vmem:[#allocation152_spill] sm:$0xff]  ;;  %vm6754_vm9 = vcmask 753344  }
 0x612   : > { %v11598_v44 = vpop.permute.xlu1 %3185  ;;  %v11600_v30 = vpop.permute.xlu0 %3189 }
 0x613   : > { %16508 = vst [vmem:[#allocation23_spill] sm:$0xff] %v11598_v44  ;;  %16509 = vst [vmem:[#allocation24_spill] sm:$0xff] %v11600_v30  ;;  %v3312_v43 = vmul.f32 %v11598_v44, %v16510_v42  ;;  %v3313_v34 = vmul.f32 %v11600_v30, %v16511_v17  ;;  %v16537_v17 = vld [vmem:[#allocation155_spill] sm:$0xff]  ;;  %v8418_v44 = vld [vmem:[%s11720_s20 + $0x38] sm:$0xff]  }
 0x614   : > { %v11916_v52 = vunpack.c.h.bf16 %v8418_v44 }
 0x615   : > { %3376 = vrot.lane.b32.xlu0 %v3312_v43, %s8834_s21  ;;  %3378 = vrot.lane.b32.xlu1 %v3313_v34, %s8834_s21 }
 0x616   : > { %v11608_v54 = vpop.permute.xlu1 %3193  ;;  %v11610_v47 = vpop.permute.xlu0 %3201  ;;  %v3638_v53 = vrot.slane %v11916_v52, 7 }
 0x617   : > { %16512 = vst [vmem:[#allocation20_spill] sm:$0xff] %v11608_v54  ;;  %16513 = vst [vmem:[#allocation10_spill] sm:$0xff] %v11610_v47  ;;  %v3314_v41 = vmul.f32 %v11608_v54, %v16514_v61  ;;  %v3316_v20 = vmul.f32 %v11610_v47, %v16517_v10  ;;  %v16538_v61 = vld [vmem:[#allocation156_spill] sm:$0xff] }
 0x618   : > { %v16592_v47 = vld [vmem:[#allocation44_spill] sm:$0xff] }
 0x619   : > { %3380 = vrot.lane.b32.xlu0 %v3314_v41, %s8834_s21 }
 0x61a   : > { %v11615_v59 = vpop.permute.xlu1 %3197  ;;  %v11617_v1 = vpop.permute.xlu0 %3209 }
 0x61b   : > { %16515 = vst [vmem:[#allocation16_spill] sm:$0xff] %v11615_v59  ;;  %16516 = vst [vmem:[#allocation14_spill] sm:$0xff] %v11617_v1  ;;  %v3315_v15 = vmul.f32 %v11615_v59, %v16518_v24  ;;  %v3318_v27 = vmul.f32 %v11617_v1, %v16521_v50  ;;  %v16541_v24 = vld [vmem:[#allocation159_spill] sm:$0xff]  ;;  %v16542_v50 = vld [vmem:[#allocation160_spill] sm:$0xff] }
 0x61c   : > { %v8417_v59 = vld [vmem:[%s11720_s20 + $0x30] sm:$0xff]  }
 0x61d   : > { %3382 = vrot.lane.b32.xlu1 %v3315_v15, %s8834_s21  ;;  %3384 = vrot.lane.b32.xlu0 %v3316_v20, %s8834_s21  ;;  %v11891_v62 = vunpack.c.h.bf16 %v8417_v59 }
 0x61e   : > { %v11625_v16 = vpop.permute.xlu1 %3205  ;;  %v11627_v55 = vpop.permute.xlu0 %3217 }
 0x61f   : > { %16519 = vst [vmem:[#allocation135_spill] sm:$0xff] %v11625_v16  ;;  %16520 = vst [vmem:[#allocation136_spill] sm:$0xff] %v11627_v55  ;;  %v3317_v60 = vmul.f32 %v11625_v16, %v16522_v33  ;;  %v3320_v32 = vmul.f32 %v11627_v55, %v16525_v46  ;;  %v16545_v46 = vld [vmem:[#allocation163_spill] sm:$0xff] }
 0x621   : > { %3386 = vrot.lane.b32.xlu1 %v3317_v60, %s8834_s21  ;;  %3388 = vrot.lane.b32.xlu0 %v3318_v27, %s8834_s21 }
 0x622   : > { %v11635_v5 = vpop.permute.xlu1 %3213  ;;  %v11637_v40 = vpop.permute.xlu0 %3225 }
 0x623   : > { %16523 = vst [vmem:[#allocation139_spill] sm:$0xff] %v11635_v5  ;;  %16524 = vst [vmem:[#allocation140_spill] sm:$0xff] %v11637_v40  ;;  %v3319_v9 = vmul.f32 %v11635_v5, %v16526_v8  ;;  %v3322_v13 = vmul.f32 %v11637_v40, %v16529_v12  ;;  %v16546_v8 = vld [vmem:[#allocation164_spill] sm:$0xff]  ;;  %v8416_v5 = vld [vmem:[%s11720_s20 + $0x28] sm:$0xff]  }
 0x625   : > { %3390 = vrot.lane.b32.xlu1 %v3319_v9, %s8834_s21  ;;  %3392 = vrot.lane.b32.xlu0 %v3320_v32, %s8834_s21 }
 0x626   : > { %v11645_v2 = vpop.permute.xlu1 %3221  ;;  %v11647_v14 = vpop.permute.xlu0 %3233 }
 0x627   : > { %16527 = vst [vmem:[#allocation143_spill] sm:$0xff] %v11645_v2  ;;  %16528 = vst [vmem:[#allocation144_spill] sm:$0xff] %v11647_v14  ;;  %v3321_v56 = vmul.f32 %v11645_v2, %v16530_v23  ;;  %v3324_v35 = vmul.f32 %v11647_v14, %v16533_v63  ;;  %v16549_v23 = vld [vmem:[#allocation167_spill] sm:$0xff]  ;;  %v16550_v63 = vld [vmem:[#allocation168_spill] sm:$0xff] }
 0x629   : > { %3394 = vrot.lane.b32.xlu1 %v3321_v56, %s8834_s21  ;;  %3396 = vrot.lane.b32.xlu0 %v3322_v13, %s8834_s21 }
 0x62a   : > { %v11655_v11 = vpop.permute.xlu1 %3229  ;;  %v11657_v48 = vpop.permute.xlu0 %3241 }
 0x62b   : > { %16531 = vst [vmem:[#allocation147_spill] sm:$0xff] %v11655_v11  ;;  %16532 = vst [vmem:[#allocation148_spill] sm:$0xff] %v11657_v48  ;;  %v3323_v22 = vmul.f32 %v11655_v11, %v16534_v0  ;;  %v3326_v34 = vmul.f32 %v11657_v48, %v16537_v17  ;;  %v16553_v17 = vld [vmem:[#allocation171_spill] sm:$0xff]  ;;  %v8415_v11 = vld [vmem:[%s11720_s20 + $0x20] sm:$0xff]  }
 0x62c   : > { %v11859_v1 = vunpack.c.h.bf16 %v8415_v11 }
 0x62d   : > { %3398 = vrot.lane.b32.xlu1 %v3323_v22, %s8834_s21  ;;  %3400 = vrot.lane.b32.xlu0 %v3324_v35, %s8834_s21 }
 0x62e   : > { %v11666_v42 = vpop.permute.xlu1 %3237  ;;  %v11668_v43 = vpop.permute.xlu0 %3249  ;;  %v3626_v54 = vrot.slane %v11859_v1, 7 }
 0x62f   : > { %16535 = vst [vmem:[#allocation151_spill] sm:$0xff] %v11666_v42  ;;  %16536 = vst [vmem:[#allocation152_spill] sm:$0xff] %v11668_v43  ;;  %v3325_v41 = vmul.f32 %v11666_v42, %v16538_v61  ;;  %v3328_v15 = vmul.f32 %v11668_v43, %v16541_v24  ;;  %v16554_v61 = vld [vmem:[#allocation172_spill] sm:$0xff]  ;;  %v8414_v43 = vld [vmem:[%s11720_s20 + $0x18] sm:$0xff]  }
 0x630   : > { %v11834_v2 = vunpack.c.h.bf16 %v8414_v43 }
 0x631   : > { %3402 = vrot.lane.b32.xlu1 %v3325_v41, %s8834_s21  ;;  %3404 = vrot.lane.b32.xlu0 %v3326_v34, %s8834_s21 }
 0x632   : > { %v11676_v10 = vpop.permute.xlu1 %3245  ;;  %v11678_v20 = vpop.permute.xlu0 %3257 }
 0x633   : > { %16539 = vst [vmem:[#allocation155_spill] sm:$0xff] %v11676_v10  ;;  %16540 = vst [vmem:[#allocation156_spill] sm:$0xff] %v11678_v20  ;;  %v3327_v27 = vmul.f32 %v11676_v10, %v16542_v50  ;;  %v3330_v32 = vmul.f32 %v11678_v20, %v16545_v46  ;;  %v16557_v50 = vld [vmem:[#allocation175_spill] sm:$0xff]  ;;  %v16558_v46 = vld [vmem:[#allocation176_spill] sm:$0xff] }
 0x635   : > { %3406 = vrot.lane.b32.xlu1 %v3327_v27, %s8834_s21  ;;  %3408 = vrot.lane.b32.xlu0 %v3328_v15, %s8834_s21 }
 0x636   : > { %v11686_v33 = vpop.permute.xlu1 %3253  ;;  %v11688_v60 = vpop.permute.xlu0 %3265 }
 0x637   : > { %16543 = vst [vmem:[#allocation159_spill] sm:$0xff] %v11686_v33  ;;  %16544 = vst [vmem:[#allocation160_spill] sm:$0xff] %v11688_v60  ;;  %v3329_v9 = vmul.f32 %v11686_v33, %v16546_v8  ;;  %v3332_v56 = vmul.f32 %v11688_v60, %v16549_v23  ;;  %v8426_v8 = vld [vmem:[%s11720_s20 + $0x78] sm:$0xff]   ;;  %v8413_v60 = vld [vmem:[%s11720_s20 + $0x10] sm:$0xff]  }
 0x638   : > { %v16580_v33 = vld [vmem:[#allocation17_spill] sm:$0xff]  ;;  %v11805_v10 = vunpack.c.l.bf16 %v8413_v60 }
 0x639   : > { %3410 = vrot.lane.b32.xlu1 %v3329_v9, %s8834_s21  ;;  %3412 = vrot.lane.b32.xlu0 %v3330_v32, %s8834_s21  ;;  %v11732_v9 = vld [vmem:[%s11720_s20 + $0x70] sm:$0xff]  }
 0x63a   : > { %v11696_v12 = vpop.permute.xlu1 %3261  ;;  %v11698_v13 = vpop.permute.xlu0 %3273 }
 0x63b   : > { %16547 = vst [vmem:[#allocation163_spill] sm:$0xff] %v11696_v12  ;;  %16548 = vst [vmem:[#allocation164_spill] sm:$0xff] %v11698_v13  ;;  %v3331_v35 = vmul.f32 %v11696_v12, %v16550_v63  ;;  %v3334_v34 = vmul.f32 %v11698_v13, %v16553_v17  ;;  %v16561_v63 = vld [vmem:[#allocation178_spill] sm:$0xff]  ;;  %v16562_v17 = vld [vmem:[#allocation180_spill] sm:$0xff] }
 0x63d   : > { %3414 = vrot.lane.b32.xlu1 %v3331_v35, %s8834_s21  ;;  %3416 = vrot.lane.b32.xlu0 %v3332_v56, %s8834_s21 }
 0x63e   : > { %v11707_v0 = vpop.permute.xlu1 %3269  ;;  %v11709_v22 = vpop.permute.xlu0 %3281 }
 0x63f   : > { %16551 = vst [vmem:[#allocation167_spill] sm:$0xff] %v11707_v0  ;;  %16552 = vst [vmem:[#allocation168_spill] sm:$0xff] %v11709_v22  ;;  %v3333_v41 = vmul.f32 %v11707_v0, %v16554_v61  ;;  %v3336_v27 = vmul.f32 %v11709_v22, %v16557_v50  ;;  %v8270_v61 = vld [vmem:[%s11720_s20] sm:$0xff]   ;;  %v11748_v50 = vunpack.c.l.bf16 %v8426_v8 }
 0x641   : > { %3418 = vrot.lane.b32.xlu1 %v3333_v41, %s8834_s21  ;;  %3420 = vrot.lane.b32.xlu0 %v3334_v34, %s8834_s21  ;;  %v11746_v41 = vunpack.c.h.bf16 %v11732_v9  ;;  %16564 = vst [vmem:[#allocation180_spill] sm:$0xff] %v11748_v50  ;;  %v3573_v22 = vrot.slane %v11748_v50, 7 }
 0x642   : > { %v11722_v24 = vpop.permute.xlu1 %3277  ;;  %v11724_v15 = vpop.permute.xlu0 %3289 }
 0x643   : > { %16555 = vst [vmem:[#allocation171_spill] sm:$0xff] %v11722_v24  ;;  %16556 = vst [vmem:[#allocation172_spill] sm:$0xff] %v11724_v15  ;;  %v3335_v32 = vmul.f32 %v11722_v24, %v16558_v46  ;;  %v3338_v35 = vmul.f32 %v11724_v15, %v16561_v63  ;;  %v16568_v63 = vld [vmem:[#allocation6_spill] sm:$0xff]  ;;  %v16575_v12 = vrot.slane %v11746_v41, 7 }
 0x644   : > { %16563 = vst [vmem:[#allocation178_spill] sm:$0xff] %v11746_v41 }
 0x645   : > { %3422 = vrot.lane.b32.xlu1 %v3335_v32, %s8834_s21  ;;  %3424 = vrot.lane.b32.xlu0 %v3336_v27, %s8834_s21  ;;  %v11752_v27 = vunpack.c.h.bf16 %v8426_v8  ;;  %v11756_v32 = vunpack.c.l.bf16 %v8270_v61 }
 0x646   : > { %v11736_v23 = vpop.permute.xlu1 %3285  ;;  %v11738_v56 = vpop.permute.xlu0 %3297 }
 0x647   : > { %16559 = vst [vmem:[#allocation175_spill] sm:$0xff] %v11736_v23  ;;  %16560 = vst [vmem:[#allocation176_spill] sm:$0xff] %v11738_v56  ;;  %v3337_v34 = vmul.f32 %v11736_v23, %v16562_v17  ;;  %v3340_v15 = vmul.f32 %v11738_v56, %v16568_v63  ;;  %v16569_v17 = vld [vmem:[#allocation182_spill] sm:$0xff]  ;;  %v3575_v8 = vrot.slane %v11752_v27, 7  ;;  %v3609_v63 = vrot.slane %v11756_v32, 7 }
 0x648   : > { %16565 = vst [vmem:[#allocation297_spill] sm:$0xff] %v11752_v27  ;;  %16567 = vst [vmem:[#allocation299_spill] sm:$0xff] %v11756_v32  ;;  %v11773_v56 = vunpack.c.h.bf16 %v8270_v61 }
 0x649   : > { %3426 = vrot.lane.b32.xlu1 %v3337_v34, %s8834_s21  ;;  %3428 = vrot.lane.b32.xlu0 %v3338_v35, %s8834_s21  ;;  %v8412_v35 = vld [vmem:[%s11720_s20 + $0x8] sm:$0xff]   ;;  %v11800_v20 = vsel %vm487_vm0, %v3573_v22, %v3575_v8 }
 0x64a   : > { %v11754_v46 = vpop.permute.xlu1 %3293  ;;  %v11764_v34 = vpop.permute.xlu0 %3305  ;;  %16572 = vst [vmem:[#allocation300_spill] sm:$0xff] %v11773_v56  ;;  %16581 = vst [vmem:[#allocation17_spill] sm:$0xff] %v11800_v20 }
 0x64b   : > { %16566 = vst [vmem:[#allocation298_spill] sm:$0xff] %v11754_v46  ;;  %v3339_v23 = vmul.f32 %v11754_v46, %v16569_v17  ;;  %16570 = vst [vmem:[#allocation6_spill] sm:$0xff] %v11764_v34  ;;  %v16573_v17 = vld [vmem:[#allocation13_spill] sm:$0xff] }
 0x64c   : > { %v3342_v24 = vmul.f32 %v11764_v34, %v16573_v17  ;;  %v16574_v46 = vld [vmem:[#allocation9_spill] sm:$0xff]  ;;  %v11792_v17 = vsel %vm487_vm0, %v3575_v8, %v3609_v63  ;;  %v16579_v34 = vld [vmem:[#allocation28_spill] sm:$0xff]  ;;  %v11817_v8 = vunpack.c.h.bf16 %v8413_v60 }
 0x64d   : > { %3430 = vrot.lane.b32.xlu1 %v3339_v23, %s8834_s21  ;;  %3432 = vrot.lane.b32.xlu0 %v3340_v15, %s8834_s21  ;;  %v11782_v23 = vsel %vm487_vm0, %v16575_v12, %v3573_v22  ;;  %v11784_v15 = vunpack.c.l.bf16 %v8412_v35  ;;  %16578 = vst [vmem:[#allocation301_spill] sm:$0xff] %v11792_v17  ;;  %v16585_v22 = vld [vmem:[#allocation32_spill] sm:$0xff] }
 0x64e   : > { %v11770_v0 = vpop.permute.xlu1 %3301  ;;  %16576 = vst [vmem:[#allocation13_spill] sm:$0xff] %v11782_v23  ;;  %16586 = vst [vmem:[#allocation304_spill] sm:$0xff] %v11817_v8  ;;  %v16588_v60 = vld [vmem:[#allocation36_spill] sm:$0xff]  ;;  %v3618_v14 = vrot.slane %v11817_v8, 7 }
 0x64f   : > { %16571 = vst [vmem:[#allocation182_spill] sm:$0xff] %v11770_v0  ;;  %v3341_v13 = vmul.f32 %v11770_v0, %v16574_v46  ;;  %v3698_v46 = vmul.f32 %v11782_v23, %v16579_v34  ;;  %v3610_v0 = vrot.slane %v11773_v56, 7  ;;  %v16583_v34 = vld [vmem:[#allocation27_spill] sm:$0xff]  ;;  %v12005_v23 = vunpack.c.h.bf16 %v8423_v4 }
 0x650   : > { %v3700_v42 = vmul.f32 %v11792_v17, %v16583_v34 }
 0x651   : > { %3434 = vrot.lane.b32.xlu1 %v3341_v13, %s8834_s21  ;;  %3436 = vrot.lane.b32.xlu0 %v3342_v24, %s8834_s21  ;;  %v11802_v13 = vunpack.c.h.bf16 %v8412_v35  ;;  %v3612_v24 = vrot.slane %v11784_v15, 7  ;;  %v3699_v35 = vmul.f32 %v11800_v20, %v16585_v22 }
 0x652   : > { %v11789_v61 = vpop.permute.xlu1 %3309 }
 0x653   : > { %16577 = vst [vmem:[#allocation9_spill] sm:$0xff] %v11789_v61  ;;  %v3343_v12 = vmul.f32 %v11789_v61, %v16580_v33  ;;  %16582 = vst [vmem:[#allocation302_spill] sm:$0xff] %v11802_v13  ;;  %v11813_v33 = vsel %vm487_vm0, %v3609_v63, %v3610_v0  ;;  %v3614_v61 = vrot.slane %v11802_v13, 7  ;;  %v11821_v48 = vsel %vm487_vm0, %v3610_v0, %v3612_v24  ;;  %v16587_v63 = vld [vmem:[#allocation31_spill] sm:$0xff] }
 0x654   : > { %16584 = vst [vmem:[#allocation303_spill] sm:$0xff] %v11813_v33  ;;  %v3701_v22 = vmul.f32 %v11813_v33, %v16587_v63  ;;  %v3702_v34 = vmul.f32 %v11821_v48, %v16588_v60  ;;  %v16589_v60 = vld [vmem:[#allocation35_spill] sm:$0xff] }
 0x655   : > { %3438 = vrot.lane.b32.xlu1 %v3343_v12, %s8834_s21  ;;  %3762 = vrot.lane.b32.xlu0 %v3698_v46, %s8835_s22  ;;  %v3616_v12 = vrot.slane %v11805_v10, 7  ;;  %v11824_v46 = vunpack.c.l.bf16 %v8414_v43  ;;  %v11837_v0 = vsel %vm487_vm0, %v3612_v24, %v3614_v61  ;;  %v16590_v24 = vld [vmem:[#allocation40_spill] sm:$0xff]  ;;  %s8836_s21 = smov 40  }
 0x656   : > { %v3703_v43 = vmul.f32 %v11837_v0, %v16589_v60 }
 0x657   : > { %v11840_v40 = vsel %vm487_vm0, %v3614_v61, %v3616_v12  ;;  %v11851_v63 = vsel %vm487_vm0, %v3616_v12, %v3618_v14  ;;  %v3622_v61 = vrot.slane %v11834_v2, 7  ;;  %v16591_v12 = vld [vmem:[#allocation39_spill] sm:$0xff] }
 0x658   : > { %v3704_v55 = vmul.f32 %v11840_v40, %v16590_v24  ;;  %v3705_v24 = vmul.f32 %v11851_v63, %v16591_v12 }
 0x659   : > { %3764 = vrot.lane.b32.xlu1 %v3699_v35, %s8835_s22  ;;  %3766 = vrot.lane.b32.xlu0 %v3700_v42, %s8835_s22  ;;  %v3620_v35 = vrot.slane %v11824_v46, 7  ;;  %v11843_v42 = vunpack.c.l.bf16 %v8415_v11  ;;  %v11874_v11 = vunpack.c.h.bf16 %v8416_v5 }
 0x65b   : > { %v11857_v16 = vsel %vm487_vm0, %v3618_v14, %v3620_v35  ;;  %v11870_v60 = vsel %vm487_vm0, %v3620_v35, %v3622_v61  ;;  %v16593_v35 = vld [vmem:[#allocation43_spill] sm:$0xff]  ;;  %v3630_v45 = vrot.slane %v11874_v11, 7 }
 0x65c   : > { %v3706_v14 = vmul.f32 %v11857_v16, %v16592_v47  ;;  %v3707_v47 = vmul.f32 %v11870_v60, %v16593_v35 }
 0x65d   : > { %3768 = vrot.lane.b32.xlu1 %v3701_v22, %s8835_s22  ;;  %3770 = vrot.lane.b32.xlu0 %v3702_v34, %s8835_s22  ;;  %v3624_v22 = vrot.slane %v11843_v42, 7  ;;  %v11862_v34 = vunpack.c.l.bf16 %v8416_v5  ;;  %v16594_v5 = vld [vmem:[#allocation50_spill] sm:$0xff] }
 0x65f   : > { %v11878_v30 = vsel %vm487_vm0, %v3622_v61, %v3624_v22  ;;  %v11894_v61 = vsel %vm487_vm0, %v3624_v22, %v3626_v54  ;;  %v16596_v22 = vld [vmem:[#allocation56_spill] sm:$0xff] }
 0x660   : > { %v3708_v12 = vmul.f32 %v11878_v30, %v16594_v5  ;;  %v16595_v5 = vld [vmem:[#allocation49_spill] sm:$0xff] }
 0x661   : > { %3772 = vrot.lane.b32.xlu1 %v3703_v43, %s8835_s22  ;;  %3774 = vrot.lane.b32.xlu0 %v3704_v55, %s8835_s22  ;;  %v3628_v43 = vrot.slane %v11862_v34, 7  ;;  %v11881_v55 = vunpack.c.l.bf16 %v8417_v59  ;;  %v3709_v59 = vmul.f32 %v11894_v61, %v16595_v5 }
 0x663   : > { %v11897_v58 = vsel %vm487_vm0, %v3626_v54, %v3628_v43  ;;  %v11908_v35 = vsel %vm487_vm0, %v3628_v43, %v3630_v45  ;;  %v3634_v54 = vrot.slane %v11891_v62, 7  ;;  %v16597_v43 = vld [vmem:[#allocation55_spill] sm:$0xff] }
 0x664   : > { %v3710_v21 = vmul.f32 %v11897_v58, %v16596_v22  ;;  %v3711_v22 = vmul.f32 %v11908_v35, %v16597_v43 }
 0x665   : > { %3776 = vrot.lane.b32.xlu1 %v3705_v24, %s8835_s22  ;;  %3778 = vrot.lane.b32.xlu0 %v3706_v14, %s8835_s22  ;;  %v3632_v24 = vrot.slane %v11881_v55, 7  ;;  %v11900_v14 = vunpack.c.l.bf16 %v8418_v44  ;;  %v11931_v44 = vunpack.c.h.bf16 %v8419_v51 }
 0x667   : > { %v11914_v7 = vsel %vm487_vm0, %v3630_v45, %v3632_v24  ;;  %v11927_v5 = vsel %vm487_vm0, %v3632_v24, %v3634_v54  ;;  %v16599_v24 = vld [vmem:[#allocation61_spill] sm:$0xff]  ;;  %v3642_v39 = vrot.slane %v11931_v44, 7 }
 0x668   : > { %v3712_v45 = vmul.f32 %v11914_v7, %v16598_v19  ;;  %v3713_v19 = vmul.f32 %v11927_v5, %v16599_v24 }
 0x669   : > { %3780 = vrot.lane.b32.xlu1 %v3707_v47, %s8835_s22  ;;  %3782 = vrot.lane.b32.xlu0 %v3708_v12, %s8835_s22  ;;  %v3636_v47 = vrot.slane %v11900_v14, 7  ;;  %v11919_v12 = vunpack.c.l.bf16 %v8419_v51  ;;  %v16600_v51 = vld [vmem:[#allocation68_spill] sm:$0xff] }
 0x66b   : > { %v11935_v49 = vsel %vm487_vm0, %v3634_v54, %v3636_v47  ;;  %v11951_v54 = vsel %vm487_vm0, %v3636_v47, %v3638_v53  ;;  %v16604_v47 = vld [vmem:[#allocation74_spill] sm:$0xff] }
 0x66c   : > { %v3714_v43 = vmul.f32 %v11935_v49, %v16600_v51  ;;  %v16602_v51 = vld [vmem:[#allocation67_spill] sm:$0xff] }
 0x66d   : > { %3784 = vrot.lane.b32.xlu1 %v3709_v59, %s8835_s22  ;;  %3786 = vrot.lane.b32.xlu0 %v3710_v21, %s8835_s22  ;;  %v3640_v59 = vrot.slane %v11919_v12, 7  ;;  %v11938_v21 = vunpack.c.l.bf16 %v8420_v36  ;;  %v3715_v36 = vmul.f32 %v11951_v54, %v16602_v51 }
 0x66f   : > { %v11954_v6 = vsel %vm487_vm0, %v3638_v53, %v3640_v59  ;;  %v11965_v24 = vsel %vm487_vm0, %v3640_v59, %v3642_v39  ;;  %v3646_v53 = vrot.slane %v11948_v26, 7  ;;  %v16606_v59 = vld [vmem:[#allocation73_spill] sm:$0xff] }
 0x670   : > { %16601 = vst [vmem:[#allocation305_spill] sm:$0xff] %v11954_v6  ;;  %16603 = vst [vmem:[#allocation306_spill] sm:$0xff] %v11965_v24  ;;  %v3716_v38 = vmul.f32 %v11954_v6, %v16604_v47  ;;  %v3717_v47 = vmul.f32 %v11965_v24, %v16606_v59 }
 0x671   : > { %3788 = vrot.lane.b32.xlu1 %v3711_v22, %s8835_s22  ;;  %3790 = vrot.lane.b32.xlu0 %v3712_v45, %s8835_s22  ;;  %v3644_v22 = vrot.slane %v11938_v21, 7  ;;  %v11957_v45 = vunpack.c.l.bf16 %v8421_v57  ;;  %v11988_v57 = vunpack.c.h.bf16 %v8422_v28 }
 0x673   : > { %v11971_v3 = vsel %vm487_vm0, %v3642_v39, %v3644_v22  ;;  %v11984_v51 = vsel %vm487_vm0, %v3644_v22, %v3646_v53  ;;  %v16610_v22 = vld [vmem:[#allocation79_spill] sm:$0xff]  ;;  %v3654_v20 = vrot.slane %v11988_v57, 7 }
 0x674   : > { %16605 = vst [vmem:[#allocation307_spill] sm:$0xff] %v11971_v3  ;;  %16607 = vst [vmem:[#allocation308_spill] sm:$0xff] %v11984_v51  ;;  %v3718_v39 = vmul.f32 %v11971_v3, %v16608_v18  ;;  %v3719_v59 = vmul.f32 %v11984_v51, %v16610_v22  ;;  %v16611_v18 = vld [vmem:[#allocation86_spill] sm:$0xff]  ;;  %v16616_v22 = vld [vmem:[#allocation92_spill] sm:$0xff] }
 0x675   : > { %3792 = vrot.lane.b32.xlu1 %v3713_v19, %s8835_s22  ;;  %3794 = vrot.lane.b32.xlu0 %v3714_v43, %s8835_s22  ;;  %v3648_v19 = vrot.slane %v11957_v45, 7  ;;  %v11976_v43 = vunpack.c.l.bf16 %v8422_v28 }
 0x677   : > { %v11992_v31 = vsel %vm487_vm0, %v3646_v53, %v3648_v19  ;;  %v12008_v53 = vsel %vm487_vm0, %v3648_v19, %v3650_v37 }
 0x678   : > { %16609 = vst [vmem:[#allocation309_spill] sm:$0xff] %v11992_v31  ;;  %v3720_v28 = vmul.f32 %v11992_v31, %v16611_v18  ;;  %16612 = vst [vmem:[#allocation310_spill] sm:$0xff] %v12008_v53 }
 0x679   : > { %3796 = vrot.lane.b32.xlu1 %v3715_v36, %s8835_s22  ;;  %3798 = vrot.lane.b32.xlu0 %v3716_v38, %s8835_s22  ;;  %v3652_v36 = vrot.slane %v11976_v43, 7  ;;  %v8424_v38 = vld [vmem:[%s11720_s20 + $0x68] sm:$0xff]   ;;  %s8842_s20 = smov 64  }
 0x67a   : > { %v12014_v24 = vunpack.c.l.bf16 %v8424_v38  ;;  %v12029_v51 = vunpack.c.h.bf16 %v8424_v38 }
 0x67b   : > { %v12011_v3 = vsel %vm487_vm0, %v3650_v37, %v3652_v36  ;;  %v12021_v4 = vsel %vm487_vm0, %v3652_v36, %v3654_v20  ;;  %v3658_v37 = vrot.slane %v12005_v23, 7  ;;  %v16619_v36 = vld [vmem:[#allocation91_spill] sm:$0xff] }
 0x67c   : > { %16613 = vst [vmem:[#allocation311_spill] sm:$0xff] %v12011_v3  ;;  %16615 = vst [vmem:[#allocation312_spill] sm:$0xff] %v12021_v4  ;;  %v3722_v19 = vmul.f32 %v12011_v3, %v16616_v22  ;;  %v3723_v22 = vmul.f32 %v12021_v4, %v16619_v36  ;;  %v3662_v6 = vrot.slane %v12029_v51, 7 }
 0x67d   : > { %3800 = vrot.lane.b32.xlu1 %v3717_v47, %s8835_s22  ;;  %3802 = vrot.lane.b32.xlu0 %v3718_v39, %s8835_s22  ;;  %v3656_v47 = vrot.slane %v11995_v29, 7  ;;  %v16614_v39 = vld [vmem:[#allocation85_spill] sm:$0xff] }
 0x67e   : > { %v3721_v18 = vmul.f32 %v12008_v53, %v16614_v39  ;;  %v16620_v39 = vld [vmem:[#allocation96_spill] sm:$0xff] }
 0x67f   : > { %v12027_v31 = vsel %vm487_vm0, %v3654_v20, %v3656_v47  ;;  %v12042_v38 = vsel %vm487_vm0, %v3656_v47, %v3658_v37  ;;  %v16624_v47 = vld [vmem:[#allocation99_spill] sm:$0xff] }
 0x680   : > { %16617 = vst [vmem:[#allocation313_spill] sm:$0xff] %v12027_v31  ;;  %v3724_v3 = vmul.f32 %v12027_v31, %v16620_v39  ;;  %16621 = vst [vmem:[#allocation315_spill] sm:$0xff] %v12042_v38 }
 0x681   : > { %3804 = vrot.lane.b32.xlu1 %v3719_v59, %s8835_s22  ;;  %3806 = vrot.lane.b32.xlu0 %v3720_v28, %s8835_s22  ;;  %v3660_v59 = vrot.slane %v12014_v24, 7  ;;  %v12033_v28 = vunpack.c.l.bf16 %v11732_v9 }
 0x683   : > { %16618 = vst [vmem:[#allocation314_spill] sm:$0xff] %v12033_v28  ;;  %v12046_v9 = vsel %vm487_vm0, %v3658_v37, %v3660_v59  ;;  %v12058_v37 = vsel %vm487_vm0, %v3660_v59, %v3662_v6  ;;  %v16629_v59 = vrot.slane %v11746_v41, 7 }
 0x684   : > { %16622 = vst [vmem:[#allocation316_spill] sm:$0xff] %v12046_v9  ;;  %v3726_v36 = vmul.f32 %v12046_v9, %v16624_v47  ;;  %16625 = vst [vmem:[#allocation317_spill] sm:$0xff] %v12058_v37 }
 0x685   : > { %3808 = vrot.lane.b32.xlu1 %v3721_v18, %s8835_s22  ;;  %3810 = vrot.lane.b32.xlu0 %v3722_v19, %s8835_s22  ;;  %v3664_v18 = vrot.slane %v12033_v28, 7  ;;  %v16623_v19 = vld [vmem:[#allocation95_spill] sm:$0xff] }
 0x686   : > { %v3725_v39 = vmul.f32 %v12042_v38, %v16623_v19 }
 0x687   : > { %v3377_v20 = vpop.permute.xlu0 %3376  ;;  %v3379_v53 = vpop.permute.xlu1 %3378  ;;  %v12061_v4 = vsel %vm487_vm0, %v3662_v6, %v3664_v18  ;;  %v12073_v9 = vsel %vm487_vm0, %v3664_v18, %v16629_v59  ;;  %v16633_v18 = vld [vmem:[#allocation102_spill] sm:$0xff] }
 0x688   : > { %3473 = vst.msk [vmem:[#allocation2] sm:$0xff] %vm3472_vm10, %v3377_v20  ;;  %3474 = vst.msk [vmem:[#allocation2 + $0x8] sm:$0xff] %vm3472_vm10, %v3379_v53  ;;  %v16628_v53 = vld [vmem:[#allocation101_spill] sm:$0xff] }
 0x689   : > { %3812 = vrot.lane.b32.xlu1 %v3723_v22, %s8835_s22  ;;  %3814 = vrot.lane.b32.xlu0 %v3724_v3, %s8835_s22  ;;  %16626 = vst [vmem:[#allocation318_spill] sm:$0xff] %v12061_v4  ;;  %v16627_v3 = vld [vmem:[#allocation98_spill] sm:$0xff]  ;;  %v3728_v20 = vmul.f32 %v12061_v4, %v16628_v53  ;;  %16630 = vst [vmem:[#allocation319_spill] sm:$0xff] %v12073_v9 }
 0x68a   : > { %v3727_v22 = vmul.f32 %v12058_v37, %v16627_v3 }
 0x68b   : > { %v3381_v31 = vpop.permute.xlu0 %3380 }
 0x68c   : > { %3475 = vst.msk [vmem:[#allocation2 + $0x10] sm:$0xff] %vm3472_vm10, %v3381_v31  ;;  %v16631_v31 = vld [vmem:[#allocation100_spill] sm:$0xff] }
 0x68d   : > { %3816 = vrot.lane.b32.xlu1 %v3725_v39, %s8835_s22  ;;  %3818 = vrot.lane.b32.xlu0 %v3726_v36, %s8835_s22  ;;  %v3729_v6 = vmul.f32 %v12073_v9, %v16631_v31  ;;  %v16632_v39 = vld [vmem:[#allocation103_spill] sm:$0xff]  ;;  %v15840_v31 = vrot.slane %v11748_v50, 1 }
 0x68e   : > { %v3891_v36 = vmul.f32 %v11748_v50, %v16632_v39 }
 0x68f   : > { %v3383_v47 = vpop.permute.xlu1 %3382  ;;  %v3385_v19 = vpop.permute.xlu0 %3384 }
 0x690   : > { %3476 = vst.msk [vmem:[#allocation2 + $0x18] sm:$0xff] %vm3472_vm10, %v3383_v47  ;;  %3477 = vst.msk [vmem:[#allocation2 + $0x20] sm:$0xff] %vm3472_vm10, %v3385_v19  ;;  %v3892_v19 = vmul.f32 %v11752_v27, %v16633_v18  ;;  %v16634_v47 = vld [vmem:[#allocation104_spill] sm:$0xff] }
 0x691   : > { %3820 = vrot.lane.b32.xlu1 %v3727_v22, %s8835_s22  ;;  %3822 = vrot.lane.b32.xlu0 %v3728_v20, %s8835_s22  ;;  %v3893_v22 = vmul.f32 %v11756_v32, %v16634_v47 }
 0x693   : > { %v3387_v53 = vpop.permute.xlu1 %3386  ;;  %v3389_v3 = vpop.permute.xlu0 %3388 }
 0x694   : > { %3478 = vst.msk [vmem:[#allocation2 + $0x28] sm:$0xff] %vm3472_vm10, %v3387_v53  ;;  %3479 = vst.msk [vmem:[#allocation2 + $0x30] sm:$0xff] %vm3472_vm10, %v3389_v3  ;;  %v16635_v3 = vld [vmem:[#allocation105_spill] sm:$0xff] }
 0x695   : > { %3824 = vrot.lane.b32.xlu1 %v3729_v6, %s8835_s22  ;;  %3955 = vrot.lane.b32.xlu0 %v3891_v36, %s8836_s21  ;;  %v3894_v53 = vmul.f32 %v11773_v56, %v16635_v3  ;;  %v16636_v6 = vld [vmem:[#allocation106_spill] sm:$0xff]  ;;  %s8843_s22 = smov 68  }
 0x696   : > { %v3895_v36 = vmul.f32 %v11784_v15, %v16636_v6 }
 0x697   : > { %v3391_v20 = vpop.permute.xlu1 %3390  ;;  %v3393_v59 = vpop.permute.xlu0 %3392 }
 0x698   : > { %3480 = vst.msk [vmem:[#allocation2 + $0x38] sm:$0xff] %vm3472_vm10, %v3391_v20  ;;  %3481 = vst.msk [vmem:[#allocation2 + $0x40] sm:$0xff] %vm3472_vm10, %v3393_v59  ;;  %v16637_v20 = vld [vmem:[#allocation107_spill] sm:$0xff] }
 0x699   : > { %3957 = vrot.lane.b32.xlu1 %v3892_v19, %s8836_s21  ;;  %3959 = vrot.lane.b32.xlu0 %v3893_v22, %s8836_s21  ;;  %v3896_v19 = vmul.f32 %v11802_v13, %v16637_v20  ;;  %v16638_v22 = vld [vmem:[#allocation108_spill] sm:$0xff] }
 0x69a   : > { %v3897_v59 = vmul.f32 %v11805_v10, %v16638_v22 }
 0x69b   : > { %v3395_v18 = vpop.permute.xlu1 %3394  ;;  %v3397_v39 = vpop.permute.xlu0 %3396 }
 0x69c   : > { %3482 = vst.msk [vmem:[#allocation2 + $0x48] sm:$0xff] %vm3472_vm10, %v3395_v18  ;;  %3483 = vst.msk [vmem:[#allocation2 + $0x50] sm:$0xff] %vm3472_vm10, %v3397_v39  ;;  %v16639_v39 = vld [vmem:[#allocation109_spill] sm:$0xff] }
 0x69d   : > { %3961 = vrot.lane.b32.xlu1 %v3894_v53, %s8836_s21  ;;  %3963 = vrot.lane.b32.xlu0 %v3895_v36, %s8836_s21  ;;  %v3898_v18 = vmul.f32 %v11817_v8, %v16639_v39  ;;  %v16640_v53 = vld [vmem:[#allocation110_spill] sm:$0xff] }
 0x69e   : > { %v3899_v36 = vmul.f32 %v11824_v46, %v16640_v53 }
 0x69f   : > { %v3399_v3 = vpop.permute.xlu1 %3398  ;;  %v3401_v47 = vpop.permute.xlu0 %3400 }
 0x6a0   : > { %3484 = vst.msk [vmem:[#allocation2 + $0x58] sm:$0xff] %vm3472_vm10, %v3399_v3  ;;  %3485 = vst.msk [vmem:[#allocation2 + $0x60] sm:$0xff] %vm3472_vm10, %v3401_v47  ;;  %v16641_v47 = vld [vmem:[#allocation111_spill] sm:$0xff] }
 0x6a1   : > { %3965 = vrot.lane.b32.xlu1 %v3896_v19, %s8836_s21  ;;  %3967 = vrot.lane.b32.xlu0 %v3897_v59, %s8836_s21  ;;  %v3900_v3 = vmul.f32 %v11834_v2, %v16641_v47  ;;  %v16642_v19 = vld [vmem:[#allocation112_spill] sm:$0xff] }
 0x6a2   : > { %v3901_v59 = vmul.f32 %v11843_v42, %v16642_v19 }
 0x6a3   : > { %v3403_v20 = vpop.permute.xlu1 %3402  ;;  %v3405_v6 = vpop.permute.xlu0 %3404 }
 0x6a4   : > { %3486 = vst.msk [vmem:[#allocation2 + $0x68] sm:$0xff] %vm3472_vm10, %v3403_v20  ;;  %3487 = vst.msk [vmem:[#allocation2 + $0x70] sm:$0xff] %vm3472_vm10, %v3405_v6  ;;  %v16643_v6 = vld [vmem:[#allocation113_spill] sm:$0xff] }
 0x6a5   : > { %3969 = vrot.lane.b32.xlu1 %v3898_v18, %s8836_s21  ;;  %3971 = vrot.lane.b32.xlu0 %v3899_v36, %s8836_s21  ;;  %v3902_v20 = vmul.f32 %v11859_v1, %v16643_v6  ;;  %v16644_v18 = vld [vmem:[#allocation114_spill] sm:$0xff] }
 0x6a6   : > { %v3903_v36 = vmul.f32 %v11862_v34, %v16644_v18 }
 0x6a7   : > { %v3407_v39 = vpop.permute.xlu1 %3406  ;;  %v3409_v22 = vpop.permute.xlu0 %3408 }
 0x6a8   : > { %3488 = vst.msk [vmem:[#allocation2 + $0x78] sm:$0xff] %vm3472_vm10, %v3407_v39  ;;  %3489 = vst.msk [vmem:[#allocation2 + $0x80] sm:$0xff] %vm3472_vm10, %v3409_v22  ;;  %v16645_v22 = vld [vmem:[#allocation115_spill] sm:$0xff] }
 0x6a9   : > { %3973 = vrot.lane.b32.xlu1 %v3900_v3, %s8836_s21  ;;  %3975 = vrot.lane.b32.xlu0 %v3901_v59, %s8836_s21  ;;  %v3904_v39 = vmul.f32 %v11874_v11, %v16645_v22  ;;  %v16646_v3 = vld [vmem:[#allocation116_spill] sm:$0xff] }
 0x6aa   : > { %v3905_v59 = vmul.f32 %v11881_v55, %v16646_v3 }
 0x6ab   : > { %v3411_v47 = vpop.permute.xlu1 %3410  ;;  %v3413_v53 = vpop.permute.xlu0 %3412 }
 0x6ac   : > { %3490 = vst.msk [vmem:[#allocation2 + $0x88] sm:$0xff] %vm3472_vm10, %v3411_v47  ;;  %3491 = vst.msk [vmem:[#allocation2 + $0x90] sm:$0xff] %vm3472_vm10, %v3413_v53  ;;  %v16647_v53 = vld [vmem:[#allocation117_spill] sm:$0xff] }
 0x6ad   : > { %3977 = vrot.lane.b32.xlu1 %v3902_v20, %s8836_s21  ;;  %3979 = vrot.lane.b32.xlu0 %v3903_v36, %s8836_s21  ;;  %v3906_v47 = vmul.f32 %v11891_v62, %v16647_v53  ;;  %v16648_v20 = vld [vmem:[#allocation118_spill] sm:$0xff] }
 0x6ae   : > { %v3907_v36 = vmul.f32 %v11900_v14, %v16648_v20 }
 0x6af   : > { %v3415_v6 = vpop.permute.xlu1 %3414  ;;  %v3417_v19 = vpop.permute.xlu0 %3416 }
 0x6b0   : > { %3492 = vst.msk [vmem:[#allocation2 + $0x98] sm:$0xff] %vm3472_vm10, %v3415_v6  ;;  %3493 = vst.msk [vmem:[#allocation2 + $0xa0] sm:$0xff] %vm3472_vm10, %v3417_v19  ;;  %v16649_v19 = vld [vmem:[#allocation119_spill] sm:$0xff] }
 0x6b1   : > { %3981 = vrot.lane.b32.xlu1 %v3904_v39, %s8836_s21  ;;  %3983 = vrot.lane.b32.xlu0 %v3905_v59, %s8836_s21  ;;  %v3908_v6 = vmul.f32 %v11916_v52, %v16649_v19  ;;  %v16650_v39 = vld [vmem:[#allocation120_spill] sm:$0xff] }
 0x6b2   : > { %v3909_v59 = vmul.f32 %v11919_v12, %v16650_v39 }
 0x6b3   : > { %v3419_v22 = vpop.permute.xlu1 %3418  ;;  %v3421_v18 = vpop.permute.xlu0 %3420 }
 0x6b4   : > { %3494 = vst.msk [vmem:[#allocation2 + $0xa8] sm:$0xff] %vm3472_vm10, %v3419_v22  ;;  %3495 = vst.msk [vmem:[#allocation2 + $0xb0] sm:$0xff] %vm3472_vm10, %v3421_v18  ;;  %v16651_v18 = vld [vmem:[#allocation121_spill] sm:$0xff] }
 0x6b5   : > { %3985 = vrot.lane.b32.xlu1 %v3906_v47, %s8836_s21  ;;  %3987 = vrot.lane.b32.xlu0 %v3907_v36, %s8836_s21  ;;  %v3910_v22 = vmul.f32 %v11931_v44, %v16651_v18  ;;  %v16652_v47 = vld [vmem:[#allocation122_spill] sm:$0xff] }
 0x6b6   : > { %v3911_v36 = vmul.f32 %v11938_v21, %v16652_v47 }
 0x6b7   : > { %v3423_v53 = vpop.permute.xlu1 %3422  ;;  %v3425_v3 = vpop.permute.xlu0 %3424 }
 0x6b8   : > { %3496 = vst.msk [vmem:[#allocation2 + $0xb8] sm:$0xff] %vm3472_vm10, %v3423_v53  ;;  %3497 = vst.msk [vmem:[#allocation2 + $0xc0] sm:$0xff] %vm3472_vm10, %v3425_v3  ;;  %v16653_v3 = vld [vmem:[#allocation123_spill] sm:$0xff] }
 0x6b9   : > { %3989 = vrot.lane.b32.xlu1 %v3908_v6, %s8836_s21  ;;  %3991 = vrot.lane.b32.xlu0 %v3909_v59, %s8836_s21  ;;  %v3912_v53 = vmul.f32 %v11948_v26, %v16653_v3  ;;  %v16654_v6 = vld [vmem:[#allocation124_spill] sm:$0xff] }
 0x6ba   : > { %v3913_v59 = vmul.f32 %v11957_v45, %v16654_v6 }
 0x6bb   : > { %v3427_v19 = vpop.permute.xlu1 %3426  ;;  %v3429_v20 = vpop.permute.xlu0 %3428 }
 0x6bc   : > { %3498 = vst.msk [vmem:[#allocation2 + $0xc8] sm:$0xff] %vm3472_vm10, %v3427_v19  ;;  %3499 = vst.msk [vmem:[#allocation2 + $0xd0] sm:$0xff] %vm3472_vm10, %v3429_v20  ;;  %v16655_v20 = vld [vmem:[#allocation125_spill] sm:$0xff] }
 0x6bd   : > { %3993 = vrot.lane.b32.xlu1 %v3910_v22, %s8836_s21  ;;  %3995 = vrot.lane.b32.xlu0 %v3911_v36, %s8836_s21  ;;  %v3914_v19 = vmul.f32 %v11973_v25, %v16655_v20  ;;  %v16656_v22 = vld [vmem:[#allocation126_spill] sm:$0xff] }
 0x6be   : > { %v3915_v36 = vmul.f32 %v11976_v43, %v16656_v22 }
 0x6bf   : > { %v3431_v18 = vpop.permute.xlu1 %3430  ;;  %v3433_v39 = vpop.permute.xlu0 %3432 }
 0x6c0   : > { %3500 = vst.msk [vmem:[#allocation2 + $0xd8] sm:$0xff] %vm3472_vm10, %v3431_v18  ;;  %3501 = vst.msk [vmem:[#allocation2 + $0xe0] sm:$0xff] %vm3472_vm10, %v3433_v39  ;;  %v16657_v39 = vld [vmem:[#allocation127_spill] sm:$0xff] }
 0x6c1   : > { %3997 = vrot.lane.b32.xlu1 %v3912_v53, %s8836_s21  ;;  %3999 = vrot.lane.b32.xlu0 %v3913_v59, %s8836_s21  ;;  %v3916_v18 = vmul.f32 %v11988_v57, %v16657_v39  ;;  %v16658_v53 = vld [vmem:[#allocation128_spill] sm:$0xff] }
 0x6c2   : > { %v3917_v59 = vmul.f32 %v11995_v29, %v16658_v53  ;;  %v4085_v53 = vrot.slane %v11752_v27, 1  ;;  %v4089_v27 = vrot.slane %v11756_v32, 1 }
 0x6c3   : > { %v3435_v3 = vpop.permute.xlu1 %3434  ;;  %v3437_v47 = vpop.permute.xlu0 %3436 }
 0x6c4   : > { %3502 = vst.msk [vmem:[#allocation2 + $0xe8] sm:$0xff] %vm3472_vm10, %v3435_v3  ;;  %3503 = vst.msk [vmem:[#allocation2 + $0xf0] sm:$0xff] %vm3472_vm10, %v3437_v47  ;;  %v16659_v47 = vld [vmem:[#allocation129_spill] sm:$0xff] }
 0x6c5   : > { %4001 = vrot.lane.b32.xlu1 %v3914_v19, %s8836_s21  ;;  %4003 = vrot.lane.b32.xlu0 %v3915_v36, %s8836_s21  ;;  %v3918_v3 = vmul.f32 %v12005_v23, %v16659_v47  ;;  %v16660_v19 = vld [vmem:[#allocation130_spill] sm:$0xff] }
 0x6c6   : > { %v3919_v36 = vmul.f32 %v12014_v24, %v16660_v19 }
 0x6c7   : > { %v3439_v20 = vpop.permute.xlu1 %3438  ;;  %v3763_v6 = vpop.permute.xlu0 %3762 }
 0x6c8   : > { %3504 = vst.msk [vmem:[#allocation2 + $0xf8] sm:$0xff] %vm3472_vm10, %v3439_v20  ;;  %vm6947_vm10 = vcmask 786144  }
 0x6c9   : > { %3859 = vst.msk [vmem:[#allocation2] sm:$0xff] %vm3858_vm11, %v3763_v6  ;;  %4005 = vrot.lane.b32.xlu1 %v3916_v18, %s8836_s21  ;;  %4007 = vrot.lane.b32.xlu0 %v3917_v59, %s8836_s21  ;;  %v16661_v6 = vld [vmem:[#allocation131_spill] sm:$0xff]  ;;  %v16662_v18 = vld [vmem:[#allocation132_spill] sm:$0xff] }
 0x6ca   : > { %v3920_v20 = vmul.f32 %v12029_v51, %v16661_v6  ;;  %v3921_v59 = vmul.f32 %v12033_v28, %v16662_v18  ;;  %v16665_v18 = vld [vmem:[#allocation7_spill] sm:$0xff] }
 0x6cb   : > { %v3765_v39 = vpop.permute.xlu1 %3764  ;;  %v3767_v22 = vpop.permute.xlu0 %3766 }
 0x6cc   : > { %3860 = vst.msk [vmem:[#allocation2 + $0x8] sm:$0xff] %vm3858_vm11, %v3765_v39  ;;  %3861 = vst.msk [vmem:[#allocation2 + $0x10] sm:$0xff] %vm3858_vm11, %v3767_v22  ;;  %v12209_v39 = vsel %vm1160_vm3, %v15840_v31, %v4085_v53  ;;  %v4090_v22 = vrot.slane %v11773_v56, 1  ;;  %v12221_v31 = vsel %vm1160_vm3, %v4085_v53, %v4089_v27  ;;  %v4092_v56 = vrot.slane %v11784_v15, 1 }
 0x6cd   : > { %4009 = vrot.lane.b32.xlu1 %v3918_v3, %s8836_s21  ;;  %4011 = vrot.lane.b32.xlu0 %v3919_v36, %s8836_s21  ;;  %16663 = vst [vmem:[#allocation320_spill] sm:$0xff] %v12209_v39  ;;  %v16664_v3 = vld [vmem:[#allocation133_spill] sm:$0xff]  ;;  %v4181_v6 = vmul.f32 %v12209_v39, %v16665_v18  ;;  %16666 = vst [vmem:[#allocation321_spill] sm:$0xff] %v12221_v31 }
 0x6ce   : > { %v3922_v36 = vmul.f32 %v11746_v41, %v16664_v3 }
 0x6cf   : > { %v3769_v19 = vpop.permute.xlu1 %3768  ;;  %v3771_v47 = vpop.permute.xlu0 %3770 }
 0x6d0   : > { %3862 = vst.msk [vmem:[#allocation2 + $0x18] sm:$0xff] %vm3858_vm11, %v3769_v19  ;;  %3863 = vst.msk [vmem:[#allocation2 + $0x20] sm:$0xff] %vm3858_vm11, %v3771_v47  ;;  %v4094_v19 = vrot.slane %v11802_v13, 1  ;;  %v12226_v47 = vsel %vm1160_vm3, %v4089_v27, %v4090_v22 }
 0x6d1   : > { %4013 = vrot.lane.b32.xlu1 %v3920_v20, %s8836_s21  ;;  %4015 = vrot.lane.b32.xlu0 %v3921_v59, %s8836_s21  ;;  %16667 = vst [vmem:[#allocation322_spill] sm:$0xff] %v12226_v47  ;;  %v16668_v20 = vld [vmem:[#allocation11_spill] sm:$0xff] }
 0x6d2   : > { %v4182_v53 = vmul.f32 %v12221_v31, %v16668_v20  ;;  %v16669_v59 = vld [vmem:[#allocation15_spill] sm:$0xff]  ;;  %v12237_v27 = vsel %vm1160_vm3, %v4092_v56, %v4094_v19 }
 0x6d3   : > { %v3773_v32 = vpop.permute.xlu1 %3772  ;;  %v3775_v9 = vpop.permute.xlu0 %3774  ;;  %v4183_v18 = vmul.f32 %v12226_v47, %v16669_v59  ;;  %16670 = vst [vmem:[#allocation323_spill] sm:$0xff] %v12237_v27  ;;  %v16673_v20 = vld [vmem:[#allocation19_spill] sm:$0xff] }
 0x6d4   : > { %3864 = vst.msk [vmem:[#allocation2 + $0x28] sm:$0xff] %vm3858_vm11, %v3773_v32  ;;  %3865 = vst.msk [vmem:[#allocation2 + $0x30] sm:$0xff] %vm3858_vm11, %v3775_v9  ;;  %v4096_v32 = vrot.slane %v11805_v10, 1  ;;  %v4098_v9 = vrot.slane %v11817_v8, 1 }
 0x6d5   : > { %4017 = vrot.lane.b32.xlu1 %v3922_v36, %s8836_s21  ;;  %4245 = vrot.lane.b32.xlu0 %v4181_v6, %s8837_s23  ;;  %v12242_v36 = vsel %vm1160_vm3, %v4090_v22, %v4092_v56  ;;  %v16672_v6 = vld [vmem:[#allocation8_spill] sm:$0xff]  ;;  %v4100_v56 = vrot.slane %v11824_v46, 1  ;;  %v4102_v22 = vrot.slane %v11834_v2, 1  ;;  %s376_s21 = sadd.s32 2, %s8800_s27 }
 0x6d6   : > { %16671 = vst [vmem:[#allocation324_spill] sm:$0xff] %v12242_v36  ;;  %v4185_v59 = vmul.f32 %v12237_v27, %v16672_v6  ;;  %v4184_v31 = vmul.f32 %v12242_v36, %v16673_v20  ;;  %v12253_v8 = vsel %vm1160_vm3, %v4096_v32, %v4098_v9  ;;  %p379_p1 = scmp.lt.s32.totalorder %s376_s21, 17 }
 0x6d7   : > { %v3777_v3 = vpop.permute.xlu1 %3776  ;;  %v3779_v39 = vpop.permute.xlu0 %3778  ;;  %16674 = vst [vmem:[#allocation325_spill] sm:$0xff] %v12253_v8  ;;  %v12269_v36 = vsel %vm1160_vm3, %v4100_v56, %v4102_v22 }
 0x6d8   : > { %3866 = vst.msk [vmem:[#allocation2 + $0x38] sm:$0xff] %vm3858_vm11, %v3777_v3  ;;  %3867 = vst.msk [vmem:[#allocation2 + $0x40] sm:$0xff] %vm3858_vm11, %v3779_v39  ;;  %v12258_v39 = vsel %vm1160_vm3, %v4094_v19, %v4096_v32  ;;  %v4104_v19 = vrot.slane %v11843_v42, 1  ;;  %v16681_v32 = vld [vmem:[#allocation138_spill] sm:$0xff]  ;;  %s17432_s21 = smov (!%p379_p1, %s376_s21), 17 }
 0x6d9   : > { %4247 = vrot.lane.b32.xlu1 %v4182_v53, %s8837_s23  ;;  %4249 = vrot.lane.b32.xlu0 %v4183_v18, %s8837_s23  ;;  %16675 = vst [vmem:[#allocation326_spill] sm:$0xff] %v12258_v39  ;;  %v16676_v18 = vld [vmem:[#allocation12_spill] sm:$0xff]  ;;  %v16677_v53 = vld [vmem:[#allocation134_spill] sm:$0xff]  ;;  %16678 = vst [vmem:[#allocation327_spill] sm:$0xff] %v12269_v36 }
 0x6da   : > { %v4187_v3 = vmul.f32 %v12253_v8, %v16676_v18  ;;  %v4186_v20 = vmul.f32 %v12258_v39, %v16677_v53 }
 0x6db   : > { %v3781_v47 = vpop.permute.xlu1 %3780  ;;  %v3783_v13 = vpop.permute.xlu0 %3782 }
 0x6dc   : > { %3868 = vst.msk [vmem:[#allocation2 + $0x48] sm:$0xff] %vm3858_vm11, %v3781_v47  ;;  %3869 = vst.msk [vmem:[#allocation2 + $0x50] sm:$0xff] %vm3858_vm11, %v3783_v13  ;;  %v4106_v47 = vrot.slane %v11859_v1, 1  ;;  %v12274_v13 = vsel %vm1160_vm3, %v4098_v9, %v4100_v56  ;;  %v4108_v9 = vrot.slane %v11862_v34, 1 }
 0x6dd   : > { %4251 = vrot.lane.b32.xlu1 %v4184_v31, %s8837_s23  ;;  %4253 = vrot.lane.b32.xlu0 %v4185_v59, %s8837_s23  ;;  %16679 = vst [vmem:[#allocation328_spill] sm:$0xff] %v12274_v13  ;;  %v16680_v31 = vld [vmem:[#allocation18_spill] sm:$0xff]  ;;  %v4188_v53 = vmul.f32 %v12274_v13, %v16681_v32 }
 0x6de   : > { %v4189_v59 = vmul.f32 %v12269_v36, %v16680_v31  ;;  %v12285_v39 = vsel %vm1160_vm3, %v4104_v19, %v4106_v47 }
 0x6df   : > { %v3785_v6 = vpop.permute.xlu1 %3784  ;;  %v3787_v27 = vpop.permute.xlu0 %3786  ;;  %16682 = vst [vmem:[#allocation329_spill] sm:$0xff] %v12285_v39 }
 0x6e0   : > { %3870 = vst.msk [vmem:[#allocation2 + $0x58] sm:$0xff] %vm3858_vm11, %v3785_v6  ;;  %3871 = vst.msk [vmem:[#allocation2 + $0x60] sm:$0xff] %vm3858_vm11, %v3787_v27  ;;  %v4110_v6 = vrot.slane %v11874_v11, 1  ;;  %v12290_v27 = vsel %vm1160_vm3, %v4102_v22, %v4104_v19  ;;  %v4112_v22 = vrot.slane %v11881_v55, 1 }
 0x6e1   : > { %4255 = vrot.lane.b32.xlu1 %v4186_v20, %s8837_s23  ;;  %4257 = vrot.lane.b32.xlu0 %v4187_v3, %s8837_s23  ;;  %16683 = vst [vmem:[#allocation330_spill] sm:$0xff] %v12290_v27  ;;  %v16684_v20 = vld [vmem:[#allocation137_spill] sm:$0xff]  ;;  %v16685_v3 = vld [vmem:[#allocation142_spill] sm:$0xff] }
 0x6e2   : > { %v4191_v56 = vmul.f32 %v12285_v39, %v16684_v20  ;;  %v4190_v32 = vmul.f32 %v12290_v27, %v16685_v3  ;;  %v12301_v13 = vsel %vm1160_vm3, %v4108_v9, %v4110_v6 }
 0x6e3   : > { %v3789_v18 = vpop.permute.xlu1 %3788  ;;  %v3791_v8 = vpop.permute.xlu0 %3790  ;;  %16686 = vst [vmem:[#allocation331_spill] sm:$0xff] %v12301_v13 }
 0x6e4   : > { %3872 = vst.msk [vmem:[#allocation2 + $0x68] sm:$0xff] %vm3858_vm11, %v3789_v18  ;;  %3873 = vst.msk [vmem:[#allocation2 + $0x70] sm:$0xff] %vm3858_vm11, %v3791_v8  ;;  %v4114_v18 = vrot.slane %v11891_v62, 1  ;;  %v12306_v8 = vsel %vm1160_vm3, %v4106_v47, %v4108_v9  ;;  %v4116_v47 = vrot.slane %v11900_v14, 1 }
 0x6e5   : > { %4259 = vrot.lane.b32.xlu1 %v4188_v53, %s8837_s23  ;;  %4261 = vrot.lane.b32.xlu0 %v4189_v59, %s8837_s23  ;;  %16687 = vst [vmem:[#allocation332_spill] sm:$0xff] %v12306_v8  ;;  %v16688_v53 = vld [vmem:[#allocation141_spill] sm:$0xff]  ;;  %v16689_v59 = vld [vmem:[#allocation146_spill] sm:$0xff] }
 0x6e6   : > { %v4193_v19 = vmul.f32 %v12301_v13, %v16688_v53  ;;  %v4192_v3 = vmul.f32 %v12306_v8, %v16689_v59  ;;  %v12317_v27 = vsel %vm1160_vm3, %v4112_v22, %v4114_v18 }
 0x6e7   : > { %v3793_v31 = vpop.permute.xlu1 %3792  ;;  %v3795_v36 = vpop.permute.xlu0 %3794  ;;  %16690 = vst [vmem:[#allocation333_spill] sm:$0xff] %v12317_v27 }
 0x6e8   : > { %3874 = vst.msk [vmem:[#allocation2 + $0x78] sm:$0xff] %vm3858_vm11, %v3793_v31  ;;  %3875 = vst.msk [vmem:[#allocation2 + $0x80] sm:$0xff] %vm3858_vm11, %v3795_v36  ;;  %v4118_v31 = vrot.slane %v11916_v52, 1  ;;  %v12322_v36 = vsel %vm1160_vm3, %v4110_v6, %v4112_v22  ;;  %v4120_v6 = vrot.slane %v11919_v12, 1 }
 0x6e9   : > { %4263 = vrot.lane.b32.xlu1 %v4190_v32, %s8837_s23  ;;  %4265 = vrot.lane.b32.xlu0 %v4191_v56, %s8837_s23  ;;  %16691 = vst [vmem:[#allocation334_spill] sm:$0xff] %v12322_v36  ;;  %v16692_v32 = vld [vmem:[#allocation145_spill] sm:$0xff]  ;;  %v16693_v56 = vld [vmem:[#allocation150_spill] sm:$0xff] }
 0x6ea   : > { %v4195_v9 = vmul.f32 %v12317_v27, %v16692_v32  ;;  %v4194_v59 = vmul.f32 %v12322_v36, %v16693_v56  ;;  %v12333_v8 = vsel %vm1160_vm3, %v4116_v47, %v4118_v31 }
 0x6eb   : > { %v3797_v20 = vpop.permute.xlu1 %3796  ;;  %v3799_v39 = vpop.permute.xlu0 %3798  ;;  %16694 = vst [vmem:[#allocation335_spill] sm:$0xff] %v12333_v8 }
 0x6ec   : > { %3876 = vst.msk [vmem:[#allocation2 + $0x88] sm:$0xff] %vm3858_vm11, %v3797_v20  ;;  %3877 = vst.msk [vmem:[#allocation2 + $0x90] sm:$0xff] %vm3858_vm11, %v3799_v39  ;;  %v4122_v20 = vrot.slane %v11931_v44, 1  ;;  %v12338_v39 = vsel %vm1160_vm3, %v4114_v18, %v4116_v47  ;;  %v4124_v18 = vrot.slane %v11938_v21, 1 }
 0x6ed   : > { %4267 = vrot.lane.b32.xlu1 %v4192_v3, %s8837_s23  ;;  %4269 = vrot.lane.b32.xlu0 %v4193_v19, %s8837_s23  ;;  %16695 = vst [vmem:[#allocation336_spill] sm:$0xff] %v12338_v39  ;;  %v16696_v3 = vld [vmem:[#allocation149_spill] sm:$0xff]  ;;  %v16697_v19 = vld [vmem:[#allocation154_spill] sm:$0xff] }
 0x6ee   : > { %v4197_v22 = vmul.f32 %v12333_v8, %v16696_v3  ;;  %v4196_v56 = vmul.f32 %v12338_v39, %v16697_v19  ;;  %v12349_v36 = vsel %vm1160_vm3, %v4120_v6, %v4122_v20 }
 0x6ef   : > { %v3801_v53 = vpop.permute.xlu1 %3800  ;;  %v3803_v13 = vpop.permute.xlu0 %3802  ;;  %16698 = vst [vmem:[#allocation337_spill] sm:$0xff] %v12349_v36 }
 0x6f0   : > { %3878 = vst.msk [vmem:[#allocation2 + $0x98] sm:$0xff] %vm3858_vm11, %v3801_v53  ;;  %3879 = vst.msk [vmem:[#allocation2 + $0xa0] sm:$0xff] %vm3858_vm11, %v3803_v13  ;;  %v4126_v53 = vrot.slane %v11948_v26, 1  ;;  %v12354_v13 = vsel %vm1160_vm3, %v4118_v31, %v4120_v6  ;;  %v4128_v31 = vrot.slane %v11957_v45, 1 }
 0x6f1   : > { %4271 = vrot.lane.b32.xlu1 %v4194_v59, %s8837_s23  ;;  %4273 = vrot.lane.b32.xlu0 %v4195_v9, %s8837_s23  ;;  %16699 = vst [vmem:[#allocation338_spill] sm:$0xff] %v12354_v13  ;;  %v16700_v59 = vld [vmem:[#allocation153_spill] sm:$0xff]  ;;  %v16701_v9 = vld [vmem:[#allocation158_spill] sm:$0xff] }
 0x6f2   : > { %v4199_v47 = vmul.f32 %v12349_v36, %v16700_v59  ;;  %v4198_v19 = vmul.f32 %v12354_v13, %v16701_v9  ;;  %v12365_v39 = vsel %vm1160_vm3, %v4124_v18, %v4126_v53 }
 0x6f3   : > { %v3805_v32 = vpop.permute.xlu1 %3804  ;;  %v3807_v27 = vpop.permute.xlu0 %3806  ;;  %16702 = vst [vmem:[#allocation339_spill] sm:$0xff] %v12365_v39 }
 0x6f4   : > { %3880 = vst.msk [vmem:[#allocation2 + $0xa8] sm:$0xff] %vm3858_vm11, %v3805_v32  ;;  %3881 = vst.msk [vmem:[#allocation2 + $0xb0] sm:$0xff] %vm3858_vm11, %v3807_v27  ;;  %v4130_v32 = vrot.slane %v11973_v25, 1  ;;  %v12370_v27 = vsel %vm1160_vm3, %v4122_v20, %v4124_v18  ;;  %v4132_v20 = vrot.slane %v11976_v43, 1 }
 0x6f5   : > { %4275 = vrot.lane.b32.xlu1 %v4196_v56, %s8837_s23  ;;  %4277 = vrot.lane.b32.xlu0 %v4197_v22, %s8837_s23  ;;  %16703 = vst [vmem:[#allocation340_spill] sm:$0xff] %v12370_v27  ;;  %v16704_v56 = vld [vmem:[#allocation157_spill] sm:$0xff]  ;;  %v16705_v22 = vld [vmem:[#allocation162_spill] sm:$0xff] }
 0x6f6   : > { %v4201_v6 = vmul.f32 %v12365_v39, %v16704_v56  ;;  %v4200_v9 = vmul.f32 %v12370_v27, %v16705_v22  ;;  %v12381_v13 = vsel %vm1160_vm3, %v4128_v31, %v4130_v32 }
 0x6f7   : > { %v3809_v3 = vpop.permute.xlu1 %3808  ;;  %v3811_v8 = vpop.permute.xlu0 %3810  ;;  %16706 = vst [vmem:[#allocation341_spill] sm:$0xff] %v12381_v13 }
 0x6f8   : > { %3882 = vst.msk [vmem:[#allocation2 + $0xb8] sm:$0xff] %vm3858_vm11, %v3809_v3  ;;  %3883 = vst.msk [vmem:[#allocation2 + $0xc0] sm:$0xff] %vm3858_vm11, %v3811_v8  ;;  %v4134_v3 = vrot.slane %v11988_v57, 1  ;;  %v12386_v8 = vsel %vm1160_vm3, %v4126_v53, %v4128_v31  ;;  %v4136_v53 = vrot.slane %v11995_v29, 1 }
 0x6f9   : > { %4279 = vrot.lane.b32.xlu1 %v4198_v19, %s8837_s23  ;;  %4281 = vrot.lane.b32.xlu0 %v4199_v47, %s8837_s23  ;;  %16707 = vst [vmem:[#allocation342_spill] sm:$0xff] %v12386_v8  ;;  %v16708_v19 = vld [vmem:[#allocation161_spill] sm:$0xff]  ;;  %v16709_v47 = vld [vmem:[#allocation166_spill] sm:$0xff] }
 0x6fa   : > { %v4203_v18 = vmul.f32 %v12381_v13, %v16708_v19  ;;  %v4202_v22 = vmul.f32 %v12386_v8, %v16709_v47  ;;  %v12397_v27 = vsel %vm1160_vm3, %v4132_v20, %v4134_v3 }
 0x6fb   : > { %v3813_v59 = vpop.permute.xlu1 %3812  ;;  %v3815_v36 = vpop.permute.xlu0 %3814  ;;  %16710 = vst [vmem:[#allocation343_spill] sm:$0xff] %v12397_v27 }
 0x6fc   : > { %3884 = vst.msk [vmem:[#allocation2 + $0xc8] sm:$0xff] %vm3858_vm11, %v3813_v59  ;;  %3885 = vst.msk [vmem:[#allocation2 + $0xd0] sm:$0xff] %vm3858_vm11, %v3815_v36  ;;  %v4138_v59 = vrot.slane %v12005_v23, 1  ;;  %v12402_v36 = vsel %vm1160_vm3, %v4130_v32, %v4132_v20  ;;  %v4140_v32 = vrot.slane %v12014_v24, 1 }
 0x6fd   : > { %4283 = vrot.lane.b32.xlu1 %v4200_v9, %s8837_s23  ;;  %4285 = vrot.lane.b32.xlu0 %v4201_v6, %s8837_s23  ;;  %16711 = vst [vmem:[#allocation344_spill] sm:$0xff] %v12402_v36  ;;  %v16712_v9 = vld [vmem:[#allocation165_spill] sm:$0xff]  ;;  %v16713_v6 = vld [vmem:[#allocation170_spill] sm:$0xff] }
 0x6fe   : > { %v4205_v31 = vmul.f32 %v12397_v27, %v16712_v9  ;;  %v4204_v47 = vmul.f32 %v12402_v36, %v16713_v6  ;;  %v12413_v8 = vsel %vm1160_vm3, %v4136_v53, %v4138_v59 }
 0x6ff   : > { %v3817_v56 = vpop.permute.xlu1 %3816  ;;  %v3819_v39 = vpop.permute.xlu0 %3818  ;;  %16714 = vst [vmem:[#allocation345_spill] sm:$0xff] %v12413_v8 }
 0x700   : > { %3886 = vst.msk [vmem:[#allocation2 + $0xd8] sm:$0xff] %vm3858_vm11, %v3817_v56  ;;  %3887 = vst.msk [vmem:[#allocation2 + $0xe0] sm:$0xff] %vm3858_vm11, %v3819_v39  ;;  %v4142_v56 = vrot.slane %v12029_v51, 1  ;;  %v12418_v39 = vsel %vm1160_vm3, %v4134_v3, %v4136_v53  ;;  %v16718_v53 = vld [vmem:[#allocation173_spill] sm:$0xff] }
 0x701   : > { %4287 = vrot.lane.b32.xlu1 %v4202_v22, %s8837_s23  ;;  %4289 = vrot.lane.b32.xlu0 %v4203_v18, %s8837_s23  ;;  %16715 = vst [vmem:[#allocation346_spill] sm:$0xff] %v12418_v39  ;;  %v16716_v22 = vld [vmem:[#allocation169_spill] sm:$0xff]  ;;  %v16717_v18 = vld [vmem:[#allocation174_spill] sm:$0xff] }
 0x702   : > { %v4207_v20 = vmul.f32 %v12413_v8, %v16716_v22  ;;  %v4206_v6 = vmul.f32 %v12418_v39, %v16717_v18  ;;  %v12429_v3 = vsel %vm1160_vm3, %v4140_v32, %v4142_v56  ;;  %v16719_v18 = vld [vmem:[#allocation177_spill] sm:$0xff] }
 0x703   : > { %v3821_v19 = vpop.permute.xlu1 %3820  ;;  %v3823_v13 = vpop.permute.xlu0 %3822 }
 0x704   : > { %3888 = vst.msk [vmem:[#allocation2 + $0xe8] sm:$0xff] %vm3858_vm11, %v3821_v19  ;;  %3889 = vst.msk [vmem:[#allocation2 + $0xf0] sm:$0xff] %vm3858_vm11, %v3823_v13  ;;  %v4144_v19 = vrot.slane %v12033_v28, 1  ;;  %v4146_v13 = vrot.slane %v11746_v41, 1 }
 0x705   : > { %4291 = vrot.lane.b32.xlu1 %v4204_v47, %s8837_s23  ;;  %4293 = vrot.lane.b32.xlu0 %v4205_v31, %s8837_s23  ;;  %v12434_v47 = vsel %vm1160_vm3, %v4138_v59, %v4140_v32  ;;  %v4209_v31 = vmul.f32 %v12429_v3, %v16718_v53  ;;  %v16723_v53 = vrot.slane %v11748_v50, 1 }
 0x706   : > { %v4208_v22 = vmul.f32 %v12434_v47, %v16719_v18  ;;  %v12445_v36 = vsel %vm1160_vm3, %v4144_v19, %v4146_v13  ;;  %v12448_v59 = vsel %vm1160_vm3, %v4142_v56, %v4144_v19 }
 0x707   : > { %v3825_v9 = vpop.permute.xlu1 %3824  ;;  %v3956_v27 = vpop.permute.xlu0 %3955  ;;  %16720 = vst [vmem:[#allocation347_spill] sm:$0xff] %v12448_v59  ;;  %v12461_v56 = vsel %vm1160_vm3, %v4146_v13, %v16723_v53  ;;  %v16728_v53 = vld [vmem:[#allocation188_spill] sm:$0xff] }
 0x708   : > { %3890 = vst.msk [vmem:[#allocation2 + $0xf8] sm:$0xff] %vm3858_vm11, %v3825_v9  ;;  %16724 = vst [vmem:[#allocation348_spill] sm:$0xff] %v12461_v56  ;;  %vm7140_vm11 = vcmask 818944  }
 0x709   : > { %4052 = vst.msk [vmem:[#allocation2] sm:$0xff] %vm4051_vm12, %v3956_v27  ;;  %4295 = vrot.lane.b32.xlu1 %v4206_v6, %s8837_s23  ;;  %4297 = vrot.lane.b32.xlu0 %v4207_v20, %s8837_s23  ;;  %v16721_v27 = vld [vmem:[#allocation179_spill] sm:$0xff]  ;;  %v16722_v6 = vld [vmem:[#allocation181_spill] sm:$0xff] }
 0x70a   : > { %v4211_v9 = vmul.f32 %v12445_v36, %v16721_v27  ;;  %v4210_v32 = vmul.f32 %v12448_v59, %v16722_v6 }
 0x70b   : > { %v3958_v8 = vpop.permute.xlu1 %3957  ;;  %v3960_v39 = vpop.permute.xlu0 %3959 }
 0x70c   : > { %4053 = vst.msk [vmem:[#allocation2 + $0x8] sm:$0xff] %vm4051_vm12, %v3958_v8  ;;  %4054 = vst.msk [vmem:[#allocation2 + $0x10] sm:$0xff] %vm4051_vm12, %v3960_v39  ;;  %v16725_v8 = vld [vmem:[#allocation183_spill] sm:$0xff] }
 0x70d   : > { %4299 = vrot.lane.b32.xlu1 %v4208_v22, %s8837_s23  ;;  %4301 = vrot.lane.b32.xlu0 %v4209_v31, %s8837_s23  ;;  %v4212_v39 = vmul.f32 %v12461_v56, %v16725_v8  ;;  %v16726_v22 = vld [vmem:[#allocation184_spill] sm:$0xff] }
 0x70e   : > { %v4374_v19 = vmul.f32 %v11792_v17, %v16726_v22 }
 0x70f   : > { %v3962_v20 = vpop.permute.xlu1 %3961  ;;  %v3964_v18 = vpop.permute.xlu0 %3963 }
 0x710   : > { %4055 = vst.msk [vmem:[#allocation2 + $0x18] sm:$0xff] %vm4051_vm12, %v3962_v20  ;;  %4056 = vst.msk [vmem:[#allocation2 + $0x20] sm:$0xff] %vm4051_vm12, %v3964_v18  ;;  %v16727_v18 = vld [vmem:[#allocation186_spill] sm:$0xff] }
 0x711   : > { %4303 = vrot.lane.b32.xlu1 %v4210_v32, %s8837_s23  ;;  %4305 = vrot.lane.b32.xlu0 %v4211_v9, %s8837_s23  ;;  %v4375_v13 = vmul.f32 %v11813_v33, %v16727_v18  ;;  %v4376_v9 = vmul.f32 %v11821_v48, %v16728_v53 }
 0x713   : > { %v3966_v31 = vpop.permute.xlu1 %3965  ;;  %v3968_v6 = vpop.permute.xlu0 %3967 }
 0x714   : > { %4057 = vst.msk [vmem:[#allocation2 + $0x28] sm:$0xff] %vm4051_vm12, %v3966_v31  ;;  %4058 = vst.msk [vmem:[#allocation2 + $0x30] sm:$0xff] %vm4051_vm12, %v3968_v6  ;;  %v16729_v6 = vld [vmem:[#allocation185_spill] sm:$0xff] }
 0x715   : > { %4307 = vrot.lane.b32.xlu1 %v4212_v39, %s8837_s23  ;;  %4438 = vrot.lane.b32.xlu0 %v4374_v19, %s8838_s10  ;;  %v4377_v39 = vmul.f32 %v11837_v0, %v16729_v6  ;;  %v16730_v19 = vld [vmem:[#allocation190_spill] sm:$0xff]  ;;  %s8172_s23 = sshll.u32 %s17432_s21, 5  ;;  %s8846_s21 = smov 80  }
 0x716   : > { %v4378_v31 = vmul.f32 %v11840_v40, %v16730_v19 }
 0x717   : > { %v3970_v32 = vpop.permute.xlu1 %3969  ;;  %v3972_v20 = vpop.permute.xlu0 %3971 }
 0x718   : > { %4059 = vst.msk [vmem:[#allocation2 + $0x38] sm:$0xff] %vm4051_vm12, %v3970_v32  ;;  %4060 = vst.msk [vmem:[#allocation2 + $0x40] sm:$0xff] %vm4051_vm12, %v3972_v20  ;;  %v16731_v32 = vld [vmem:[#allocation187_spill] sm:$0xff] }
 0x719   : > { %4440 = vrot.lane.b32.xlu1 %v4375_v13, %s8838_s10  ;;  %4442 = vrot.lane.b32.xlu0 %v4376_v9, %s8838_s10  ;;  %v4379_v13 = vmul.f32 %v11851_v63, %v16731_v32  ;;  %v16732_v9 = vld [vmem:[#allocation192_spill] sm:$0xff] }
 0x71a   : > { %v4380_v20 = vmul.f32 %v11857_v16, %v16732_v9 }
 0x71b   : > { %v3974_v18 = vpop.permute.xlu1 %3973  ;;  %v3976_v22 = vpop.permute.xlu0 %3975 }
 0x71c   : > { %4061 = vst.msk [vmem:[#allocation2 + $0x48] sm:$0xff] %vm4051_vm12, %v3974_v18  ;;  %4062 = vst.msk [vmem:[#allocation2 + $0x50] sm:$0xff] %vm4051_vm12, %v3976_v22  ;;  %v16733_v22 = vld [vmem:[#allocation189_spill] sm:$0xff] }
 0x71d   : > { %4444 = vrot.lane.b32.xlu1 %v4377_v39, %s8838_s10  ;;  %4446 = vrot.lane.b32.xlu0 %v4378_v31, %s8838_s10  ;;  %v4381_v18 = vmul.f32 %v11870_v60, %v16733_v22  ;;  %v16734_v39 = vld [vmem:[#allocation194_spill] sm:$0xff] }
 0x71e   : > { %v4382_v31 = vmul.f32 %v11878_v30, %v16734_v39 }
 0x71f   : > { %v3978_v6 = vpop.permute.xlu1 %3977  ;;  %v3980_v53 = vpop.permute.xlu0 %3979 }
 0x720   : > { %4063 = vst.msk [vmem:[#allocation2 + $0x58] sm:$0xff] %vm4051_vm12, %v3978_v6  ;;  %4064 = vst.msk [vmem:[#allocation2 + $0x60] sm:$0xff] %vm4051_vm12, %v3980_v53  ;;  %v16735_v53 = vld [vmem:[#allocation191_spill] sm:$0xff] }
 0x721   : > { %4448 = vrot.lane.b32.xlu1 %v4379_v13, %s8838_s10  ;;  %4450 = vrot.lane.b32.xlu0 %v4380_v20, %s8838_s10  ;;  %v4383_v6 = vmul.f32 %v11894_v61, %v16735_v53  ;;  %v16736_v13 = vld [vmem:[#allocation196_spill] sm:$0xff] }
 0x722   : > { %v4384_v20 = vmul.f32 %v11897_v58, %v16736_v13 }
 0x723   : > { %v3982_v32 = vpop.permute.xlu1 %3981  ;;  %v3984_v19 = vpop.permute.xlu0 %3983 }
 0x724   : > { %4065 = vst.msk [vmem:[#allocation2 + $0x68] sm:$0xff] %vm4051_vm12, %v3982_v32  ;;  %4066 = vst.msk [vmem:[#allocation2 + $0x70] sm:$0xff] %vm4051_vm12, %v3984_v19  ;;  %v16737_v19 = vld [vmem:[#allocation193_spill] sm:$0xff] }
 0x725   : > { %4452 = vrot.lane.b32.xlu1 %v4381_v18, %s8838_s10  ;;  %4454 = vrot.lane.b32.xlu0 %v4382_v31, %s8838_s10  ;;  %v4385_v32 = vmul.f32 %v11908_v35, %v16737_v19  ;;  %v16738_v18 = vld [vmem:[#allocation198_spill] sm:$0xff] }
 0x726   : > { %v4386_v31 = vmul.f32 %v11914_v7, %v16738_v18 }
 0x727   : > { %v3986_v22 = vpop.permute.xlu1 %3985  ;;  %v3988_v9 = vpop.permute.xlu0 %3987 }
 0x728   : > { %4067 = vst.msk [vmem:[#allocation2 + $0x78] sm:$0xff] %vm4051_vm12, %v3986_v22  ;;  %4068 = vst.msk [vmem:[#allocation2 + $0x80] sm:$0xff] %vm4051_vm12, %v3988_v9  ;;  %v16739_v9 = vld [vmem:[#allocation195_spill] sm:$0xff] }
 0x729   : > { %4456 = vrot.lane.b32.xlu1 %v4383_v6, %s8838_s10  ;;  %4458 = vrot.lane.b32.xlu0 %v4384_v20, %s8838_s10  ;;  %v4387_v22 = vmul.f32 %v11927_v5, %v16739_v9  ;;  %v16740_v6 = vld [vmem:[#allocation200_spill] sm:$0xff] }
 0x72a   : > { %v4388_v20 = vmul.f32 %v11935_v49, %v16740_v6  ;;  %v16747_v6 = vld [vmem:[#allocation307_spill] sm:$0xff] }
 0x72b   : > { %v3990_v53 = vpop.permute.xlu1 %3989  ;;  %v3992_v39 = vpop.permute.xlu0 %3991 }
 0x72c   : > { %4069 = vst.msk [vmem:[#allocation2 + $0x88] sm:$0xff] %vm4051_vm12, %v3990_v53  ;;  %4070 = vst.msk [vmem:[#allocation2 + $0x90] sm:$0xff] %vm4051_vm12, %v3992_v39  ;;  %v16741_v39 = vld [vmem:[#allocation197_spill] sm:$0xff] }
 0x72d   : > { %4460 = vrot.lane.b32.xlu1 %v4385_v32, %s8838_s10  ;;  %4462 = vrot.lane.b32.xlu0 %v4386_v31, %s8838_s10  ;;  %v4389_v53 = vmul.f32 %v11951_v54, %v16741_v39  ;;  %v16742_v32 = vld [vmem:[#allocation202_spill] sm:$0xff]  ;;  %v16743_v31 = vld [vmem:[#allocation305_spill] sm:$0xff] }
 0x72e   : > { %v4390_v18 = vmul.f32 %v16743_v31, %v16742_v32  ;;  %v16751_v32 = vld [vmem:[#allocation309_spill] sm:$0xff] }
 0x72f   : > { %v3994_v19 = vpop.permute.xlu1 %3993  ;;  %v3996_v13 = vpop.permute.xlu0 %3995 }
 0x730   : > { %4071 = vst.msk [vmem:[#allocation2 + $0x98] sm:$0xff] %vm4051_vm12, %v3994_v19  ;;  %4072 = vst.msk [vmem:[#allocation2 + $0xa0] sm:$0xff] %vm4051_vm12, %v3996_v13  ;;  %v16744_v13 = vld [vmem:[#allocation199_spill] sm:$0xff]  ;;  %v16745_v19 = vld [vmem:[#allocation306_spill] sm:$0xff] }
 0x731   : > { %4464 = vrot.lane.b32.xlu1 %v4387_v22, %s8838_s10  ;;  %4466 = vrot.lane.b32.xlu0 %v4388_v20, %s8838_s10  ;;  %v4391_v22 = vmul.f32 %v16745_v19, %v16744_v13  ;;  %v16746_v20 = vld [vmem:[#allocation204_spill] sm:$0xff] }
 0x732   : > { %v4392_v27 = vmul.f32 %v16747_v6, %v16746_v20  ;;  %v16755_v20 = vld [vmem:[#allocation311_spill] sm:$0xff] }
 0x733   : > { %v3998_v9 = vpop.permute.xlu1 %3997  ;;  %v4000_v8 = vpop.permute.xlu0 %3999 }
 0x734   : > { %4073 = vst.msk [vmem:[#allocation2 + $0xa8] sm:$0xff] %vm4051_vm12, %v3998_v9  ;;  %4074 = vst.msk [vmem:[#allocation2 + $0xb0] sm:$0xff] %vm4051_vm12, %v4000_v8  ;;  %v16748_v8 = vld [vmem:[#allocation201_spill] sm:$0xff]  ;;  %v16749_v9 = vld [vmem:[#allocation308_spill] sm:$0xff] }
 0x735   : > { %4468 = vrot.lane.b32.xlu1 %v4389_v53, %s8838_s10  ;;  %4470 = vrot.lane.b32.xlu0 %v4390_v18, %s8838_s10  ;;  %v4393_v53 = vmul.f32 %v16749_v9, %v16748_v8  ;;  %v16750_v18 = vld [vmem:[#allocation206_spill] sm:$0xff] }
 0x736   : > { %v4394_v17 = vmul.f32 %v16751_v32, %v16750_v18  ;;  %v16759_v18 = vld [vmem:[#allocation313_spill] sm:$0xff] }
 0x737   : > { %v4002_v39 = vpop.permute.xlu1 %4001  ;;  %v4004_v33 = vpop.permute.xlu0 %4003 }
 0x738   : > { %4075 = vst.msk [vmem:[#allocation2 + $0xb8] sm:$0xff] %vm4051_vm12, %v4002_v39  ;;  %4076 = vst.msk [vmem:[#allocation2 + $0xc0] sm:$0xff] %vm4051_vm12, %v4004_v33  ;;  %v16752_v33 = vld [vmem:[#allocation203_spill] sm:$0xff]  ;;  %v16753_v39 = vld [vmem:[#allocation310_spill] sm:$0xff] }
 0x739   : > { %4472 = vrot.lane.b32.xlu1 %v4391_v22, %s8838_s10  ;;  %4474 = vrot.lane.b32.xlu0 %v4392_v27, %s8838_s10  ;;  %v4395_v22 = vmul.f32 %v16753_v39, %v16752_v33  ;;  %v16754_v27 = vld [vmem:[#allocation207_spill] sm:$0xff] }
 0x73a   : > { %v4396_v6 = vmul.f32 %v16755_v20, %v16754_v27 }
 0x73b   : > { %v4006_v13 = vpop.permute.xlu1 %4005  ;;  %v4008_v19 = vpop.permute.xlu0 %4007 }
 0x73c   : > { %4077 = vst.msk [vmem:[#allocation2 + $0xc8] sm:$0xff] %vm4051_vm12, %v4006_v13  ;;  %4078 = vst.msk [vmem:[#allocation2 + $0xd0] sm:$0xff] %vm4051_vm12, %v4008_v19  ;;  %v16756_v13 = vld [vmem:[#allocation205_spill] sm:$0xff]  ;;  %v16757_v19 = vld [vmem:[#allocation312_spill] sm:$0xff] }
 0x73d   : > { %4476 = vrot.lane.b32.xlu1 %v4393_v53, %s8838_s10  ;;  %4478 = vrot.lane.b32.xlu0 %v4394_v17, %s8838_s10  ;;  %v4397_v53 = vmul.f32 %v16757_v19, %v16756_v13  ;;  %v16758_v17 = vld [vmem:[#allocation87_spill] sm:$0xff] }
 0x73e   : > { %v4398_v32 = vmul.f32 %v16759_v18, %v16758_v17 }
 0x73f   : > { %v4010_v8 = vpop.permute.xlu1 %4009  ;;  %v4012_v9 = vpop.permute.xlu0 %4011 }
 0x740   : > { %4079 = vst.msk [vmem:[#allocation2 + $0xd8] sm:$0xff] %vm4051_vm12, %v4010_v8  ;;  %4080 = vst.msk [vmem:[#allocation2 + $0xe0] sm:$0xff] %vm4051_vm12, %v4012_v9  ;;  %v16760_v8 = vld [vmem:[#allocation83_spill] sm:$0xff]  ;;  %v16761_v9 = vld [vmem:[#allocation208_spill] sm:$0xff] }
 0x741   : > { %4480 = vrot.lane.b32.xlu1 %v4395_v22, %s8838_s10  ;;  %4482 = vrot.lane.b32.xlu0 %v4396_v6, %s8838_s10  ;;  %v4399_v6 = vmul.f32 %v12042_v38, %v16760_v8  ;;  %v16762_v22 = vld [vmem:[#allocation316_spill] sm:$0xff] }
 0x742   : > { %v4400_v13 = vmul.f32 %v16762_v22, %v16761_v9  ;;  %v16768_v9 = vld [vmem:[#allocation13_spill] sm:$0xff] }
 0x743   : > { %v4014_v33 = vpop.permute.xlu1 %4013  ;;  %v4016_v39 = vpop.permute.xlu0 %4015 }
 0x744   : > { %4081 = vst.msk [vmem:[#allocation2 + $0xe8] sm:$0xff] %vm4051_vm12, %v4014_v33  ;;  %4082 = vst.msk [vmem:[#allocation2 + $0xf0] sm:$0xff] %vm4051_vm12, %v4016_v39  ;;  %v16763_v33 = vld [vmem:[#allocation88_spill] sm:$0xff]  ;;  %v16764_v39 = vld [vmem:[#allocation209_spill] sm:$0xff] }
 0x745   : > { %4484 = vrot.lane.b32.xlu1 %v4397_v53, %s8838_s10  ;;  %4486 = vrot.lane.b32.xlu0 %v4398_v32, %s8838_s10  ;;  %v4401_v32 = vmul.f32 %v12058_v37, %v16763_v33  ;;  %v4402_v53 = vmul.f32 %v12061_v4, %v16764_v39  ;;  %v16772_v39 = vld [vmem:[#allocation299_spill] sm:$0xff] }
 0x747   : > { %v4018_v27 = vpop.permute.xlu1 %4017  ;;  %v4246_v19 = vpop.permute.xlu0 %4245 }
 0x748   : > { %4083 = vst.msk [vmem:[#allocation2 + $0xf8] sm:$0xff] %vm4051_vm12, %v4018_v27  ;;  %v16765_v27 = vld [vmem:[#allocation93_spill] sm:$0xff]  ;;  %vm7333_vm12 = vcmask 851744  }
 0x749   : > { %4342 = vst.msk [vmem:[#allocation2] sm:$0xff] %vm4341_vm13, %v4246_v19  ;;  %4488 = vrot.lane.b32.xlu1 %v4399_v6, %s8838_s10  ;;  %4490 = vrot.lane.b32.xlu0 %v4400_v13, %s8838_s10  ;;  %v16766_v19 = vld [vmem:[#allocation319_spill] sm:$0xff] }
 0x74a   : > { %v4403_v6 = vmul.f32 %v16766_v19, %v16765_v27  ;;  %v16767_v13 = vld [vmem:[#allocation211_spill] sm:$0xff] }
 0x74b   : > { %v4248_v8 = vpop.permute.xlu1 %4247  ;;  %v4250_v17 = vpop.permute.xlu0 %4249  ;;  %v4404_v38 = vmul.f32 %v16768_v9, %v16767_v13 }
 0x74c   : > { %4343 = vst.msk [vmem:[#allocation2 + $0x8] sm:$0xff] %vm4341_vm13, %v4248_v8  ;;  %4344 = vst.msk [vmem:[#allocation2 + $0x10] sm:$0xff] %vm4341_vm13, %v4250_v17  ;;  %v16769_v17 = vld [vmem:[#allocation210_spill] sm:$0xff]  ;;  %v16770_v8 = vld [vmem:[#allocation17_spill] sm:$0xff] }
 0x74d   : > { %4492 = vrot.lane.b32.xlu1 %v4401_v32, %s8838_s10  ;;  %4494 = vrot.lane.b32.xlu0 %v4402_v53, %s8838_s10  ;;  %v4405_v32 = vmul.f32 %v16770_v8, %v16769_v17  ;;  %v16771_v53 = vld [vmem:[#allocation26_spill] sm:$0xff] }
 0x74e   : > { %v4567_v4 = vmul.f32 %v16772_v39, %v16771_v53 }
 0x74f   : > { %v4252_v33 = vpop.permute.xlu1 %4251  ;;  %v4254_v37 = vpop.permute.xlu0 %4253 }
 0x750   : > { %4345 = vst.msk [vmem:[#allocation2 + $0x18] sm:$0xff] %vm4341_vm13, %v4252_v33  ;;  %4346 = vst.msk [vmem:[#allocation2 + $0x20] sm:$0xff] %vm4341_vm13, %v4254_v37  ;;  %v16773_v37 = vld [vmem:[#allocation212_spill] sm:$0xff] }
 0x751   : > { %4496 = vrot.lane.b32.xlu1 %v4403_v6, %s8838_s10  ;;  %4498 = vrot.lane.b32.xlu0 %v4404_v38, %s8838_s10  ;;  %v16774_v33 = vld [vmem:[#allocation300_spill] sm:$0xff]  ;;  %v16775_v6 = vld [vmem:[#allocation213_spill] sm:$0xff] }
 0x752   : > { %v4568_v38 = vmul.f32 %v16774_v33, %v16773_v37  ;;  %v4569_v17 = vmul.f32 %v11784_v15, %v16775_v6 }
 0x753   : > { %v4256_v27 = vpop.permute.xlu1 %4255  ;;  %v4258_v19 = vpop.permute.xlu0 %4257 }
 0x754   : > { %4347 = vst.msk [vmem:[#allocation2 + $0x28] sm:$0xff] %vm4341_vm13, %v4256_v27  ;;  %4348 = vst.msk [vmem:[#allocation2 + $0x30] sm:$0xff] %vm4341_vm13, %v4258_v19  ;;  %v16776_v27 = vld [vmem:[#allocation214_spill] sm:$0xff] }
 0x755   : > { %4500 = vrot.lane.b32.xlu1 %v4405_v32, %s8838_s10  ;;  %4631 = vrot.lane.b32.xlu0 %v4567_v4, %s8839_s16  ;;  %v4571_v19 = vmul.f32 %v11805_v10, %v16776_v27  ;;  %v16777_v4 = vld [vmem:[#allocation215_spill] sm:$0xff]  ;;  %v16778_v32 = vld [vmem:[#allocation302_spill] sm:$0xff]  ;;  %s383_s10 = sadd.s32 %s9180_s13, %s8172_s23  ;;  %s8847_s23 = smov 84  }
 0x756   : > { %v4570_v53 = vmul.f32 %v16778_v32, %v16777_v4  ;;  %s8850_s13 = smov 96  }
 0x757   : > { %v4260_v13 = vpop.permute.xlu1 %4259  ;;  %v4262_v8 = vpop.permute.xlu0 %4261 }
 0x758   : > { %4349 = vst.msk [vmem:[#allocation2 + $0x38] sm:$0xff] %vm4341_vm13, %v4260_v13  ;;  %4350 = vst.msk [vmem:[#allocation2 + $0x40] sm:$0xff] %vm4341_vm13, %v4262_v8  ;;  %v16779_v13 = vld [vmem:[#allocation216_spill] sm:$0xff] }
 0x759   : > { %4633 = vrot.lane.b32.xlu1 %v4568_v38, %s8839_s16  ;;  %4635 = vrot.lane.b32.xlu0 %v4569_v17, %s8839_s16  ;;  %v4573_v8 = vmul.f32 %v11824_v46, %v16779_v13  ;;  %v16780_v17 = vld [vmem:[#allocation217_spill] sm:$0xff]  ;;  %v16781_v38 = vld [vmem:[#allocation304_spill] sm:$0xff] }
 0x75a   : > { %v4572_v6 = vmul.f32 %v16781_v38, %v16780_v17 }
 0x75b   : > { %v4264_v37 = vpop.permute.xlu1 %4263  ;;  %v4266_v33 = vpop.permute.xlu0 %4265 }
 0x75c   : > { %4351 = vst.msk [vmem:[#allocation2 + $0x48] sm:$0xff] %vm4341_vm13, %v4264_v37  ;;  %4352 = vst.msk [vmem:[#allocation2 + $0x50] sm:$0xff] %vm4341_vm13, %v4266_v33  ;;  %v16782_v37 = vld [vmem:[#allocation218_spill] sm:$0xff]  ;;  %v16783_v33 = vld [vmem:[#allocation219_spill] sm:$0xff] }
 0x75d   : > { %4637 = vrot.lane.b32.xlu1 %v4570_v53, %s8839_s16  ;;  %4639 = vrot.lane.b32.xlu0 %v4571_v19, %s8839_s16  ;;  %v4575_v53 = vmul.f32 %v11843_v42, %v16782_v37  ;;  %v4574_v19 = vmul.f32 %v11834_v2, %v16783_v33 }
 0x75f   : > { %v4268_v27 = vpop.permute.xlu1 %4267  ;;  %v4270_v39 = vpop.permute.xlu0 %4269 }
 0x760   : > { %4353 = vst.msk [vmem:[#allocation2 + $0x58] sm:$0xff] %vm4341_vm13, %v4268_v27  ;;  %4354 = vst.msk [vmem:[#allocation2 + $0x60] sm:$0xff] %vm4341_vm13, %v4270_v39  ;;  %v16784_v39 = vld [vmem:[#allocation220_spill] sm:$0xff]  ;;  %v16785_v27 = vld [vmem:[#allocation221_spill] sm:$0xff] }
 0x761   : > { %4641 = vrot.lane.b32.xlu1 %v4572_v6, %s8839_s16  ;;  %4643 = vrot.lane.b32.xlu0 %v4573_v8, %s8839_s16  ;;  %v4577_v6 = vmul.f32 %v11862_v34, %v16784_v39  ;;  %v4576_v8 = vmul.f32 %v11859_v1, %v16785_v27 }
 0x763   : > { %v4272_v13 = vpop.permute.xlu1 %4271  ;;  %v4274_v4 = vpop.permute.xlu0 %4273 }
 0x764   : > { %4355 = vst.msk [vmem:[#allocation2 + $0x68] sm:$0xff] %vm4341_vm13, %v4272_v13  ;;  %4356 = vst.msk [vmem:[#allocation2 + $0x70] sm:$0xff] %vm4341_vm13, %v4274_v4  ;;  %v16786_v4 = vld [vmem:[#allocation222_spill] sm:$0xff] }
 0x765   : > { %4645 = vrot.lane.b32.xlu1 %v4574_v19, %s8839_s16  ;;  %4647 = vrot.lane.b32.xlu0 %v4575_v53, %s8839_s16  ;;  %v4579_v13 = vmul.f32 %v11881_v55, %v16786_v4  ;;  %v16787_v53 = vld [vmem:[#allocation223_spill] sm:$0xff] }
 0x766   : > { %v4578_v19 = vmul.f32 %v11874_v11, %v16787_v53 }
 0x767   : > { %v4276_v37 = vpop.permute.xlu1 %4275  ;;  %v4278_v17 = vpop.permute.xlu0 %4277 }
 0x768   : > { %4357 = vst.msk [vmem:[#allocation2 + $0x78] sm:$0xff] %vm4341_vm13, %v4276_v37  ;;  %4358 = vst.msk [vmem:[#allocation2 + $0x80] sm:$0xff] %vm4341_vm13, %v4278_v17  ;;  %v16788_v17 = vld [vmem:[#allocation224_spill] sm:$0xff] }
 0x769   : > { %4649 = vrot.lane.b32.xlu1 %v4576_v8, %s8839_s16  ;;  %4651 = vrot.lane.b32.xlu0 %v4577_v6, %s8839_s16  ;;  %v4581_v37 = vmul.f32 %v11900_v14, %v16788_v17  ;;  %v16789_v6 = vld [vmem:[#allocation225_spill] sm:$0xff] }
 0x76a   : > { %v4580_v8 = vmul.f32 %v11891_v62, %v16789_v6 }
 0x76b   : > { %v4280_v39 = vpop.permute.xlu1 %4279  ;;  %v4282_v33 = vpop.permute.xlu0 %4281 }
 0x76c   : > { %4359 = vst.msk [vmem:[#allocation2 + $0x88] sm:$0xff] %vm4341_vm13, %v4280_v39  ;;  %4360 = vst.msk [vmem:[#allocation2 + $0x90] sm:$0xff] %vm4341_vm13, %v4282_v33  ;;  %v16790_v33 = vld [vmem:[#allocation226_spill] sm:$0xff] }
 0x76d   : > { %4653 = vrot.lane.b32.xlu1 %v4578_v19, %s8839_s16  ;;  %4655 = vrot.lane.b32.xlu0 %v4579_v13, %s8839_s16  ;;  %v4583_v39 = vmul.f32 %v11919_v12, %v16790_v33  ;;  %v16791_v13 = vld [vmem:[#allocation227_spill] sm:$0xff] }
 0x76e   : > { %v4582_v19 = vmul.f32 %v11916_v52, %v16791_v13 }
 0x76f   : > { %v4284_v4 = vpop.permute.xlu1 %4283  ;;  %v4286_v27 = vpop.permute.xlu0 %4285 }
 0x770   : > { %4361 = vst.msk [vmem:[#allocation2 + $0x98] sm:$0xff] %vm4341_vm13, %v4284_v4  ;;  %4362 = vst.msk [vmem:[#allocation2 + $0xa0] sm:$0xff] %vm4341_vm13, %v4286_v27  ;;  %v16792_v27 = vld [vmem:[#allocation228_spill] sm:$0xff] }
 0x771   : > { %4657 = vrot.lane.b32.xlu1 %v4580_v8, %s8839_s16  ;;  %4659 = vrot.lane.b32.xlu0 %v4581_v37, %s8839_s16  ;;  %v4585_v4 = vmul.f32 %v11938_v21, %v16792_v27  ;;  %v16793_v37 = vld [vmem:[#allocation229_spill] sm:$0xff] }
 0x772   : > { %v4584_v8 = vmul.f32 %v11931_v44, %v16793_v37 }
 0x773   : > { %v4288_v17 = vpop.permute.xlu1 %4287  ;;  %v4290_v53 = vpop.permute.xlu0 %4289 }
 0x774   : > { %4363 = vst.msk [vmem:[#allocation2 + $0xa8] sm:$0xff] %vm4341_vm13, %v4288_v17  ;;  %4364 = vst.msk [vmem:[#allocation2 + $0xb0] sm:$0xff] %vm4341_vm13, %v4290_v53  ;;  %v16794_v53 = vld [vmem:[#allocation230_spill] sm:$0xff] }
 0x775   : > { %4661 = vrot.lane.b32.xlu1 %v4582_v19, %s8839_s16  ;;  %4663 = vrot.lane.b32.xlu0 %v4583_v39, %s8839_s16  ;;  %v4587_v17 = vmul.f32 %v11957_v45, %v16794_v53  ;;  %v16795_v39 = vld [vmem:[#allocation231_spill] sm:$0xff] }
 0x776   : > { %v4586_v19 = vmul.f32 %v11948_v26, %v16795_v39 }
 0x777   : > { %v4292_v6 = vpop.permute.xlu1 %4291  ;;  %v4294_v33 = vpop.permute.xlu0 %4293 }
 0x778   : > { %4365 = vst.msk [vmem:[#allocation2 + $0xb8] sm:$0xff] %vm4341_vm13, %v4292_v6  ;;  %4366 = vst.msk [vmem:[#allocation2 + $0xc0] sm:$0xff] %vm4341_vm13, %v4294_v33  ;;  %v16796_v6 = vld [vmem:[#allocation232_spill] sm:$0xff] }
 0x779   : > { %4665 = vrot.lane.b32.xlu1 %v4584_v8, %s8839_s16  ;;  %4667 = vrot.lane.b32.xlu0 %v4585_v4, %s8839_s16  ;;  %v4589_v33 = vmul.f32 %v11976_v43, %v16796_v6  ;;  %v16797_v4 = vld [vmem:[#allocation233_spill] sm:$0xff] }
 0x77a   : > { %v4588_v8 = vmul.f32 %v11973_v25, %v16797_v4 }
 0x77b   : > { %v4296_v13 = vpop.permute.xlu1 %4295  ;;  %v4298_v27 = vpop.permute.xlu0 %4297 }
 0x77c   : > { %4367 = vst.msk [vmem:[#allocation2 + $0xc8] sm:$0xff] %vm4341_vm13, %v4296_v13  ;;  %4368 = vst.msk [vmem:[#allocation2 + $0xd0] sm:$0xff] %vm4341_vm13, %v4298_v27  ;;  %v16798_v13 = vld [vmem:[#allocation234_spill] sm:$0xff] }
 0x77d   : > { %4669 = vrot.lane.b32.xlu1 %v4586_v19, %s8839_s16  ;;  %4671 = vrot.lane.b32.xlu0 %v4587_v17, %s8839_s16  ;;  %v4591_v27 = vmul.f32 %v11995_v29, %v16798_v13  ;;  %v16799_v17 = vld [vmem:[#allocation235_spill] sm:$0xff] }
 0x77e   : > { %v4590_v19 = vmul.f32 %v11988_v57, %v16799_v17 }
 0x77f   : > { %v4300_v53 = vpop.permute.xlu1 %4299  ;;  %v4302_v37 = vpop.permute.xlu0 %4301 }
 0x780   : > { %4369 = vst.msk [vmem:[#allocation2 + $0xd8] sm:$0xff] %vm4341_vm13, %v4300_v53  ;;  %4370 = vst.msk [vmem:[#allocation2 + $0xe0] sm:$0xff] %vm4341_vm13, %v4302_v37  ;;  %v16800_v37 = vld [vmem:[#allocation236_spill] sm:$0xff] }
 0x781   : > { %4673 = vrot.lane.b32.xlu1 %v4588_v8, %s8839_s16  ;;  %4675 = vrot.lane.b32.xlu0 %v4589_v33, %s8839_s16  ;;  %v4593_v53 = vmul.f32 %v12014_v24, %v16800_v37  ;;  %v16801_v33 = vld [vmem:[#allocation237_spill] sm:$0xff] }
 0x782   : > { %v4592_v8 = vmul.f32 %v12005_v23, %v16801_v33 }
 0x783   : > { %v4304_v6 = vpop.permute.xlu1 %4303  ;;  %v4306_v39 = vpop.permute.xlu0 %4305 }
 0x784   : > { %4371 = vst.msk [vmem:[#allocation2 + $0xe8] sm:$0xff] %vm4341_vm13, %v4304_v6  ;;  %4372 = vst.msk [vmem:[#allocation2 + $0xf0] sm:$0xff] %vm4341_vm13, %v4306_v39  ;;  %v16802_v39 = vld [vmem:[#allocation238_spill] sm:$0xff] }
 0x785   : > { %4677 = vrot.lane.b32.xlu1 %v4590_v19, %s8839_s16  ;;  %4679 = vrot.lane.b32.xlu0 %v4591_v27, %s8839_s16  ;;  %v4595_v6 = vmul.f32 %v12033_v28, %v16802_v39  ;;  %v16803_v27 = vld [vmem:[#allocation239_spill] sm:$0xff] }
 0x786   : > { %v4594_v19 = vmul.f32 %v12029_v51, %v16803_v27  ;;  %v16809_v27 = vld [vmem:[#allocation322_spill] sm:$0xff] }
 0x787   : > { %v4308_v13 = vpop.permute.xlu1 %4307  ;;  %v4439_v4 = vpop.permute.xlu0 %4438 }
 0x788   : > { %4373 = vst.msk [vmem:[#allocation2 + $0xf8] sm:$0xff] %vm4341_vm13, %v4308_v13  ;;  %vm7526_vm13 = vcmask 884544  }
 0x789   : > { %4535 = vst.msk [vmem:[#allocation2] sm:$0xff] %vm4534_vm14, %v4439_v4  ;;  %4681 = vrot.lane.b32.xlu1 %v4592_v8, %s8839_s16  ;;  %4683 = vrot.lane.b32.xlu0 %v4593_v53, %s8839_s16  ;;  %v16804_v4 = vld [vmem:[#allocation240_spill] sm:$0xff]  ;;  %v16805_v53 = vld [vmem:[#allocation241_spill] sm:$0xff] }
 0x78a   : > { %v4597_v13 = vmul.f32 %v11748_v50, %v16804_v4  ;;  %v4596_v8 = vmul.f32 %v11746_v41, %v16805_v53  ;;  %v16813_v53 = vld [vmem:[#allocation323_spill] sm:$0xff] }
 0x78b   : > { %v4441_v37 = vpop.permute.xlu1 %4440  ;;  %v4443_v17 = vpop.permute.xlu0 %4442 }
 0x78c   : > { %4536 = vst.msk [vmem:[#allocation2 + $0x8] sm:$0xff] %vm4534_vm14, %v4441_v37  ;;  %4537 = vst.msk [vmem:[#allocation2 + $0x10] sm:$0xff] %vm4534_vm14, %v4443_v17  ;;  %v16806_v17 = vld [vmem:[#allocation242_spill] sm:$0xff]  ;;  %v16807_v37 = vld [vmem:[#allocation297_spill] sm:$0xff] }
 0x78d   : > { %4685 = vrot.lane.b32.xlu1 %v4594_v19, %s8839_s16  ;;  %4687 = vrot.lane.b32.xlu0 %v4595_v6, %s8839_s16  ;;  %v4598_v19 = vmul.f32 %v16807_v37, %v16806_v17  ;;  %v16808_v6 = vld [vmem:[#allocation243_spill] sm:$0xff] }
 0x78e   : > { %v4760_v28 = vmul.f32 %v16809_v27, %v16808_v6  ;;  %v16817_v6 = vld [vmem:[#allocation325_spill] sm:$0xff] }
 0x78f   : > { %v4445_v39 = vpop.permute.xlu1 %4444  ;;  %v4447_v33 = vpop.permute.xlu0 %4446 }
 0x790   : > { %4538 = vst.msk [vmem:[#allocation2 + $0x18] sm:$0xff] %vm4534_vm14, %v4445_v39  ;;  %4539 = vst.msk [vmem:[#allocation2 + $0x20] sm:$0xff] %vm4534_vm14, %v4447_v33  ;;  %v16810_v33 = vld [vmem:[#allocation244_spill] sm:$0xff] }
 0x791   : > { %4689 = vrot.lane.b32.xlu1 %v4596_v8, %s8839_s16  ;;  %4691 = vrot.lane.b32.xlu0 %v4597_v13, %s8839_s16  ;;  %v16811_v39 = vld [vmem:[#allocation324_spill] sm:$0xff]  ;;  %v16812_v8 = vld [vmem:[#allocation246_spill] sm:$0xff] }
 0x792   : > { %v4761_v13 = vmul.f32 %v16811_v39, %v16810_v33  ;;  %v4762_v17 = vmul.f32 %v16813_v53, %v16812_v8  ;;  %v16821_v8 = vld [vmem:[#allocation327_spill] sm:$0xff] }
 0x793   : > { %v4449_v4 = vpop.permute.xlu1 %4448  ;;  %v4451_v50 = vpop.permute.xlu0 %4450 }
 0x794   : > { %4540 = vst.msk [vmem:[#allocation2 + $0x28] sm:$0xff] %vm4534_vm14, %v4449_v4  ;;  %4541 = vst.msk [vmem:[#allocation2 + $0x30] sm:$0xff] %vm4534_vm14, %v4451_v50  ;;  %v16814_v50 = vld [vmem:[#allocation245_spill] sm:$0xff]  ;;  %v16815_v4 = vld [vmem:[#allocation326_spill] sm:$0xff] }
 0x795   : > { %4693 = vrot.lane.b32.xlu1 %v4598_v19, %s8839_s16  ;;  %4824 = vrot.lane.b32.xlu0 %v4760_v28, %s8840_s17  ;;  %v4763_v19 = vmul.f32 %v16815_v4, %v16814_v50  ;;  %v16816_v28 = vld [vmem:[#allocation248_spill] sm:$0xff]  ;;  %s8173_s16 = sshll.u32 %s383_s10, 2  ;;  %s8848_s10 = smov 88  }
 0x796   : > { %v4764_v27 = vmul.f32 %v16817_v6, %v16816_v28  ;;  %v16825_v28 = vld [vmem:[#allocation329_spill] sm:$0xff] }
 0x797   : > { %v4453_v37 = vpop.permute.xlu1 %4452  ;;  %v4455_v41 = vpop.permute.xlu0 %4454 }
 0x798   : > { %4542 = vst.msk [vmem:[#allocation2 + $0x38] sm:$0xff] %vm4534_vm14, %v4453_v37  ;;  %4543 = vst.msk [vmem:[#allocation2 + $0x40] sm:$0xff] %vm4534_vm14, %v4455_v41  ;;  %v16818_v41 = vld [vmem:[#allocation247_spill] sm:$0xff]  ;;  %v16819_v37 = vld [vmem:[#allocation328_spill] sm:$0xff] }
 0x799   : > { %4826 = vrot.lane.b32.xlu1 %v4761_v13, %s8840_s17  ;;  %4828 = vrot.lane.b32.xlu0 %v4762_v17, %s8840_s17  ;;  %v4765_v13 = vmul.f32 %v16819_v37, %v16818_v41  ;;  %v16820_v17 = vld [vmem:[#allocation250_spill] sm:$0xff] }
 0x79a   : > { %v4766_v53 = vmul.f32 %v16821_v8, %v16820_v17  ;;  %v16829_v17 = vld [vmem:[#allocation331_spill] sm:$0xff] }
 0x79b   : > { %v4457_v33 = vpop.permute.xlu1 %4456  ;;  %v4459_v39 = vpop.permute.xlu0 %4458 }
 0x79c   : > { %4544 = vst.msk [vmem:[#allocation2 + $0x48] sm:$0xff] %vm4534_vm14, %v4457_v33  ;;  %4545 = vst.msk [vmem:[#allocation2 + $0x50] sm:$0xff] %vm4534_vm14, %v4459_v39  ;;  %v16822_v33 = vld [vmem:[#allocation249_spill] sm:$0xff]  ;;  %v16823_v39 = vld [vmem:[#allocation330_spill] sm:$0xff] }
 0x79d   : > { %4830 = vrot.lane.b32.xlu1 %v4763_v19, %s8840_s17  ;;  %4832 = vrot.lane.b32.xlu0 %v4764_v27, %s8840_s17  ;;  %v4767_v19 = vmul.f32 %v16823_v39, %v16822_v33  ;;  %v16824_v27 = vld [vmem:[#allocation252_spill] sm:$0xff] }
 0x79e   : > { %v4768_v6 = vmul.f32 %v16825_v28, %v16824_v27  ;;  %v16833_v27 = vld [vmem:[#allocation333_spill] sm:$0xff] }
 0x79f   : > { %v4461_v50 = vpop.permute.xlu1 %4460  ;;  %v4463_v4 = vpop.permute.xlu0 %4462 }
 0x7a0   : > { %4546 = vst.msk [vmem:[#allocation2 + $0x58] sm:$0xff] %vm4534_vm14, %v4461_v50  ;;  %4547 = vst.msk [vmem:[#allocation2 + $0x60] sm:$0xff] %vm4534_vm14, %v4463_v4  ;;  %v16826_v50 = vld [vmem:[#allocation251_spill] sm:$0xff]  ;;  %v16827_v4 = vld [vmem:[#allocation332_spill] sm:$0xff] }
 0x7a1   : > { %4834 = vrot.lane.b32.xlu1 %v4765_v13, %s8840_s17  ;;  %4836 = vrot.lane.b32.xlu0 %v4766_v53, %s8840_s17  ;;  %v4769_v13 = vmul.f32 %v16827_v4, %v16826_v50  ;;  %v16828_v53 = vld [vmem:[#allocation254_spill] sm:$0xff] }
 0x7a2   : > { %v4770_v8 = vmul.f32 %v16829_v17, %v16828_v53  ;;  %v16837_v53 = vld [vmem:[#allocation335_spill] sm:$0xff] }
 0x7a3   : > { %v4465_v41 = vpop.permute.xlu1 %4464  ;;  %v4467_v37 = vpop.permute.xlu0 %4466 }
 0x7a4   : > { %4548 = vst.msk [vmem:[#allocation2 + $0x68] sm:$0xff] %vm4534_vm14, %v4465_v41  ;;  %4549 = vst.msk [vmem:[#allocation2 + $0x70] sm:$0xff] %vm4534_vm14, %v4467_v37  ;;  %v16830_v41 = vld [vmem:[#allocation253_spill] sm:$0xff]  ;;  %v16831_v37 = vld [vmem:[#allocation334_spill] sm:$0xff] }
 0x7a5   : > { %4838 = vrot.lane.b32.xlu1 %v4767_v19, %s8840_s17  ;;  %4840 = vrot.lane.b32.xlu0 %v4768_v6, %s8840_s17  ;;  %v4771_v19 = vmul.f32 %v16831_v37, %v16830_v41  ;;  %v16832_v6 = vld [vmem:[#allocation256_spill] sm:$0xff] }
 0x7a6   : > { %v4772_v28 = vmul.f32 %v16833_v27, %v16832_v6  ;;  %v16841_v6 = vld [vmem:[#allocation337_spill] sm:$0xff] }
 0x7a7   : > { %v4469_v33 = vpop.permute.xlu1 %4468  ;;  %v4471_v39 = vpop.permute.xlu0 %4470 }
 0x7a8   : > { %4550 = vst.msk [vmem:[#allocation2 + $0x78] sm:$0xff] %vm4534_vm14, %v4469_v33  ;;  %4551 = vst.msk [vmem:[#allocation2 + $0x80] sm:$0xff] %vm4534_vm14, %v4471_v39  ;;  %v16834_v33 = vld [vmem:[#allocation255_spill] sm:$0xff]  ;;  %v16835_v39 = vld [vmem:[#allocation336_spill] sm:$0xff] }
 0x7a9   : > { %4842 = vrot.lane.b32.xlu1 %v4769_v13, %s8840_s17  ;;  %4844 = vrot.lane.b32.xlu0 %v4770_v8, %s8840_s17  ;;  %v4773_v13 = vmul.f32 %v16835_v39, %v16834_v33  ;;  %v16836_v8 = vld [vmem:[#allocation258_spill] sm:$0xff] }
 0x7aa   : > { %v4774_v17 = vmul.f32 %v16837_v53, %v16836_v8  ;;  %v16845_v8 = vld [vmem:[#allocation339_spill] sm:$0xff] }
 0x7ab   : > { %v4473_v50 = vpop.permute.xlu1 %4472  ;;  %v4475_v4 = vpop.permute.xlu0 %4474 }
 0x7ac   : > { %4552 = vst.msk [vmem:[#allocation2 + $0x88] sm:$0xff] %vm4534_vm14, %v4473_v50  ;;  %4553 = vst.msk [vmem:[#allocation2 + $0x90] sm:$0xff] %vm4534_vm14, %v4475_v4  ;;  %v16838_v50 = vld [vmem:[#allocation257_spill] sm:$0xff]  ;;  %v16839_v4 = vld [vmem:[#allocation338_spill] sm:$0xff] }
 0x7ad   : > { %4846 = vrot.lane.b32.xlu1 %v4771_v19, %s8840_s17  ;;  %4848 = vrot.lane.b32.xlu0 %v4772_v28, %s8840_s17  ;;  %v4775_v19 = vmul.f32 %v16839_v4, %v16838_v50  ;;  %v16840_v28 = vld [vmem:[#allocation260_spill] sm:$0xff] }
 0x7ae   : > { %v4776_v27 = vmul.f32 %v16841_v6, %v16840_v28  ;;  %v16849_v28 = vld [vmem:[#allocation341_spill] sm:$0xff] }
 0x7af   : > { %v4477_v41 = vpop.permute.xlu1 %4476  ;;  %v4479_v37 = vpop.permute.xlu0 %4478 }
 0x7b0   : > { %4554 = vst.msk [vmem:[#allocation2 + $0x98] sm:$0xff] %vm4534_vm14, %v4477_v41  ;;  %4555 = vst.msk [vmem:[#allocation2 + $0xa0] sm:$0xff] %vm4534_vm14, %v4479_v37  ;;  %v16842_v41 = vld [vmem:[#allocation259_spill] sm:$0xff]  ;;  %v16843_v37 = vld [vmem:[#allocation340_spill] sm:$0xff] }
 0x7b1   : > { %4850 = vrot.lane.b32.xlu1 %v4773_v13, %s8840_s17  ;;  %4852 = vrot.lane.b32.xlu0 %v4774_v17, %s8840_s17  ;;  %v4777_v13 = vmul.f32 %v16843_v37, %v16842_v41  ;;  %v16844_v17 = vld [vmem:[#allocation262_spill] sm:$0xff] }
 0x7b2   : > { %v4778_v53 = vmul.f32 %v16845_v8, %v16844_v17  ;;  %v16853_v17 = vld [vmem:[#allocation343_spill] sm:$0xff] }
 0x7b3   : > { %v4481_v33 = vpop.permute.xlu1 %4480  ;;  %v4483_v39 = vpop.permute.xlu0 %4482 }
 0x7b4   : > { %4556 = vst.msk [vmem:[#allocation2 + $0xa8] sm:$0xff] %vm4534_vm14, %v4481_v33  ;;  %4557 = vst.msk [vmem:[#allocation2 + $0xb0] sm:$0xff] %vm4534_vm14, %v4483_v39  ;;  %v16846_v33 = vld [vmem:[#allocation261_spill] sm:$0xff]  ;;  %v16847_v39 = vld [vmem:[#allocation342_spill] sm:$0xff] }
 0x7b5   : > { %4854 = vrot.lane.b32.xlu1 %v4775_v19, %s8840_s17  ;;  %4856 = vrot.lane.b32.xlu0 %v4776_v27, %s8840_s17  ;;  %v4779_v19 = vmul.f32 %v16847_v39, %v16846_v33  ;;  %v16848_v27 = vld [vmem:[#allocation264_spill] sm:$0xff] }
 0x7b6   : > { %v4780_v6 = vmul.f32 %v16849_v28, %v16848_v27  ;;  %v16857_v27 = vld [vmem:[#allocation345_spill] sm:$0xff] }
 0x7b7   : > { %v4485_v50 = vpop.permute.xlu1 %4484  ;;  %v4487_v4 = vpop.permute.xlu0 %4486 }
 0x7b8   : > { %4558 = vst.msk [vmem:[#allocation2 + $0xb8] sm:$0xff] %vm4534_vm14, %v4485_v50  ;;  %4559 = vst.msk [vmem:[#allocation2 + $0xc0] sm:$0xff] %vm4534_vm14, %v4487_v4  ;;  %v16850_v50 = vld [vmem:[#allocation263_spill] sm:$0xff]  ;;  %v16851_v4 = vld [vmem:[#allocation344_spill] sm:$0xff] }
 0x7b9   : > { %4858 = vrot.lane.b32.xlu1 %v4777_v13, %s8840_s17  ;;  %4860 = vrot.lane.b32.xlu0 %v4778_v53, %s8840_s17  ;;  %v4781_v13 = vmul.f32 %v16851_v4, %v16850_v50  ;;  %v16852_v53 = vld [vmem:[#allocation266_spill] sm:$0xff] }
 0x7ba   : > { %v4782_v8 = vmul.f32 %v16853_v17, %v16852_v53 }
 0x7bb   : > { %v4489_v41 = vpop.permute.xlu1 %4488  ;;  %v4491_v37 = vpop.permute.xlu0 %4490 }
 0x7bc   : > { %4560 = vst.msk [vmem:[#allocation2 + $0xc8] sm:$0xff] %vm4534_vm14, %v4489_v41  ;;  %4561 = vst.msk [vmem:[#allocation2 + $0xd0] sm:$0xff] %vm4534_vm14, %v4491_v37  ;;  %v16854_v41 = vld [vmem:[#allocation265_spill] sm:$0xff]  ;;  %v16855_v37 = vld [vmem:[#allocation346_spill] sm:$0xff] }
 0x7bd   : > { %4862 = vrot.lane.b32.xlu1 %v4779_v19, %s8840_s17  ;;  %4864 = vrot.lane.b32.xlu0 %v4780_v6, %s8840_s17  ;;  %v4783_v19 = vmul.f32 %v16855_v37, %v16854_v41  ;;  %v16856_v6 = vld [vmem:[#allocation268_spill] sm:$0xff] }
 0x7be   : > { %v4784_v28 = vmul.f32 %v16857_v27, %v16856_v6 }
 0x7bf   : > { %v4493_v33 = vpop.permute.xlu1 %4492  ;;  %v4495_v39 = vpop.permute.xlu0 %4494 }
 0x7c0   : > { %4562 = vst.msk [vmem:[#allocation2 + $0xd8] sm:$0xff] %vm4534_vm14, %v4493_v33  ;;  %4563 = vst.msk [vmem:[#allocation2 + $0xe0] sm:$0xff] %vm4534_vm14, %v4495_v39  ;;  %v16858_v33 = vld [vmem:[#allocation267_spill] sm:$0xff]  ;;  %v16859_v39 = vld [vmem:[#allocation270_spill] sm:$0xff] }
 0x7c1   : > { %4866 = vrot.lane.b32.xlu1 %v4781_v13, %s8840_s17  ;;  %4868 = vrot.lane.b32.xlu0 %v4782_v8, %s8840_s17  ;;  %v4785_v8 = vmul.f32 %v12434_v47, %v16858_v33  ;;  %v4786_v13 = vmul.f32 %v12429_v3, %v16859_v39 }
 0x7c3   : > { %v4497_v50 = vpop.permute.xlu1 %4496  ;;  %v4499_v4 = vpop.permute.xlu0 %4498 }
 0x7c4   : > { %4564 = vst.msk [vmem:[#allocation2 + $0xe8] sm:$0xff] %vm4534_vm14, %v4497_v50  ;;  %4565 = vst.msk [vmem:[#allocation2 + $0xf0] sm:$0xff] %vm4534_vm14, %v4499_v4  ;;  %v16860_v50 = vld [vmem:[#allocation269_spill] sm:$0xff]  ;;  %v16861_v4 = vld [vmem:[#allocation272_spill] sm:$0xff] }
 0x7c5   : > { %4870 = vrot.lane.b32.xlu1 %v4783_v19, %s8840_s17  ;;  %4872 = vrot.lane.b32.xlu0 %v4784_v28, %s8840_s17  ;;  %v4787_v28 = vmul.f32 %v12448_v59, %v16860_v50  ;;  %v4788_v19 = vmul.f32 %v12445_v36, %v16861_v4 }
 0x7c7   : > { %v4501_v53 = vpop.permute.xlu1 %4500  ;;  %v4632_v41 = vpop.permute.xlu0 %4631 }
 0x7c8   : > { %4566 = vst.msk [vmem:[#allocation2 + $0xf8] sm:$0xff] %vm4534_vm14, %v4501_v53  ;;  %v16862_v53 = vld [vmem:[#allocation271_spill] sm:$0xff]  ;;  %vm7669_vm14 = vcmask 883712  }
 0x7c9   : > { %4728 = vst.msk [vmem:[#allocation2] sm:$0xff] %vm4727_vm15, %v4632_v41  ;;  %4874 = vrot.lane.b32.xlu1 %v4785_v8, %s8840_s17  ;;  %4876 = vrot.lane.b32.xlu0 %v4786_v13, %s8840_s17  ;;  %v4789_v41 = vmul.f32 %v12461_v56, %v16862_v53  ;;  %v16863_v8 = vld [vmem:[#allocation274_spill] sm:$0xff]  ;;  %v16864_v13 = vld [vmem:[#allocation320_spill] sm:$0xff] }
 0x7ca   : > { %v4790_v39 = vmul.f32 %v16864_v13, %v16863_v8 }
 0x7cb   : > { %v4634_v33 = vpop.permute.xlu1 %4633  ;;  %v4636_v6 = vpop.permute.xlu0 %4635 }
 0x7cc   : > { %4729 = vst.msk [vmem:[#allocation2 + $0x8] sm:$0xff] %vm4727_vm15, %v4634_v33  ;;  %4730 = vst.msk [vmem:[#allocation2 + $0x10] sm:$0xff] %vm4727_vm15, %v4636_v6  ;;  %v16865_v6 = vld [vmem:[#allocation273_spill] sm:$0xff] }
 0x7cd   : > { %4878 = vrot.lane.b32.xlu1 %v4787_v28, %s8840_s17  ;;  %4880 = vrot.lane.b32.xlu0 %v4788_v19, %s8840_s17  ;;  %v16866_v33 = vld [vmem:[#allocation321_spill] sm:$0xff]  ;;  %v16867_v19 = vld [vmem:[#allocation275_spill] sm:$0xff] }
 0x7ce   : > { %v4791_v28 = vmul.f32 %v16866_v33, %v16865_v6  ;;  %v4953_v4 = vmul.f32 %v11821_v48, %v16867_v19  ;;  %v16870_v48 = vld [vmem:[#allocation33_spill] sm:$0xff] }
 0x7cf   : > { %v4638_v50 = vpop.permute.xlu1 %4637  ;;  %v4640_v59 = vpop.permute.xlu0 %4639 }
 0x7d0   : > { %4731 = vst.msk [vmem:[#allocation2 + $0x18] sm:$0xff] %vm4727_vm15, %v4638_v50  ;;  %4732 = vst.msk [vmem:[#allocation2 + $0x20] sm:$0xff] %vm4727_vm15, %v4640_v59  ;;  %v16868_v59 = vld [vmem:[#allocation276_spill] sm:$0xff]  ;;  %v16869_v50 = vld [vmem:[#allocation34_spill] sm:$0xff] }
 0x7d1   : > { %4882 = vrot.lane.b32.xlu1 %v4789_v41, %s8840_s17  ;;  %4884 = vrot.lane.b32.xlu0 %v4790_v39, %s8840_s17  ;;  %v4954_v39 = vmul.f32 %v11837_v0, %v16868_v59  ;;  %v4955_v41 = vmul.f32 %v11840_v40, %v16869_v50  ;;  %v16872_v40 = vld [vmem:[#allocation277_spill] sm:$0xff] }
 0x7d3   : > { %v4642_v53 = vpop.permute.xlu1 %4641  ;;  %v4644_v56 = vpop.permute.xlu0 %4643 }
 0x7d4   : > { %4733 = vst.msk [vmem:[#allocation2 + $0x28] sm:$0xff] %vm4727_vm15, %v4642_v53  ;;  %4734 = vst.msk [vmem:[#allocation2 + $0x30] sm:$0xff] %vm4727_vm15, %v4644_v56  ;;  %v4957_v56 = vmul.f32 %v11857_v16, %v16870_v48 }
 0x7d5   : > { %4886 = vrot.lane.b32.xlu1 %v4791_v28, %s8840_s17  ;;  %5017 = vrot.lane.b32.xlu0 %v4953_v4, %s8841_s18  ;;  %v16871_v4 = vld [vmem:[#allocation38_spill] sm:$0xff] }
 0x7d6   : > { %v4956_v53 = vmul.f32 %v11851_v63, %v16871_v4  ;;  %v16874_v63 = vld [vmem:[#allocation37_spill] sm:$0xff] }
 0x7d7   : > { %v4646_v6 = vpop.permute.xlu1 %4645  ;;  %v4648_v8 = vpop.permute.xlu0 %4647 }
 0x7d8   : > { %4735 = vst.msk [vmem:[#allocation2 + $0x38] sm:$0xff] %vm4727_vm15, %v4646_v6  ;;  %4736 = vst.msk [vmem:[#allocation2 + $0x40] sm:$0xff] %vm4727_vm15, %v4648_v8  ;;  %v4959_v8 = vmul.f32 %v11878_v30, %v16872_v40  ;;  %v16873_v6 = vld [vmem:[#allocation42_spill] sm:$0xff] }
 0x7d9   : > { %5019 = vrot.lane.b32.xlu1 %v4954_v39, %s8841_s18  ;;  %5021 = vrot.lane.b32.xlu0 %v4955_v41, %s8841_s18  ;;  %v4958_v39 = vmul.f32 %v11870_v60, %v16873_v6  ;;  %v16876_v60 = vld [vmem:[#allocation41_spill] sm:$0xff] }
 0x7db   : > { %v4650_v0 = vpop.permute.xlu1 %4649  ;;  %v4652_v28 = vpop.permute.xlu0 %4651 }
 0x7dc   : > { %4737 = vst.msk [vmem:[#allocation2 + $0x48] sm:$0xff] %vm4727_vm15, %v4650_v0  ;;  %4738 = vst.msk [vmem:[#allocation2 + $0x50] sm:$0xff] %vm4727_vm15, %v4652_v28 }
 0x7dd   : > { %5023 = vrot.lane.b32.xlu1 %v4956_v53, %s8841_s18  ;;  %5025 = vrot.lane.b32.xlu0 %v4957_v56, %s8841_s18  ;;  %v4961_v53 = vmul.f32 %v11897_v58, %v16874_v63  ;;  %v16875_v56 = vld [vmem:[#allocation47_spill] sm:$0xff] }
 0x7de   : > { %v4960_v0 = vmul.f32 %v11894_v61, %v16875_v56  ;;  %v16878_v61 = vld [vmem:[#allocation46_spill] sm:$0xff] }
 0x7df   : > { %v4654_v16 = vpop.permute.xlu1 %4653  ;;  %v4656_v41 = vpop.permute.xlu0 %4655 }
 0x7e0   : > { %4739 = vst.msk [vmem:[#allocation2 + $0x58] sm:$0xff] %vm4727_vm15, %v4654_v16  ;;  %4740 = vst.msk [vmem:[#allocation2 + $0x60] sm:$0xff] %vm4727_vm15, %v4656_v41 }
 0x7e1   : > { %5027 = vrot.lane.b32.xlu1 %v4958_v39, %s8841_s18  ;;  %5029 = vrot.lane.b32.xlu0 %v4959_v8, %s8841_s18  ;;  %v4963_v39 = vmul.f32 %v11914_v7, %v16876_v60  ;;  %v16877_v8 = vld [vmem:[#allocation51_spill] sm:$0xff] }
 0x7e2   : > { %v4962_v16 = vmul.f32 %v11908_v35, %v16877_v8  ;;  %v16880_v35 = vld [vmem:[#allocation52_spill] sm:$0xff] }
 0x7e3   : > { %v4658_v30 = vpop.permute.xlu1 %4657  ;;  %v4660_v28 = vpop.permute.xlu0 %4659 }
 0x7e4   : > { %4741 = vst.msk [vmem:[#allocation2 + $0x68] sm:$0xff] %vm4727_vm15, %v4658_v30  ;;  %4742 = vst.msk [vmem:[#allocation2 + $0x70] sm:$0xff] %vm4727_vm15, %v4660_v28 }
 0x7e5   : > { %5031 = vrot.lane.b32.xlu1 %v4960_v0, %s8841_s18  ;;  %5033 = vrot.lane.b32.xlu0 %v4961_v53, %s8841_s18  ;;  %v4965_v0 = vmul.f32 %v11935_v49, %v16878_v61  ;;  %v16879_v53 = vld [vmem:[#allocation57_spill] sm:$0xff] }
 0x7e6   : > { %v4964_v30 = vmul.f32 %v11927_v5, %v16879_v53  ;;  %v16882_v5 = vld [vmem:[#allocation59_spill] sm:$0xff] }
 0x7e7   : > { %v4662_v58 = vpop.permute.xlu1 %4661  ;;  %v4664_v41 = vpop.permute.xlu0 %4663 }
 0x7e8   : > { %4743 = vst.msk [vmem:[#allocation2 + $0x78] sm:$0xff] %vm4727_vm15, %v4662_v58  ;;  %4744 = vst.msk [vmem:[#allocation2 + $0x80] sm:$0xff] %vm4727_vm15, %v4664_v41 }
 0x7e9   : > { %5035 = vrot.lane.b32.xlu1 %v4962_v16, %s8841_s18  ;;  %5037 = vrot.lane.b32.xlu0 %v4963_v39, %s8841_s18  ;;  %v4967_v16 = vmul.f32 %v16743_v31, %v16880_v35  ;;  %v16881_v39 = vld [vmem:[#allocation65_spill] sm:$0xff] }
 0x7ea   : > { %v4966_v58 = vmul.f32 %v11951_v54, %v16881_v39  ;;  %v16886_v54 = vld [vmem:[#allocation64_spill] sm:$0xff] }
 0x7eb   : > { %v4666_v7 = vpop.permute.xlu1 %4665  ;;  %v4668_v28 = vpop.permute.xlu0 %4667 }
 0x7ec   : > { %4745 = vst.msk [vmem:[#allocation2 + $0x88] sm:$0xff] %vm4727_vm15, %v4666_v7  ;;  %4746 = vst.msk [vmem:[#allocation2 + $0x90] sm:$0xff] %vm4727_vm15, %v4668_v28  ;;  %v16885_v28 = vld [vmem:[#allocation306_spill] sm:$0xff] }
 0x7ed   : > { %5039 = vrot.lane.b32.xlu1 %v4964_v30, %s8841_s18  ;;  %5041 = vrot.lane.b32.xlu0 %v4965_v0, %s8841_s18  ;;  %v16883_v30 = vld [vmem:[#allocation307_spill] sm:$0xff]  ;;  %v16884_v0 = vld [vmem:[#allocation69_spill] sm:$0xff] }
 0x7ee   : > { %v4969_v7 = vmul.f32 %v16883_v30, %v16882_v5  ;;  %v4968_v61 = vmul.f32 %v16885_v28, %v16884_v0  ;;  %v16892_v28 = vld [vmem:[#allocation310_spill] sm:$0xff] }
 0x7ef   : > { %v4670_v49 = vpop.permute.xlu1 %4669  ;;  %v4672_v41 = vpop.permute.xlu0 %4671 }
 0x7f0   : > { %4747 = vst.msk [vmem:[#allocation2 + $0x98] sm:$0xff] %vm4727_vm15, %v4670_v49  ;;  %4748 = vst.msk [vmem:[#allocation2 + $0xa0] sm:$0xff] %vm4727_vm15, %v4672_v41  ;;  %v16889_v41 = vld [vmem:[#allocation308_spill] sm:$0xff] }
 0x7f1   : > { %5043 = vrot.lane.b32.xlu1 %v4966_v58, %s8841_s18  ;;  %5045 = vrot.lane.b32.xlu0 %v4967_v16, %s8841_s18  ;;  %v16887_v58 = vld [vmem:[#allocation309_spill] sm:$0xff]  ;;  %v16888_v16 = vld [vmem:[#allocation75_spill] sm:$0xff] }
 0x7f2   : > { %v4971_v49 = vmul.f32 %v16887_v58, %v16886_v54  ;;  %v4970_v39 = vmul.f32 %v16889_v41, %v16888_v16  ;;  %v16895_v41 = vld [vmem:[#allocation312_spill] sm:$0xff] }
 0x7f3   : > { %v4674_v31 = vpop.permute.xlu1 %4673  ;;  %v4676_v35 = vpop.permute.xlu0 %4675 }
 0x7f4   : > { %4749 = vst.msk [vmem:[#allocation2 + $0xa8] sm:$0xff] %vm4727_vm15, %v4674_v31  ;;  %4750 = vst.msk [vmem:[#allocation2 + $0xb0] sm:$0xff] %vm4727_vm15, %v4676_v35  ;;  %v16890_v35 = vld [vmem:[#allocation70_spill] sm:$0xff] }
 0x7f5   : > { %5047 = vrot.lane.b32.xlu1 %v4968_v61, %s8841_s18  ;;  %5049 = vrot.lane.b32.xlu0 %v4969_v7, %s8841_s18  ;;  %v4973_v61 = vmul.f32 %v16755_v20, %v16890_v35  ;;  %v16891_v7 = vld [vmem:[#allocation77_spill] sm:$0xff] }
 0x7f6   : > { %v4972_v31 = vmul.f32 %v16892_v28, %v16891_v7 }
 0x7f7   : > { %v4678_v30 = vpop.permute.xlu1 %4677  ;;  %v4680_v53 = vpop.permute.xlu0 %4679 }
 0x7f8   : > { %4751 = vst.msk [vmem:[#allocation2 + $0xb8] sm:$0xff] %vm4727_vm15, %v4678_v30  ;;  %4752 = vst.msk [vmem:[#allocation2 + $0xc0] sm:$0xff] %vm4727_vm15, %v4680_v53  ;;  %v16893_v53 = vld [vmem:[#allocation278_spill] sm:$0xff] }
 0x7f9   : > { %5051 = vrot.lane.b32.xlu1 %v4970_v39, %s8841_s18  ;;  %5053 = vrot.lane.b32.xlu0 %v4971_v49, %s8841_s18  ;;  %v4975_v39 = vmul.f32 %v16759_v18, %v16893_v53  ;;  %v16894_v49 = vld [vmem:[#allocation82_spill] sm:$0xff] }
 0x7fa   : > { %v4974_v30 = vmul.f32 %v16895_v41, %v16894_v49  ;;  %v16900_v41 = vld [vmem:[#allocation318_spill] sm:$0xff] }
 0x7fb   : > { %v4682_v58 = vpop.permute.xlu1 %4681  ;;  %v4684_v0 = vpop.permute.xlu0 %4683 }
 0x7fc   : > { %4753 = vst.msk [vmem:[#allocation2 + $0xc8] sm:$0xff] %vm4727_vm15, %v4682_v58  ;;  %4754 = vst.msk [vmem:[#allocation2 + $0xd0] sm:$0xff] %vm4727_vm15, %v4684_v0  ;;  %v16896_v0 = vld [vmem:[#allocation279_spill] sm:$0xff] }
 0x7fd   : > { %5055 = vrot.lane.b32.xlu1 %v4972_v31, %s8841_s18  ;;  %5057 = vrot.lane.b32.xlu0 %v4973_v61, %s8841_s18  ;;  %v4977_v28 = vmul.f32 %v16762_v22, %v16896_v0  ;;  %v16897_v61 = vld [vmem:[#allocation280_spill] sm:$0xff]  ;;  %v16898_v31 = vld [vmem:[#allocation315_spill] sm:$0xff] }
 0x7fe   : > { %v4976_v58 = vmul.f32 %v16898_v31, %v16897_v61  ;;  %v16904_v31 = vld [vmem:[#allocation97_spill] sm:$0xff] }
 0x7ff   : > { %v4686_v20 = vpop.permute.xlu1 %4685  ;;  %v4688_v60 = vpop.permute.xlu0 %4687 }
 0x800   : > { %4755 = vst.msk [vmem:[#allocation2 + $0xd8] sm:$0xff] %vm4727_vm15, %v4686_v20  ;;  %4756 = vst.msk [vmem:[#allocation2 + $0xe0] sm:$0xff] %vm4727_vm15, %v4688_v60  ;;  %v16899_v60 = vld [vmem:[#allocation281_spill] sm:$0xff] }
 0x801   : > { %5059 = vrot.lane.b32.xlu1 %v4974_v30, %s8841_s18  ;;  %5061 = vrot.lane.b32.xlu0 %v4975_v39, %s8841_s18  ;;  %v4979_v39 = vmul.f32 %v16900_v41, %v16899_v60  ;;  %v16901_v30 = vld [vmem:[#allocation282_spill] sm:$0xff]  ;;  %v16902_v20 = vld [vmem:[#allocation317_spill] sm:$0xff] }
 0x802   : > { %v4978_v22 = vmul.f32 %v16902_v20, %v16901_v30 }
 0x803   : > { %v4690_v18 = vpop.permute.xlu1 %4689  ;;  %v4692_v8 = vpop.permute.xlu0 %4691 }
 0x804   : > { %4757 = vst.msk [vmem:[#allocation2 + $0xe8] sm:$0xff] %vm4727_vm15, %v4690_v18  ;;  %4758 = vst.msk [vmem:[#allocation2 + $0xf0] sm:$0xff] %vm4727_vm15, %v4692_v8  ;;  %v16903_v8 = vld [vmem:[#allocation283_spill] sm:$0xff] }
 0x805   : > { %5063 = vrot.lane.b32.xlu1 %v4976_v58, %s8841_s18  ;;  %5065 = vrot.lane.b32.xlu0 %v4977_v28, %s8841_s18  ;;  %v4981_v28 = vmul.f32 %v16768_v9, %v16903_v8  ;;  %v16905_v58 = vld [vmem:[#allocation319_spill] sm:$0xff] }
 0x806   : > { %v4980_v18 = vmul.f32 %v16905_v58, %v16904_v31  ;;  %v16911_v58 = vld [vmem:[#allocation303_spill] sm:$0xff] }
 0x807   : > { %v4694_v0 = vpop.permute.xlu1 %4693  ;;  %v4825_v63 = vpop.permute.xlu0 %4824 }
 0x808   : > { %4759 = vst.msk [vmem:[#allocation2 + $0xf8] sm:$0xff] %vm4727_vm15, %v4694_v0  ;;  %v16907_v0 = vld [vmem:[#allocation301_spill] sm:$0xff] }
 0x809   : > { %4921 = vst.msk [vmem:[#allocation2] sm:$0xff] %vm4920_vm1, %v4825_v63  ;;  %5067 = vrot.lane.b32.xlu1 %v4978_v22, %s8841_s18  ;;  %5069 = vrot.lane.b32.xlu0 %v4979_v39, %s8841_s18  ;;  %v16906_v63 = vld [vmem:[#allocation284_spill] sm:$0xff]  ;;  %v16908_v39 = vld [vmem:[#allocation285_spill] sm:$0xff] }
 0x80a   : > { %v4983_v20 = vmul.f32 %v16907_v0, %v16906_v63  ;;  %v16909_v22 = vld [vmem:[#allocation17_spill] sm:$0xff] }
 0x80b   : > { %v4827_v41 = vpop.permute.xlu1 %4826  ;;  %v4829_v60 = vpop.permute.xlu0 %4828  ;;  %v4982_v30 = vmul.f32 %v16909_v22, %v16908_v39 }
 0x80c   : > { %4922 = vst.msk [vmem:[#allocation2 + $0x8] sm:$0xff] %vm4920_vm1, %v4827_v41  ;;  %4923 = vst.msk [vmem:[#allocation2 + $0x10] sm:$0xff] %vm4920_vm1, %v4829_v60  ;;  %v16910_v60 = vld [vmem:[#allocation25_spill] sm:$0xff] }
 0x80d   : > { %5071 = vrot.lane.b32.xlu1 %v4980_v18, %s8841_s18  ;;  %5073 = vrot.lane.b32.xlu0 %v4981_v28, %s8841_s18  ;;  %v4984_v18 = vmul.f32 %v16911_v58, %v16910_v60  ;;  %v16912_v28 = vld [vmem:[#allocation30_spill] sm:$0xff] }
 0x80e   : > { %v5146_v41 = vmul.f32 %v11784_v15, %v16912_v28  ;;  %v16915_v15 = vld [vmem:[#allocation286_spill] sm:$0xff] }
 0x80f   : > { %v4831_v9 = vpop.permute.xlu1 %4830  ;;  %v4833_v8 = vpop.permute.xlu0 %4832 }
 0x810   : > { %4924 = vst.msk [vmem:[#allocation2 + $0x18] sm:$0xff] %vm4920_vm1, %v4831_v9  ;;  %4925 = vst.msk [vmem:[#allocation2 + $0x20] sm:$0xff] %vm4920_vm1, %v4833_v8 }
 0x811   : > { %5075 = vrot.lane.b32.xlu1 %v4982_v30, %s8841_s18  ;;  %5077 = vrot.lane.b32.xlu0 %v4983_v20, %s8841_s18  ;;  %v16913_v30 = vld [vmem:[#allocation29_spill] sm:$0xff]  ;;  %v16914_v20 = vld [vmem:[#allocation287_spill] sm:$0xff] }
 0x812   : > { %v5147_v8 = vmul.f32 %v16778_v32, %v16913_v30  ;;  %v5148_v22 = vmul.f32 %v11805_v10, %v16914_v20  ;;  %v16917_v10 = vld [vmem:[#allocation288_spill] sm:$0xff] }
 0x813   : > { %v4835_v0 = vpop.permute.xlu1 %4834  ;;  %v4837_v63 = vpop.permute.xlu0 %4836 }
 0x814   : > { %4926 = vst.msk [vmem:[#allocation2 + $0x28] sm:$0xff] %vm4920_vm1, %v4835_v0  ;;  %4927 = vst.msk [vmem:[#allocation2 + $0x30] sm:$0xff] %vm4920_vm1, %v4837_v63  ;;  %v5149_v63 = vmul.f32 %v16781_v38, %v16915_v15 }
 0x815   : > { %5079 = vrot.lane.b32.xlu1 %v4984_v18, %s8841_s18  ;;  %5210 = vrot.lane.b32.xlu0 %v5146_v41, %s8842_s20  ;;  %v16916_v18 = vld [vmem:[#allocation289_spill] sm:$0xff]  ;;  %s13208_s18 = scalar_lea.vmem %s15053_s2, %s8173_s16  ;;  %s8849_s16 = smov 92  }
 0x816   : > { %v5150_v41 = vmul.f32 %v11824_v46, %v16916_v18  ;;  %v16919_v46 = vld [vmem:[#allocation290_spill] sm:$0xff] }
 0x817   : > { %v4839_v9 = vpop.permute.xlu1 %4838  ;;  %v4841_v58 = vpop.permute.xlu0 %4840 }
 0x818   : > { %4928 = vst.msk [vmem:[#allocation2 + $0x38] sm:$0xff] %vm4920_vm1, %v4839_v9  ;;  %4929 = vst.msk [vmem:[#allocation2 + $0x40] sm:$0xff] %vm4920_vm1, %v4841_v58 }
 0x819   : > { %5212 = vrot.lane.b32.xlu1 %v5147_v8, %s8842_s20  ;;  %5214 = vrot.lane.b32.xlu0 %v5148_v22, %s8842_s20  ;;  %v5151_v8 = vmul.f32 %v11834_v2, %v16917_v10  ;;  %v16918_v22 = vld [vmem:[#allocation291_spill] sm:$0xff] }
 0x81a   : > { %v5152_v9 = vmul.f32 %v11843_v42, %v16918_v22  ;;  %v16921_v42 = vld [vmem:[#allocation292_spill] sm:$0xff] }
 0x81b   : > { %v4843_v32 = vpop.permute.xlu1 %4842  ;;  %v4845_v0 = vpop.permute.xlu0 %4844 }
 0x81c   : > { %4930 = vst.msk [vmem:[#allocation2 + $0x48] sm:$0xff] %vm4920_vm1, %v4843_v32  ;;  %4931 = vst.msk [vmem:[#allocation2 + $0x50] sm:$0xff] %vm4920_vm1, %v4845_v0 }
 0x81d   : > { %5216 = vrot.lane.b32.xlu1 %v5149_v63, %s8842_s20  ;;  %5218 = vrot.lane.b32.xlu0 %v5150_v41, %s8842_s20  ;;  %v5153_v63 = vmul.f32 %v11859_v1, %v16919_v46  ;;  %v16920_v41 = vld [vmem:[#allocation293_spill] sm:$0xff] }
 0x81e   : > { %v5154_v32 = vmul.f32 %v11862_v34, %v16920_v41  ;;  %v16923_v34 = vld [vmem:[#allocation294_spill] sm:$0xff] }
 0x81f   : > { %v4847_v38 = vpop.permute.xlu1 %4846  ;;  %v4849_v58 = vpop.permute.xlu0 %4848 }
 0x820   : > { %4932 = vst.msk [vmem:[#allocation2 + $0x58] sm:$0xff] %vm4920_vm1, %v4847_v38  ;;  %4933 = vst.msk [vmem:[#allocation2 + $0x60] sm:$0xff] %vm4920_vm1, %v4849_v58 }
 0x821   : > { %5220 = vrot.lane.b32.xlu1 %v5151_v8, %s8842_s20  ;;  %5222 = vrot.lane.b32.xlu0 %v5152_v9, %s8842_s20  ;;  %v5155_v8 = vmul.f32 %v11874_v11, %v16921_v42  ;;  %v16922_v9 = vld [vmem:[#allocation295_spill] sm:$0xff] }
 0x822   : > { %v5156_v38 = vmul.f32 %v11881_v55, %v16922_v9  ;;  %v16925_v55 = vld [vmem:[#allocation296_spill] sm:$0xff] }
 0x823   : > { %v4851_v2 = vpop.permute.xlu1 %4850  ;;  %v4853_v0 = vpop.permute.xlu0 %4852 }
 0x824   : > { %4934 = vst.msk [vmem:[#allocation2 + $0x68] sm:$0xff] %vm4920_vm1, %v4851_v2  ;;  %4935 = vst.msk [vmem:[#allocation2 + $0x70] sm:$0xff] %vm4920_vm1, %v4853_v0 }
 0x825   : > { %5224 = vrot.lane.b32.xlu1 %v5153_v63, %s8842_s20  ;;  %5226 = vrot.lane.b32.xlu0 %v5154_v32, %s8842_s20  ;;  %v5157_v63 = vmul.f32 %v11891_v62, %v16923_v34  ;;  %v16924_v32 = vld [vmem:[#allocation48_spill] sm:$0xff] }
 0x826   : > { %v5158_v2 = vmul.f32 %v11900_v14, %v16924_v32  ;;  %v16927_v14 = vld [vmem:[#allocation45_spill] sm:$0xff] }
 0x827   : > { %v4855_v1 = vpop.permute.xlu1 %4854  ;;  %v4857_v58 = vpop.permute.xlu0 %4856 }
 0x828   : > { %4936 = vst.msk [vmem:[#allocation2 + $0x78] sm:$0xff] %vm4920_vm1, %v4855_v1  ;;  %4937 = vst.msk [vmem:[#allocation2 + $0x80] sm:$0xff] %vm4920_vm1, %v4857_v58 }
 0x829   : > { %5228 = vrot.lane.b32.xlu1 %v5155_v8, %s8842_s20  ;;  %5230 = vrot.lane.b32.xlu0 %v5156_v38, %s8842_s20  ;;  %v5159_v8 = vmul.f32 %v11916_v52, %v16925_v55  ;;  %v16926_v38 = vld [vmem:[#allocation54_spill] sm:$0xff] }
 0x82a   : > { %v5160_v1 = vmul.f32 %v11919_v12, %v16926_v38  ;;  %v16929_v12 = vld [vmem:[#allocation53_spill] sm:$0xff] }
 0x82b   : > { %v4859_v11 = vpop.permute.xlu1 %4858  ;;  %v4861_v0 = vpop.permute.xlu0 %4860 }
 0x82c   : > { %4938 = vst.msk [vmem:[#allocation2 + $0x88] sm:$0xff] %vm4920_vm1, %v4859_v11  ;;  %4939 = vst.msk [vmem:[#allocation2 + $0x90] sm:$0xff] %vm4920_vm1, %v4861_v0 }
 0x82d   : > { %5232 = vrot.lane.b32.xlu1 %v5157_v63, %s8842_s20  ;;  %5234 = vrot.lane.b32.xlu0 %v5158_v2, %s8842_s20  ;;  %v5161_v63 = vmul.f32 %v11931_v44, %v16927_v14  ;;  %v16928_v2 = vld [vmem:[#allocation60_spill] sm:$0xff] }
 0x82e   : > { %v5162_v11 = vmul.f32 %v11938_v21, %v16928_v2  ;;  %v16931_v21 = vld [vmem:[#allocation58_spill] sm:$0xff] }
 0x82f   : > { %v4863_v62 = vpop.permute.xlu1 %4862  ;;  %v4865_v58 = vpop.permute.xlu0 %4864 }
 0x830   : > { %4940 = vst.msk [vmem:[#allocation2 + $0x98] sm:$0xff] %vm4920_vm1, %v4863_v62  ;;  %4941 = vst.msk [vmem:[#allocation2 + $0xa0] sm:$0xff] %vm4920_vm1, %v4865_v58 }
 0x831   : > { %5236 = vrot.lane.b32.xlu1 %v5159_v8, %s8842_s20  ;;  %5238 = vrot.lane.b32.xlu0 %v5160_v1, %s8842_s20  ;;  %v5163_v8 = vmul.f32 %v11948_v26, %v16929_v12  ;;  %v16930_v1 = vld [vmem:[#allocation66_spill] sm:$0xff] }
 0x832   : > { %v5164_v62 = vmul.f32 %v11957_v45, %v16930_v1  ;;  %v16933_v45 = vld [vmem:[#allocation63_spill] sm:$0xff] }
 0x833   : > { %v4867_v52 = vpop.permute.xlu1 %4866  ;;  %v4869_v0 = vpop.permute.xlu0 %4868 }
 0x834   : > { %4942 = vst.msk [vmem:[#allocation2 + $0xa8] sm:$0xff] %vm4920_vm1, %v4867_v52  ;;  %4943 = vst.msk [vmem:[#allocation2 + $0xb0] sm:$0xff] %vm4920_vm1, %v4869_v0 }
 0x835   : > { %5240 = vrot.lane.b32.xlu1 %v5161_v63, %s8842_s20  ;;  %5242 = vrot.lane.b32.xlu0 %v5162_v11, %s8842_s20  ;;  %v5165_v63 = vmul.f32 %v11973_v25, %v16931_v21  ;;  %v16932_v11 = vld [vmem:[#allocation72_spill] sm:$0xff] }
 0x836   : > { %v5166_v52 = vmul.f32 %v11976_v43, %v16932_v11  ;;  %v16935_v43 = vld [vmem:[#allocation71_spill] sm:$0xff] }
 0x837   : > { %v4871_v44 = vpop.permute.xlu1 %4870  ;;  %v4873_v58 = vpop.permute.xlu0 %4872 }
 0x838   : > { %4944 = vst.msk [vmem:[#allocation2 + $0xb8] sm:$0xff] %vm4920_vm1, %v4871_v44  ;;  %4945 = vst.msk [vmem:[#allocation2 + $0xc0] sm:$0xff] %vm4920_vm1, %v4873_v58 }
 0x839   : > { %5244 = vrot.lane.b32.xlu1 %v5163_v8, %s8842_s20  ;;  %5246 = vrot.lane.b32.xlu0 %v5164_v62, %s8842_s20  ;;  %v5167_v8 = vmul.f32 %v11988_v57, %v16933_v45  ;;  %v16934_v62 = vld [vmem:[#allocation78_spill] sm:$0xff] }
 0x83a   : > { %v5168_v44 = vmul.f32 %v11995_v29, %v16934_v62  ;;  %v16937_v29 = vld [vmem:[#allocation76_spill] sm:$0xff] }
 0x83b   : > { %v4875_v26 = vpop.permute.xlu1 %4874  ;;  %v4877_v0 = vpop.permute.xlu0 %4876 }
 0x83c   : > { %4946 = vst.msk [vmem:[#allocation2 + $0xc8] sm:$0xff] %vm4920_vm1, %v4875_v26  ;;  %4947 = vst.msk [vmem:[#allocation2 + $0xd0] sm:$0xff] %vm4920_vm1, %v4877_v0 }
 0x83d   : > { %5248 = vrot.lane.b32.xlu1 %v5165_v63, %s8842_s20  ;;  %5250 = vrot.lane.b32.xlu0 %v5166_v52, %s8842_s20  ;;  %v5169_v63 = vmul.f32 %v12005_v23, %v16935_v43  ;;  %v16936_v52 = vld [vmem:[#allocation84_spill] sm:$0xff] }
 0x83e   : > { %v5170_v26 = vmul.f32 %v12014_v24, %v16936_v52  ;;  %v16940_v24 = vld [vmem:[#allocation81_spill] sm:$0xff] }
 0x83f   : > { %v4879_v25 = vpop.permute.xlu1 %4878  ;;  %v4881_v58 = vpop.permute.xlu0 %4880 }
 0x840   : > { %4948 = vst.msk [vmem:[#allocation2 + $0xd8] sm:$0xff] %vm4920_vm1, %v4879_v25  ;;  %4949 = vst.msk [vmem:[#allocation2 + $0xe0] sm:$0xff] %vm4920_vm1, %v4881_v58  ;;  %v16939_v25 = vld [vmem:[#allocation314_spill] sm:$0xff] }
 0x841   : > { %5252 = vrot.lane.b32.xlu1 %v5167_v8, %s8842_s20  ;;  %5254 = vrot.lane.b32.xlu0 %v5168_v44, %s8842_s20  ;;  %v5171_v8 = vmul.f32 %v12029_v51, %v16937_v29  ;;  %v16938_v44 = vld [vmem:[#allocation90_spill] sm:$0xff] }
 0x842   : > { %v5172_v23 = vmul.f32 %v16939_v25, %v16938_v44 }
 0x843   : > { %v4883_v57 = vpop.permute.xlu1 %4882  ;;  %v4885_v0 = vpop.permute.xlu0 %4884 }
 0x844   : > { %4950 = vst.msk [vmem:[#allocation2 + $0xe8] sm:$0xff] %vm4920_vm1, %v4883_v57  ;;  %4951 = vst.msk [vmem:[#allocation2 + $0xf0] sm:$0xff] %vm4920_vm1, %v4885_v0  ;;  %v16942_v57 = vld [vmem:[#allocation22_spill] sm:$0xff]  ;;  %v16943_v0 = vld [vmem:[#allocation180_spill] sm:$0xff] }
 0x845   : > { %5256 = vrot.lane.b32.xlu1 %v5169_v63, %s8842_s20  ;;  %5258 = vrot.lane.b32.xlu0 %v5170_v26, %s8842_s20  ;;  %v16941_v63 = vld [vmem:[#allocation178_spill] sm:$0xff]  ;;  %v5174_v38 = vmul.f32 %v16943_v0, %v16942_v57 }
 0x846   : > { %v5173_v26 = vmul.f32 %v16941_v63, %v16940_v24 }
 0x847   : > { %v4887_v58 = vpop.permute.xlu1 %4886  ;;  %v5018_v14 = vpop.permute.xlu0 %5017 }
 0x848   : > { %4952 = vst.msk [vmem:[#allocation2 + $0xf8] sm:$0xff] %vm4920_vm1, %v4887_v58  ;;  %v16947_v58 = vld [vmem:[#allocation299_spill] sm:$0xff]  ;;  %vm7986_vm1 = vcmask 261120  }
 0x849   : > { %5114 = vst.msk [vmem:[#allocation2] sm:$0xff] %vm5113_vm2, %v5018_v14  ;;  %5260 = vrot.lane.b32.xlu1 %v5171_v8, %s8842_s20  ;;  %5262 = vrot.lane.b32.xlu0 %v5172_v23, %s8842_s20  ;;  %v16944_v14 = vld [vmem:[#allocation89_spill] sm:$0xff] }
 0x84a   : > { %v16945_v8 = vld [vmem:[#allocation297_spill] sm:$0xff] }
 0x84b   : > { %v5020_v51 = vpop.permute.xlu1 %5019  ;;  %v5022_v55 = vpop.permute.xlu0 %5021  ;;  %v5175_v25 = vmul.f32 %v16945_v8, %v16944_v14  ;;  %v16946_v23 = vld [vmem:[#allocation21_spill] sm:$0xff] }
 0x84c   : > { %5115 = vst.msk [vmem:[#allocation2 + $0x8] sm:$0xff] %vm5113_vm2, %v5020_v51  ;;  %5116 = vst.msk [vmem:[#allocation2 + $0x10] sm:$0xff] %vm5113_vm2, %v5022_v55  ;;  %v5176_v32 = vmul.f32 %v16947_v58, %v16946_v23  ;;  %v16948_v55 = vld [vmem:[#allocation94_spill] sm:$0xff]  ;;  %v16951_v51 = vld [vmem:[#allocation323_spill] sm:$0xff] }
 0x84d   : > { %5264 = vrot.lane.b32.xlu1 %v5173_v26, %s8842_s20  ;;  %5266 = vrot.lane.b32.xlu0 %v5174_v38, %s8842_s20  ;;  %v16949_v26 = vld [vmem:[#allocation300_spill] sm:$0xff]  ;;  %v16950_v38 = vld [vmem:[#allocation23_spill] sm:$0xff] }
 0x84e   : > { %v5177_v0 = vmul.f32 %v16949_v26, %v16948_v55  ;;  %v5339_v57 = vmul.f32 %v16951_v51, %v16950_v38  ;;  %v16954_v58 = vld [vmem:[#allocation20_spill] sm:$0xff] }
 0x84f   : > { %v5024_v63 = vpop.permute.xlu1 %5023  ;;  %v5026_v60 = vpop.permute.xlu0 %5025 }
 0x850   : > { %5117 = vst.msk [vmem:[#allocation2 + $0x18] sm:$0xff] %vm5113_vm2, %v5024_v63  ;;  %5118 = vst.msk [vmem:[#allocation2 + $0x20] sm:$0xff] %vm5113_vm2, %v5026_v60  ;;  %v16952_v60 = vld [vmem:[#allocation24_spill] sm:$0xff]  ;;  %v16955_v63 = vld [vmem:[#allocation325_spill] sm:$0xff] }
 0x851   : > { %5268 = vrot.lane.b32.xlu1 %v5175_v25, %s8842_s20  ;;  %5270 = vrot.lane.b32.xlu0 %v5176_v32, %s8842_s20  ;;  %v16953_v25 = vld [vmem:[#allocation326_spill] sm:$0xff]  ;;  %v5341_v26 = vmul.f32 %v16955_v63, %v16954_v58  ;;  %v16962_v63 = vld [vmem:[#allocation135_spill] sm:$0xff] }
 0x852   : > { %v5340_v32 = vmul.f32 %v16953_v25, %v16952_v60 }
 0x853   : > { %v5028_v8 = vpop.permute.xlu1 %5027  ;;  %v5030_v14 = vpop.permute.xlu0 %5029 }
 0x854   : > { %5119 = vst.msk [vmem:[#allocation2 + $0x28] sm:$0xff] %vm5113_vm2, %v5028_v8  ;;  %5120 = vst.msk [vmem:[#allocation2 + $0x30] sm:$0xff] %vm5113_vm2, %v5030_v14  ;;  %v16956_v14 = vld [vmem:[#allocation10_spill] sm:$0xff]  ;;  %v16959_v8 = vld [vmem:[#allocation328_spill] sm:$0xff] }
 0x855   : > { %5272 = vrot.lane.b32.xlu1 %v5177_v0, %s8842_s20  ;;  %5403 = vrot.lane.b32.xlu0 %v5339_v57, %s8843_s22  ;;  %v16957_v0 = vld [vmem:[#allocation327_spill] sm:$0xff]  ;;  %v16958_v57 = vld [vmem:[#allocation16_spill] sm:$0xff]  ;;  %s8844_s20 = smov 72  }
 0x856   : > { %v5343_v51 = vmul.f32 %v16957_v0, %v16956_v14  ;;  %v5342_v39 = vmul.f32 %v16959_v8, %v16958_v57 }
 0x857   : > { %v5032_v55 = vpop.permute.xlu1 %5031  ;;  %v5034_v23 = vpop.permute.xlu0 %5033 }
 0x858   : > { %5121 = vst.msk [vmem:[#allocation2 + $0x38] sm:$0xff] %vm5113_vm2, %v5032_v55  ;;  %5122 = vst.msk [vmem:[#allocation2 + $0x40] sm:$0xff] %vm5113_vm2, %v5034_v23  ;;  %v16960_v23 = vld [vmem:[#allocation14_spill] sm:$0xff]  ;;  %v16961_v55 = vld [vmem:[#allocation329_spill] sm:$0xff] }
 0x859   : > { %5405 = vrot.lane.b32.xlu1 %v5340_v32, %s8843_s22  ;;  %5407 = vrot.lane.b32.xlu0 %v5341_v26, %s8843_s22  ;;  %v5345_v32 = vmul.f32 %v16961_v55, %v16960_v23  ;;  %v16963_v26 = vld [vmem:[#allocation330_spill] sm:$0xff] }
 0x85a   : > { %v5344_v44 = vmul.f32 %v16963_v26, %v16962_v63  ;;  %v17014_v63 = vld [vmem:[#allocation324_spill] sm:$0xff] }
 0x85b   : > { %v5036_v25 = vpop.permute.xlu1 %5035  ;;  %v5038_v24 = vpop.permute.xlu0 %5037 }
 0x85c   : > { %5123 = vst.msk [vmem:[#allocation2 + $0x48] sm:$0xff] %vm5113_vm2, %v5036_v25  ;;  %5124 = vst.msk [vmem:[#allocation2 + $0x50] sm:$0xff] %vm5113_vm2, %v5038_v24  ;;  %v16964_v24 = vld [vmem:[#allocation136_spill] sm:$0xff] }
 0x85d   : > { %5409 = vrot.lane.b32.xlu1 %v5342_v39, %s8843_s22  ;;  %5411 = vrot.lane.b32.xlu0 %v5343_v51, %s8843_s22  ;;  %v16965_v39 = vld [vmem:[#allocation331_spill] sm:$0xff]  ;;  %v16967_v25 = vld [vmem:[#allocation332_spill] sm:$0xff] }
 0x85e   : > { %v5347_v8 = vmul.f32 %v16965_v39, %v16964_v24  ;;  %v16966_v51 = vld [vmem:[#allocation139_spill] sm:$0xff] }
 0x85f   : > { %v5040_v0 = vpop.permute.xlu1 %5039  ;;  %v5042_v34 = vpop.permute.xlu0 %5041  ;;  %v5346_v29 = vmul.f32 %v16967_v25, %v16966_v51  ;;  %v16974_v25 = vld [vmem:[#allocation147_spill] sm:$0xff] }
 0x860   : > { %5125 = vst.msk [vmem:[#allocation2 + $0x58] sm:$0xff] %vm5113_vm2, %v5040_v0  ;;  %5126 = vst.msk [vmem:[#allocation2 + $0x60] sm:$0xff] %vm5113_vm2, %v5042_v34  ;;  %v16968_v34 = vld [vmem:[#allocation140_spill] sm:$0xff]  ;;  %v16971_v0 = vld [vmem:[#allocation334_spill] sm:$0xff] }
 0x861   : > { %5413 = vrot.lane.b32.xlu1 %v5344_v44, %s8843_s22  ;;  %5415 = vrot.lane.b32.xlu0 %v5345_v32, %s8843_s22  ;;  %v16969_v44 = vld [vmem:[#allocation333_spill] sm:$0xff]  ;;  %v16970_v32 = vld [vmem:[#allocation143_spill] sm:$0xff] }
 0x862   : > { %v5349_v26 = vmul.f32 %v16969_v44, %v16968_v34  ;;  %v5348_v39 = vmul.f32 %v16971_v0, %v16970_v32  ;;  %v16978_v0 = vld [vmem:[#allocation151_spill] sm:$0xff] }
 0x863   : > { %v5044_v55 = vpop.permute.xlu1 %5043  ;;  %v5046_v9 = vpop.permute.xlu0 %5045 }
 0x864   : > { %5127 = vst.msk [vmem:[#allocation2 + $0x68] sm:$0xff] %vm5113_vm2, %v5044_v55  ;;  %5128 = vst.msk [vmem:[#allocation2 + $0x70] sm:$0xff] %vm5113_vm2, %v5046_v9  ;;  %v16972_v9 = vld [vmem:[#allocation144_spill] sm:$0xff] }
 0x865   : > { %5417 = vrot.lane.b32.xlu1 %v5346_v29, %s8843_s22  ;;  %5419 = vrot.lane.b32.xlu0 %v5347_v8, %s8843_s22  ;;  %v16973_v29 = vld [vmem:[#allocation335_spill] sm:$0xff]  ;;  %v16975_v55 = vld [vmem:[#allocation336_spill] sm:$0xff] }
 0x866   : > { %v5351_v8 = vmul.f32 %v16973_v29, %v16972_v9  ;;  %v5350_v44 = vmul.f32 %v16975_v55, %v16974_v25  ;;  %v16982_v55 = vld [vmem:[#allocation155_spill] sm:$0xff] }
 0x867   : > { %v5048_v24 = vpop.permute.xlu1 %5047  ;;  %v5050_v52 = vpop.permute.xlu0 %5049 }
 0x868   : > { %5129 = vst.msk [vmem:[#allocation2 + $0x78] sm:$0xff] %vm5113_vm2, %v5048_v24  ;;  %5130 = vst.msk [vmem:[#allocation2 + $0x80] sm:$0xff] %vm5113_vm2, %v5050_v52  ;;  %v16976_v52 = vld [vmem:[#allocation148_spill] sm:$0xff]  ;;  %v16977_v24 = vld [vmem:[#allocation337_spill] sm:$0xff] }
 0x869   : > { %5421 = vrot.lane.b32.xlu1 %v5348_v39, %s8843_s22  ;;  %5423 = vrot.lane.b32.xlu0 %v5349_v26, %s8843_s22  ;;  %v5353_v26 = vmul.f32 %v16977_v24, %v16976_v52  ;;  %v16979_v39 = vld [vmem:[#allocation338_spill] sm:$0xff] }
 0x86a   : > { %v5352_v29 = vmul.f32 %v16979_v39, %v16978_v0  ;;  %v16986_v39 = vld [vmem:[#allocation159_spill] sm:$0xff] }
 0x86b   : > { %v5052_v34 = vpop.permute.xlu1 %5051  ;;  %v5054_v42 = vpop.permute.xlu0 %5053 }
 0x86c   : > { %5131 = vst.msk [vmem:[#allocation2 + $0x88] sm:$0xff] %vm5113_vm2, %v5052_v34  ;;  %5132 = vst.msk [vmem:[#allocation2 + $0x90] sm:$0xff] %vm5113_vm2, %v5054_v42  ;;  %v16980_v42 = vld [vmem:[#allocation152_spill] sm:$0xff]  ;;  %v16981_v34 = vld [vmem:[#allocation339_spill] sm:$0xff] }
 0x86d   : > { %5425 = vrot.lane.b32.xlu1 %v5350_v44, %s8843_s22  ;;  %5427 = vrot.lane.b32.xlu0 %v5351_v8, %s8843_s22  ;;  %v5355_v8 = vmul.f32 %v16981_v34, %v16980_v42  ;;  %v16983_v44 = vld [vmem:[#allocation340_spill] sm:$0xff] }
 0x86e   : > { %v5354_v24 = vmul.f32 %v16983_v44, %v16982_v55 }
 0x86f   : > { %v5056_v9 = vpop.permute.xlu1 %5055  ;;  %v5058_v32 = vpop.permute.xlu0 %5057 }
 0x870   : > { %5133 = vst.msk [vmem:[#allocation2 + $0x98] sm:$0xff] %vm5113_vm2, %v5056_v9  ;;  %5134 = vst.msk [vmem:[#allocation2 + $0xa0] sm:$0xff] %vm5113_vm2, %v5058_v32  ;;  %v16984_v32 = vld [vmem:[#allocation156_spill] sm:$0xff]  ;;  %v16985_v9 = vld [vmem:[#allocation341_spill] sm:$0xff] }
 0x871   : > { %5429 = vrot.lane.b32.xlu1 %v5352_v29, %s8843_s22  ;;  %5431 = vrot.lane.b32.xlu0 %v5353_v26, %s8843_s22  ;;  %v5357_v26 = vmul.f32 %v16985_v9, %v16984_v32  ;;  %v16987_v29 = vld [vmem:[#allocation342_spill] sm:$0xff] }
 0x872   : > { %v5356_v34 = vmul.f32 %v16987_v29, %v16986_v39  ;;  %v16992_v29 = vld [vmem:[#allocation167_spill] sm:$0xff] }
 0x873   : > { %v5060_v52 = vpop.permute.xlu1 %5059  ;;  %v5062_v25 = vpop.permute.xlu0 %5061 }
 0x874   : > { %5135 = vst.msk [vmem:[#allocation2 + $0xa8] sm:$0xff] %vm5113_vm2, %v5060_v52  ;;  %5136 = vst.msk [vmem:[#allocation2 + $0xb0] sm:$0xff] %vm5113_vm2, %v5062_v25  ;;  %v16988_v25 = vld [vmem:[#allocation160_spill] sm:$0xff] }
 0x875   : > { %5433 = vrot.lane.b32.xlu1 %v5354_v24, %s8843_s22  ;;  %5435 = vrot.lane.b32.xlu0 %v5355_v8, %s8843_s22  ;;  %v5359_v52 = vmul.f32 %v16853_v17, %v16988_v25  ;;  %v16989_v8 = vld [vmem:[#allocation163_spill] sm:$0xff]  ;;  %v16990_v24 = vld [vmem:[#allocation344_spill] sm:$0xff]  ;;  %v5360_v17 = vmul.f32 %v16855_v37, %v16992_v29 }
 0x876   : > { %v5358_v9 = vmul.f32 %v16990_v24, %v16989_v8  ;;  %v16994_v37 = vld [vmem:[#allocation171_spill] sm:$0xff] }
 0x877   : > { %v5064_v0 = vpop.permute.xlu1 %5063  ;;  %v5066_v44 = vpop.permute.xlu0 %5065 }
 0x878   : > { %5137 = vst.msk [vmem:[#allocation2 + $0xb8] sm:$0xff] %vm5113_vm2, %v5064_v0  ;;  %5138 = vst.msk [vmem:[#allocation2 + $0xc0] sm:$0xff] %vm5113_vm2, %v5066_v44  ;;  %v16991_v0 = vld [vmem:[#allocation164_spill] sm:$0xff] }
 0x879   : > { %5437 = vrot.lane.b32.xlu1 %v5356_v34, %s8843_s22  ;;  %5439 = vrot.lane.b32.xlu0 %v5357_v26, %s8843_s22  ;;  %v5361_v26 = vmul.f32 %v16857_v27, %v16991_v0 }
 0x87b   : > { %v5068_v55 = vpop.permute.xlu1 %5067  ;;  %v5070_v41 = vpop.permute.xlu0 %5069 }
 0x87c   : > { %5139 = vst.msk [vmem:[#allocation2 + $0xc8] sm:$0xff] %vm5113_vm2, %v5068_v55  ;;  %5140 = vst.msk [vmem:[#allocation2 + $0xd0] sm:$0xff] %vm5113_vm2, %v5070_v41  ;;  %v16993_v41 = vld [vmem:[#allocation168_spill] sm:$0xff]  ;;  %v5362_v55 = vmul.f32 %v12434_v47, %v16994_v37  ;;  %v8334_v37 = vld [vmem:[%s13208_s18] sm:$0xff]  }
 0x87d   : > { %5441 = vrot.lane.b32.xlu1 %v5358_v9, %s8843_s22  ;;  %5443 = vrot.lane.b32.xlu0 %v5359_v52, %s8843_s22  ;;  %v5363_v27 = vmul.f32 %v12429_v3, %v16993_v41  ;;  %v8441_v9 = vld [vmem:[%s13208_s18 + $0x78] sm:$0xff]  }
 0x87f   : > { %v5072_v34 = vpop.permute.xlu1 %5071  ;;  %v5074_v44 = vpop.permute.xlu0 %5073 }
 0x880   : > { %5141 = vst.msk [vmem:[#allocation2 + $0xd8] sm:$0xff] %vm5113_vm2, %v5072_v34  ;;  %5142 = vst.msk [vmem:[#allocation2 + $0xe0] sm:$0xff] %vm5113_vm2, %v5074_v44  ;;  %v16996_v34 = vld [vmem:[#allocation175_spill] sm:$0xff] }
 0x881   : > { %5445 = vrot.lane.b32.xlu1 %v5360_v17, %s8843_s22  ;;  %5447 = vrot.lane.b32.xlu0 %v5361_v26, %s8843_s22  ;;  %v13218_v26 = vld [vmem:[%s13208_s18 + $0x70] sm:$0xff]   ;;  %v16997_v44 = vld [vmem:[#allocation347_spill] sm:$0xff] }
 0x882   : > { %v16995_v17 = vld [vmem:[#allocation172_spill] sm:$0xff]  ;;  %v5364_v47 = vmul.f32 %v16997_v44, %v16996_v34 }
 0x883   : > { %v5076_v52 = vpop.permute.xlu1 %5075  ;;  %v5078_v24 = vpop.permute.xlu0 %5077  ;;  %v5365_v3 = vmul.f32 %v12445_v36, %v16995_v17  ;;  %v13236_v36 = vunpack.c.h.bf16 %v8441_v9  ;;  %v17003_v17 = vld [vmem:[#allocation298_spill] sm:$0xff]  ;;  %v17004_v34 = vld [vmem:[#allocation348_spill] sm:$0xff] }
 0x884   : > { %5143 = vst.msk [vmem:[#allocation2 + $0xe8] sm:$0xff] %vm5113_vm2, %v5076_v52  ;;  %5144 = vst.msk [vmem:[#allocation2 + $0xf0] sm:$0xff] %vm5113_vm2, %v5078_v24  ;;  %v13228_v52 = vunpack.c.h.bf16 %v13218_v26  ;;  %v13230_v24 = vunpack.c.l.bf16 %v8441_v9  ;;  %v5366_v0 = vmul.f32 %v17004_v34, %v17003_v17  ;;  %v8427_v9 = vld [vmem:[%s13208_s18 + $0x8] sm:$0xff]   ;;  %v13253_v34 = vunpack.c.h.bf16 %v8334_v37  ;;  %v17008_v17 = vld [vmem:[#allocation182_spill] sm:$0xff] }
 0x885   : > { %5449 = vrot.lane.b32.xlu1 %v5362_v55, %s8843_s22  ;;  %5451 = vrot.lane.b32.xlu0 %v5363_v27, %s8843_s22  ;;  %17000 = vst [vmem:[#allocation313_spill] sm:$0xff] %v13236_v36  ;;  %v13238_v27 = vunpack.c.l.bf16 %v8334_v37  ;;  %v17002_v55 = vld [vmem:[#allocation176_spill] sm:$0xff]  ;;  %v13282_v43 = vunpack.c.h.bf16 %v8427_v9 }
 0x886   : > { %16998 = vst [vmem:[#allocation305_spill] sm:$0xff] %v13228_v52  ;;  %16999 = vst [vmem:[#allocation311_spill] sm:$0xff] %v13230_v24  ;;  %v5367_v44 = vmul.f32 %v16864_v13, %v17002_v55  ;;  %v5602_v13 = vrot.slane %v13236_v36, 7  ;;  %v8428_v37 = vld [vmem:[%s13208_s18 + $0x10] sm:$0xff]  }
 0x887   : > { %v5080_v41 = vpop.permute.xlu1 %5079  ;;  %v5211_v31 = vpop.permute.xlu0 %5210  ;;  %17001 = vst [vmem:[#allocation316_spill] sm:$0xff] %v13238_v27  ;;  %17005 = vst [vmem:[#allocation13_spill] sm:$0xff] %v13253_v34  ;;  %v13299_v22 = vunpack.c.h.bf16 %v8428_v37  ;;  %v5641_v46 = vrot.slane %v13282_v43, 7 }
 0x888   : > { %5145 = vst.msk [vmem:[#allocation2 + $0xf8] sm:$0xff] %vm5113_vm2, %v5080_v41  ;;  %v17007_v41 = vld [vmem:[#allocation322_spill] sm:$0xff]  ;;  %17016 = vst [vmem:[#allocation346_spill] sm:$0xff] %v13282_v43 }
 0x889   : > { %5307 = vst.msk [vmem:[#allocation2] sm:$0xff] %vm5306_vm4, %v5211_v31  ;;  %5453 = vrot.lane.b32.xlu1 %v5364_v47, %s8843_s22  ;;  %5455 = vrot.lane.b32.xlu0 %v5365_v3, %s8843_s22  ;;  %v5600_v31 = vrot.slane %v13230_v24, 7  ;;  %v5636_v3 = vrot.slane %v13238_v27, 7  ;;  %v17006_v47 = vld [vmem:[#allocation6_spill] sm:$0xff]  ;;  %17020 = vst [vmem:[#allocation320_spill] sm:$0xff] %v13299_v22  ;;  %v5645_v45 = vrot.slane %v13299_v22, 7 }
 0x88a   : > { %v5369_v55 = vmul.f32 %v17007_v41, %v17006_v47  ;;  %v17012_v41 = vld [vmem:[#allocation28_spill] sm:$0xff] }
 0x88b   : > { %v5213_v51 = vpop.permute.xlu1 %5212  ;;  %v5215_v23 = vpop.permute.xlu0 %5214 }
 0x88c   : > { %5308 = vst.msk [vmem:[#allocation2 + $0x8] sm:$0xff] %vm5306_vm4, %v5213_v51  ;;  %5309 = vst.msk [vmem:[#allocation2 + $0x10] sm:$0xff] %vm5306_vm4, %v5215_v23  ;;  %v5368_v51 = vmul.f32 %v16866_v33, %v17008_v17  ;;  %v17009_v23 = vrot.slane %v13228_v52, 7  ;;  %v13272_v33 = vsel %vm487_vm0, %v5602_v13, %v5636_v3  ;;  %v17013_v17 = vld [vmem:[#allocation9_spill] sm:$0xff] }
 0x88d   : > { %5457 = vrot.lane.b32.xlu1 %v5366_v0, %s8843_s22  ;;  %5459 = vrot.lane.b32.xlu0 %v5367_v44, %s8843_s22  ;;  %v13264_v44 = vunpack.c.l.bf16 %v8427_v9  ;;  %17011 = vst [vmem:[#allocation304_spill] sm:$0xff] %v13272_v33  ;;  %v5370_v14 = vmul.f32 %v17014_v63, %v17013_v17  ;;  %v17017_v63 = vld [vmem:[#allocation27_spill] sm:$0xff] }
 0x88e   : > { %v13262_v0 = vsel %vm487_vm0, %v17009_v23, %v5600_v31  ;;  %v5637_v23 = vrot.slane %v13253_v34, 7 }
 0x88f   : > { %v5217_v29 = vpop.permute.xlu1 %5216  ;;  %v5219_v25 = vpop.permute.xlu0 %5218  ;;  %17010 = vst [vmem:[#allocation302_spill] sm:$0xff] %v13262_v0  ;;  %v5725_v47 = vmul.f32 %v13262_v0, %v17012_v41  ;;  %v8429_v41 = vld [vmem:[%s13208_s18 + $0x18] sm:$0xff]  }
 0x890   : > { %5310 = vst.msk [vmem:[#allocation2 + $0x18] sm:$0xff] %vm5306_vm4, %v5217_v29  ;;  %5311 = vst.msk [vmem:[#allocation2 + $0x20] sm:$0xff] %vm5306_vm4, %v5219_v25  ;;  %v13280_v25 = vsel %vm487_vm0, %v5600_v31, %v5602_v13  ;;  %v5727_v31 = vmul.f32 %v13272_v33, %v17017_v63  ;;  %v13295_v9 = vsel %vm487_vm0, %v5636_v3, %v5637_v23  ;;  %v17019_v13 = vld [vmem:[#allocation32_spill] sm:$0xff]  ;;  %v13306_v11 = vunpack.c.l.bf16 %v8429_v41  ;;  %v8430_v3 = vld [vmem:[%s13208_s18 + $0x20] sm:$0xff]  }
 0x891   : > { %5461 = vrot.lane.b32.xlu1 %v5368_v51, %s8843_s22  ;;  %5463 = vrot.lane.b32.xlu0 %v5369_v55, %s8843_s22  ;;  %17015 = vst [vmem:[#allocation343_spill] sm:$0xff] %v13280_v25  ;;  %v5639_v55 = vrot.slane %v13264_v44, 7  ;;  %v13285_v51 = vunpack.c.l.bf16 %v8428_v37  ;;  %17018 = vst [vmem:[#allocation345_spill] sm:$0xff] %v13295_v9  ;;  %v5726_v17 = vmul.f32 %v13280_v25, %v17019_v13  ;;  %v17021_v37 = vld [vmem:[#allocation31_spill] sm:$0xff]  ;;  %v17022_v13 = vld [vmem:[#allocation36_spill] sm:$0xff]  ;;  %v13318_v18 = vunpack.c.h.bf16 %v8429_v41 }
 0x892   : > { %v5728_v63 = vmul.f32 %v13295_v9, %v17021_v37  ;;  %v8431_v37 = vld [vmem:[%s13208_s18 + $0x28] sm:$0xff]   ;;  %v13345_v49 = vunpack.c.h.bf16 %v8430_v3 }
 0x893   : > { %v5221_v29 = vpop.permute.xlu1 %5220  ;;  %v5223_v62 = vpop.permute.xlu0 %5222  ;;  %v17023_v41 = vld [vmem:[#allocation35_spill] sm:$0xff]  ;;  %v5649_v56 = vrot.slane %v13318_v18, 7  ;;  %v13362_v6 = vunpack.c.h.bf16 %v8431_v37 }
 0x894   : > { %5312 = vst.msk [vmem:[#allocation2 + $0x28] sm:$0xff] %vm5306_vm4, %v5221_v29  ;;  %5313 = vst.msk [vmem:[#allocation2 + $0x30] sm:$0xff] %vm5306_vm4, %v5223_v62 }
 0x895   : > { %5465 = vrot.lane.b32.xlu1 %v5370_v14, %s8843_s22  ;;  %5789 = vrot.lane.b32.xlu0 %v5725_v47, %s8844_s20  ;;  %v13303_v14 = vsel %vm487_vm0, %v5637_v23, %v5639_v55  ;;  %v5643_v47 = vrot.slane %v13285_v51, 7  ;;  %17025 = vst [vmem:[#allocation321_spill] sm:$0xff] %v13345_v49  ;;  %17029 = vst [vmem:[#allocation306_spill] sm:$0xff] %v13362_v6  ;;  %v5657_v32 = vrot.slane %v13362_v6, 7  ;;  %s8845_s22 = smov 76  }
 0x896   : > { %v5729_v23 = vmul.f32 %v13303_v14, %v17022_v13  ;;  %v17024_v13 = vld [vmem:[#allocation40_spill] sm:$0xff] }
 0x897   : > { %v5225_v29 = vpop.permute.xlu1 %5224  ;;  %v5227_v62 = vpop.permute.xlu0 %5226  ;;  %v13324_v61 = vsel %vm487_vm0, %v5641_v46, %v5643_v47 }
 0x898   : > { %5314 = vst.msk [vmem:[#allocation2 + $0x38] sm:$0xff] %vm5306_vm4, %v5225_v29  ;;  %5315 = vst.msk [vmem:[#allocation2 + $0x40] sm:$0xff] %vm5306_vm4, %v5227_v62  ;;  %v13321_v62 = vsel %vm487_vm0, %v5639_v55, %v5641_v46  ;;  %v13337_v46 = vsel %vm487_vm0, %v5643_v47, %v5645_v45  ;;  %v5731_v53 = vmul.f32 %v13324_v61, %v17024_v13  ;;  %v8432_v47 = vld [vmem:[%s13208_s18 + $0x30] sm:$0xff]  }
 0x899   : > { %5791 = vrot.lane.b32.xlu1 %v5726_v17, %s8844_s20  ;;  %5793 = vrot.lane.b32.xlu0 %v5727_v31, %s8844_s20  ;;  %v5647_v17 = vrot.slane %v13306_v11, 7  ;;  %v13327_v31 = vunpack.c.l.bf16 %v8430_v3  ;;  %v5730_v55 = vmul.f32 %v13321_v62, %v17023_v41  ;;  %v17027_v41 = vld [vmem:[#allocation39_spill] sm:$0xff]  ;;  %v17028_v13 = vld [vmem:[#allocation44_spill] sm:$0xff]  ;;  %v13381_v57 = vunpack.c.h.bf16 %v8432_v47 }
 0x89b   : > { %v5229_v10 = vpop.permute.xlu1 %5228  ;;  %v5231_v29 = vpop.permute.xlu0 %5230  ;;  %v13358_v3 = vsel %vm487_vm0, %v5647_v17, %v5649_v56  ;;  %17033 = vst [vmem:[#allocation308_spill] sm:$0xff] %v13381_v57  ;;  %v5661_v60 = vrot.slane %v13381_v57, 7 }
 0x89c   : > { %5316 = vst.msk [vmem:[#allocation2 + $0x48] sm:$0xff] %vm5306_vm4, %v5229_v10  ;;  %5317 = vst.msk [vmem:[#allocation2 + $0x50] sm:$0xff] %vm5306_vm4, %v5231_v29  ;;  %v13343_v29 = vsel %vm487_vm0, %v5645_v45, %v5647_v17  ;;  %v5732_v45 = vmul.f32 %v13337_v46, %v17027_v41  ;;  %v8433_v17 = vld [vmem:[%s13208_s18 + $0x38] sm:$0xff]  }
 0x89d   : > { %5795 = vrot.lane.b32.xlu1 %v5728_v63, %s8844_s20  ;;  %5797 = vrot.lane.b32.xlu0 %v5729_v23, %s8844_s20  ;;  %v5651_v63 = vrot.slane %v13327_v31, 7  ;;  %v13348_v23 = vunpack.c.l.bf16 %v8431_v37  ;;  %v5733_v35 = vmul.f32 %v13343_v29, %v17028_v13  ;;  %v17031_v37 = vld [vmem:[#allocation43_spill] sm:$0xff]  ;;  %v17032_v13 = vld [vmem:[#allocation50_spill] sm:$0xff]  ;;  %v13408_v1 = vunpack.c.h.bf16 %v8433_v17 }
 0x89e   : > { %v5734_v41 = vmul.f32 %v13358_v3, %v17031_v37  ;;  %v8434_v37 = vld [vmem:[%s13208_s18 + $0x40] sm:$0xff]  }
 0x89f   : > { %v5233_v10 = vpop.permute.xlu1 %5232  ;;  %v5235_v40 = vpop.permute.xlu0 %5234  ;;  %17026 = vst [vmem:[#allocation307_spill] sm:$0xff] %v13348_v23  ;;  %v13366_v8 = vsel %vm487_vm0, %v5649_v56, %v5651_v63  ;;  %17037 = vst [vmem:[#allocation312_spill] sm:$0xff] %v13408_v1  ;;  %v13425_v20 = vunpack.c.h.bf16 %v8434_v37 }
 0x8a0   : > { %5318 = vst.msk [vmem:[#allocation2 + $0x58] sm:$0xff] %vm5306_vm4, %v5233_v10  ;;  %5319 = vst.msk [vmem:[#allocation2 + $0x60] sm:$0xff] %vm5306_vm4, %v5235_v40  ;;  %v5653_v40 = vrot.slane %v13345_v49, 7  ;;  %v5735_v56 = vmul.f32 %v13366_v8, %v17032_v13  ;;  %v17036_v13 = vld [vmem:[#allocation56_spill] sm:$0xff] }
 0x8a1   : > { %5799 = vrot.lane.b32.xlu1 %v5730_v55, %s8844_s20  ;;  %5801 = vrot.lane.b32.xlu0 %v5731_v53, %s8844_s20  ;;  %v5655_v53 = vrot.slane %v13348_v23, 7  ;;  %v13369_v55 = vunpack.c.l.bf16 %v8432_v47  ;;  %v17035_v47 = vld [vmem:[#allocation49_spill] sm:$0xff]  ;;  %17042 = vst [vmem:[#allocation317_spill] sm:$0xff] %v13425_v20  ;;  %v5669_v12 = vrot.slane %v13425_v20, 7 }
 0x8a3   : > { %v5237_v10 = vpop.permute.xlu1 %5236  ;;  %v5239_v48 = vpop.permute.xlu0 %5238  ;;  %17030 = vst [vmem:[#allocation309_spill] sm:$0xff] %v13369_v55  ;;  %v13387_v39 = vsel %vm487_vm0, %v5653_v40, %v5655_v53 }
 0x8a4   : > { %5320 = vst.msk [vmem:[#allocation2 + $0x68] sm:$0xff] %vm5306_vm4, %v5237_v10  ;;  %5321 = vst.msk [vmem:[#allocation2 + $0x70] sm:$0xff] %vm5306_vm4, %v5239_v48  ;;  %v13384_v48 = vsel %vm487_vm0, %v5651_v63, %v5653_v40  ;;  %v13400_v40 = vsel %vm487_vm0, %v5655_v53, %v5657_v32  ;;  %v5737_v42 = vmul.f32 %v13387_v39, %v17036_v13  ;;  %v8435_v53 = vld [vmem:[%s13208_s18 + $0x48] sm:$0xff]   ;;  %v17041_v13 = vld [vmem:[#allocation62_spill] sm:$0xff] }
 0x8a5   : > { %5803 = vrot.lane.b32.xlu1 %v5732_v45, %s8844_s20  ;;  %5805 = vrot.lane.b32.xlu0 %v5733_v35, %s8844_s20  ;;  %v5659_v35 = vrot.slane %v13369_v55, 7  ;;  %v13390_v45 = vunpack.c.l.bf16 %v8433_v17  ;;  %v5736_v63 = vmul.f32 %v13384_v48, %v17035_v47  ;;  %v17039_v47 = vld [vmem:[#allocation55_spill] sm:$0xff]  ;;  %v13444_v30 = vunpack.c.h.bf16 %v8435_v53 }
 0x8a7   : > { %v5241_v58 = vpop.permute.xlu1 %5240  ;;  %v5243_v10 = vpop.permute.xlu0 %5242  ;;  %17034 = vst [vmem:[#allocation310_spill] sm:$0xff] %v13390_v45  ;;  %v13421_v17 = vsel %vm487_vm0, %v5659_v35, %v5661_v60  ;;  %v5673_v4 = vrot.slane %v13444_v30, 7 }
 0x8a8   : > { %5322 = vst.msk [vmem:[#allocation2 + $0x78] sm:$0xff] %vm5306_vm4, %v5241_v58  ;;  %5323 = vst.msk [vmem:[#allocation2 + $0x80] sm:$0xff] %vm5306_vm4, %v5243_v10  ;;  %v13406_v10 = vsel %vm487_vm0, %v5657_v32, %v5659_v35  ;;  %v5738_v32 = vmul.f32 %v13400_v40, %v17039_v47  ;;  %v8436_v35 = vld [vmem:[%s13208_s18 + $0x50] sm:$0xff]  }
 0x8a9   : > { %5807 = vrot.lane.b32.xlu1 %v5734_v41, %s8844_s20  ;;  %5809 = vrot.lane.b32.xlu0 %v5735_v56, %s8844_s20  ;;  %v5663_v41 = vrot.slane %v13390_v45, 7  ;;  %v13411_v56 = vunpack.c.l.bf16 %v8434_v37  ;;  %17040 = vst [vmem:[#allocation318_spill] sm:$0xff] %v13421_v17  ;;  %v5739_v21 = vmul.f32 %v13406_v10, %v17041_v13  ;;  %v17044_v37 = vld [vmem:[#allocation61_spill] sm:$0xff]  ;;  %v17045_v13 = vld [vmem:[#allocation68_spill] sm:$0xff]  ;;  %v13471_v16 = vunpack.c.h.bf16 %v8436_v35 }
 0x8aa   : > { %v5740_v47 = vmul.f32 %v13421_v17, %v17044_v37  ;;  %v8437_v37 = vld [vmem:[%s13208_s18 + $0x58] sm:$0xff]  }
 0x8ab   : > { %v5245_v58 = vpop.permute.xlu1 %5244  ;;  %v5247_v38 = vpop.permute.xlu0 %5246  ;;  %17038 = vst [vmem:[#allocation315_spill] sm:$0xff] %v13411_v56  ;;  %v13429_v2 = vsel %vm487_vm0, %v5661_v60, %v5663_v41  ;;  %v13488_v59 = vunpack.c.h.bf16 %v8437_v37 }
 0x8ac   : > { %5324 = vst.msk [vmem:[#allocation2 + $0x88] sm:$0xff] %vm5306_vm4, %v5245_v58  ;;  %5325 = vst.msk [vmem:[#allocation2 + $0x90] sm:$0xff] %vm5306_vm4, %v5247_v38  ;;  %v5665_v38 = vrot.slane %v13408_v1, 7  ;;  %v5741_v60 = vmul.f32 %v13429_v2, %v17045_v13  ;;  %v17050_v13 = vld [vmem:[#allocation74_spill] sm:$0xff] }
 0x8ad   : > { %5811 = vrot.lane.b32.xlu1 %v5736_v63, %s8844_s20  ;;  %5813 = vrot.lane.b32.xlu0 %v5737_v42, %s8844_s20  ;;  %17043 = vst [vmem:[#allocation319_spill] sm:$0xff] %v13429_v2  ;;  %v5667_v42 = vrot.slane %v13411_v56, 7  ;;  %v13432_v63 = vunpack.c.l.bf16 %v8435_v53  ;;  %v17048_v53 = vld [vmem:[#allocation67_spill] sm:$0xff]  ;;  %v5681_v0 = vrot.slane %v13488_v59, 7 }
 0x8af   : > { %v5249_v58 = vpop.permute.xlu1 %5248  ;;  %v5251_v15 = vpop.permute.xlu0 %5250  ;;  %v13450_v7 = vsel %vm487_vm0, %v5665_v38, %v5667_v42 }
 0x8b0   : > { %5326 = vst.msk [vmem:[#allocation2 + $0x98] sm:$0xff] %vm5306_vm4, %v5249_v58  ;;  %5327 = vst.msk [vmem:[#allocation2 + $0xa0] sm:$0xff] %vm5306_vm4, %v5251_v15  ;;  %v13447_v15 = vsel %vm487_vm0, %v5663_v41, %v5665_v38  ;;  %v13463_v38 = vsel %vm487_vm0, %v5667_v42, %v5669_v12  ;;  %v5743_v54 = vmul.f32 %v13450_v7, %v17050_v13  ;;  %v8438_v42 = vld [vmem:[%s13208_s18 + $0x60] sm:$0xff]   ;;  %v17054_v13 = vld [vmem:[#allocation80_spill] sm:$0xff] }
 0x8b1   : > { %5815 = vrot.lane.b32.xlu1 %v5738_v32, %s8844_s20  ;;  %5817 = vrot.lane.b32.xlu0 %v5739_v21, %s8844_s20  ;;  %17046 = vst [vmem:[#allocation301_spill] sm:$0xff] %v13447_v15  ;;  %17047 = vst [vmem:[#allocation17_spill] sm:$0xff] %v13450_v7  ;;  %v5671_v21 = vrot.slane %v13432_v63, 7  ;;  %v13453_v32 = vunpack.c.l.bf16 %v8436_v35  ;;  %v5742_v41 = vmul.f32 %v13447_v15, %v17048_v53  ;;  %v17052_v53 = vld [vmem:[#allocation73_spill] sm:$0xff] }
 0x8b2   : > { %17049 = vst [vmem:[#allocation303_spill] sm:$0xff] %v13463_v38 }
 0x8b3   : > { %v5253_v28 = vpop.permute.xlu1 %5252  ;;  %v5255_v58 = vpop.permute.xlu0 %5254  ;;  %v13484_v35 = vsel %vm487_vm0, %v5671_v21, %v5673_v4 }
 0x8b4   : > { %5328 = vst.msk [vmem:[#allocation2 + $0xa8] sm:$0xff] %vm5306_vm4, %v5253_v28  ;;  %5329 = vst.msk [vmem:[#allocation2 + $0xb0] sm:$0xff] %vm5306_vm4, %v5255_v58  ;;  %v13469_v58 = vsel %vm487_vm0, %v5669_v12, %v5671_v21  ;;  %v5744_v12 = vmul.f32 %v13463_v38, %v17052_v53  ;;  %v8439_v21 = vld [vmem:[%s13208_s18 + $0x68] sm:$0xff]  }
 0x8b5   : > { %5819 = vrot.lane.b32.xlu1 %v5740_v47, %s8844_s20  ;;  %5821 = vrot.lane.b32.xlu0 %v5741_v60, %s8844_s20  ;;  %17051 = vst [vmem:[#allocation314_spill] sm:$0xff] %v13469_v58  ;;  %v5675_v47 = vrot.slane %v13453_v32, 7  ;;  %v13474_v60 = vunpack.c.l.bf16 %v8437_v37  ;;  %17053 = vst [vmem:[#allocation178_spill] sm:$0xff] %v13484_v35  ;;  %v5745_v5 = vmul.f32 %v13469_v58, %v17054_v13  ;;  %v17057_v37 = vld [vmem:[#allocation79_spill] sm:$0xff]  ;;  %v17058_v13 = vld [vmem:[#allocation86_spill] sm:$0xff]  ;;  %v13507_v58 = vunpack.c.h.bf16 %v8438_v42 }
 0x8b6   : > { %v5746_v53 = vmul.f32 %v13484_v35, %v17057_v37 }
 0x8b7   : > { %v5257_v28 = vpop.permute.xlu1 %5256  ;;  %v5259_v50 = vpop.permute.xlu0 %5258  ;;  %v13492_v25 = vsel %vm487_vm0, %v5673_v4, %v5675_v47  ;;  %17059 = vst [vmem:[#allocation299_spill] sm:$0xff] %v13507_v58 }
 0x8b8   : > { %5330 = vst.msk [vmem:[#allocation2 + $0xb8] sm:$0xff] %vm5306_vm4, %v5257_v28  ;;  %5331 = vst.msk [vmem:[#allocation2 + $0xc0] sm:$0xff] %vm5306_vm4, %v5259_v50  ;;  %v5677_v50 = vrot.slane %v13471_v16, 7  ;;  %v5747_v4 = vmul.f32 %v13492_v25, %v17058_v13 }
 0x8b9   : > { %5823 = vrot.lane.b32.xlu1 %v5742_v41, %s8844_s20  ;;  %5825 = vrot.lane.b32.xlu0 %v5743_v54, %s8844_s20  ;;  %17055 = vst [vmem:[#allocation180_spill] sm:$0xff] %v13492_v25  ;;  %v5679_v54 = vrot.slane %v13474_v60, 7  ;;  %v13495_v41 = vunpack.c.l.bf16 %v8438_v42  ;;  %v17063_v42 = vld [vmem:[#allocation85_spill] sm:$0xff]  ;;  %v5685_v25 = vrot.slane %v13507_v58, 7 }
 0x8bb   : > { %v5261_v28 = vpop.permute.xlu1 %5260  ;;  %v5263_v19 = vpop.permute.xlu0 %5262  ;;  %17056 = vst [vmem:[#allocation297_spill] sm:$0xff] %v13495_v41 }
 0x8bc   : > { %5332 = vst.msk [vmem:[#allocation2 + $0xc8] sm:$0xff] %vm5306_vm4, %v5261_v28  ;;  %5333 = vst.msk [vmem:[#allocation2 + $0xd0] sm:$0xff] %vm5306_vm4, %v5263_v19  ;;  %v13510_v28 = vsel %vm487_vm0, %v5675_v47, %v5677_v50  ;;  %v13513_v19 = vsel %vm487_vm0, %v5677_v50, %v5679_v54  ;;  %v13525_v47 = vsel %vm487_vm0, %v5679_v54, %v5681_v0  ;;  %v17065_v50 = vld [vmem:[#allocation92_spill] sm:$0xff]  ;;  %v17069_v54 = vld [vmem:[#allocation91_spill] sm:$0xff] }
 0x8bd   : > { %5827 = vrot.lane.b32.xlu1 %v5744_v12, %s8844_s20  ;;  %5829 = vrot.lane.b32.xlu0 %v5745_v5, %s8844_s20  ;;  %17060 = vst [vmem:[#allocation300_spill] sm:$0xff] %v13510_v28  ;;  %17061 = vst [vmem:[#allocation323_spill] sm:$0xff] %v13513_v19  ;;  %v5683_v5 = vrot.slane %v13495_v41, 7  ;;  %v13516_v12 = vunpack.c.l.bf16 %v8439_v21  ;;  %v5748_v37 = vmul.f32 %v13510_v28, %v17063_v42  ;;  %v17070_v42 = vld [vmem:[#allocation96_spill] sm:$0xff] }
 0x8be   : > { %17064 = vst [vmem:[#allocation325_spill] sm:$0xff] %v13525_v47  ;;  %v5749_v13 = vmul.f32 %v13513_v19, %v17065_v50 }
 0x8bf   : > { %v5265_v38 = vpop.permute.xlu1 %5264  ;;  %v5267_v7 = vpop.permute.xlu0 %5266  ;;  %17062 = vst [vmem:[#allocation326_spill] sm:$0xff] %v13516_v12 }
 0x8c0   : > { %5334 = vst.msk [vmem:[#allocation2 + $0xd8] sm:$0xff] %vm5306_vm4, %v5265_v38  ;;  %5335 = vst.msk [vmem:[#allocation2 + $0xe0] sm:$0xff] %vm5306_vm4, %v5267_v7  ;;  %v13531_v38 = vsel %vm487_vm0, %v5681_v0, %v5683_v5  ;;  %v13533_v7 = vunpack.c.h.bf16 %v8439_v21  ;;  %v5750_v0 = vmul.f32 %v13525_v47, %v17069_v54 }
 0x8c1   : > { %5831 = vrot.lane.b32.xlu1 %v5746_v53, %s8844_s20  ;;  %5833 = vrot.lane.b32.xlu0 %v5747_v4, %s8844_s20  ;;  %17066 = vst [vmem:[#allocation327_spill] sm:$0xff] %v13531_v38  ;;  %v5687_v53 = vrot.slane %v13516_v12, 7  ;;  %v13537_v4 = vunpack.c.l.bf16 %v13218_v26  ;;  %v5751_v21 = vmul.f32 %v13531_v38, %v17070_v42  ;;  %v13548_v26 = vsel %vm487_vm0, %v5683_v5, %v5685_v25  ;;  %v17072_v5 = vld [vmem:[#allocation99_spill] sm:$0xff] }
 0x8c2   : > { %17067 = vst [vmem:[#allocation328_spill] sm:$0xff] %v13533_v7 }
 0x8c3   : > { %v5269_v35 = vpop.permute.xlu1 %5268  ;;  %v5271_v15 = vpop.permute.xlu0 %5270  ;;  %17068 = vst [vmem:[#allocation329_spill] sm:$0xff] %v13537_v4 }
 0x8c4   : > { %5336 = vst.msk [vmem:[#allocation2 + $0xe8] sm:$0xff] %vm5306_vm4, %v5269_v35  ;;  %5337 = vst.msk [vmem:[#allocation2 + $0xf0] sm:$0xff] %vm5306_vm4, %v5271_v15  ;;  %v5689_v35 = vrot.slane %v13533_v7, 7  ;;  %v13552_v15 = vsel %vm487_vm0, %v5685_v25, %v5687_v53 }
 0x8c5   : > { %5835 = vrot.lane.b32.xlu1 %v5748_v37, %s8844_s20  ;;  %5837 = vrot.lane.b32.xlu0 %v5749_v13, %s8844_s20  ;;  %v5691_v37 = vrot.slane %v13537_v4, 7  ;;  %v17071_v13 = vld [vmem:[#allocation95_spill] sm:$0xff]  ;;  %v5753_v42 = vmul.f32 %v13552_v15, %v17072_v5  ;;  %v17076_v5 = vrot.slane %v13228_v52, 7 }
 0x8c6   : > { %v5752_v54 = vmul.f32 %v13548_v26, %v17071_v13  ;;  %v13564_v25 = vsel %vm487_vm0, %v5687_v53, %v5689_v35 }
 0x8c7   : > { %v5273_v50 = vpop.permute.xlu1 %5272  ;;  %v5404_v19 = vpop.permute.xlu0 %5403  ;;  %v13567_v28 = vsel %vm487_vm0, %v5689_v35, %v5691_v37  ;;  %v13580_v35 = vsel %vm487_vm0, %v5691_v37, %v17076_v5  ;;  %v17080_v37 = vld [vmem:[#allocation102_spill] sm:$0xff]  ;;  %vm5885_vm0 = vcmask 622144  }
 0x8c8   : > { %5338 = vst.msk [vmem:[#allocation2 + $0xf8] sm:$0xff] %vm5306_vm4, %v5273_v50  ;;  %17073 = vst [vmem:[#allocation330_spill] sm:$0xff] %v13567_v28 }
 0x8c9   : > { %5500 = vst.msk [vmem:[#allocation2] sm:$0xff] %vm5499_vm5, %v5404_v19  ;;  %5839 = vrot.lane.b32.xlu1 %v5750_v0, %s8844_s20  ;;  %5841 = vrot.lane.b32.xlu0 %v5751_v21, %s8844_s20  ;;  %v17074_v19 = vld [vmem:[#allocation98_spill] sm:$0xff]  ;;  %v17075_v21 = vld [vmem:[#allocation101_spill] sm:$0xff]  ;;  %17077 = vst [vmem:[#allocation331_spill] sm:$0xff] %v13580_v35 }
 0x8ca   : > { %v5754_v0 = vmul.f32 %v13564_v25, %v17074_v19  ;;  %v5755_v50 = vmul.f32 %v13567_v28, %v17075_v21 }
 0x8cb   : > { %v5406_v38 = vpop.permute.xlu1 %5405  ;;  %v5408_v47 = vpop.permute.xlu0 %5407 }
 0x8cc   : > { %5501 = vst.msk [vmem:[#allocation2 + $0x8] sm:$0xff] %vm5499_vm5, %v5406_v38  ;;  %5502 = vst.msk [vmem:[#allocation2 + $0x10] sm:$0xff] %vm5499_vm5, %v5408_v47  ;;  %v17078_v47 = vld [vmem:[#allocation100_spill] sm:$0xff] }
 0x8cd   : > { %5843 = vrot.lane.b32.xlu1 %v5752_v54, %s8844_s20  ;;  %5845 = vrot.lane.b32.xlu0 %v5753_v42, %s8844_s20  ;;  %v5756_v38 = vmul.f32 %v13580_v35, %v17078_v47  ;;  %v17079_v54 = vld [vmem:[#allocation103_spill] sm:$0xff]  ;;  %v17082_v47 = vld [vmem:[#allocation105_spill] sm:$0xff] }
 0x8ce   : > { %v5918_v42 = vmul.f32 %v13230_v24, %v17079_v54  ;;  %v17083_v54 = vld [vmem:[#allocation106_spill] sm:$0xff] }
 0x8cf   : > { %v5410_v13 = vpop.permute.xlu1 %5409  ;;  %v5412_v53 = vpop.permute.xlu0 %5411 }
 0x8d0   : > { %5503 = vst.msk [vmem:[#allocation2 + $0x18] sm:$0xff] %vm5499_vm5, %v5410_v13  ;;  %5504 = vst.msk [vmem:[#allocation2 + $0x20] sm:$0xff] %vm5499_vm5, %v5412_v53 }
 0x8d1   : > { %5847 = vrot.lane.b32.xlu1 %v5754_v0, %s8844_s20  ;;  %5849 = vrot.lane.b32.xlu0 %v5755_v50, %s8844_s20  ;;  %v5919_v0 = vmul.f32 %v13236_v36, %v17080_v37  ;;  %v17081_v50 = vld [vmem:[#allocation104_spill] sm:$0xff]  ;;  %v17084_v37 = vld [vmem:[#allocation107_spill] sm:$0xff] }
 0x8d2   : > { %v5920_v13 = vmul.f32 %v13238_v27, %v17081_v50  ;;  %v17085_v50 = vld [vmem:[#allocation108_spill] sm:$0xff] }
 0x8d3   : > { %v5414_v19 = vpop.permute.xlu1 %5413  ;;  %v5416_v21 = vpop.permute.xlu0 %5415 }
 0x8d4   : > { %5505 = vst.msk [vmem:[#allocation2 + $0x28] sm:$0xff] %vm5499_vm5, %v5414_v19  ;;  %5506 = vst.msk [vmem:[#allocation2 + $0x30] sm:$0xff] %vm5499_vm5, %v5416_v21 }
 0x8d5   : > { %5851 = vrot.lane.b32.xlu1 %v5756_v38, %s8844_s20  ;;  %5982 = vrot.lane.b32.xlu0 %v5918_v42, %s8845_s22  ;;  %v5921_v38 = vmul.f32 %v13253_v34, %v17082_v47  ;;  %v5922_v42 = vmul.f32 %v13264_v44, %v17083_v54  ;;  %v17086_v47 = vld [vmem:[#allocation109_spill] sm:$0xff]  ;;  %v17087_v54 = vld [vmem:[#allocation110_spill] sm:$0xff]  ;;  %s8852_s20 = smov 104  }
 0x8d7   : > { %v5418_v53 = vpop.permute.xlu1 %5417  ;;  %v5420_v5 = vpop.permute.xlu0 %5419 }
 0x8d8   : > { %5507 = vst.msk [vmem:[#allocation2 + $0x38] sm:$0xff] %vm5499_vm5, %v5418_v53  ;;  %5508 = vst.msk [vmem:[#allocation2 + $0x40] sm:$0xff] %vm5499_vm5, %v5420_v5 }
 0x8d9   : > { %5984 = vrot.lane.b32.xlu1 %v5919_v0, %s8845_s22  ;;  %5986 = vrot.lane.b32.xlu0 %v5920_v13, %s8845_s22  ;;  %v5923_v0 = vmul.f32 %v13282_v43, %v17084_v37  ;;  %v5924_v13 = vmul.f32 %v13285_v51, %v17085_v50  ;;  %v17088_v37 = vld [vmem:[#allocation111_spill] sm:$0xff]  ;;  %v17089_v50 = vld [vmem:[#allocation112_spill] sm:$0xff] }
 0x8db   : > { %v5422_v19 = vpop.permute.xlu1 %5421  ;;  %v5424_v21 = vpop.permute.xlu0 %5423 }
 0x8dc   : > { %5509 = vst.msk [vmem:[#allocation2 + $0x48] sm:$0xff] %vm5499_vm5, %v5422_v19  ;;  %5510 = vst.msk [vmem:[#allocation2 + $0x50] sm:$0xff] %vm5499_vm5, %v5424_v21 }
 0x8dd   : > { %5988 = vrot.lane.b32.xlu1 %v5921_v38, %s8845_s22  ;;  %5990 = vrot.lane.b32.xlu0 %v5922_v42, %s8845_s22  ;;  %v5925_v38 = vmul.f32 %v13299_v22, %v17086_v47  ;;  %v5926_v42 = vmul.f32 %v13306_v11, %v17087_v54  ;;  %v17090_v47 = vld [vmem:[#allocation113_spill] sm:$0xff]  ;;  %v17091_v54 = vld [vmem:[#allocation114_spill] sm:$0xff] }
 0x8df   : > { %v5426_v53 = vpop.permute.xlu1 %5425  ;;  %v5428_v5 = vpop.permute.xlu0 %5427 }
 0x8e0   : > { %5511 = vst.msk [vmem:[#allocation2 + $0x58] sm:$0xff] %vm5499_vm5, %v5426_v53  ;;  %5512 = vst.msk [vmem:[#allocation2 + $0x60] sm:$0xff] %vm5499_vm5, %v5428_v5 }
 0x8e1   : > { %5992 = vrot.lane.b32.xlu1 %v5923_v0, %s8845_s22  ;;  %5994 = vrot.lane.b32.xlu0 %v5924_v13, %s8845_s22  ;;  %v5927_v0 = vmul.f32 %v13318_v18, %v17088_v37  ;;  %v5928_v13 = vmul.f32 %v13327_v31, %v17089_v50  ;;  %v17092_v37 = vld [vmem:[#allocation115_spill] sm:$0xff]  ;;  %v17093_v50 = vld [vmem:[#allocation116_spill] sm:$0xff] }
 0x8e3   : > { %v5430_v19 = vpop.permute.xlu1 %5429  ;;  %v5432_v21 = vpop.permute.xlu0 %5431 }
 0x8e4   : > { %5513 = vst.msk [vmem:[#allocation2 + $0x68] sm:$0xff] %vm5499_vm5, %v5430_v19  ;;  %5514 = vst.msk [vmem:[#allocation2 + $0x70] sm:$0xff] %vm5499_vm5, %v5432_v21 }
 0x8e5   : > { %5996 = vrot.lane.b32.xlu1 %v5925_v38, %s8845_s22  ;;  %5998 = vrot.lane.b32.xlu0 %v5926_v42, %s8845_s22  ;;  %v5929_v38 = vmul.f32 %v13345_v49, %v17090_v47  ;;  %v5930_v42 = vmul.f32 %v13348_v23, %v17091_v54  ;;  %v17094_v47 = vld [vmem:[#allocation117_spill] sm:$0xff]  ;;  %v17095_v54 = vld [vmem:[#allocation118_spill] sm:$0xff] }
 0x8e7   : > { %v5434_v53 = vpop.permute.xlu1 %5433  ;;  %v5436_v5 = vpop.permute.xlu0 %5435 }
 0x8e8   : > { %5515 = vst.msk [vmem:[#allocation2 + $0x78] sm:$0xff] %vm5499_vm5, %v5434_v53  ;;  %5516 = vst.msk [vmem:[#allocation2 + $0x80] sm:$0xff] %vm5499_vm5, %v5436_v5 }
 0x8e9   : > { %6000 = vrot.lane.b32.xlu1 %v5927_v0, %s8845_s22  ;;  %6002 = vrot.lane.b32.xlu0 %v5928_v13, %s8845_s22  ;;  %v5931_v0 = vmul.f32 %v13362_v6, %v17092_v37  ;;  %v5932_v13 = vmul.f32 %v13369_v55, %v17093_v50  ;;  %v17096_v37 = vld [vmem:[#allocation119_spill] sm:$0xff]  ;;  %v17097_v50 = vld [vmem:[#allocation120_spill] sm:$0xff] }
 0x8eb   : > { %v5438_v19 = vpop.permute.xlu1 %5437  ;;  %v5440_v21 = vpop.permute.xlu0 %5439 }
 0x8ec   : > { %5517 = vst.msk [vmem:[#allocation2 + $0x88] sm:$0xff] %vm5499_vm5, %v5438_v19  ;;  %5518 = vst.msk [vmem:[#allocation2 + $0x90] sm:$0xff] %vm5499_vm5, %v5440_v21 }
 0x8ed   : > { %6004 = vrot.lane.b32.xlu1 %v5929_v38, %s8845_s22  ;;  %6006 = vrot.lane.b32.xlu0 %v5930_v42, %s8845_s22  ;;  %v5933_v38 = vmul.f32 %v13381_v57, %v17094_v47  ;;  %v5934_v42 = vmul.f32 %v13390_v45, %v17095_v54  ;;  %v17098_v47 = vld [vmem:[#allocation121_spill] sm:$0xff]  ;;  %v17099_v54 = vld [vmem:[#allocation122_spill] sm:$0xff] }
 0x8ef   : > { %v5442_v53 = vpop.permute.xlu1 %5441  ;;  %v5444_v5 = vpop.permute.xlu0 %5443 }
 0x8f0   : > { %5519 = vst.msk [vmem:[#allocation2 + $0x98] sm:$0xff] %vm5499_vm5, %v5442_v53  ;;  %5520 = vst.msk [vmem:[#allocation2 + $0xa0] sm:$0xff] %vm5499_vm5, %v5444_v5 }
 0x8f1   : > { %6008 = vrot.lane.b32.xlu1 %v5931_v0, %s8845_s22  ;;  %6010 = vrot.lane.b32.xlu0 %v5932_v13, %s8845_s22  ;;  %v5935_v0 = vmul.f32 %v13408_v1, %v17096_v37  ;;  %v5936_v13 = vmul.f32 %v13411_v56, %v17097_v50  ;;  %v17100_v37 = vld [vmem:[#allocation123_spill] sm:$0xff]  ;;  %v17101_v50 = vld [vmem:[#allocation124_spill] sm:$0xff] }
 0x8f3   : > { %v5446_v19 = vpop.permute.xlu1 %5445  ;;  %v5448_v21 = vpop.permute.xlu0 %5447 }
 0x8f4   : > { %5521 = vst.msk [vmem:[#allocation2 + $0xa8] sm:$0xff] %vm5499_vm5, %v5446_v19  ;;  %5522 = vst.msk [vmem:[#allocation2 + $0xb0] sm:$0xff] %vm5499_vm5, %v5448_v21 }
 0x8f5   : > { %6012 = vrot.lane.b32.xlu1 %v5933_v38, %s8845_s22  ;;  %6014 = vrot.lane.b32.xlu0 %v5934_v42, %s8845_s22  ;;  %v5937_v38 = vmul.f32 %v13425_v20, %v17098_v47  ;;  %v5938_v42 = vmul.f32 %v13432_v63, %v17099_v54  ;;  %v17102_v47 = vld [vmem:[#allocation125_spill] sm:$0xff]  ;;  %v17103_v54 = vld [vmem:[#allocation126_spill] sm:$0xff] }
 0x8f7   : > { %v5450_v53 = vpop.permute.xlu1 %5449  ;;  %v5452_v5 = vpop.permute.xlu0 %5451 }
 0x8f8   : > { %5523 = vst.msk [vmem:[#allocation2 + $0xb8] sm:$0xff] %vm5499_vm5, %v5450_v53  ;;  %5524 = vst.msk [vmem:[#allocation2 + $0xc0] sm:$0xff] %vm5499_vm5, %v5452_v5 }
 0x8f9   : > { %6016 = vrot.lane.b32.xlu1 %v5935_v0, %s8845_s22  ;;  %6018 = vrot.lane.b32.xlu0 %v5936_v13, %s8845_s22  ;;  %v5939_v0 = vmul.f32 %v13444_v30, %v17100_v37  ;;  %v5940_v13 = vmul.f32 %v13453_v32, %v17101_v50  ;;  %v17104_v37 = vld [vmem:[#allocation127_spill] sm:$0xff]  ;;  %v17105_v50 = vld [vmem:[#allocation128_spill] sm:$0xff] }
 0x8fb   : > { %v5454_v19 = vpop.permute.xlu1 %5453  ;;  %v5456_v21 = vpop.permute.xlu0 %5455 }
 0x8fc   : > { %5525 = vst.msk [vmem:[#allocation2 + $0xc8] sm:$0xff] %vm5499_vm5, %v5454_v19  ;;  %5526 = vst.msk [vmem:[#allocation2 + $0xd0] sm:$0xff] %vm5499_vm5, %v5456_v21 }
 0x8fd   : > { %6020 = vrot.lane.b32.xlu1 %v5937_v38, %s8845_s22  ;;  %6022 = vrot.lane.b32.xlu0 %v5938_v42, %s8845_s22  ;;  %v5941_v38 = vmul.f32 %v13471_v16, %v17102_v47  ;;  %v5942_v42 = vmul.f32 %v13474_v60, %v17103_v54  ;;  %v17106_v47 = vld [vmem:[#allocation129_spill] sm:$0xff]  ;;  %v17107_v54 = vld [vmem:[#allocation130_spill] sm:$0xff] }
 0x8ff   : > { %v5458_v53 = vpop.permute.xlu1 %5457  ;;  %v5460_v5 = vpop.permute.xlu0 %5459 }
 0x900   : > { %5527 = vst.msk [vmem:[#allocation2 + $0xd8] sm:$0xff] %vm5499_vm5, %v5458_v53  ;;  %5528 = vst.msk [vmem:[#allocation2 + $0xe0] sm:$0xff] %vm5499_vm5, %v5460_v5 }
 0x901   : > { %6024 = vrot.lane.b32.xlu1 %v5939_v0, %s8845_s22  ;;  %6026 = vrot.lane.b32.xlu0 %v5940_v13, %s8845_s22  ;;  %v5943_v0 = vmul.f32 %v13488_v59, %v17104_v37  ;;  %v5944_v13 = vmul.f32 %v13495_v41, %v17105_v50  ;;  %v6112_v37 = vrot.slane %v13236_v36, 1  ;;  %v15941_v50 = vrot.slane %v13230_v24, 1 }
 0x902   : > { %v6116_v36 = vrot.slane %v13238_v27, 1 }
 0x903   : > { %v5462_v19 = vpop.permute.xlu1 %5461  ;;  %v5464_v21 = vpop.permute.xlu0 %5463 }
 0x904   : > { %5529 = vst.msk [vmem:[#allocation2 + $0xe8] sm:$0xff] %vm5499_vm5, %v5462_v19  ;;  %5530 = vst.msk [vmem:[#allocation2 + $0xf0] sm:$0xff] %vm5499_vm5, %v5464_v21 }
 0x905   : > { %6028 = vrot.lane.b32.xlu1 %v5941_v38, %s8845_s22  ;;  %6030 = vrot.lane.b32.xlu0 %v5942_v42, %s8845_s22  ;;  %v5945_v38 = vmul.f32 %v13507_v58, %v17106_v47  ;;  %v5946_v42 = vmul.f32 %v13516_v12, %v17107_v54 }
 0x907   : > { %v5466_v53 = vpop.permute.xlu1 %5465  ;;  %v5790_v5 = vpop.permute.xlu0 %5789 }
 0x908   : > { %5531 = vst.msk [vmem:[#allocation2 + $0xf8] sm:$0xff] %vm5499_vm5, %v5466_v53  ;;  %v17109_v53 = vld [vmem:[#allocation132_spill] sm:$0xff] }
 0x909   : > { %5886 = vst.msk [vmem:[#allocation2] sm:$0xff] %vm5885_vm0, %v5790_v5  ;;  %6032 = vrot.lane.b32.xlu1 %v5943_v0, %s8845_s22  ;;  %6034 = vrot.lane.b32.xlu0 %v5944_v13, %s8845_s22  ;;  %v17108_v0 = vld [vmem:[#allocation131_spill] sm:$0xff]  ;;  %v5948_v5 = vmul.f32 %v13537_v4, %v17109_v53 }
 0x90a   : > { %v5947_v13 = vmul.f32 %v13533_v7, %v17108_v0  ;;  %v17112_v0 = vld [vmem:[#allocation7_spill] sm:$0xff] }
 0x90b   : > { %v5792_v19 = vpop.permute.xlu1 %5791  ;;  %v5794_v21 = vpop.permute.xlu0 %5793 }
 0x90c   : > { %5887 = vst.msk [vmem:[#allocation2 + $0x8] sm:$0xff] %vm5885_vm0, %v5792_v19  ;;  %5888 = vst.msk [vmem:[#allocation2 + $0x10] sm:$0xff] %vm5885_vm0, %v5794_v21  ;;  %v13716_v19 = vsel %vm1160_vm3, %v15941_v50, %v6112_v37  ;;  %v6117_v21 = vrot.slane %v13253_v34, 1  ;;  %v13728_v50 = vsel %vm1160_vm3, %v6112_v37, %v6116_v36  ;;  %v6119_v34 = vrot.slane %v13264_v44, 1 }
 0x90d   : > { %6036 = vrot.lane.b32.xlu1 %v5945_v38, %s8845_s22  ;;  %6038 = vrot.lane.b32.xlu0 %v5946_v42, %s8845_s22  ;;  %17110 = vst [vmem:[#allocation332_spill] sm:$0xff] %v13716_v19  ;;  %v17111_v38 = vld [vmem:[#allocation133_spill] sm:$0xff]  ;;  %v6208_v53 = vmul.f32 %v13716_v19, %v17112_v0  ;;  %17113 = vst [vmem:[#allocation333_spill] sm:$0xff] %v13728_v50 }
 0x90e   : > { %v5949_v42 = vmul.f32 %v13228_v52, %v17111_v38 }
 0x90f   : > { %v5796_v47 = vpop.permute.xlu1 %5795  ;;  %v5798_v54 = vpop.permute.xlu0 %5797 }
 0x910   : > { %5889 = vst.msk [vmem:[#allocation2 + $0x18] sm:$0xff] %vm5885_vm0, %v5796_v47  ;;  %5890 = vst.msk [vmem:[#allocation2 + $0x20] sm:$0xff] %vm5885_vm0, %v5798_v54  ;;  %v6121_v47 = vrot.slane %v13282_v43, 1  ;;  %v13733_v54 = vsel %vm1160_vm3, %v6116_v36, %v6117_v21 }
 0x911   : > { %6040 = vrot.lane.b32.xlu1 %v5947_v13, %s8845_s22  ;;  %6042 = vrot.lane.b32.xlu0 %v5948_v5, %s8845_s22  ;;  %17114 = vst [vmem:[#allocation334_spill] sm:$0xff] %v13733_v54  ;;  %v17115_v13 = vld [vmem:[#allocation11_spill] sm:$0xff] }
 0x912   : > { %v6209_v37 = vmul.f32 %v13728_v50, %v17115_v13  ;;  %v17116_v5 = vld [vmem:[#allocation15_spill] sm:$0xff]  ;;  %v13744_v36 = vsel %vm1160_vm3, %v6119_v34, %v6121_v47 }
 0x913   : > { %v5800_v27 = vpop.permute.xlu1 %5799  ;;  %v5802_v35 = vpop.permute.xlu0 %5801  ;;  %v6210_v38 = vmul.f32 %v13733_v54, %v17116_v5  ;;  %17117 = vst [vmem:[#allocation335_spill] sm:$0xff] %v13744_v36  ;;  %v17120_v5 = vld [vmem:[#allocation19_spill] sm:$0xff] }
 0x914   : > { %5891 = vst.msk [vmem:[#allocation2 + $0x28] sm:$0xff] %vm5885_vm0, %v5800_v27  ;;  %5892 = vst.msk [vmem:[#allocation2 + $0x30] sm:$0xff] %vm5885_vm0, %v5802_v35  ;;  %v6123_v27 = vrot.slane %v13285_v51, 1  ;;  %v6125_v35 = vrot.slane %v13299_v22, 1 }
 0x915   : > { %6044 = vrot.lane.b32.xlu1 %v5949_v42, %s8845_s22  ;;  %6272 = vrot.lane.b32.xlu0 %v6208_v53, %s8846_s21  ;;  %v13749_v42 = vsel %vm1160_vm3, %v6117_v21, %v6119_v34  ;;  %v17119_v53 = vld [vmem:[#allocation8_spill] sm:$0xff]  ;;  %v6127_v34 = vrot.slane %v13306_v11, 1  ;;  %v6129_v21 = vrot.slane %v13318_v18, 1  ;;  %s8200_s22 = sshll.u32 %s8800_s27, 5 }
 0x916   : > { %17118 = vst [vmem:[#allocation336_spill] sm:$0xff] %v13749_v42  ;;  %v6212_v13 = vmul.f32 %v13744_v36, %v17119_v53  ;;  %v6211_v50 = vmul.f32 %v13749_v42, %v17120_v5  ;;  %v13760_v22 = vsel %vm1160_vm3, %v6123_v27, %v6125_v35 }
 0x917   : > { %v5804_v0 = vpop.permute.xlu1 %5803  ;;  %v5806_v19 = vpop.permute.xlu0 %5805  ;;  %17121 = vst [vmem:[#allocation337_spill] sm:$0xff] %v13760_v22  ;;  %v13776_v42 = vsel %vm1160_vm3, %v6127_v34, %v6129_v21 }
 0x918   : > { %5893 = vst.msk [vmem:[#allocation2 + $0x38] sm:$0xff] %vm5885_vm0, %v5804_v0  ;;  %5894 = vst.msk [vmem:[#allocation2 + $0x40] sm:$0xff] %vm5885_vm0, %v5806_v19  ;;  %v13765_v19 = vsel %vm1160_vm3, %v6121_v47, %v6123_v27  ;;  %v17123_v0 = vld [vmem:[#allocation134_spill] sm:$0xff]  ;;  %v6131_v47 = vrot.slane %v13327_v31, 1 }
 0x919   : > { %6274 = vrot.lane.b32.xlu1 %v6209_v37, %s8846_s21  ;;  %6276 = vrot.lane.b32.xlu0 %v6210_v38, %s8846_s21  ;;  %v17122_v37 = vld [vmem:[#allocation12_spill] sm:$0xff]  ;;  %v6213_v53 = vmul.f32 %v13765_v19, %v17123_v0 }
 0x91a   : > { %v6214_v38 = vmul.f32 %v13760_v22, %v17122_v37 }
 0x91b   : > { %v5808_v54 = vpop.permute.xlu1 %5807  ;;  %v5810_v43 = vpop.permute.xlu0 %5809 }
 0x91c   : > { %5895 = vst.msk [vmem:[#allocation2 + $0x48] sm:$0xff] %vm5885_vm0, %v5808_v54  ;;  %5896 = vst.msk [vmem:[#allocation2 + $0x50] sm:$0xff] %vm5885_vm0, %v5810_v43  ;;  %v6133_v54 = vrot.slane %v13345_v49, 1  ;;  %v13781_v43 = vsel %vm1160_vm3, %v6125_v35, %v6127_v34  ;;  %v6135_v35 = vrot.slane %v13348_v23, 1  ;;  %v6137_v34 = vrot.slane %v13362_v6, 1 }
 0x91d   : > { %6278 = vrot.lane.b32.xlu1 %v6211_v50, %s8846_s21  ;;  %6280 = vrot.lane.b32.xlu0 %v6212_v13, %s8846_s21  ;;  %v17124_v50 = vld [vmem:[#allocation18_spill] sm:$0xff] }
 0x91e   : > { %v6216_v27 = vmul.f32 %v13776_v42, %v17124_v50  ;;  %v17125_v13 = vld [vmem:[#allocation138_spill] sm:$0xff]  ;;  %v13792_v49 = vsel %vm1160_vm3, %v6131_v47, %v6133_v54  ;;  %v13808_v6 = vsel %vm1160_vm3, %v6135_v35, %v6137_v34 }
 0x91f   : > { %v5812_v5 = vpop.permute.xlu1 %5811  ;;  %v5814_v36 = vpop.permute.xlu0 %5813  ;;  %v6215_v37 = vmul.f32 %v13781_v43, %v17125_v13  ;;  %17126 = vst [vmem:[#allocation338_spill] sm:$0xff] %v13792_v49  ;;  %17129 = vst [vmem:[#allocation339_spill] sm:$0xff] %v13808_v6 }
 0x920   : > { %5897 = vst.msk [vmem:[#allocation2 + $0x58] sm:$0xff] %vm5885_vm0, %v5812_v5  ;;  %5898 = vst.msk [vmem:[#allocation2 + $0x60] sm:$0xff] %vm5885_vm0, %v5814_v36  ;;  %v13797_v36 = vsel %vm1160_vm3, %v6129_v21, %v6131_v47  ;;  %v17128_v5 = vld [vmem:[#allocation142_spill] sm:$0xff]  ;;  %v6139_v21 = vrot.slane %v13369_v55, 1  ;;  %v6141_v47 = vrot.slane %v13381_v57, 1 }
 0x921   : > { %6282 = vrot.lane.b32.xlu1 %v6213_v53, %s8846_s21  ;;  %6284 = vrot.lane.b32.xlu0 %v6214_v38, %s8846_s21  ;;  %v17127_v38 = vld [vmem:[#allocation137_spill] sm:$0xff]  ;;  %v6217_v50 = vmul.f32 %v13797_v36, %v17128_v5 }
 0x922   : > { %v6218_v53 = vmul.f32 %v13792_v49, %v17127_v38  ;;  %v13824_v57 = vsel %vm1160_vm3, %v6139_v21, %v6141_v47 }
 0x923   : > { %v5816_v0 = vpop.permute.xlu1 %5815  ;;  %v5818_v22 = vpop.permute.xlu0 %5817  ;;  %17133 = vst [vmem:[#allocation341_spill] sm:$0xff] %v13824_v57 }
 0x924   : > { %5899 = vst.msk [vmem:[#allocation2 + $0x68] sm:$0xff] %vm5885_vm0, %v5816_v0  ;;  %5900 = vst.msk [vmem:[#allocation2 + $0x70] sm:$0xff] %vm5885_vm0, %v5818_v22  ;;  %v13813_v22 = vsel %vm1160_vm3, %v6133_v54, %v6135_v35  ;;  %v17132_v0 = vld [vmem:[#allocation146_spill] sm:$0xff]  ;;  %v6143_v54 = vrot.slane %v13390_v45, 1  ;;  %v6145_v35 = vrot.slane %v13408_v1, 1 }
 0x925   : > { %6286 = vrot.lane.b32.xlu1 %v6215_v37, %s8846_s21  ;;  %6288 = vrot.lane.b32.xlu0 %v6216_v27, %s8846_s21  ;;  %17130 = vst [vmem:[#allocation340_spill] sm:$0xff] %v13813_v22  ;;  %v17131_v27 = vld [vmem:[#allocation141_spill] sm:$0xff]  ;;  %v6219_v38 = vmul.f32 %v13813_v22, %v17132_v0 }
 0x926   : > { %v6220_v37 = vmul.f32 %v13808_v6, %v17131_v27  ;;  %v13840_v1 = vsel %vm1160_vm3, %v6143_v54, %v6145_v35 }
 0x927   : > { %v5820_v13 = vpop.permute.xlu1 %5819  ;;  %v5822_v23 = vpop.permute.xlu0 %5821  ;;  %17137 = vst [vmem:[#allocation344_spill] sm:$0xff] %v13840_v1 }
 0x928   : > { %5901 = vst.msk [vmem:[#allocation2 + $0x78] sm:$0xff] %vm5885_vm0, %v5820_v13  ;;  %5902 = vst.msk [vmem:[#allocation2 + $0x80] sm:$0xff] %vm5885_vm0, %v5822_v23  ;;  %v13829_v23 = vsel %vm1160_vm3, %v6137_v34, %v6139_v21  ;;  %v17136_v13 = vld [vmem:[#allocation150_spill] sm:$0xff]  ;;  %v6147_v34 = vrot.slane %v13411_v56, 1  ;;  %v6149_v21 = vrot.slane %v13425_v20, 1 }
 0x929   : > { %6290 = vrot.lane.b32.xlu1 %v6217_v50, %s8846_s21  ;;  %6292 = vrot.lane.b32.xlu0 %v6218_v53, %s8846_s21  ;;  %17134 = vst [vmem:[#allocation342_spill] sm:$0xff] %v13829_v23  ;;  %v17135_v53 = vld [vmem:[#allocation145_spill] sm:$0xff]  ;;  %v6221_v27 = vmul.f32 %v13829_v23, %v17136_v13 }
 0x92a   : > { %v6222_v50 = vmul.f32 %v13824_v57, %v17135_v53  ;;  %v13856_v23 = vsel %vm1160_vm3, %v6147_v34, %v6149_v21 }
 0x92b   : > { %v5824_v5 = vpop.permute.xlu1 %5823  ;;  %v5826_v55 = vpop.permute.xlu0 %5825 }
 0x92c   : > { %5903 = vst.msk [vmem:[#allocation2 + $0x88] sm:$0xff] %vm5885_vm0, %v5824_v5  ;;  %5904 = vst.msk [vmem:[#allocation2 + $0x90] sm:$0xff] %vm5885_vm0, %v5826_v55  ;;  %v13845_v55 = vsel %vm1160_vm3, %v6141_v47, %v6143_v54  ;;  %v17140_v5 = vld [vmem:[#allocation154_spill] sm:$0xff]  ;;  %v6151_v47 = vrot.slane %v13432_v63, 1  ;;  %v6153_v54 = vrot.slane %v13444_v30, 1 }
 0x92d   : > { %6294 = vrot.lane.b32.xlu1 %v6219_v38, %s8846_s21  ;;  %6296 = vrot.lane.b32.xlu0 %v6220_v37, %s8846_s21  ;;  %17138 = vst [vmem:[#allocation347_spill] sm:$0xff] %v13845_v55  ;;  %v17139_v37 = vld [vmem:[#allocation149_spill] sm:$0xff]  ;;  %v6223_v53 = vmul.f32 %v13845_v55, %v17140_v5 }
 0x92e   : > { %v6224_v38 = vmul.f32 %v13840_v1, %v17139_v37  ;;  %v13872_v55 = vsel %vm1160_vm3, %v6151_v47, %v6153_v54 }
 0x92f   : > { %v5828_v0 = vpop.permute.xlu1 %5827  ;;  %v5830_v45 = vpop.permute.xlu0 %5829 }
 0x930   : > { %5905 = vst.msk [vmem:[#allocation2 + $0x98] sm:$0xff] %vm5885_vm0, %v5828_v0  ;;  %5906 = vst.msk [vmem:[#allocation2 + $0xa0] sm:$0xff] %vm5885_vm0, %v5830_v45  ;;  %v13861_v45 = vsel %vm1160_vm3, %v6145_v35, %v6147_v34  ;;  %v17143_v0 = vld [vmem:[#allocation158_spill] sm:$0xff]  ;;  %v6155_v35 = vrot.slane %v13453_v32, 1  ;;  %v6157_v34 = vrot.slane %v13471_v16, 1 }
 0x931   : > { %6298 = vrot.lane.b32.xlu1 %v6221_v27, %s8846_s21  ;;  %6300 = vrot.lane.b32.xlu0 %v6222_v50, %s8846_s21  ;;  %17141 = vst [vmem:[#allocation348_spill] sm:$0xff] %v13861_v45  ;;  %v17142_v50 = vld [vmem:[#allocation153_spill] sm:$0xff]  ;;  %v6225_v37 = vmul.f32 %v13861_v45, %v17143_v0 }
 0x932   : > { %v6226_v27 = vmul.f32 %v13856_v23, %v17142_v50  ;;  %v13888_v6 = vsel %vm1160_vm3, %v6155_v35, %v6157_v34 }
 0x933   : > { %v5832_v13 = vpop.permute.xlu1 %5831  ;;  %v5834_v57 = vpop.permute.xlu0 %5833 }
 0x934   : > { %5907 = vst.msk [vmem:[#allocation2 + $0xa8] sm:$0xff] %vm5885_vm0, %v5832_v13  ;;  %5908 = vst.msk [vmem:[#allocation2 + $0xb0] sm:$0xff] %vm5885_vm0, %v5834_v57  ;;  %v13877_v57 = vsel %vm1160_vm3, %v6149_v21, %v6151_v47  ;;  %v17145_v13 = vld [vmem:[#allocation162_spill] sm:$0xff]  ;;  %v6159_v21 = vrot.slane %v13474_v60, 1  ;;  %v6161_v47 = vrot.slane %v13488_v59, 1 }
 0x935   : > { %6302 = vrot.lane.b32.xlu1 %v6223_v53, %s8846_s21  ;;  %6304 = vrot.lane.b32.xlu0 %v6224_v38, %s8846_s21  ;;  %v17144_v38 = vld [vmem:[#allocation157_spill] sm:$0xff]  ;;  %v6227_v50 = vmul.f32 %v13877_v57, %v17145_v13 }
 0x936   : > { %v6228_v53 = vmul.f32 %v13872_v55, %v17144_v38  ;;  %v13904_v49 = vsel %vm1160_vm3, %v6159_v21, %v6161_v47 }
 0x937   : > { %v5836_v5 = vpop.permute.xlu1 %5835  ;;  %v5838_v1 = vpop.permute.xlu0 %5837 }
 0x938   : > { %5909 = vst.msk [vmem:[#allocation2 + $0xb8] sm:$0xff] %vm5885_vm0, %v5836_v5  ;;  %5910 = vst.msk [vmem:[#allocation2 + $0xc0] sm:$0xff] %vm5885_vm0, %v5838_v1  ;;  %v13893_v1 = vsel %vm1160_vm3, %v6153_v54, %v6155_v35  ;;  %v17147_v5 = vld [vmem:[#allocation166_spill] sm:$0xff]  ;;  %v6163_v54 = vrot.slane %v13495_v41, 1  ;;  %v6165_v35 = vrot.slane %v13507_v58, 1 }
 0x939   : > { %6306 = vrot.lane.b32.xlu1 %v6225_v37, %s8846_s21  ;;  %6308 = vrot.lane.b32.xlu0 %v6226_v27, %s8846_s21  ;;  %v17146_v27 = vld [vmem:[#allocation161_spill] sm:$0xff]  ;;  %v6229_v38 = vmul.f32 %v13893_v1, %v17147_v5 }
 0x93a   : > { %v6230_v37 = vmul.f32 %v13888_v6, %v17146_v27  ;;  %v13920_v58 = vsel %vm1160_vm3, %v6163_v54, %v6165_v35 }
 0x93b   : > { %v5840_v0 = vpop.permute.xlu1 %5839  ;;  %v5842_v45 = vpop.permute.xlu0 %5841 }
 0x93c   : > { %5911 = vst.msk [vmem:[#allocation2 + $0xc8] sm:$0xff] %vm5885_vm0, %v5840_v0  ;;  %5912 = vst.msk [vmem:[#allocation2 + $0xd0] sm:$0xff] %vm5885_vm0, %v5842_v45  ;;  %v13909_v45 = vsel %vm1160_vm3, %v6157_v34, %v6159_v21  ;;  %v17149_v0 = vld [vmem:[#allocation170_spill] sm:$0xff]  ;;  %v6167_v34 = vrot.slane %v13516_v12, 1  ;;  %v6169_v21 = vrot.slane %v13533_v7, 1 }
 0x93d   : > { %6310 = vrot.lane.b32.xlu1 %v6227_v50, %s8846_s21  ;;  %6312 = vrot.lane.b32.xlu0 %v6228_v53, %s8846_s21  ;;  %v17148_v53 = vld [vmem:[#allocation165_spill] sm:$0xff]  ;;  %v6231_v27 = vmul.f32 %v13909_v45, %v17149_v0 }
 0x93e   : > { %v6232_v50 = vmul.f32 %v13904_v49, %v17148_v53 }
 0x93f   : > { %v5844_v13 = vpop.permute.xlu1 %5843  ;;  %v5846_v22 = vpop.permute.xlu0 %5845 }
 0x940   : > { %5913 = vst.msk [vmem:[#allocation2 + $0xd8] sm:$0xff] %vm5885_vm0, %v5844_v13  ;;  %5914 = vst.msk [vmem:[#allocation2 + $0xe0] sm:$0xff] %vm5885_vm0, %v5846_v22  ;;  %v13925_v22 = vsel %vm1160_vm3, %v6161_v47, %v6163_v54  ;;  %v17151_v13 = vld [vmem:[#allocation174_spill] sm:$0xff]  ;;  %v13936_v47 = vsel %vm1160_vm3, %v6167_v34, %v6169_v21  ;;  %v6171_v54 = vrot.slane %v13537_v4, 1 }
 0x941   : > { %6314 = vrot.lane.b32.xlu1 %v6229_v38, %s8846_s21  ;;  %6316 = vrot.lane.b32.xlu0 %v6230_v37, %s8846_s21  ;;  %v17150_v37 = vld [vmem:[#allocation169_spill] sm:$0xff]  ;;  %v6233_v53 = vmul.f32 %v13925_v22, %v17151_v13 }
 0x942   : > { %v6234_v38 = vmul.f32 %v13920_v58, %v17150_v37  ;;  %v17153_v37 = vld [vmem:[#allocation177_spill] sm:$0xff] }
 0x943   : > { %v5848_v5 = vpop.permute.xlu1 %5847  ;;  %v5850_v41 = vpop.permute.xlu0 %5849 }
 0x944   : > { %5915 = vst.msk [vmem:[#allocation2 + $0xe8] sm:$0xff] %vm5885_vm0, %v5848_v5  ;;  %5916 = vst.msk [vmem:[#allocation2 + $0xf0] sm:$0xff] %vm5885_vm0, %v5850_v41  ;;  %v6173_v41 = vrot.slane %v13228_v52, 1 }
 0x945   : > { %6318 = vrot.lane.b32.xlu1 %v6231_v27, %s8846_s21  ;;  %6320 = vrot.lane.b32.xlu0 %v6232_v50, %s8846_s21  ;;  %v13941_v27 = vsel %vm1160_vm3, %v6165_v35, %v6167_v34  ;;  %v17152_v50 = vld [vmem:[#allocation173_spill] sm:$0xff]  ;;  %v13955_v35 = vsel %vm1160_vm3, %v6169_v21, %v6171_v54 }
 0x946   : > { %v6236_v5 = vmul.f32 %v13936_v47, %v17152_v50  ;;  %v6235_v13 = vmul.f32 %v13941_v27, %v17153_v37  ;;  %v13952_v52 = vsel %vm1160_vm3, %v6171_v54, %v6173_v41  ;;  %v17157_v37 = vrot.slane %v13230_v24, 1  ;;  %v17160_v54 = vld [vmem:[#allocation184_spill] sm:$0xff] }
 0x947   : > { %v5852_v0 = vpop.permute.xlu1 %5851  ;;  %v5983_v7 = vpop.permute.xlu0 %5982  ;;  %17154 = vst [vmem:[#allocation322_spill] sm:$0xff] %v13952_v52 }
 0x948   : > { %5917 = vst.msk [vmem:[#allocation2 + $0xf8] sm:$0xff] %vm5885_vm0, %v5852_v0  ;;  %v13968_v21 = vsel %vm1160_vm3, %v6173_v41, %v17157_v37  ;;  %v17161_v41 = vld [vmem:[#allocation186_spill] sm:$0xff]  ;;  %v17163_v37 = vld [vmem:[#allocation185_spill] sm:$0xff]  ;;  %vm6368_vm3 = vcmask 687744  }
 0x949   : > { %6079 = vst.msk [vmem:[#allocation2] sm:$0xff] %vm6078_vm6, %v5983_v7  ;;  %6322 = vrot.lane.b32.xlu1 %v6233_v53, %s8846_s21  ;;  %6324 = vrot.lane.b32.xlu0 %v6234_v38, %s8846_s21  ;;  %v17155_v7 = vld [vmem:[#allocation179_spill] sm:$0xff]  ;;  %v17156_v38 = vld [vmem:[#allocation181_spill] sm:$0xff]  ;;  %17158 = vst [vmem:[#allocation28_spill] sm:$0xff] %v13968_v21 }
 0x94a   : > { %v6238_v34 = vmul.f32 %v13952_v52, %v17155_v7  ;;  %v6237_v53 = vmul.f32 %v13955_v35, %v17156_v38  ;;  %v17162_v38 = vld [vmem:[#allocation188_spill] sm:$0xff] }
 0x94b   : > { %v5985_v4 = vpop.permute.xlu1 %5984  ;;  %v5987_v12 = vpop.permute.xlu0 %5986 }
 0x94c   : > { %6080 = vst.msk [vmem:[#allocation2 + $0x8] sm:$0xff] %vm6078_vm6, %v5985_v4  ;;  %6081 = vst.msk [vmem:[#allocation2 + $0x10] sm:$0xff] %vm6078_vm6, %v5987_v12  ;;  %v17159_v12 = vld [vmem:[#allocation183_spill] sm:$0xff] }
 0x94d   : > { %6326 = vrot.lane.b32.xlu1 %v6235_v13, %s8846_s21  ;;  %6328 = vrot.lane.b32.xlu0 %v6236_v5, %s8846_s21  ;;  %v6239_v4 = vmul.f32 %v13968_v21, %v17159_v12  ;;  %v6401_v5 = vmul.f32 %v13272_v33, %v17160_v54  ;;  %v6404_v12 = vmul.f32 %v13321_v62, %v17163_v37 }
 0x94f   : > { %v5989_v0 = vpop.permute.xlu1 %5988  ;;  %v5991_v50 = vpop.permute.xlu0 %5990 }
 0x950   : > { %6082 = vst.msk [vmem:[#allocation2 + $0x18] sm:$0xff] %vm6078_vm6, %v5989_v0  ;;  %6083 = vst.msk [vmem:[#allocation2 + $0x20] sm:$0xff] %vm6078_vm6, %v5991_v50 }
 0x951   : > { %6330 = vrot.lane.b32.xlu1 %v6237_v53, %s8846_s21  ;;  %6332 = vrot.lane.b32.xlu0 %v6238_v34, %s8846_s21  ;;  %v6402_v34 = vmul.f32 %v13295_v9, %v17161_v41  ;;  %v6403_v53 = vmul.f32 %v13303_v14, %v17162_v38 }
 0x953   : > { %v5993_v13 = vpop.permute.xlu1 %5992  ;;  %v5995_v7 = vpop.permute.xlu0 %5994 }
 0x954   : > { %6084 = vst.msk [vmem:[#allocation2 + $0x28] sm:$0xff] %vm6078_vm6, %v5993_v13  ;;  %6085 = vst.msk [vmem:[#allocation2 + $0x30] sm:$0xff] %vm6078_vm6, %v5995_v7  ;;  %v17165_v7 = vld [vmem:[#allocation187_spill] sm:$0xff] }
 0x955   : > { %6334 = vrot.lane.b32.xlu1 %v6239_v4, %s8846_s21  ;;  %6465 = vrot.lane.b32.xlu0 %v6401_v5, %s8847_s23  ;;  %v17164_v4 = vld [vmem:[#allocation190_spill] sm:$0xff]  ;;  %v6406_v41 = vmul.f32 %v13337_v46, %v17165_v7  ;;  %s8851_s21 = smov 100  }
 0x956   : > { %v6405_v54 = vmul.f32 %v13324_v61, %v17164_v4 }
 0x957   : > { %v5997_v0 = vpop.permute.xlu1 %5996  ;;  %v5999_v50 = vpop.permute.xlu0 %5998 }
 0x958   : > { %6086 = vst.msk [vmem:[#allocation2 + $0x38] sm:$0xff] %vm6078_vm6, %v5997_v0  ;;  %6087 = vst.msk [vmem:[#allocation2 + $0x40] sm:$0xff] %vm6078_vm6, %v5999_v50  ;;  %v17167_v50 = vld [vmem:[#allocation189_spill] sm:$0xff] }
 0x959   : > { %6467 = vrot.lane.b32.xlu1 %v6402_v34, %s8847_s23  ;;  %6469 = vrot.lane.b32.xlu0 %v6403_v53, %s8847_s23  ;;  %v17166_v34 = vld [vmem:[#allocation192_spill] sm:$0xff]  ;;  %v6408_v37 = vmul.f32 %v13358_v3, %v17167_v50 }
 0x95a   : > { %v6407_v38 = vmul.f32 %v13343_v29, %v17166_v34 }
 0x95b   : > { %v6001_v5 = vpop.permute.xlu1 %6000  ;;  %v6003_v13 = vpop.permute.xlu0 %6002 }
 0x95c   : > { %6088 = vst.msk [vmem:[#allocation2 + $0x48] sm:$0xff] %vm6078_vm6, %v6001_v5  ;;  %6089 = vst.msk [vmem:[#allocation2 + $0x50] sm:$0xff] %vm6078_vm6, %v6003_v13  ;;  %v17169_v13 = vld [vmem:[#allocation191_spill] sm:$0xff] }
 0x95d   : > { %6471 = vrot.lane.b32.xlu1 %v6404_v12, %s8847_s23  ;;  %6473 = vrot.lane.b32.xlu0 %v6405_v54, %s8847_s23  ;;  %v17168_v12 = vld [vmem:[#allocation194_spill] sm:$0xff]  ;;  %v6410_v7 = vmul.f32 %v13384_v48, %v17169_v13 }
 0x95e   : > { %v6409_v4 = vmul.f32 %v13366_v8, %v17168_v12 }
 0x95f   : > { %v6005_v53 = vpop.permute.xlu1 %6004  ;;  %v6007_v0 = vpop.permute.xlu0 %6006 }
 0x960   : > { %6090 = vst.msk [vmem:[#allocation2 + $0x58] sm:$0xff] %vm6078_vm6, %v6005_v53  ;;  %6091 = vst.msk [vmem:[#allocation2 + $0x60] sm:$0xff] %vm6078_vm6, %v6007_v0  ;;  %v17171_v0 = vld [vmem:[#allocation193_spill] sm:$0xff] }
 0x961   : > { %6475 = vrot.lane.b32.xlu1 %v6406_v41, %s8847_s23  ;;  %6477 = vrot.lane.b32.xlu0 %v6407_v38, %s8847_s23  ;;  %v17170_v41 = vld [vmem:[#allocation196_spill] sm:$0xff]  ;;  %v6412_v50 = vmul.f32 %v13400_v40, %v17171_v0  ;;  %v17176_v0 = vld [vmem:[#allocation301_spill] sm:$0xff] }
 0x962   : > { %v6411_v34 = vmul.f32 %v13387_v39, %v17170_v41 }
 0x963   : > { %v6009_v54 = vpop.permute.xlu1 %6008  ;;  %v6011_v5 = vpop.permute.xlu0 %6010 }
 0x964   : > { %6092 = vst.msk [vmem:[#allocation2 + $0x68] sm:$0xff] %vm6078_vm6, %v6009_v54  ;;  %6093 = vst.msk [vmem:[#allocation2 + $0x70] sm:$0xff] %vm6078_vm6, %v6011_v5  ;;  %v17173_v5 = vld [vmem:[#allocation195_spill] sm:$0xff] }
 0x965   : > { %6479 = vrot.lane.b32.xlu1 %v6408_v37, %s8847_s23  ;;  %6481 = vrot.lane.b32.xlu0 %v6409_v4, %s8847_s23  ;;  %v17172_v37 = vld [vmem:[#allocation198_spill] sm:$0xff]  ;;  %v6414_v13 = vmul.f32 %v13421_v17, %v17173_v5 }
 0x966   : > { %v6413_v12 = vmul.f32 %v13406_v10, %v17172_v37  ;;  %v17177_v37 = vld [vmem:[#allocation202_spill] sm:$0xff] }
 0x967   : > { %v6013_v38 = vpop.permute.xlu1 %6012  ;;  %v6015_v53 = vpop.permute.xlu0 %6014 }
 0x968   : > { %6094 = vst.msk [vmem:[#allocation2 + $0x78] sm:$0xff] %vm6078_vm6, %v6013_v38  ;;  %6095 = vst.msk [vmem:[#allocation2 + $0x80] sm:$0xff] %vm6078_vm6, %v6015_v53  ;;  %v17175_v53 = vld [vmem:[#allocation197_spill] sm:$0xff] }
 0x969   : > { %6483 = vrot.lane.b32.xlu1 %v6410_v7, %s8847_s23  ;;  %6485 = vrot.lane.b32.xlu0 %v6411_v34, %s8847_s23  ;;  %v17174_v7 = vld [vmem:[#allocation200_spill] sm:$0xff] }
 0x96a   : > { %v6415_v41 = vmul.f32 %v13429_v2, %v17174_v7  ;;  %v17179_v7 = vld [vmem:[#allocation199_spill] sm:$0xff] }
 0x96b   : > { %v6017_v4 = vpop.permute.xlu1 %6016  ;;  %v6019_v54 = vpop.permute.xlu0 %6018 }
 0x96c   : > { %6096 = vst.msk [vmem:[#allocation2 + $0x88] sm:$0xff] %vm6078_vm6, %v6017_v4  ;;  %6097 = vst.msk [vmem:[#allocation2 + $0x90] sm:$0xff] %vm6078_vm6, %v6019_v54 }
 0x96d   : > { %6487 = vrot.lane.b32.xlu1 %v6412_v50, %s8847_s23  ;;  %6489 = vrot.lane.b32.xlu0 %v6413_v12, %s8847_s23  ;;  %v6416_v50 = vmul.f32 %v17176_v0, %v17175_v53  ;;  %v17178_v12 = vld [vmem:[#allocation17_spill] sm:$0xff] }
 0x96e   : > { %v6417_v4 = vmul.f32 %v17178_v12, %v17177_v37  ;;  %v17183_v37 = vld [vmem:[#allocation201_spill] sm:$0xff] }
 0x96f   : > { %v6021_v34 = vpop.permute.xlu1 %6020  ;;  %v6023_v38 = vpop.permute.xlu0 %6022 }
 0x970   : > { %6098 = vst.msk [vmem:[#allocation2 + $0x98] sm:$0xff] %vm6078_vm6, %v6021_v34  ;;  %6099 = vst.msk [vmem:[#allocation2 + $0xa0] sm:$0xff] %vm6078_vm6, %v6023_v38  ;;  %v17182_v38 = vld [vmem:[#allocation314_spill] sm:$0xff] }
 0x971   : > { %6491 = vrot.lane.b32.xlu1 %v6414_v13, %s8847_s23  ;;  %6493 = vrot.lane.b32.xlu0 %v6415_v41, %s8847_s23  ;;  %v17180_v13 = vld [vmem:[#allocation303_spill] sm:$0xff]  ;;  %v17181_v41 = vld [vmem:[#allocation204_spill] sm:$0xff] }
 0x972   : > { %v6418_v34 = vmul.f32 %v17180_v13, %v17179_v7  ;;  %v6419_v9 = vmul.f32 %v17182_v38, %v17181_v41 }
 0x973   : > { %v6025_v54 = vpop.permute.xlu1 %6024  ;;  %v6027_v5 = vpop.permute.xlu0 %6026 }
 0x974   : > { %6100 = vst.msk [vmem:[#allocation2 + $0xa8] sm:$0xff] %vm6078_vm6, %v6025_v54  ;;  %6101 = vst.msk [vmem:[#allocation2 + $0xb0] sm:$0xff] %vm6078_vm6, %v6027_v5  ;;  %v17186_v5 = vld [vmem:[#allocation180_spill] sm:$0xff] }
 0x975   : > { %6495 = vrot.lane.b32.xlu1 %v6416_v50, %s8847_s23  ;;  %6497 = vrot.lane.b32.xlu0 %v6417_v4, %s8847_s23  ;;  %v17184_v50 = vld [vmem:[#allocation178_spill] sm:$0xff] }
 0x976   : > { %v6420_v54 = vmul.f32 %v17184_v50, %v17183_v37  ;;  %v17185_v4 = vld [vmem:[#allocation206_spill] sm:$0xff] }
 0x977   : > { %v6029_v53 = vpop.permute.xlu1 %6028  ;;  %v6031_v33 = vpop.permute.xlu0 %6030  ;;  %v6421_v12 = vmul.f32 %v17186_v5, %v17185_v4 }
 0x978   : > { %6102 = vst.msk [vmem:[#allocation2 + $0xb8] sm:$0xff] %vm6078_vm6, %v6029_v53  ;;  %6103 = vst.msk [vmem:[#allocation2 + $0xc0] sm:$0xff] %vm6078_vm6, %v6031_v33  ;;  %v17187_v33 = vld [vmem:[#allocation203_spill] sm:$0xff] }
 0x979   : > { %6499 = vrot.lane.b32.xlu1 %v6418_v34, %s8847_s23  ;;  %6501 = vrot.lane.b32.xlu0 %v6419_v9, %s8847_s23  ;;  %v17188_v34 = vld [vmem:[#allocation300_spill] sm:$0xff]  ;;  %v17189_v9 = vld [vmem:[#allocation207_spill] sm:$0xff] }
 0x97a   : > { %v6422_v41 = vmul.f32 %v17188_v34, %v17187_v33  ;;  %v17190_v53 = vld [vmem:[#allocation323_spill] sm:$0xff] }
 0x97b   : > { %v6033_v7 = vpop.permute.xlu1 %6032  ;;  %v6035_v13 = vpop.permute.xlu0 %6034  ;;  %v6423_v0 = vmul.f32 %v17190_v53, %v17189_v9 }
 0x97c   : > { %6104 = vst.msk [vmem:[#allocation2 + $0xc8] sm:$0xff] %vm6078_vm6, %v6033_v7  ;;  %6105 = vst.msk [vmem:[#allocation2 + $0xd0] sm:$0xff] %vm6078_vm6, %v6035_v13  ;;  %v17191_v13 = vld [vmem:[#allocation205_spill] sm:$0xff]  ;;  %v17194_v7 = vld [vmem:[#allocation327_spill] sm:$0xff] }
 0x97d   : > { %6503 = vrot.lane.b32.xlu1 %v6420_v54, %s8847_s23  ;;  %6505 = vrot.lane.b32.xlu0 %v6421_v12, %s8847_s23  ;;  %v17192_v54 = vld [vmem:[#allocation325_spill] sm:$0xff]  ;;  %v17193_v12 = vld [vmem:[#allocation87_spill] sm:$0xff] }
 0x97e   : > { %v6424_v4 = vmul.f32 %v17192_v54, %v17191_v13  ;;  %v6425_v24 = vmul.f32 %v17194_v7, %v17193_v12 }
 0x97f   : > { %v6037_v37 = vpop.permute.xlu1 %6036  ;;  %v6039_v2 = vpop.permute.xlu0 %6038 }
 0x980   : > { %6106 = vst.msk [vmem:[#allocation2 + $0xd8] sm:$0xff] %vm6078_vm6, %v6037_v37  ;;  %6107 = vst.msk [vmem:[#allocation2 + $0xe0] sm:$0xff] %vm6078_vm6, %v6039_v2  ;;  %v17195_v2 = vld [vmem:[#allocation83_spill] sm:$0xff] }
 0x981   : > { %6507 = vrot.lane.b32.xlu1 %v6422_v41, %s8847_s23  ;;  %6509 = vrot.lane.b32.xlu0 %v6423_v0, %s8847_s23  ;;  %v6426_v0 = vmul.f32 %v13548_v26, %v17195_v2  ;;  %v17196_v41 = vld [vmem:[#allocation208_spill] sm:$0xff] }
 0x982   : > { %v6427_v9 = vmul.f32 %v13552_v15, %v17196_v41  ;;  %v17199_v41 = vld [vmem:[#allocation93_spill] sm:$0xff] }
 0x983   : > { %v6041_v33 = vpop.permute.xlu1 %6040  ;;  %v6043_v21 = vpop.permute.xlu0 %6042 }
 0x984   : > { %6108 = vst.msk [vmem:[#allocation2 + $0xe8] sm:$0xff] %vm6078_vm6, %v6041_v33  ;;  %6109 = vst.msk [vmem:[#allocation2 + $0xf0] sm:$0xff] %vm6078_vm6, %v6043_v21  ;;  %v17197_v21 = vld [vmem:[#allocation88_spill] sm:$0xff] }
 0x985   : > { %6511 = vrot.lane.b32.xlu1 %v6424_v4, %s8847_s23  ;;  %6513 = vrot.lane.b32.xlu0 %v6425_v24, %s8847_s23  ;;  %v6428_v24 = vmul.f32 %v13564_v25, %v17197_v21  ;;  %v17198_v4 = vld [vmem:[#allocation209_spill] sm:$0xff] }
 0x986   : > { %v6429_v12 = vmul.f32 %v13567_v28, %v17198_v4  ;;  %v17203_v4 = vld [vmem:[#allocation210_spill] sm:$0xff] }
 0x987   : > { %v6045_v37 = vpop.permute.xlu1 %6044  ;;  %v6273_v13 = vpop.permute.xlu0 %6272 }
 0x988   : > { %6110 = vst.msk [vmem:[#allocation2 + $0xf8] sm:$0xff] %vm6078_vm6, %v6045_v37 }
 0x989   : > { %6369 = vst.msk [vmem:[#allocation2] sm:$0xff] %vm6368_vm3, %v6273_v13  ;;  %6515 = vrot.lane.b32.xlu1 %v6426_v0, %s8847_s23  ;;  %6517 = vrot.lane.b32.xlu0 %v6427_v9, %s8847_s23  ;;  %v17200_v0 = vld [vmem:[#allocation331_spill] sm:$0xff]  ;;  %v17202_v13 = vld [vmem:[#allocation302_spill] sm:$0xff] }
 0x98a   : > { %v6430_v37 = vmul.f32 %v17200_v0, %v17199_v41  ;;  %v17201_v9 = vld [vmem:[#allocation211_spill] sm:$0xff] }
 0x98b   : > { %v6275_v33 = vpop.permute.xlu1 %6274  ;;  %v6277_v2 = vpop.permute.xlu0 %6276  ;;  %v6431_v52 = vmul.f32 %v17202_v13, %v17201_v9  ;;  %v17209_v9 = vld [vmem:[#allocation213_spill] sm:$0xff] }
 0x98c   : > { %6370 = vst.msk [vmem:[#allocation2 + $0x8] sm:$0xff] %vm6368_vm3, %v6275_v33  ;;  %6371 = vst.msk [vmem:[#allocation2 + $0x10] sm:$0xff] %vm6368_vm3, %v6277_v2  ;;  %v17206_v2 = vld [vmem:[#allocation316_spill] sm:$0xff] }
 0x98d   : > { %6519 = vrot.lane.b32.xlu1 %v6428_v24, %s8847_s23  ;;  %6521 = vrot.lane.b32.xlu0 %v6429_v12, %s8847_s23  ;;  %v17204_v24 = vld [vmem:[#allocation343_spill] sm:$0xff]  ;;  %v17205_v12 = vld [vmem:[#allocation26_spill] sm:$0xff] }
 0x98e   : > { %v6432_v33 = vmul.f32 %v17204_v24, %v17203_v4  ;;  %v6594_v28 = vmul.f32 %v17206_v2, %v17205_v12  ;;  %v17212_v12 = vld [vmem:[#allocation346_spill] sm:$0xff] }
 0x98f   : > { %v6279_v21 = vpop.permute.xlu1 %6278  ;;  %v6281_v17 = vpop.permute.xlu0 %6280 }
 0x990   : > { %6372 = vst.msk [vmem:[#allocation2 + $0x18] sm:$0xff] %vm6368_vm3, %v6279_v21  ;;  %6373 = vst.msk [vmem:[#allocation2 + $0x20] sm:$0xff] %vm6368_vm3, %v6281_v17  ;;  %v17207_v17 = vld [vmem:[#allocation212_spill] sm:$0xff]  ;;  %v6596_v21 = vmul.f32 %v13264_v44, %v17209_v9  ;;  %v17214_v9 = vld [vmem:[#allocation217_spill] sm:$0xff] }
 0x991   : > { %6523 = vrot.lane.b32.xlu1 %v6430_v37, %s8847_s23  ;;  %6525 = vrot.lane.b32.xlu0 %v6431_v52, %s8847_s23  ;;  %v17208_v37 = vld [vmem:[#allocation13_spill] sm:$0xff] }
 0x992   : > { %v6595_v52 = vmul.f32 %v17208_v37, %v17207_v17 }
 0x993   : > { %v6283_v41 = vpop.permute.xlu1 %6282  ;;  %v6285_v0 = vpop.permute.xlu0 %6284 }
 0x994   : > { %6374 = vst.msk [vmem:[#allocation2 + $0x28] sm:$0xff] %vm6368_vm3, %v6283_v41  ;;  %6375 = vst.msk [vmem:[#allocation2 + $0x30] sm:$0xff] %vm6368_vm3, %v6285_v0  ;;  %v17210_v0 = vld [vmem:[#allocation214_spill] sm:$0xff] }
 0x995   : > { %6527 = vrot.lane.b32.xlu1 %v6432_v33, %s8847_s23  ;;  %6658 = vrot.lane.b32.xlu0 %v6594_v28, %s8848_s10  ;;  %v6598_v33 = vmul.f32 %v13285_v51, %v17210_v0  ;;  %v17211_v28 = vld [vmem:[#allocation215_spill] sm:$0xff]  ;;  %s8201_s23 = sshll.u32 %s8804_s28, 9 }
 0x996   : > { %v6597_v41 = vmul.f32 %v17212_v12, %v17211_v28  ;;  %s14964_s27 = sadd.s32 %s8201_s23, %s8200_s22  ;;  %s8853_s23 = smov [#allocation3]  }
 0x997   : > { %v6287_v4 = vpop.permute.xlu1 %6286  ;;  %v6289_v24 = vpop.permute.xlu0 %6288  ;;  %s8202_s28 = sshll.u32 %s14964_s27, 7  ;;  %s8728_s27 = sshll.u32 %s8853_s23, 4  ;;  %s8729_s27 = int_to_ptr.vmem [resolvable:$false] %s8728_s27 }
 0x998   : > { %6376 = vst.msk [vmem:[#allocation2 + $0x38] sm:$0xff] %vm6368_vm3, %v6287_v4  ;;  %6377 = vst.msk [vmem:[#allocation2 + $0x40] sm:$0xff] %vm6368_vm3, %v6289_v24  ;;  %v17213_v24 = vld [vmem:[#allocation216_spill] sm:$0xff]  ;;  %s14989_s17 = scalar_lea.hbm %s15058_s7, %s8202_s28  ;;  %s8730_s28 = scalar_lea.vmem %s8729_s27, 8192 }
 0x999   : > { %6660 = vrot.lane.b32.xlu1 %v6595_v52, %s8848_s10  ;;  %6662 = vrot.lane.b32.xlu0 %v6596_v21, %s8848_s10  ;;  %v6600_v52 = vmul.f32 %v13306_v11, %v17213_v24  ;;  %v17215_v21 = vld [vmem:[#allocation320_spill] sm:$0xff] }
 0x99a   : > { %v6599_v4 = vmul.f32 %v17215_v21, %v17214_v9 }
 0x99b   : > { %v6291_v17 = vpop.permute.xlu1 %6290  ;;  %v6293_v37 = vpop.permute.xlu0 %6292 }
 0x99c   : > { %6378 = vst.msk [vmem:[#allocation2 + $0x48] sm:$0xff] %vm6368_vm3, %v6291_v17  ;;  %6379 = vst.msk [vmem:[#allocation2 + $0x50] sm:$0xff] %vm6368_vm3, %v6293_v37  ;;  %v17216_v37 = vld [vmem:[#allocation218_spill] sm:$0xff] }
 0x99d   : > { %6664 = vrot.lane.b32.xlu1 %v6597_v41, %s8848_s10  ;;  %6666 = vrot.lane.b32.xlu0 %v6598_v33, %s8848_s10  ;;  %v6602_v28 = vmul.f32 %v13327_v31, %v17216_v37  ;;  %v17217_v33 = vld [vmem:[#allocation219_spill] sm:$0xff] }
 0x99e   : > { %v6601_v41 = vmul.f32 %v13318_v18, %v17217_v33  ;;  %v17220_v33 = vld [vmem:[#allocation228_spill] sm:$0xff] }
 0x99f   : > { %v6295_v0 = vpop.permute.xlu1 %6294  ;;  %v6297_v2 = vpop.permute.xlu0 %6296 }
 0x9a0   : > { %6380 = vst.msk [vmem:[#allocation2 + $0x58] sm:$0xff] %vm6368_vm3, %v6295_v0  ;;  %6381 = vst.msk [vmem:[#allocation2 + $0x60] sm:$0xff] %vm6368_vm3, %v6297_v2  ;;  %v17218_v2 = vld [vmem:[#allocation226_spill] sm:$0xff] }
 0x9a1   : > { %6668 = vrot.lane.b32.xlu1 %v6599_v4, %s8848_s10  ;;  %6670 = vrot.lane.b32.xlu0 %v6600_v52, %s8848_s10  ;;  %v6610_v9 = vmul.f32 %v13411_v56, %v17218_v2  ;;  %v17219_v52 = vld [vmem:[#allocation229_spill] sm:$0xff] }
 0x9a2   : > { %v6611_v4 = vmul.f32 %v13425_v20, %v17219_v52  ;;  %v17222_v52 = vld [vmem:[#allocation243_spill] sm:$0xff] }
 0x9a3   : > { %v6299_v17 = vpop.permute.xlu1 %6298  ;;  %v6301_v24 = vpop.permute.xlu0 %6300 }
 0x9a4   : > { %6382 = vst.msk [vmem:[#allocation2 + $0x68] sm:$0xff] %vm6368_vm3, %v6299_v17  ;;  %6383 = vst.msk [vmem:[#allocation2 + $0x70] sm:$0xff] %vm6368_vm3, %v6301_v24 }
 0x9a5   : > { %6672 = vrot.lane.b32.xlu1 %v6601_v41, %s8848_s10  ;;  %6674 = vrot.lane.b32.xlu0 %v6602_v28, %s8848_s10  ;;  %v6612_v41 = vmul.f32 %v13432_v63, %v17220_v33  ;;  %v17221_v28 = vld [vmem:[#allocation231_spill] sm:$0xff] }
 0x9a6   : > { %v6613_v17 = vmul.f32 %v13444_v30, %v17221_v28 }
 0x9a7   : > { %v6303_v0 = vpop.permute.xlu1 %6302  ;;  %v6305_v37 = vpop.permute.xlu0 %6304 }
 0x9a8   : > { %6384 = vst.msk [vmem:[#allocation2 + $0x78] sm:$0xff] %vm6368_vm3, %v6303_v0  ;;  %6385 = vst.msk [vmem:[#allocation2 + $0x80] sm:$0xff] %vm6368_vm3, %v6305_v37  ;;  %v17225_v37 = vld [vmem:[#allocation336_spill] sm:$0xff] }
 0x9a9   : > { %6690 = vrot.lane.b32.xlu1 %v6610_v9, %s8848_s10  ;;  %6692 = vrot.lane.b32.xlu0 %v6611_v4, %s8848_s10  ;;  %v17223_v9 = vld [vmem:[#allocation334_spill] sm:$0xff]  ;;  %v17224_v4 = vld [vmem:[#allocation244_spill] sm:$0xff] }
 0x9aa   : > { %v6787_v0 = vmul.f32 %v17223_v9, %v17222_v52  ;;  %v6788_v20 = vmul.f32 %v17225_v37, %v17224_v4  ;;  %v17230_v4 = vld [vmem:[#allocation335_spill] sm:$0xff] }
 0x9ab   : > { %v6307_v24 = vpop.permute.xlu1 %6306  ;;  %v6309_v2 = vpop.permute.xlu0 %6308 }
 0x9ac   : > { %6386 = vst.msk [vmem:[#allocation2 + $0x88] sm:$0xff] %vm6368_vm3, %v6307_v24  ;;  %6387 = vst.msk [vmem:[#allocation2 + $0x90] sm:$0xff] %vm6368_vm3, %v6309_v2 }
 0x9ad   : > { %6694 = vrot.lane.b32.xlu1 %v6612_v41, %s8848_s10  ;;  %6696 = vrot.lane.b32.xlu0 %v6613_v17, %s8848_s10  ;;  %v17226_v41 = vld [vmem:[#allocation259_spill] sm:$0xff]  ;;  %v17227_v17 = vld [vmem:[#allocation260_spill] sm:$0xff] }
 0x9ae   : > { %v6804_v28 = vmul.f32 %v13877_v57, %v17226_v41  ;;  %v6803_v24 = vmul.f32 %v13856_v23, %v17227_v17  ;;  %v17231_v17 = vld [vmem:[#allocation261_spill] sm:$0xff] }
 0x9af   : > { %v6311_v33 = vpop.permute.xlu1 %6310  ;;  %v6313_v56 = vpop.permute.xlu0 %6312 }
 0x9b0   : > { %6388 = vst.msk [vmem:[#allocation2 + $0x98] sm:$0xff] %vm6368_vm3, %v6311_v33  ;;  %6389 = vst.msk [vmem:[#allocation2 + $0xa0] sm:$0xff] %vm6368_vm3, %v6313_v56  ;;  %v17228_v56 = vld [vmem:[#allocation245_spill] sm:$0xff] }
 0x9b1   : > { %6851 = vrot.lane.b32.xlu1 %v6787_v0, %s8849_s16  ;;  %6853 = vrot.lane.b32.xlu0 %v6788_v20, %s8849_s16  ;;  %v6790_v0 = vmul.f32 %v13765_v19, %v17228_v56  ;;  %v17229_v20 = vld [vmem:[#allocation246_spill] sm:$0xff] }
 0x9b2   : > { %v6789_v33 = vmul.f32 %v17230_v4, %v17229_v20 }
 0x9b3   : > { %v6315_v2 = vpop.permute.xlu1 %6314  ;;  %v6317_v52 = vpop.permute.xlu0 %6316 }
 0x9b4   : > { %6390 = vst.msk [vmem:[#allocation2 + $0xa8] sm:$0xff] %vm6368_vm3, %v6315_v2  ;;  %6391 = vst.msk [vmem:[#allocation2 + $0xb0] sm:$0xff] %vm6368_vm3, %v6317_v52 }
 0x9b5   : > { %6883 = vrot.lane.b32.xlu1 %v6803_v24, %s8849_s16  ;;  %6885 = vrot.lane.b32.xlu0 %v6804_v28, %s8849_s16  ;;  %v6806_v24 = vmul.f32 %v13893_v1, %v17231_v17  ;;  %v17232_v28 = vld [vmem:[#allocation262_spill] sm:$0xff] }
 0x9b6   : > { %v6805_v2 = vmul.f32 %v13872_v55, %v17232_v28  ;;  %v17235_v28 = vld [vmem:[#allocation59_spill] sm:$0xff] }
 0x9b7   : > { %v6319_v41 = vpop.permute.xlu1 %6318  ;;  %v6321_v37 = vpop.permute.xlu0 %6320 }
 0x9b8   : > { %6392 = vst.msk [vmem:[#allocation2 + $0xb8] sm:$0xff] %vm6368_vm3, %v6319_v41  ;;  %6393 = vst.msk [vmem:[#allocation2 + $0xc0] sm:$0xff] %vm6368_vm3, %v6321_v37  ;;  %v17233_v37 = vld [vmem:[#allocation275_spill] sm:$0xff] }
 0x9b9   : > { %6855 = vrot.lane.b32.xlu1 %v6789_v33, %s8849_s16  ;;  %6857 = vrot.lane.b32.xlu0 %v6790_v0, %s8849_s16  ;;  %v6980_v20 = vmul.f32 %v13303_v14, %v17233_v37  ;;  %v17234_v0 = vld [vmem:[#allocation276_spill] sm:$0xff] }
 0x9ba   : > { %v6981_v33 = vmul.f32 %v13321_v62, %v17234_v0  ;;  %v17237_v62 = vld [vmem:[#allocation34_spill] sm:$0xff] }
 0x9bb   : > { %v6323_v52 = vpop.permute.xlu1 %6322  ;;  %v6325_v56 = vpop.permute.xlu0 %6324  ;;  %v6982_v37 = vmul.f32 %v13324_v61, %v17237_v62 }
 0x9bc   : > { %6394 = vst.msk [vmem:[#allocation2 + $0xc8] sm:$0xff] %vm6368_vm3, %v6323_v52  ;;  %6395 = vst.msk [vmem:[#allocation2 + $0xd0] sm:$0xff] %vm6368_vm3, %v6325_v56 }
 0x9bd   : > { %6887 = vrot.lane.b32.xlu1 %v6805_v2, %s8849_s16  ;;  %6889 = vrot.lane.b32.xlu0 %v6806_v24, %s8849_s16  ;;  %v6996_v24 = vmul.f32 %v17182_v38, %v17235_v28  ;;  %v17236_v2 = vld [vmem:[#allocation75_spill] sm:$0xff] }
 0x9be   : > { %v6997_v14 = vmul.f32 %v17184_v50, %v17236_v2  ;;  %v8653_v50 = vld [vmem:[%s15054_s3 + $0x30] sm:$0x3f]  }
 0x9bf   : > { %v6327_v41 = vpop.permute.xlu1 %6326  ;;  %v6329_v17 = vpop.permute.xlu0 %6328  ;;  %8525 = vmatprep.subr.msk.bf16.mxu0 %vm7718_vm8, %v8653_v50  ;;  %v7720_v2 = vsel %vm7718_vm8, %v8653_v50, 0  ;;  %8526 = vmatprep.subr.msk.bf16.mxu1 %vm7718_vm8, %v8653_v50 }
 0x9c0   : > { %6396 = vst.msk [vmem:[#allocation2 + $0xd8] sm:$0xff] %vm6368_vm3, %v6327_v41  ;;  %6397 = vst.msk [vmem:[#allocation2 + $0xe0] sm:$0xff] %vm6368_vm3, %v6329_v17  ;;  %v17239_v41 = vld [vmem:[#allocation64_spill] sm:$0xff]  ;;  %v17240_v17 = vld [vmem:[#allocation77_spill] sm:$0xff]  ;;  %8466 = vmatpush3.bf16.msra.mxu0 %v7720_v2  ;;  %8518 = vmatpush3.bf16.msra.mxu1 %v7720_v2 }
 0x9c1   : > { %7044 = vrot.lane.b32.xlu1 %v6980_v20, %s8850_s13  ;;  %7046 = vrot.lane.b32.xlu0 %v6981_v33, %s8850_s13  ;;  %v17238_v20 = vld [vmem:[#allocation38_spill] sm:$0xff]  ;;  %v6998_v61 = vmul.f32 %v17186_v5, %v17239_v41  ;;  %v8654_v5 = vld [vmem:[%s15054_s3 + $0x28] sm:$0xff]  }
 0x9c2   : > { %v6983_v38 = vmul.f32 %v13337_v46, %v17238_v20  ;;  %v6999_v46 = vmul.f32 %v17188_v34, %v17240_v17  ;;  %v17241_v34 = vld [vmem:[#allocation30_spill] sm:$0xff]  ;;  %8467 = vmatprep.subr.bf16.mxu0 %v8654_v5  ;;  %8512 = vmatprep.subr.bf16.mxu1 %v8654_v5 }
 0x9c3   : > { %v6331_v52 = vpop.permute.xlu1 %6330  ;;  %v6333_v56 = vpop.permute.xlu0 %6332  ;;  %v17245_v41 = vld [vmem:[#allocation286_spill] sm:$0xff] }
 0x9c4   : > { %6398 = vst.msk [vmem:[#allocation2 + $0xe8] sm:$0xff] %vm6368_vm3, %v6331_v52  ;;  %6399 = vst.msk [vmem:[#allocation2 + $0xf0] sm:$0xff] %vm6368_vm3, %v6333_v56  ;;  %v17242_v52 = vld [vmem:[#allocation29_spill] sm:$0xff]  ;;  %8468 = vmatpush3.bf16.msra.mxu0 %v8654_v5  ;;  %8519 = vmatpush3.bf16.msra.mxu1 %v8654_v5  ;;  %v17248_v2 = vld [vmem:[#allocation66_spill] sm:$0xff] }
 0x9c5   : > { %7076 = vrot.lane.b32.xlu1 %v6996_v24, %s8850_s13  ;;  %7078 = vrot.lane.b32.xlu0 %v6997_v14, %s8850_s13  ;;  %v7173_v14 = vmul.f32 %v13264_v44, %v17241_v34  ;;  %v7174_v56 = vmul.f32 %v17212_v12, %v17242_v52  ;;  %v8655_v44 = vld [vmem:[%s15054_s3 + $0x20] sm:$0xff]   ;;  %v17243_v12 = vld [vmem:[#allocation53_spill] sm:$0xff]  ;;  %v7191_v5 = vmul.f32 %v13453_v32, %v17248_v2  ;;  %v8658_v52 = vld [vmem:[%s15054_s3 + $0x8] sm:$0xff]  }
 0x9c6   : > { %v7190_v20 = vmul.f32 %v13444_v30, %v17243_v12  ;;  %8469 = vmatprep.subr.bf16.mxu0 %v8655_v44  ;;  %8513 = vmatprep.subr.bf16.mxu1 %v8655_v44  ;;  %v8656_v30 = vld [vmem:[%s15054_s3 + $0x18] sm:$0xff]  }
 0x9c7   : > { %v6335_v0 = vpop.permute.xlu1 %6334  ;;  %v6466_v33 = vpop.permute.xlu0 %6465 }
 0x9c8   : > { %6400 = vst.msk [vmem:[#allocation2 + $0xf8] sm:$0xff] %vm6368_vm3, %v6335_v0  ;;  %8470 = vmatpush3.bf16.msra.mxu0 %v8655_v44  ;;  %8520 = vmatpush3.bf16.msra.mxu1 %v8655_v44 }
 0x9c9   : > { %6562 = vst.msk [vmem:[#allocation2] sm:$0xff] %vm6561_vm7, %v6466_v33  ;;  %7048 = vrot.lane.b32.xlu1 %v6982_v37, %s8850_s13  ;;  %7050 = vrot.lane.b32.xlu0 %v6983_v38, %s8850_s13  ;;  %v17244_v38 = vld [vmem:[#allocation60_spill] sm:$0xff] }
 0x9ca   : > { %v7189_v0 = vmul.f32 %v13432_v63, %v17244_v38  ;;  %v7176_v63 = vmul.f32 %v17215_v21, %v17245_v41  ;;  %8471 = vmatprep.subr.bf16.mxu0 %v8656_v30  ;;  %8514 = vmatprep.subr.bf16.mxu1 %v8656_v30  ;;  %v8657_v21 = vld [vmem:[%s15054_s3 + $0x10] sm:$0xff]  }
 0x9cb   : > { %v6468_v28 = vpop.permute.xlu1 %6467  ;;  %v6470_v24 = vpop.permute.xlu0 %6469  ;;  %v17253_v41 = vld [vmem:[#allocation20_spill] sm:$0xff] }
 0x9cc   : > { %6563 = vst.msk [vmem:[#allocation2 + $0x8] sm:$0xff] %vm6561_vm7, %v6468_v28  ;;  %6564 = vst.msk [vmem:[#allocation2 + $0x10] sm:$0xff] %vm6561_vm7, %v6470_v24  ;;  %8472 = vmatpush3.bf16.msra.mxu0 %v8656_v30  ;;  %8521 = vmatpush3.bf16.msra.mxu1 %v8656_v30  ;;  %v17247_v24 = vld [vmem:[#allocation58_spill] sm:$0xff] }
 0x9cd   : > { %7080 = vrot.lane.b32.xlu1 %v6998_v61, %s8850_s13  ;;  %7082 = vrot.lane.b32.xlu0 %v6999_v46, %s8850_s13  ;;  %v17246_v61 = vld [vmem:[#allocation287_spill] sm:$0xff] }
 0x9ce   : > { %v7175_v17 = vmul.f32 %v13285_v51, %v17246_v61  ;;  %v7192_v51 = vmul.f32 %v13471_v16, %v17247_v24  ;;  %8473 = vmatprep.subr.bf16.mxu0 %v8657_v21  ;;  %8515 = vmatprep.subr.bf16.mxu1 %v8657_v21  ;;  %v17255_v61 = vld [vmem:[#allocation16_spill] sm:$0xff]  ;;  %v17257_v24 = vld [vmem:[#allocation163_spill] sm:$0xff] }
 0x9cf   : > { %v6472_v62 = vpop.permute.xlu1 %6471  ;;  %v6474_v37 = vpop.permute.xlu0 %6473 }
 0x9d0   : > { %6565 = vst.msk [vmem:[#allocation2 + $0x18] sm:$0xff] %vm6561_vm7, %v6472_v62  ;;  %6566 = vst.msk [vmem:[#allocation2 + $0x20] sm:$0xff] %vm6561_vm7, %v6474_v37  ;;  %8474 = vmatpush3.bf16.msra.mxu0 %v8657_v21  ;;  %8522 = vmatpush3.bf16.msra.mxu1 %v8657_v21  ;;  %v17250_v37 = vld [vmem:[#allocation24_spill] sm:$0xff] }
 0x9d1   : > { %7237 = vrot.lane.b32.xlu1 %v7173_v14, %s8851_s21  ;;  %7239 = vrot.lane.b32.xlu0 %v7174_v56, %s8851_s21  ;;  %v17249_v56 = vld [vmem:[#allocation23_spill] sm:$0xff]  ;;  %v7367_v44 = vmul.f32 %v13765_v19, %v17250_v37  ;;  %v17251_v19 = vld [vmem:[#allocation152_spill] sm:$0xff] }
 0x9d2   : > { %v7366_v62 = vmul.f32 %v17230_v4, %v17249_v56  ;;  %8475 = vmatprep.subr.bf16.mxu0 %v8658_v52  ;;  %8516 = vmatprep.subr.bf16.mxu1 %v8658_v52  ;;  %v8659_v4 = vld [vmem:[%s15054_s3] sm:$0xff]   ;;  %v7382_v38 = vmul.f32 %v13872_v55, %v17251_v19 }
 0x9d3   : > { %v6476_v33 = vpop.permute.xlu1 %6475  ;;  %v6478_v50 = vpop.permute.xlu0 %6477 }
 0x9d4   : > { %6567 = vst.msk [vmem:[#allocation2 + $0x28] sm:$0xff] %vm6561_vm7, %v6476_v33  ;;  %6568 = vst.msk [vmem:[#allocation2 + $0x30] sm:$0xff] %vm6561_vm7, %v6478_v50  ;;  %8476 = vmatpush3.bf16.msra.mxu0 %v8658_v52  ;;  %8523 = vmatpush3.bf16.msra.mxu1 %v8658_v52  ;;  %v17259_v52 = vld [vmem:[#allocation233_spill] sm:$0xff] }
 0x9d5   : > { %7269 = vrot.lane.b32.xlu1 %v7189_v0, %s8851_s21  ;;  %7271 = vrot.lane.b32.xlu0 %v7190_v20, %s8851_s21  ;;  %v17252_v0 = vld [vmem:[#allocation159_spill] sm:$0xff]  ;;  %v6615_v56 = vmul.f32 %v13471_v16, %v17259_v52  ;;  %v17270_v52 = vld [vmem:[#allocation33_spill] sm:$0xff] }
 0x9d6   : > { %v7383_v33 = vmul.f32 %v13893_v1, %v17252_v0  ;;  %8477 = vmatprep.subr.bf16.mxu0 %v8659_v4  ;;  %8517 = vmatprep.subr.bf16.mxu1 %v8659_v4  ;;  %v7369_v1 = vmul.f32 %v13781_v43, %v17255_v61  ;;  %v17262_v16 = vld [vmem:[#allocation247_spill] sm:$0xff]  ;;  %v17263_v0 = vld [vmem:[#allocation248_spill] sm:$0xff] }
 0x9d7   : > { %v6480_v46 = vpop.permute.xlu1 %6479  ;;  %v6482_v28 = vpop.permute.xlu0 %6481  ;;  %v17265_v61 = vld [vmem:[#allocation264_spill] sm:$0xff] }
 0x9d8   : > { %6569 = vst.msk [vmem:[#allocation2 + $0x38] sm:$0xff] %vm6561_vm7, %v6480_v46  ;;  %6570 = vst.msk [vmem:[#allocation2 + $0x40] sm:$0xff] %vm6561_vm7, %v6482_v28  ;;  %8478 = vmatpush3.bf16.msra.mxu0 %v8659_v4  ;;  %8524 = vmatpush3.bf16.msra.mxu1 %v8659_v4  ;;  %v17256_v28 = vld [vmem:[#allocation156_spill] sm:$0xff] }
 0x9d9   : > { %7241 = vrot.lane.b32.xlu1 %v7175_v17, %s8851_s21  ;;  %7243 = vrot.lane.b32.xlu0 %v7176_v63, %s8851_s21  ;;  %v17254_v63 = vld [vmem:[#allocation337_spill] sm:$0xff]  ;;  %v7384_v21 = vmul.f32 %v13888_v6, %v17256_v28  ;;  %v17267_v28 = vld [vmem:[#allocation250_spill] sm:$0xff] }
 0x9da   : > { %v7368_v55 = vmul.f32 %v17254_v63, %v17253_v41  ;;  %v17264_v41 = vld [vmem:[#allocation263_spill] sm:$0xff] }
 0x9db   : > { %v6484_v34 = vpop.permute.xlu1 %6483  ;;  %v6486_v14 = vpop.permute.xlu0 %6485 }
 0x9dc   : > { %6571 = vst.msk [vmem:[#allocation2 + $0x48] sm:$0xff] %vm6561_vm7, %v6484_v34  ;;  %6572 = vst.msk [vmem:[#allocation2 + $0x50] sm:$0xff] %vm6561_vm7, %v6486_v14  ;;  %v17258_v34 = vld [vmem:[#allocation230_spill] sm:$0xff] }
 0x9dd   : > { %7273 = vrot.lane.b32.xlu1 %v7191_v5, %s8851_s21  ;;  %7275 = vrot.lane.b32.xlu0 %v7192_v51, %s8851_s21  ;;  %v7385_v51 = vmul.f32 %v13909_v45, %v17257_v24  ;;  %v6614_v14 = vmul.f32 %v13453_v32, %v17258_v34 }
 0x9df   : > { %v6488_v12 = vpop.permute.xlu1 %6487  ;;  %v6490_v20 = vpop.permute.xlu0 %6489 }
 0x9e0   : > { %6573 = vst.msk [vmem:[#allocation2 + $0x58] sm:$0xff] %vm6561_vm7, %v6488_v12  ;;  %6574 = vst.msk [vmem:[#allocation2 + $0x60] sm:$0xff] %vm6561_vm7, %v6490_v20  ;;  %v17261_v20 = vld [vmem:[#allocation235_spill] sm:$0xff] }
 0x9e1   : > { %7430 = vrot.lane.b32.xlu1 %v7366_v62, %s8852_s20  ;;  %7432 = vrot.lane.b32.xlu0 %v7367_v44, %s8852_s20  ;;  %v17260_v44 = vld [vmem:[#allocation232_spill] sm:$0xff]  ;;  %v6617_v4 = vmul.f32 %v13488_v59, %v17261_v20  ;;  %v17272_v20 = vld [vmem:[#allocation70_spill] sm:$0xff] }
 0x9e2   : > { %v6616_v12 = vmul.f32 %v13474_v60, %v17260_v44 }
 0x9e3   : > { %v6492_v50 = vpop.permute.xlu1 %6491  ;;  %v6494_v30 = vpop.permute.xlu0 %6493 }
 0x9e4   : > { %6575 = vst.msk [vmem:[#allocation2 + $0x68] sm:$0xff] %vm6561_vm7, %v6492_v50  ;;  %6576 = vst.msk [vmem:[#allocation2 + $0x70] sm:$0xff] %vm6561_vm7, %v6494_v30 }
 0x9e5   : > { %7462 = vrot.lane.b32.xlu1 %v7382_v38, %s8852_s20  ;;  %7464 = vrot.lane.b32.xlu0 %v7383_v33, %s8852_s20  ;;  %v6792_v38 = vmul.f32 %v13781_v43, %v17262_v16  ;;  %v6791_v33 = vmul.f32 %v17254_v63, %v17263_v0  ;;  %v17266_v63 = vld [vmem:[#allocation249_spill] sm:$0xff]  ;;  %v17275_v0 = vld [vmem:[#allocation47_spill] sm:$0xff] }
 0x9e7   : > { %v6496_v17 = vpop.permute.xlu1 %6495  ;;  %v6498_v46 = vpop.permute.xlu0 %6497 }
 0x9e8   : > { %6577 = vst.msk [vmem:[#allocation2 + $0x78] sm:$0xff] %vm6561_vm7, %v6496_v17  ;;  %6578 = vst.msk [vmem:[#allocation2 + $0x80] sm:$0xff] %vm6561_vm7, %v6498_v46  ;;  %v6794_v46 = vmul.f32 %v13797_v36, %v17266_v63 }
 0x9e9   : > { %7434 = vrot.lane.b32.xlu1 %v7368_v55, %s8852_s20  ;;  %7436 = vrot.lane.b32.xlu0 %v7369_v1, %s8852_s20  ;;  %v6808_v55 = vmul.f32 %v13909_v45, %v17264_v41  ;;  %v6807_v1 = vmul.f32 %v13888_v6, %v17265_v61  ;;  %v17268_v6 = vld [vmem:[#allocation265_spill] sm:$0xff]  ;;  %v17277_v41 = vld [vmem:[#allocation280_spill] sm:$0xff] }
 0x9eb   : > { %v6500_v2 = vpop.permute.xlu1 %6499  ;;  %v6502_v5 = vpop.permute.xlu0 %6501 }
 0x9ec   : > { %6579 = vst.msk [vmem:[#allocation2 + $0x88] sm:$0xff] %vm6561_vm7, %v6500_v2  ;;  %6580 = vst.msk [vmem:[#allocation2 + $0x90] sm:$0xff] %vm6561_vm7, %v6502_v5  ;;  %v17269_v2 = vld [vmem:[#allocation266_spill] sm:$0xff] }
 0x9ed   : > { %7466 = vrot.lane.b32.xlu1 %v7384_v21, %s8852_s20  ;;  %7468 = vrot.lane.b32.xlu0 %v7385_v51, %s8852_s20  ;;  %v6793_v21 = vmul.f32 %v13776_v42, %v17267_v28  ;;  %v6810_v51 = vmul.f32 %v13925_v22, %v17268_v6  ;;  %v6809_v5 = vmul.f32 %v13904_v49, %v17269_v2  ;;  %v17281_v28 = vld [vmem:[#allocation72_spill] sm:$0xff] }
 0x9ef   : > { %v6504_v62 = vpop.permute.xlu1 %6503  ;;  %v6506_v37 = vpop.permute.xlu0 %6505 }
 0x9f0   : > { %6581 = vst.msk [vmem:[#allocation2 + $0x98] sm:$0xff] %vm6561_vm7, %v6504_v62  ;;  %6582 = vst.msk [vmem:[#allocation2 + $0xa0] sm:$0xff] %vm6561_vm7, %v6506_v37  ;;  %v17271_v62 = vld [vmem:[#allocation42_spill] sm:$0xff] }
 0x9f1   : > { %6698 = vrot.lane.b32.xlu1 %v6614_v14, %s8848_s10  ;;  %6700 = vrot.lane.b32.xlu0 %v6615_v56, %s8848_s10  ;;  %v6984_v56 = vmul.f32 %v13343_v29, %v17270_v52  ;;  %v6985_v37 = vmul.f32 %v13358_v3, %v17271_v62  ;;  %v17274_v3 = vld [vmem:[#allocation277_spill] sm:$0xff]  ;;  %v17287_v52 = vld [vmem:[#allocation78_spill] sm:$0xff] }
 0x9f3   : > { %v6508_v32 = vpop.permute.xlu1 %6507  ;;  %v6510_v19 = vpop.permute.xlu0 %6509 }
 0x9f4   : > { %6583 = vst.msk [vmem:[#allocation2 + $0xa8] sm:$0xff] %vm6561_vm7, %v6508_v32  ;;  %6584 = vst.msk [vmem:[#allocation2 + $0xb0] sm:$0xff] %vm6561_vm7, %v6510_v19  ;;  %v17273_v32 = vld [vmem:[#allocation82_spill] sm:$0xff] }
 0x9f5   : > { %6702 = vrot.lane.b32.xlu1 %v6616_v12, %s8848_s10  ;;  %6704 = vrot.lane.b32.xlu0 %v6617_v4, %s8848_s10  ;;  %v7000_v4 = vmul.f32 %v17190_v53, %v17272_v20  ;;  %v7001_v19 = vmul.f32 %v17192_v54, %v17273_v32  ;;  %v17276_v54 = vld [vmem:[#allocation278_spill] sm:$0xff]  ;;  %v17290_v20 = vld [vmem:[#allocation135_spill] sm:$0xff] }
 0x9f7   : > { %v6512_v50 = vpop.permute.xlu1 %6511  ;;  %v6514_v30 = vpop.permute.xlu0 %6513 }
 0x9f8   : > { %6585 = vst.msk [vmem:[#allocation2 + $0xb8] sm:$0xff] %vm6561_vm7, %v6512_v50  ;;  %6586 = vst.msk [vmem:[#allocation2 + $0xc0] sm:$0xff] %vm6561_vm7, %v6514_v30  ;;  %v7002_v30 = vmul.f32 %v17194_v7, %v17276_v54  ;;  %v17296_v54 = vld [vmem:[#allocation340_spill] sm:$0xff] }
 0x9f9   : > { %6859 = vrot.lane.b32.xlu1 %v6791_v33, %s8849_s16  ;;  %6861 = vrot.lane.b32.xlu0 %v6792_v38, %s8849_s16  ;;  %v6986_v38 = vmul.f32 %v13366_v8, %v17274_v3  ;;  %v6987_v33 = vmul.f32 %v13384_v48, %v17275_v0  ;;  %v17278_v48 = vld [vmem:[#allocation288_spill] sm:$0xff]  ;;  %v17292_v3 = vld [vmem:[#allocation167_spill] sm:$0xff] }
 0x9fb   : > { %v6516_v43 = vpop.permute.xlu1 %6515  ;;  %v6518_v17 = vpop.permute.xlu0 %6517 }
 0x9fc   : > { %6587 = vst.msk [vmem:[#allocation2 + $0xc8] sm:$0xff] %vm6561_vm7, %v6516_v43  ;;  %6588 = vst.msk [vmem:[#allocation2 + $0xd0] sm:$0xff] %vm6561_vm7, %v6518_v17  ;;  %v17279_v43 = vld [vmem:[#allocation289_spill] sm:$0xff] }
 0x9fd   : > { %6891 = vrot.lane.b32.xlu1 %v6807_v1, %s8849_s16  ;;  %6893 = vrot.lane.b32.xlu0 %v6808_v55, %s8849_s16  ;;  %v7003_v55 = vmul.f32 %v13548_v26, %v17277_v41  ;;  %v7178_v1 = vmul.f32 %v13318_v18, %v17278_v48  ;;  %v7177_v17 = vmul.f32 %v13306_v11, %v17279_v43  ;;  %v17280_v26 = vld [vmem:[#allocation63_spill] sm:$0xff]  ;;  %v17282_v11 = vld [vmem:[#allocation290_spill] sm:$0xff]  ;;  %v17299_v43 = vld [vmem:[#allocation221_spill] sm:$0xff] }
 0x9ff   : > { %v6520_v45 = vpop.permute.xlu1 %6519  ;;  %v6522_v24 = vpop.permute.xlu0 %6521 }
 0xa00   : > { %6589 = vst.msk [vmem:[#allocation2 + $0xd8] sm:$0xff] %vm6561_vm7, %v6520_v45  ;;  %6590 = vst.msk [vmem:[#allocation2 + $0xe0] sm:$0xff] %vm6561_vm7, %v6522_v24  ;;  %v17283_v24 = vld [vmem:[#allocation321_spill] sm:$0xff] }
 0xa01   : > { %6863 = vrot.lane.b32.xlu1 %v6793_v21, %s8849_s16  ;;  %6865 = vrot.lane.b32.xlu0 %v6794_v46, %s8849_s16  ;;  %v7194_v46 = vmul.f32 %v13488_v59, %v17280_v26  ;;  %v7193_v21 = vmul.f32 %v13474_v60, %v17281_v28  ;;  %v7180_v6 = vmul.f32 %v17283_v24, %v17282_v11  ;;  %v17285_v60 = vld [vmem:[#allocation71_spill] sm:$0xff]  ;;  %v17301_v28 = vld [vmem:[#allocation220_spill] sm:$0xff] }
 0xa03   : > { %v6524_v34 = vpop.permute.xlu1 %6523  ;;  %v6526_v14 = vpop.permute.xlu0 %6525 }
 0xa04   : > { %6591 = vst.msk [vmem:[#allocation2 + $0xe8] sm:$0xff] %vm6561_vm7, %v6524_v34  ;;  %6592 = vst.msk [vmem:[#allocation2 + $0xf0] sm:$0xff] %vm6561_vm7, %v6526_v14  ;;  %v17286_v34 = vld [vmem:[#allocation299_spill] sm:$0xff] }
 0xa05   : > { %6895 = vrot.lane.b32.xlu1 %v6809_v5, %s8849_s16  ;;  %6897 = vrot.lane.b32.xlu0 %v6810_v51, %s8849_s16  ;;  %v17284_v51 = vld [vmem:[#allocation291_spill] sm:$0xff]  ;;  %v7196_v14 = vmul.f32 %v17286_v34, %v17285_v60  ;;  %v17307_v60 = vld [vmem:[#allocation326_spill] sm:$0xff] }
 0xa06   : > { %v7179_v2 = vmul.f32 %v13327_v31, %v17284_v51  ;;  %v17289_v31 = vld [vmem:[#allocation10_spill] sm:$0xff]  ;;  %v17304_v51 = vld [vmem:[#allocation223_spill] sm:$0xff] }
 0xa07   : > { %v6528_v44 = vpop.permute.xlu1 %6527  ;;  %v6659_v12 = vpop.permute.xlu0 %6658 }
 0xa08   : > { %6593 = vst.msk [vmem:[#allocation2 + $0xf8] sm:$0xff] %vm6561_vm7, %v6528_v44 }
 0xa09   : > { %6755 = vst.msk [vmem:[#allocation2] sm:$0xff] %vm6754_vm9, %v6659_v12  ;;  %7052 = vrot.lane.b32.xlu1 %v6984_v56, %s8850_s13  ;;  %7054 = vrot.lane.b32.xlu0 %v6985_v37, %s8850_s13  ;;  %v17288_v56 = vld [vmem:[#allocation297_spill] sm:$0xff]  ;;  %v7370_v12 = vmul.f32 %v13776_v42, %v17289_v31 }
 0xa0a   : > { %v7195_v62 = vmul.f32 %v17288_v56, %v17287_v52 }
 0xa0b   : > { %v6661_v29 = vpop.permute.xlu1 %6660  ;;  %v6663_v16 = vpop.permute.xlu0 %6662 }
 0xa0c   : > { %6756 = vst.msk [vmem:[#allocation2 + $0x8] sm:$0xff] %vm6754_vm9, %v6661_v29  ;;  %6757 = vst.msk [vmem:[#allocation2 + $0x10] sm:$0xff] %vm6754_vm9, %v6663_v16  ;;  %v17291_v29 = vld [vmem:[#allocation160_spill] sm:$0xff] }
 0xa0d   : > { %7084 = vrot.lane.b32.xlu1 %v7000_v4, %s8850_s13  ;;  %7086 = vrot.lane.b32.xlu0 %v7001_v19, %s8850_s13  ;;  %v7371_v4 = vmul.f32 %v13797_v36, %v17290_v20  ;;  %v7386_v16 = vmul.f32 %v13904_v49, %v17291_v29  ;;  %v17293_v36 = vld [vmem:[#allocation14_spill] sm:$0xff] }
 0xa0f   : > { %v6665_v53 = vpop.permute.xlu1 %6664  ;;  %v6667_v50 = vpop.permute.xlu0 %6666 }
 0xa10   : > { %6758 = vst.msk [vmem:[#allocation2 + $0x18] sm:$0xff] %vm6754_vm9, %v6665_v53  ;;  %6759 = vst.msk [vmem:[#allocation2 + $0x20] sm:$0xff] %vm6754_vm9, %v6667_v50  ;;  %v17295_v50 = vld [vmem:[#allocation139_spill] sm:$0xff] }
 0xa11   : > { %7056 = vrot.lane.b32.xlu1 %v6986_v38, %s8850_s13  ;;  %7058 = vrot.lane.b32.xlu0 %v6987_v33, %s8850_s13  ;;  %v7387_v38 = vmul.f32 %v13925_v22, %v17292_v3  ;;  %v17294_v33 = vld [vmem:[#allocation338_spill] sm:$0xff]  ;;  %v17297_v22 = vld [vmem:[#allocation164_spill] sm:$0xff] }
 0xa12   : > { %v7372_v53 = vmul.f32 %v17294_v33, %v17293_v36  ;;  %v17315_v36 = vld [vmem:[#allocation267_spill] sm:$0xff] }
 0xa13   : > { %v6669_v8 = vpop.permute.xlu1 %6668  ;;  %v6671_v61 = vpop.permute.xlu0 %6670 }
 0xa14   : > { %6760 = vst.msk [vmem:[#allocation2 + $0x28] sm:$0xff] %vm6754_vm9, %v6669_v8  ;;  %6761 = vst.msk [vmem:[#allocation2 + $0x30] sm:$0xff] %vm6754_vm9, %v6671_v61  ;;  %v17298_v8 = vld [vmem:[#allocation171_spill] sm:$0xff] }
 0xa15   : > { %7088 = vrot.lane.b32.xlu1 %v7002_v30, %s8850_s13  ;;  %7090 = vrot.lane.b32.xlu0 %v7003_v55, %s8850_s13  ;;  %v7373_v30 = vmul.f32 %v17296_v54, %v17295_v50  ;;  %v7388_v55 = vmul.f32 %v13920_v58, %v17297_v22  ;;  %v7389_v61 = vmul.f32 %v13941_v27, %v17298_v8 }
 0xa17   : > { %v6673_v7 = vpop.permute.xlu1 %6672  ;;  %v6675_v63 = vpop.permute.xlu0 %6674 }
 0xa18   : > { %6762 = vst.msk [vmem:[#allocation2 + $0x38] sm:$0xff] %vm6754_vm9, %v6673_v7  ;;  %6763 = vst.msk [vmem:[#allocation2 + $0x40] sm:$0xff] %vm6754_vm9, %v6675_v63  ;;  %v17300_v7 = vld [vmem:[#allocation234_spill] sm:$0xff] }
 0xa19   : > { %7245 = vrot.lane.b32.xlu1 %v7177_v17, %s8851_s21  ;;  %7247 = vrot.lane.b32.xlu0 %v7178_v1, %s8851_s21  ;;  %v6603_v17 = vmul.f32 %v17283_v24, %v17299_v43  ;;  %v6618_v63 = vmul.f32 %v17288_v56, %v17300_v7 }
 0xa1b   : > { %v6691_v18 = vpop.permute.xlu1 %6690  ;;  %v6693_v45 = vpop.permute.xlu0 %6692 }
 0xa1c   : > { %6771 = vst.msk [vmem:[#allocation2 + $0x80] sm:$0xff] %vm6754_vm9, %v6691_v18  ;;  %6772 = vst.msk [vmem:[#allocation2 + $0x88] sm:$0xff] %vm6754_vm9, %v6693_v45  ;;  %v17303_v45 = vld [vmem:[#allocation237_spill] sm:$0xff] }
 0xa1d   : > { %7277 = vrot.lane.b32.xlu1 %v7193_v21, %s8851_s21  ;;  %7279 = vrot.lane.b32.xlu0 %v7194_v46, %s8851_s21  ;;  %v17302_v21 = vld [vmem:[#allocation307_spill] sm:$0xff]  ;;  %v6619_v11 = vmul.f32 %v17286_v34, %v17303_v45  ;;  %v17324_v45 = vld [vmem:[#allocation282_spill] sm:$0xff] }
 0xa1e   : > { %v6604_v18 = vmul.f32 %v17302_v21, %v17301_v28  ;;  %v17308_v34 = vld [vmem:[#allocation239_spill] sm:$0xff] }
 0xa1f   : > { %v6695_v59 = vpop.permute.xlu1 %6694  ;;  %v6697_v5 = vpop.permute.xlu0 %6696 }
 0xa20   : > { %6773 = vst.msk [vmem:[#allocation2 + $0x90] sm:$0xff] %vm6754_vm9, %v6695_v59  ;;  %6774 = vst.msk [vmem:[#allocation2 + $0x98] sm:$0xff] %vm6754_vm9, %v6697_v5  ;;  %v17306_v5 = vld [vmem:[#allocation236_spill] sm:$0xff] }
 0xa21   : > { %7249 = vrot.lane.b32.xlu1 %v7179_v2, %s8851_s21  ;;  %7251 = vrot.lane.b32.xlu0 %v7180_v6, %s8851_s21  ;;  %v17305_v2 = vld [vmem:[#allocation306_spill] sm:$0xff] }
 0xa22   : > { %v6605_v59 = vmul.f32 %v17305_v2, %v17304_v51 }
 0xa23   : > { %v6852_v37 = vpop.permute.xlu1 %6851  ;;  %v6854_v44 = vpop.permute.xlu0 %6853 }
 0xa24   : > { %6948 = vst.msk [vmem:[#allocation2] sm:$0xff] %vm6947_vm10, %v6852_v37  ;;  %6949 = vst.msk [vmem:[#allocation2 + $0x8] sm:$0xff] %vm6947_vm10, %v6854_v44  ;;  %v17310_v44 = vld [vmem:[#allocation252_spill] sm:$0xff] }
 0xa25   : > { %7281 = vrot.lane.b32.xlu1 %v7195_v62, %s8851_s21  ;;  %7283 = vrot.lane.b32.xlu0 %v7196_v14, %s8851_s21  ;;  %v6620_v14 = vmul.f32 %v17307_v60, %v17306_v5  ;;  %v17309_v62 = vld [vmem:[#allocation328_spill] sm:$0xff]  ;;  %v6795_v31 = vmul.f32 %v17294_v33, %v17310_v44  ;;  %v6812_v33 = vmul.f32 %v13941_v27, %v17315_v36  ;;  %v17319_v27 = vld [vmem:[#allocation269_spill] sm:$0xff] }
 0xa26   : > { %v6621_v37 = vmul.f32 %v17309_v62, %v17308_v34  ;;  %v6814_v8 = vmul.f32 %v13955_v35, %v17319_v27  ;;  %v17332_v36 = vld [vmem:[#allocation292_spill] sm:$0xff] }
 0xa27   : > { %v6884_v32 = vpop.permute.xlu1 %6883  ;;  %v6886_v19 = vpop.permute.xlu0 %6885  ;;  %v17336_v27 = vld [vmem:[#allocation76_spill] sm:$0xff] }
 0xa28   : > { %6964 = vst.msk [vmem:[#allocation2 + $0x80] sm:$0xff] %vm6947_vm10, %v6884_v32  ;;  %6965 = vst.msk [vmem:[#allocation2 + $0x88] sm:$0xff] %vm6947_vm10, %v6886_v19  ;;  %v17312_v19 = vld [vmem:[#allocation268_spill] sm:$0xff] }
 0xa29   : > { %7438 = vrot.lane.b32.xlu1 %v7370_v12, %s8852_s20  ;;  %7440 = vrot.lane.b32.xlu0 %v7371_v4, %s8852_s20  ;;  %v17311_v4 = vld [vmem:[#allocation251_spill] sm:$0xff]  ;;  %v6811_v29 = vmul.f32 %v13920_v58, %v17312_v19  ;;  %v17316_v58 = vld [vmem:[#allocation253_spill] sm:$0xff] }
 0xa2a   : > { %v6796_v32 = vmul.f32 %v17296_v54, %v17311_v4  ;;  %v17317_v54 = vld [vmem:[#allocation342_spill] sm:$0xff] }
 0xa2b   : > { %v6856_v42 = vpop.permute.xlu1 %6855  ;;  %v6858_v0 = vpop.permute.xlu0 %6857 }
 0xa2c   : > { %6950 = vst.msk [vmem:[#allocation2 + $0x10] sm:$0xff] %vm6947_vm10, %v6856_v42  ;;  %6951 = vst.msk [vmem:[#allocation2 + $0x18] sm:$0xff] %vm6947_vm10, %v6858_v0  ;;  %v17314_v42 = vld [vmem:[#allocation339_spill] sm:$0xff] }
 0xa2d   : > { %7470 = vrot.lane.b32.xlu1 %v7386_v16, %s8852_s20  ;;  %7472 = vrot.lane.b32.xlu0 %v7387_v38, %s8852_s20  ;;  %v17313_v38 = vld [vmem:[#allocation254_spill] sm:$0xff] }
 0xa2e   : > { %v6797_v0 = vmul.f32 %v17314_v42, %v17313_v38 }
 0xa2f   : > { %v6888_v49 = vpop.permute.xlu1 %6887  ;;  %v6890_v41 = vpop.permute.xlu0 %6889 }
 0xa30   : > { %6966 = vst.msk [vmem:[#allocation2 + $0x90] sm:$0xff] %vm6947_vm10, %v6888_v49  ;;  %6967 = vst.msk [vmem:[#allocation2 + $0x98] sm:$0xff] %vm6947_vm10, %v6890_v41  ;;  %v17318_v49 = vld [vmem:[#allocation270_spill] sm:$0xff] }
 0xa31   : > { %7442 = vrot.lane.b32.xlu1 %v7372_v53, %s8852_s20  ;;  %7444 = vrot.lane.b32.xlu0 %v7373_v30, %s8852_s20  ;;  %v6798_v30 = vmul.f32 %v17317_v54, %v17316_v58  ;;  %v6813_v41 = vmul.f32 %v13936_v47, %v17318_v49 }
 0xa33   : > { %v7045_v48 = vpop.permute.xlu1 %7044  ;;  %v7047_v1 = vpop.permute.xlu0 %7046 }
 0xa34   : > { %7141 = vst.msk [vmem:[#allocation2] sm:$0xff] %vm7140_vm11, %v7045_v48  ;;  %7142 = vst.msk [vmem:[#allocation2 + $0x8] sm:$0xff] %vm7140_vm11, %v7047_v1 }
 0xa35   : > { %7474 = vrot.lane.b32.xlu1 %v7388_v55, %s8852_s20  ;;  %7476 = vrot.lane.b32.xlu0 %v7389_v61, %s8852_s20  ;;  %v17320_v61 = vld [vmem:[#allocation37_spill] sm:$0xff] }
 0xa36   : > { %v6988_v48 = vmul.f32 %v13387_v39, %v17320_v61  ;;  %v17323_v39 = vld [vmem:[#allocation41_spill] sm:$0xff] }
 0xa37   : > { %v7077_v26 = vpop.permute.xlu1 %7076  ;;  %v7079_v46 = vpop.permute.xlu0 %7078 }
 0xa38   : > { %7157 = vst.msk [vmem:[#allocation2 + $0x80] sm:$0xff] %vm7140_vm11, %v7077_v26  ;;  %7158 = vst.msk [vmem:[#allocation2 + $0x88] sm:$0xff] %vm7140_vm11, %v7079_v46 }
 0xa39   : > { %6676 = vrot.lane.b32.xlu1 %v6603_v17, %s8848_s10  ;;  %6706 = vrot.lane.b32.xlu0 %v6618_v63, %s8848_s10  ;;  %v17321_v17 = vld [vmem:[#allocation51_spill] sm:$0xff] }
 0xa3a   : > { %v6989_v7 = vmul.f32 %v13400_v40, %v17321_v17  ;;  %v17322_v63 = vld [vmem:[#allocation279_spill] sm:$0xff]  ;;  %v17339_v17 = vld [vmem:[#allocation90_spill] sm:$0xff] }
 0xa3b   : > { %v7049_v24 = vpop.permute.xlu1 %7048  ;;  %v7051_v6 = vpop.permute.xlu0 %7050  ;;  %v7004_v26 = vmul.f32 %v13552_v15, %v17322_v63 }
 0xa3c   : > { %7143 = vst.msk [vmem:[#allocation2 + $0x10] sm:$0xff] %vm7140_vm11, %v7049_v24  ;;  %7144 = vst.msk [vmem:[#allocation2 + $0x18] sm:$0xff] %vm7140_vm11, %v7051_v6 }
 0xa3d   : > { %6708 = vrot.lane.b32.xlu1 %v6619_v11, %s8848_s10  ;;  %6678 = vrot.lane.b32.xlu0 %v6604_v18, %s8848_s10  ;;  %v6990_v18 = vmul.f32 %v13406_v10, %v17323_v39  ;;  %v7005_v11 = vmul.f32 %v13564_v25, %v17324_v45  ;;  %v17325_v10 = vld [vmem:[#allocation57_spill] sm:$0xff] }
 0xa3e   : > { %v17327_v25 = vld [vmem:[#allocation281_spill] sm:$0xff] }
 0xa3f   : > { %v7081_v52 = vpop.permute.xlu1 %7080  ;;  %v7083_v56 = vpop.permute.xlu0 %7082 }
 0xa40   : > { %7159 = vst.msk [vmem:[#allocation2 + $0x90] sm:$0xff] %vm7140_vm11, %v7081_v52  ;;  %7160 = vst.msk [vmem:[#allocation2 + $0x98] sm:$0xff] %vm7140_vm11, %v7083_v56 }
 0xa41   : > { %6680 = vrot.lane.b32.xlu1 %v6605_v59, %s8848_s10  ;;  %6710 = vrot.lane.b32.xlu0 %v6620_v14, %s8848_s10  ;;  %v17326_v59 = vld [vmem:[#allocation318_spill] sm:$0xff] }
 0xa42   : > { %v6991_v5 = vmul.f32 %v17326_v59, %v17325_v10  ;;  %v17328_v14 = vld [vmem:[#allocation330_spill] sm:$0xff] }
 0xa43   : > { %v7238_v12 = vpop.permute.xlu1 %7237  ;;  %v7240_v20 = vpop.permute.xlu0 %7239  ;;  %v7006_v52 = vmul.f32 %v17328_v14, %v17327_v25  ;;  %v17348_v14 = vld [vmem:[#allocation175_spill] sm:$0xff] }
 0xa44   : > { %7334 = vst.msk [vmem:[#allocation2] sm:$0xff] %vm7333_vm12, %v7238_v12  ;;  %7335 = vst.msk [vmem:[#allocation2 + $0x8] sm:$0xff] %vm7333_vm12, %v7240_v20  ;;  %v17329_v12 = vld [vmem:[#allocation97_spill] sm:$0xff]  ;;  %v17330_v20 = vld [vmem:[#allocation331_spill] sm:$0xff] }
 0xa45   : > { %6712 = vrot.lane.b32.xlu1 %v6621_v37, %s8848_s10  ;;  %6867 = vrot.lane.b32.xlu0 %v6795_v31, %s8849_s16  ;;  %v7007_v4 = vmul.f32 %v17330_v20, %v17329_v12 }
 0xa47   : > { %v7270_v16 = vpop.permute.xlu1 %7269  ;;  %v7272_v3 = vpop.permute.xlu0 %7271 }
 0xa48   : > { %7350 = vst.msk [vmem:[#allocation2 + $0x80] sm:$0xff] %vm7333_vm12, %v7270_v16  ;;  %7351 = vst.msk [vmem:[#allocation2 + $0x88] sm:$0xff] %vm7333_vm12, %v7272_v3 }
 0xa49   : > { %6869 = vrot.lane.b32.xlu1 %v6796_v32, %s8849_s16  ;;  %6899 = vrot.lane.b32.xlu0 %v6811_v29, %s8849_s16  ;;  %v17331_v32 = vld [vmem:[#allocation293_spill] sm:$0xff] }
 0xa4a   : > { %v7181_v19 = vmul.f32 %v17302_v21, %v17331_v32 }
 0xa4b   : > { %v7242_v53 = vpop.permute.xlu1 %7241  ;;  %v7244_v50 = vpop.permute.xlu0 %7243 }
 0xa4c   : > { %7336 = vst.msk [vmem:[#allocation2 + $0x10] sm:$0xff] %vm7333_vm12, %v7242_v53  ;;  %7337 = vst.msk [vmem:[#allocation2 + $0x18] sm:$0xff] %vm7333_vm12, %v7244_v50  ;;  %v17333_v53 = vld [vmem:[#allocation84_spill] sm:$0xff] }
 0xa4d   : > { %6901 = vrot.lane.b32.xlu1 %v6812_v33, %s8849_s16  ;;  %6871 = vrot.lane.b32.xlu0 %v6797_v0, %s8849_s16  ;;  %v7182_v33 = vmul.f32 %v17305_v2, %v17332_v36  ;;  %v7197_v21 = vmul.f32 %v17307_v60, %v17333_v53  ;;  %v17335_v2 = vld [vmem:[#allocation309_spill] sm:$0xff]  ;;  %v7198_v60 = vmul.f32 %v17309_v62, %v17336_v27  ;;  %v17361_v27 = vld [vmem:[#allocation227_spill] sm:$0xff] }
 0xa4e   : > { %v17341_v62 = vld [vmem:[#allocation81_spill] sm:$0xff] }
 0xa4f   : > { %v7274_v22 = vpop.permute.xlu1 %7273  ;;  %v7276_v55 = vpop.permute.xlu0 %7275 }
 0xa50   : > { %7352 = vst.msk [vmem:[#allocation2 + $0x90] sm:$0xff] %vm7333_vm12, %v7274_v22  ;;  %7353 = vst.msk [vmem:[#allocation2 + $0x98] sm:$0xff] %vm7333_vm12, %v7276_v55  ;;  %v17334_v22 = vld [vmem:[#allocation295_spill] sm:$0xff] }
 0xa51   : > { %6873 = vrot.lane.b32.xlu1 %v6798_v30, %s8849_s16  ;;  %6903 = vrot.lane.b32.xlu0 %v6813_v41, %s8849_s16  ;;  %v7183_v55 = vmul.f32 %v17335_v2, %v17334_v22 }
 0xa53   : > { %v7431_v1 = vpop.permute.xlu1 %7430  ;;  %v7433_v43 = vpop.permute.xlu0 %7432 }
 0xa54   : > { %7527 = vst.msk [vmem:[#allocation2] sm:$0xff] %vm7526_vm13, %v7431_v1  ;;  %7528 = vst.msk [vmem:[#allocation2 + $0x8] sm:$0xff] %vm7526_vm13, %v7433_v43  ;;  %v17338_v1 = vld [vmem:[#allocation308_spill] sm:$0xff] }
 0xa55   : > { %6905 = vrot.lane.b32.xlu1 %v6814_v8, %s8849_s16  ;;  %7060 = vrot.lane.b32.xlu0 %v6988_v48, %s8850_s13  ;;  %v17337_v48 = vld [vmem:[#allocation294_spill] sm:$0xff] }
 0xa56   : > { %v7184_v43 = vmul.f32 %v17338_v1, %v17337_v48  ;;  %v17364_v48 = vld [vmem:[#allocation311_spill] sm:$0xff] }
 0xa57   : > { %v7463_v46 = vpop.permute.xlu1 %7462  ;;  %v7465_v28 = vpop.permute.xlu0 %7464 }
 0xa58   : > { %7543 = vst.msk [vmem:[#allocation2 + $0x80] sm:$0xff] %vm7526_vm13, %v7463_v46  ;;  %7544 = vst.msk [vmem:[#allocation2 + $0x88] sm:$0xff] %vm7526_vm13, %v7465_v28  ;;  %v17342_v28 = vld [vmem:[#allocation305_spill] sm:$0xff] }
 0xa59   : > { %7062 = vrot.lane.b32.xlu1 %v6989_v7, %s8850_s13  ;;  %7092 = vrot.lane.b32.xlu0 %v7004_v26, %s8850_s13  ;;  %v17340_v7 = vld [vmem:[#allocation329_spill] sm:$0xff]  ;;  %v7200_v39 = vmul.f32 %v17342_v28, %v17341_v62 }
 0xa5a   : > { %v7199_v63 = vmul.f32 %v17340_v7, %v17339_v17 }
 0xa5b   : > { %v7435_v40 = vpop.permute.xlu1 %7434  ;;  %v7437_v24 = vpop.permute.xlu0 %7436  ;;  %v7559_v6 = vld [vmem:[#allocation2] sm:$0xff]  ;;  %v7560_v15 = vld [vmem:[#allocation2 + $0x8] sm:$0xff] }
 0xa5c   : > { %7529 = vst.msk [vmem:[#allocation2 + $0x10] sm:$0xff] %vm7526_vm13, %v7435_v40  ;;  %7530 = vst.msk [vmem:[#allocation2 + $0x18] sm:$0xff] %vm7526_vm13, %v7437_v24  ;;  %v7591_v51 = vpack.c.bf16 %v7560_v15, %v7559_v6  ;;  %v17344_v24 = vld [vmem:[#allocation143_spill] sm:$0xff]  ;;  %v17345_v15 = vld [vmem:[#allocation168_spill] sm:$0xff] }
 0xa5d   : > { %7094 = vrot.lane.b32.xlu1 %v7005_v11, %s8850_s13  ;;  %7064 = vrot.lane.b32.xlu0 %v6990_v18, %s8850_s13  ;;  %v17343_v18 = vld [vmem:[#allocation136_spill] sm:$0xff]  ;;  %v7375_v6 = vmul.f32 %v17317_v54, %v17344_v24 }
 0xa5e   : > { %8479 = vmatprep.mubr.msk.bf16.mxu0 %vm7669_vm14, %v7591_v51  ;;  %v7374_v45 = vmul.f32 %v17314_v42, %v17343_v18  ;;  %v7390_v51 = vmul.f32 %v13936_v47, %v17345_v15  ;;  %v17346_v42 = vld [vmem:[#allocation140_spill] sm:$0xff]  ;;  %v17349_v47 = vld [vmem:[#allocation147_spill] sm:$0xff]  ;;  %v17370_v15 = vld [vmem:[#allocation258_spill] sm:$0xff] }
 0xa5f   : > { %v7467_v56 = vpop.permute.xlu1 %7466  ;;  %v7469_v34 = vpop.permute.xlu0 %7468  ;;  %v7575_v37 = vld [vmem:[#allocation2 + $0x80] sm:$0xff]  ;;  %v7576_v44 = vld [vmem:[#allocation2 + $0x88] sm:$0xff] }
 0xa60   : > { %7545 = vst.msk [vmem:[#allocation2 + $0x90] sm:$0xff] %vm7526_vm13, %v7467_v56  ;;  %7546 = vst.msk [vmem:[#allocation2 + $0x98] sm:$0xff] %vm7526_vm13, %v7469_v34  ;;  %v7599_v31 = vpack.c.bf16 %v7576_v44, %v7575_v37  ;;  %v17350_v34 = vld [vmem:[#allocation347_spill] sm:$0xff]  ;;  %v17351_v44 = vld [vmem:[#allocation172_spill] sm:$0xff] }
 0xa61   : > { %7066 = vrot.lane.b32.xlu1 %v6991_v5, %s8850_s13  ;;  %7096 = vrot.lane.b32.xlu0 %v7006_v52, %s8850_s13  ;;  %v17347_v5 = vld [vmem:[#allocation341_spill] sm:$0xff]  ;;  %v7391_v52 = vmul.f32 %v13955_v35, %v17348_v14  ;;  %v7377_v37 = vmul.f32 %v17350_v34, %v17349_v47  ;;  %v17353_v35 = vld [vmem:[#allocation222_spill] sm:$0xff]  ;;  %v17368_v18 = vld [vmem:[#allocation255_spill] sm:$0xff] }
 0xa62   : > { %8495 = vmatprep.mubr.msk.bf16.mxu1 %vm7669_vm14, %v7599_v31  ;;  %v7376_v25 = vmul.f32 %v17347_v5, %v17346_v42  ;;  %v17352_v31 = vld [vmem:[#allocation322_spill] sm:$0xff]  ;;  %v6606_v32 = vmul.f32 %v17335_v2, %v17353_v35  ;;  %v17373_v14 = vld [vmem:[#allocation257_spill] sm:$0xff]  ;;  %v17376_v47 = vld [vmem:[#allocation332_spill] sm:$0xff] }
 0xa63   : > { %v6699_v29 = vpop.permute.xlu1 %6698  ;;  %v6701_v16 = vpop.permute.xlu0 %6700  ;;  %v7561_v3 = vld [vmem:[#allocation2 + $0x10] sm:$0xff]  ;;  %v7562_v38 = vld [vmem:[#allocation2 + $0x18] sm:$0xff]  ;;  %v7392_v12 = vmul.f32 %v17352_v31, %v17351_v44  ;;  %v17380_v35 = vld [vmem:[#allocation319_spill] sm:$0xff] }
 0xa64   : > { %6775 = vst.msk [vmem:[#allocation2 + $0xa0] sm:$0xff] %vm6754_vm9, %v6699_v29  ;;  %6776 = vst.msk [vmem:[#allocation2 + $0xa8] sm:$0xff] %vm6754_vm9, %v6701_v16  ;;  %v7592_v0 = vpack.c.bf16 %v7562_v38, %v7561_v3  ;;  %v17355_v29 = vld [vmem:[#allocation28_spill] sm:$0xff] }
 0xa65   : > { %7098 = vrot.lane.b32.xlu1 %v7007_v4, %s8850_s13  ;;  %7253 = vrot.lane.b32.xlu0 %v7181_v19, %s8851_s21  ;;  %v17354_v19 = vld [vmem:[#allocation298_spill] sm:$0xff] }
 0xa66   : > { %8480 = vmatmul.mubr.msk.bf16.vlgmr.msra.gmra.mxu0 %vm7669_vm14, %v7592_v0  ;;  %v7393_v16 = vmul.f32 %v17355_v29, %v17354_v19  ;;  %v17356_v0 = vld [vmem:[#allocation225_spill] sm:$0xff] }
 0xa67   : > { %v6703_v50 = vpop.permute.xlu1 %6702  ;;  %v6705_v58 = vpop.permute.xlu0 %6704  ;;  %v7577_v30 = vld [vmem:[#allocation2 + $0x90] sm:$0xff]  ;;  %v7578_v49 = vld [vmem:[#allocation2 + $0x98] sm:$0xff]  ;;  %v6607_v36 = vmul.f32 %v17338_v1, %v17356_v0 }
 0xa68   : > { %6777 = vst.msk [vmem:[#allocation2 + $0xb0] sm:$0xff] %vm6754_vm9, %v6703_v50  ;;  %6778 = vst.msk [vmem:[#allocation2 + $0xb8] sm:$0xff] %vm6754_vm9, %v6705_v58  ;;  %v7600_v41 = vpack.c.bf16 %v7578_v49, %v7577_v30  ;;  %v17358_v58 = vld [vmem:[#allocation224_spill] sm:$0xff]  ;;  %v17359_v30 = vld [vmem:[#allocation310_spill] sm:$0xff] }
 0xa69   : > { %7255 = vrot.lane.b32.xlu1 %v7182_v33, %s8851_s21  ;;  %7285 = vrot.lane.b32.xlu0 %v7197_v21, %s8851_s21  ;;  %v17357_v33 = vld [vmem:[#allocation238_spill] sm:$0xff]  ;;  %v6608_v49 = vmul.f32 %v17359_v30, %v17358_v58  ;;  %v17381_v0 = vld [vmem:[#allocation65_spill] sm:$0xff] }
 0xa6a   : > { %8496 = vmatmul.mubr.msk.bf16.vlgmr.msra.gmra.mxu1 %vm7669_vm14, %v7600_v41  ;;  %v6622_v53 = vmul.f32 %v17340_v7, %v17357_v33  ;;  %v17360_v41 = vld [vmem:[#allocation241_spill] sm:$0xff]  ;;  %v17365_v7 = vld [vmem:[#allocation242_spill] sm:$0xff] }
 0xa6b   : > { %v6860_v8 = vpop.permute.xlu1 %6859  ;;  %v6862_v61 = vpop.permute.xlu0 %6861  ;;  %v6623_v22 = vmul.f32 %v17342_v28, %v17360_v41 }
 0xa6c   : > { %6952 = vst.msk [vmem:[#allocation2 + $0x20] sm:$0xff] %vm6947_vm10, %v6860_v8  ;;  %6953 = vst.msk [vmem:[#allocation2 + $0x28] sm:$0xff] %vm6947_vm10, %v6862_v61  ;;  %v17363_v61 = vld [vmem:[#allocation240_spill] sm:$0xff] }
 0xa6d   : > { %7287 = vrot.lane.b32.xlu1 %v7198_v60, %s8851_s21  ;;  %7257 = vrot.lane.b32.xlu0 %v7183_v55, %s8851_s21  ;;  %v17362_v60 = vld [vmem:[#allocation312_spill] sm:$0xff]  ;;  %v6624_v1 = vmul.f32 %v17364_v48, %v17363_v61 }
 0xa6e   : > { %v6609_v8 = vmul.f32 %v17362_v60, %v17361_v27 }
 0xa6f   : > { %v6892_v26 = vpop.permute.xlu1 %6891  ;;  %v6894_v46 = vpop.permute.xlu0 %6893 }
 0xa70   : > { %6968 = vst.msk [vmem:[#allocation2 + $0xa0] sm:$0xff] %vm6947_vm10, %v6892_v26  ;;  %6969 = vst.msk [vmem:[#allocation2 + $0xa8] sm:$0xff] %vm6947_vm10, %v6894_v46  ;;  %v17367_v46 = vld [vmem:[#allocation256_spill] sm:$0xff] }
 0xa71   : > { %7259 = vrot.lane.b32.xlu1 %v7184_v43, %s8851_s21  ;;  %7289 = vrot.lane.b32.xlu0 %v7199_v63, %s8851_s21  ;;  %v17366_v63 = vld [vmem:[#allocation313_spill] sm:$0xff]  ;;  %v6799_v62 = vmul.f32 %v17347_v5, %v17367_v46 }
 0xa72   : > { %v6625_v26 = vmul.f32 %v17366_v63, %v17365_v7  ;;  %v17388_v46 = vld [vmem:[#allocation69_spill] sm:$0xff] }
 0xa73   : > { %v6864_v11 = vpop.permute.xlu1 %6863  ;;  %v6866_v40 = vpop.permute.xlu0 %6865 }
 0xa74   : > { %6954 = vst.msk [vmem:[#allocation2 + $0x30] sm:$0xff] %vm6947_vm10, %v6864_v11  ;;  %6955 = vst.msk [vmem:[#allocation2 + $0x38] sm:$0xff] %vm6947_vm10, %v6866_v40  ;;  %v17369_v11 = vld [vmem:[#allocation272_spill] sm:$0xff] }
 0xa75   : > { %7291 = vrot.lane.b32.xlu1 %v7200_v39, %s8851_s21  ;;  %7446 = vrot.lane.b32.xlu0 %v7374_v45, %s8852_s20  ;;  %v6800_v45 = vmul.f32 %v17350_v34, %v17368_v18  ;;  %v6815_v40 = vmul.f32 %v17352_v31, %v17369_v11  ;;  %v17377_v31 = vld [vmem:[#allocation273_spill] sm:$0xff]  ;;  %v17391_v18 = vld [vmem:[#allocation304_spill] sm:$0xff] }
 0xa77   : > { %v6896_v10 = vpop.permute.xlu1 %6895  ;;  %v6898_v59 = vpop.permute.xlu0 %6897 }
 0xa78   : > { %6970 = vst.msk [vmem:[#allocation2 + $0xb0] sm:$0xff] %vm6947_vm10, %v6896_v10  ;;  %6971 = vst.msk [vmem:[#allocation2 + $0xb8] sm:$0xff] %vm6947_vm10, %v6898_v59  ;;  %v17372_v59 = vld [vmem:[#allocation271_spill] sm:$0xff] }
 0xa79   : > { %7448 = vrot.lane.b32.xlu1 %v7375_v6, %s8852_s20  ;;  %7478 = vrot.lane.b32.xlu0 %v7390_v51, %s8852_s20  ;;  %v17371_v51 = vld [vmem:[#allocation344_spill] sm:$0xff]  ;;  %v6816_v42 = vmul.f32 %v17355_v29, %v17372_v59  ;;  %v17393_v59 = vld [vmem:[#allocation345_spill] sm:$0xff] }
 0xa7a   : > { %v6801_v10 = vmul.f32 %v17371_v51, %v17370_v15 }
 0xa7b   : > { %v7053_v54 = vpop.permute.xlu1 %7052  ;;  %v7055_v56 = vpop.permute.xlu0 %7054 }
 0xa7c   : > { %7145 = vst.msk [vmem:[#allocation2 + $0x20] sm:$0xff] %vm7140_vm11, %v7053_v54  ;;  %7146 = vst.msk [vmem:[#allocation2 + $0x28] sm:$0xff] %vm7140_vm11, %v7055_v56  ;;  %v17375_v56 = vld [vmem:[#allocation274_spill] sm:$0xff] }
 0xa7d   : > { %7480 = vrot.lane.b32.xlu1 %v7391_v52, %s8852_s20  ;;  %7450 = vrot.lane.b32.xlu0 %v7376_v25, %s8852_s20  ;;  %v17374_v52 = vld [vmem:[#allocation348_spill] sm:$0xff]  ;;  %v6817_v34 = vmul.f32 %v17376_v47, %v17375_v56 }
 0xa7e   : > { %v6802_v54 = vmul.f32 %v17374_v52, %v17373_v14  ;;  %v17395_v56 = vld [vmem:[#allocation296_spill] sm:$0xff] }
 0xa7f   : > { %v7085_v20 = vpop.permute.xlu1 %7084  ;;  %v7087_v4 = vpop.permute.xlu0 %7086 }
 0xa80   : > { %7161 = vst.msk [vmem:[#allocation2 + $0xa0] sm:$0xff] %vm7140_vm11, %v7085_v20  ;;  %7162 = vst.msk [vmem:[#allocation2 + $0xa8] sm:$0xff] %vm7140_vm11, %v7087_v4  ;;  %v17379_v4 = vld [vmem:[#allocation46_spill] sm:$0xff] }
 0xa81   : > { %7452 = vrot.lane.b32.xlu1 %v7377_v37, %s8852_s20  ;;  %7482 = vrot.lane.b32.xlu0 %v7392_v12, %s8852_s20  ;;  %v17378_v12 = vld [vmem:[#allocation333_spill] sm:$0xff] }
 0xa82   : > { %v6818_v20 = vmul.f32 %v17378_v12, %v17377_v31 }
 0xa83   : > { %v7057_v3 = vpop.permute.xlu1 %7056  ;;  %v7059_v38 = vpop.permute.xlu0 %7058 }
 0xa84   : > { %7147 = vst.msk [vmem:[#allocation2 + $0x30] sm:$0xff] %vm7140_vm11, %v7057_v3  ;;  %7148 = vst.msk [vmem:[#allocation2 + $0x38] sm:$0xff] %vm7140_vm11, %v7059_v38 }
 0xa85   : > { %7484 = vrot.lane.b32.xlu1 %v7393_v16, %s8852_s20  ;;  %6682 = vrot.lane.b32.xlu0 %v6606_v32, %s8848_s10  ;;  %v6992_v32 = vmul.f32 %v17380_v35, %v17379_v4  ;;  %v17398_v4 = vld [vmem:[#allocation315_spill] sm:$0xff] }
 0xa87   : > { %v7089_v21 = vpop.permute.xlu1 %7088  ;;  %v7091_v50 = vpop.permute.xlu0 %7090 }
 0xa88   : > { %7163 = vst.msk [vmem:[#allocation2 + $0xb0] sm:$0xff] %vm7140_vm11, %v7089_v21  ;;  %7164 = vst.msk [vmem:[#allocation2 + $0xb8] sm:$0xff] %vm7140_vm11, %v7091_v50 }
 0xa89   : > { %6684 = vrot.lane.b32.xlu1 %v6607_v36, %s8848_s10  ;;  %6714 = vrot.lane.b32.xlu0 %v6622_v53, %s8848_s10  ;;  %v17382_v36 = vld [vmem:[#allocation301_spill] sm:$0xff]  ;;  %v17383_v53 = vld [vmem:[#allocation283_spill] sm:$0xff] }
 0xa8a   : > { %v6993_v33 = vmul.f32 %v17382_v36, %v17381_v0  ;;  %v7008_v21 = vmul.f32 %v17202_v13, %v17383_v53  ;;  %v17387_v13 = vld [vmem:[#allocation343_spill] sm:$0xff]  ;;  %v17403_v0 = vld [vmem:[#allocation316_spill] sm:$0xff] }
 0xa8b   : > { %v7246_v2 = vpop.permute.xlu1 %7245  ;;  %v7248_v55 = vpop.permute.xlu0 %7247 }
 0xa8c   : > { %7338 = vst.msk [vmem:[#allocation2 + $0x20] sm:$0xff] %vm7333_vm12, %v7246_v2  ;;  %7339 = vst.msk [vmem:[#allocation2 + $0x28] sm:$0xff] %vm7333_vm12, %v7248_v55  ;;  %v17384_v2 = vld [vmem:[#allocation52_spill] sm:$0xff]  ;;  %v17385_v55 = vld [vmem:[#allocation17_spill] sm:$0xff] }
 0xa8d   : > { %6716 = vrot.lane.b32.xlu1 %v6623_v22, %s8848_s10  ;;  %6686 = vrot.lane.b32.xlu0 %v6608_v49, %s8848_s10  ;;  %v6994_v27 = vmul.f32 %v17385_v55, %v17384_v2  ;;  %v17407_v2 = vld [vmem:[#allocation151_spill] sm:$0xff] }
 0xa8e   : > { %v7379_v55 = vmul.f32 %v17374_v52, %v17407_v2 }
 0xa8f   : > { %v7278_v43 = vpop.permute.xlu1 %7277  ;;  %v7280_v17 = vpop.permute.xlu0 %7279 }
 0xa90   : > { %7354 = vst.msk [vmem:[#allocation2 + $0xa0] sm:$0xff] %vm7333_vm12, %v7278_v43  ;;  %7355 = vst.msk [vmem:[#allocation2 + $0xa8] sm:$0xff] %vm7333_vm12, %v7280_v17 }
 0xa91   : > { %6688 = vrot.lane.b32.xlu1 %v6609_v8, %s8848_s10  ;;  %6718 = vrot.lane.b32.xlu0 %v6624_v1, %s8848_s10  ;;  %v17386_v8 = vld [vmem:[#allocation285_spill] sm:$0xff] }
 0xa92   : > { %v7009_v61 = vmul.f32 %v17387_v13, %v17386_v8 }
 0xa93   : > { %v7250_v28 = vpop.permute.xlu1 %7249  ;;  %v7252_v39 = vpop.permute.xlu0 %7251 }
 0xa94   : > { %7340 = vst.msk [vmem:[#allocation2 + $0x30] sm:$0xff] %vm7333_vm12, %v7250_v28  ;;  %7341 = vst.msk [vmem:[#allocation2 + $0x38] sm:$0xff] %vm7333_vm12, %v7252_v39  ;;  %v17390_v39 = vld [vmem:[#allocation284_spill] sm:$0xff] }
 0xa95   : > { %6720 = vrot.lane.b32.xlu1 %v6625_v26, %s8848_s10  ;;  %6875 = vrot.lane.b32.xlu0 %v6799_v62, %s8849_s16  ;;  %v17389_v62 = vld [vmem:[#allocation303_spill] sm:$0xff]  ;;  %s353_s10 = sand.u32 1, %s8792_s25  }
 0xa96   : > { %v6995_v28 = vmul.f32 %v17389_v62, %v17388_v46  ;;  %v17412_v46 = vld [vmem:[#allocation6_spill] sm:$0xff]  ;;  %s14999_s18 = scalar_lea.sflag [#allocation4], %s353_s10 }
 0xa97   : > { %v7282_v24 = vpop.permute.xlu1 %7281  ;;  %v7284_v6 = vpop.permute.xlu0 %7283  ;;  %v7396_v62 = vmul.f32 %v17223_v9, %v17412_v46 }
 0xa98   : > { %7356 = vst.msk [vmem:[#allocation2 + $0xb0] sm:$0xff] %vm7333_vm12, %v7282_v24  ;;  %7357 = vst.msk [vmem:[#allocation2 + $0xb8] sm:$0xff] %vm7333_vm12, %v7284_v6 }
 0xa99   : > { %6877 = vrot.lane.b32.xlu1 %v6800_v45, %s8849_s16  ;;  %6907 = vrot.lane.b32.xlu0 %v6815_v40, %s8849_s16  ;;  %v7010_v45 = vmul.f32 %v17391_v18, %v17390_v39  ;;  %v17414_v39 = vld [vmem:[#allocation336_spill] sm:$0xff] }
 0xa9b   : > { %v7439_v5 = vpop.permute.xlu1 %7438  ;;  %v7441_v25 = vpop.permute.xlu0 %7440 }
 0xa9c   : > { %7531 = vst.msk [vmem:[#allocation2 + $0x20] sm:$0xff] %vm7526_vm13, %v7439_v5  ;;  %7532 = vst.msk [vmem:[#allocation2 + $0x28] sm:$0xff] %vm7526_vm13, %v7441_v25  ;;  %v17394_v5 = vld [vmem:[#allocation48_spill] sm:$0xff] }
 0xa9d   : > { %6909 = vrot.lane.b32.xlu1 %v6816_v42, %s8849_s16  ;;  %6879 = vrot.lane.b32.xlu0 %v6801_v10, %s8849_s16  ;;  %v17392_v10 = vld [vmem:[#allocation25_spill] sm:$0xff]  ;;  %v7185_v25 = vmul.f32 %v17359_v30, %v17394_v5  ;;  %v17397_v30 = vld [vmem:[#allocation54_spill] sm:$0xff] }
 0xa9e   : > { %v7011_v42 = vmul.f32 %v17393_v59, %v17392_v10  ;;  %v7187_v35 = vmul.f32 %v17398_v4, %v17397_v30 }
 0xa9f   : > { %v7471_v37 = vpop.permute.xlu1 %7470  ;;  %v7473_v44 = vpop.permute.xlu0 %7472 }
 0xaa0   : > { %7547 = vst.msk [vmem:[#allocation2 + $0xa0] sm:$0xff] %vm7526_vm13, %v7471_v37  ;;  %7548 = vst.msk [vmem:[#allocation2 + $0xa8] sm:$0xff] %vm7526_vm13, %v7473_v44  ;;  %v17396_v37 = vld [vmem:[#allocation22_spill] sm:$0xff] }
 0xaa1   : > { %6881 = vrot.lane.b32.xlu1 %v6802_v54, %s8849_s16  ;;  %6911 = vrot.lane.b32.xlu0 %v6817_v34, %s8849_s16  ;;  %v7186_v34 = vmul.f32 %v17362_v60, %v17395_v56  ;;  %v7201_v44 = vmul.f32 %v17364_v48, %v17396_v37  ;;  %v17400_v48 = vld [vmem:[#allocation45_spill] sm:$0xff] }
 0xaa3   : > { %v7443_v19 = vpop.permute.xlu1 %7442  ;;  %v7445_v29 = vpop.permute.xlu0 %7444  ;;  %v7563_v16 = vld [vmem:[#allocation2 + $0x20] sm:$0xff]  ;;  %v7564_v3 = vld [vmem:[#allocation2 + $0x28] sm:$0xff] }
 0xaa4   : > { %7533 = vst.msk [vmem:[#allocation2 + $0x30] sm:$0xff] %vm7526_vm13, %v7443_v19  ;;  %7534 = vst.msk [vmem:[#allocation2 + $0x38] sm:$0xff] %vm7526_vm13, %v7445_v29  ;;  %v7593_v38 = vpack.c.bf16 %v7564_v3, %v7563_v16  ;;  %v17401_v16 = vld [vmem:[#allocation317_spill] sm:$0xff] }
 0xaa5   : > { %6913 = vrot.lane.b32.xlu1 %v6818_v20, %s8849_s16  ;;  %7068 = vrot.lane.b32.xlu0 %v6992_v32, %s8850_s13  ;;  %v17399_v32 = vld [vmem:[#allocation89_spill] sm:$0xff]  ;;  %v7188_v3 = vmul.f32 %v17401_v16, %v17400_v48 }
 0xaa6   : > { %8483 = vmatprep.mubr.msk.bf16.mxu0 %vm7669_vm14, %v7593_v38  ;;  %v7202_v19 = vmul.f32 %v17366_v63, %v17399_v32  ;;  %v17402_v38 = vld [vmem:[#allocation21_spill] sm:$0xff]  ;;  %v17404_v63 = vld [vmem:[#allocation94_spill] sm:$0xff] }
 0xaa7   : > { %v7475_v50 = vpop.permute.xlu1 %7474  ;;  %v7477_v58 = vpop.permute.xlu0 %7476  ;;  %v7579_v49 = vld [vmem:[#allocation2 + $0xa0] sm:$0xff]  ;;  %v7580_v41 = vld [vmem:[#allocation2 + $0xa8] sm:$0xff]  ;;  %v7203_v36 = vmul.f32 %v17403_v0, %v17402_v38 }
 0xaa8   : > { %7549 = vst.msk [vmem:[#allocation2 + $0xb0] sm:$0xff] %vm7526_vm13, %v7475_v50  ;;  %7550 = vst.msk [vmem:[#allocation2 + $0xb8] sm:$0xff] %vm7526_vm13, %v7477_v58  ;;  %v7601_v22 = vpack.c.bf16 %v7580_v41, %v7579_v49  ;;  %v17406_v58 = vld [vmem:[#allocation144_spill] sm:$0xff] }
 0xaa9   : > { %7070 = vrot.lane.b32.xlu1 %v6993_v33, %s8850_s13  ;;  %7100 = vrot.lane.b32.xlu0 %v7008_v21, %s8850_s13  ;;  %v17405_v21 = vld [vmem:[#allocation13_spill] sm:$0xff]  ;;  %v7378_v49 = vmul.f32 %v17371_v51, %v17406_v58  ;;  %v17409_v51 = vld [vmem:[#allocation148_spill] sm:$0xff] }
 0xaaa   : > { %8499 = vmatprep.mubr.msk.bf16.mxu1 %vm7669_vm14, %v7601_v22  ;;  %v7204_v50 = vmul.f32 %v17405_v21, %v17404_v63 }
 0xaab   : > { %v6677_v1 = vpop.permute.xlu1 %6676  ;;  %v6707_v43 = vpop.permute.xlu0 %6706  ;;  %v7565_v17 = vld [vmem:[#allocation2 + $0x30] sm:$0xff]  ;;  %v7566_v7 = vld [vmem:[#allocation2 + $0x38] sm:$0xff] }
 0xaac   : > { %6764 = vst.msk [vmem:[#allocation2 + $0x48] sm:$0xff] %vm6754_vm9, %v6677_v1  ;;  %6779 = vst.msk [vmem:[#allocation2 + $0xc0] sm:$0xff] %vm6754_vm9, %v6707_v43  ;;  %v7594_v26 = vpack.c.bf16 %v7566_v7, %v7565_v17  ;;  %v7380_v1 = vmul.f32 %v13856_v23, %v17409_v51  ;;  %v17410_v43 = vld [vmem:[#allocation182_spill] sm:$0xff] }
 0xaad   : > { %7102 = vrot.lane.b32.xlu1 %v7009_v61, %s8850_s13  ;;  %7072 = vrot.lane.b32.xlu0 %v6994_v27, %s8850_s13  ;;  %v17408_v27 = vld [vmem:[#allocation176_spill] sm:$0xff]  ;;  %v7395_v17 = vmul.f32 %v17378_v12, %v17410_v43  ;;  %v17413_v12 = vld [vmem:[#allocation9_spill] sm:$0xff] }
 0xaae   : > { %8484 = vmatmul.mubr.msk.bf16.gmra.mxu0 %vm7669_vm14, %v7594_v26  ;;  %v7394_v8 = vmul.f32 %v17376_v47, %v17408_v27  ;;  %v17411_v47 = vld [vmem:[#allocation155_spill] sm:$0xff]  ;;  %v7397_v18 = vmul.f32 %v17414_v39, %v17413_v12 }
 0xaaf   : > { %v6709_v11 = vpop.permute.xlu1 %6708  ;;  %v6679_v40 = vpop.permute.xlu0 %6678  ;;  %v7581_v24 = vld [vmem:[#allocation2 + $0xb0] sm:$0xff]  ;;  %v7582_v6 = vld [vmem:[#allocation2 + $0xb8] sm:$0xff]  ;;  %v7381_v26 = vmul.f32 %v13877_v57, %v17411_v47 }
 0xab0   : > { %6780 = vst.msk [vmem:[#allocation2 + $0xc8] sm:$0xff] %vm6754_vm9, %v6709_v11  ;;  %6765 = vst.msk [vmem:[#allocation2 + $0x50] sm:$0xff] %vm6754_vm9, %v6679_v40  ;;  %v7602_v15 = vpack.c.bf16 %v7582_v6, %v7581_v24 }
 0xab1   : > { %7074 = vrot.lane.b32.xlu1 %v6995_v28, %s8850_s13  ;;  %7104 = vrot.lane.b32.xlu0 %v7010_v45, %s8850_s13 }
 0xab2   : > { %8500 = vmatmul.mubr.msk.bf16.gmra.mxu1 %vm7669_vm14, %v7602_v15 }
 0xab3   : > { %v6681_v14 = vpop.permute.xlu1 %6680  ;;  %v6711_v54 = vpop.permute.xlu0 %6710 }
 0xab4   : > { %6766 = vst.msk [vmem:[#allocation2 + $0x58] sm:$0xff] %vm6754_vm9, %v6681_v14  ;;  %6781 = vst.msk [vmem:[#allocation2 + $0xd0] sm:$0xff] %vm6754_vm9, %v6711_v54 }
 0xab5   : > { %7106 = vrot.lane.b32.xlu1 %v7011_v42, %s8850_s13  ;;  %7261 = vrot.lane.b32.xlu0 %v7185_v25, %s8851_s21 }
 0xab7   : > { %v6713_v31 = vpop.permute.xlu1 %6712  ;;  %v6868_v20 = vpop.permute.xlu0 %6867 }
 0xab8   : > { %6782 = vst.msk [vmem:[#allocation2 + $0xd8] sm:$0xff] %vm6754_vm9, %v6713_v31 }
 0xab9   : > { %6956 = vst.msk [vmem:[#allocation2 + $0x40] sm:$0xff] %vm6947_vm10, %v6868_v20  ;;  %7263 = vrot.lane.b32.xlu1 %v7186_v34, %s8851_s21  ;;  %7293 = vrot.lane.b32.xlu0 %v7201_v44, %s8851_s21 }
 0xabb   : > { %v6870_v60 = vpop.permute.xlu1 %6869  ;;  %v6900_v29 = vpop.permute.xlu0 %6899 }
 0xabc   : > { %6957 = vst.msk [vmem:[#allocation2 + $0x48] sm:$0xff] %vm6947_vm10, %v6870_v60  ;;  %6972 = vst.msk [vmem:[#allocation2 + $0xc0] sm:$0xff] %vm6947_vm10, %v6900_v29 }
 0xabd   : > { %7295 = vrot.lane.b32.xlu1 %v7202_v19, %s8851_s21  ;;  %7265 = vrot.lane.b32.xlu0 %v7187_v35, %s8851_s21 }
 0xabf   : > { %v6902_v33 = vpop.permute.xlu1 %6901  ;;  %v6872_v53 = vpop.permute.xlu0 %6871 }
 0xac0   : > { %6973 = vst.msk [vmem:[#allocation2 + $0xc8] sm:$0xff] %vm6947_vm10, %v6902_v33  ;;  %6958 = vst.msk [vmem:[#allocation2 + $0x50] sm:$0xff] %vm6947_vm10, %v6872_v53 }
 0xac1   : > { %7267 = vrot.lane.b32.xlu1 %v7188_v3, %s8851_s21  ;;  %7297 = vrot.lane.b32.xlu0 %v7203_v36, %s8851_s21 }
 0xac3   : > { %v6874_v41 = vpop.permute.xlu1 %6873  ;;  %v6904_v22 = vpop.permute.xlu0 %6903 }
 0xac4   : > { %6959 = vst.msk [vmem:[#allocation2 + $0x58] sm:$0xff] %vm6947_vm10, %v6874_v41  ;;  %6974 = vst.msk [vmem:[#allocation2 + $0xd0] sm:$0xff] %vm6947_vm10, %v6904_v22 }
 0xac5   : > { %7299 = vrot.lane.b32.xlu1 %v7204_v50, %s8851_s21  ;;  %7454 = vrot.lane.b32.xlu0 %v7378_v49, %s8852_s20  ;;  %s8167_s21 = sshll.u32 %s353_s10, 8 }
 0xac7   : > { %v6906_v13 = vpop.permute.xlu1 %6905  ;;  %v7061_v61 = vpop.permute.xlu0 %7060 }
 0xac8   : > { %6975 = vst.msk [vmem:[#allocation2 + $0xd8] sm:$0xff] %vm6947_vm10, %v6906_v13 }
 0xac9   : > { %7149 = vst.msk [vmem:[#allocation2 + $0x40] sm:$0xff] %vm7140_vm11, %v7061_v61  ;;  %7456 = vrot.lane.b32.xlu1 %v7379_v55, %s8852_s20  ;;  %7486 = vrot.lane.b32.xlu0 %v7394_v8, %s8852_s20 }
 0xacb   : > { %v7063_v52 = vpop.permute.xlu1 %7062  ;;  %v7093_v7 = vpop.permute.xlu0 %7092 }
 0xacc   : > { %7150 = vst.msk [vmem:[#allocation2 + $0x48] sm:$0xff] %vm7140_vm11, %v7063_v52  ;;  %7165 = vst.msk [vmem:[#allocation2 + $0xc0] sm:$0xff] %vm7140_vm11, %v7093_v7  ;;  %v14824_v7 = vld [vmem:[%s15056_s5] ss:$0 sm:$0xff] }
 0xacd   : > { %7488 = vrot.lane.b32.xlu1 %v7395_v17, %s8852_s20  ;;  %7458 = vrot.lane.b32.xlu0 %v7380_v1, %s8852_s20 }
 0xacf   : > { %v7095_v23 = vpop.permute.xlu1 %7094  ;;  %v7065_v28 = vpop.permute.xlu0 %7064 }
 0xad0   : > { %7166 = vst.msk [vmem:[#allocation2 + $0xc8] sm:$0xff] %vm7140_vm11, %v7095_v23  ;;  %7151 = vst.msk [vmem:[#allocation2 + $0x50] sm:$0xff] %vm7140_vm11, %v7065_v28 }
 0xad1   : > { %7460 = vrot.lane.b32.xlu1 %v7381_v26, %s8852_s20  ;;  %7490 = vrot.lane.b32.xlu0 %v7396_v62, %s8852_s20  ;;  %v14831_v26 = vld [vmem:[%s15057_s6] ss:$0 sm:$0xff] }
 0xad3   : > { %v7067_v45 = vpop.permute.xlu1 %7066  ;;  %v7097_v11 = vpop.permute.xlu0 %7096 }
 0xad4   : > { %7152 = vst.msk [vmem:[#allocation2 + $0x58] sm:$0xff] %vm7140_vm11, %v7067_v45  ;;  %7167 = vst.msk [vmem:[#allocation2 + $0xd0] sm:$0xff] %vm7140_vm11, %v7097_v11 }
 0xad5   : > { %7492 = vrot.lane.b32.xlu1 %v7397_v18, %s8852_s20  ;;  %s14840_s20 = scalar_lea.vmem [#allocation3], %s8167_s21 }
 0xad6   : > { %s8035_s16 = sshll.u32 %s14840_s20, 4  ;;  %s14993_s16 = int_to_ptr.vmem [resolvable:$true] %s8035_s16 }
 0xad7   : > { %v7099_v57 = vpop.permute.xlu1 %7098  ;;  %v7254_v9 = vpop.permute.xlu0 %7253  ;;  %s8724_s22 = scalar_lea.vmem %s14993_s16, 4096  ;;  %p8731_p6 = scmp.lt.s32.totalorder %s14993_s16, %s8729_s27 }
 0xad8   : > { %7168 = vst.msk [vmem:[#allocation2 + $0xd8] sm:$0xff] %vm7140_vm11, %v7099_v57  ;;  %p8725_p2 = scmp.ne.s32.totalorder %s14993_s16, %s8724_s22  ;;  %p8732_p7 = scmp.lt.s32.totalorder %s8730_s28, %s8724_s22 }
 0xad9   : > { %7342 = vst.msk [vmem:[#allocation2 + $0x40] sm:$0xff] %vm7333_vm12, %v7254_v9 }
 0xada   : > { %p8726_p4 = pnand %p8725_p2, %p8946_p3  ;;  %p8733_p9 = por %p8732_p7, %p8731_p6 }
 0xadb   : > { %v7256_v40 = vpop.permute.xlu1 %7255  ;;  %v7286_v24 = vpop.permute.xlu0 %7285 }
 0xadc   : > { %7343 = vst.msk [vmem:[#allocation2 + $0x48] sm:$0xff] %vm7333_vm12, %v7256_v40  ;;  %7358 = vst.msk [vmem:[#allocation2 + $0xc0] sm:$0xff] %vm7333_vm12, %v7286_v24  ;;  %p8727_p5 = pneg %p8726_p4 }
 0xade   : > { %p8734_p10 = pnand %p8733_p9, %p8727_p5 }
 0xadf   : > { %v7288_v6 = vpop.permute.xlu1 %7287  ;;  %v7258_v15 = vpop.permute.xlu0 %7257 }
 0xae0   : > { %7359 = vst.msk [vmem:[#allocation2 + $0xc8] sm:$0xff] %vm7333_vm12, %v7288_v6  ;;  %7344 = vst.msk [vmem:[#allocation2 + $0x50] sm:$0xff] %vm7333_vm12, %v7258_v15 }
 0xae3   : > { %v7260_v10 = vpop.permute.xlu1 %7259  ;;  %v7290_v59 = vpop.permute.xlu0 %7289 }
 0xae4   : > { %7345 = vst.msk [vmem:[#allocation2 + $0x58] sm:$0xff] %vm7333_vm12, %v7260_v10  ;;  %7360 = vst.msk [vmem:[#allocation2 + $0xd0] sm:$0xff] %vm7333_vm12, %v7290_v59 }
 0xae7   : > { %v7292_v42 = vpop.permute.xlu1 %7291  ;;  %v7447_v5 = vpop.permute.xlu0 %7446 }
 0xae8   : > { %7361 = vst.msk [vmem:[#allocation2 + $0xd8] sm:$0xff] %vm7333_vm12, %v7292_v42 }
 0xae9   : > { %7535 = vst.msk [vmem:[#allocation2 + $0x40] sm:$0xff] %vm7526_vm13, %v7447_v5 }
 0xaeb   : > { %v7449_v25 = vpop.permute.xlu1 %7448  ;;  %v7479_v14 = vpop.permute.xlu0 %7478 }
 0xaec   : > { %7536 = vst.msk [vmem:[#allocation2 + $0x48] sm:$0xff] %vm7526_vm13, %v7449_v25  ;;  %7551 = vst.msk [vmem:[#allocation2 + $0xc0] sm:$0xff] %vm7526_vm13, %v7479_v14 }
 0xaef   : > { %v7481_v54 = vpop.permute.xlu1 %7480  ;;  %v7451_v56 = vpop.permute.xlu0 %7450 }
 0xaf0   : > { %7552 = vst.msk [vmem:[#allocation2 + $0xc8] sm:$0xff] %vm7526_vm13, %v7481_v54  ;;  %7537 = vst.msk [vmem:[#allocation2 + $0x50] sm:$0xff] %vm7526_vm13, %v7451_v56  ;;  %v7567_v44 = vld [vmem:[#allocation2 + $0x40] sm:$0xff] }
 0xaf3   : > { %v7453_v34 = vpop.permute.xlu1 %7452  ;;  %v7483_v37 = vpop.permute.xlu0 %7482  ;;  %v7568_v31 = vld [vmem:[#allocation2 + $0x48] sm:$0xff]  ;;  %v7583_v35 = vld [vmem:[#allocation2 + $0xc0] sm:$0xff] }
 0xaf4   : > { %7538 = vst.msk [vmem:[#allocation2 + $0x58] sm:$0xff] %vm7526_vm13, %v7453_v34  ;;  %7553 = vst.msk [vmem:[#allocation2 + $0xd0] sm:$0xff] %vm7526_vm13, %v7483_v37  ;;  %v7595_v20 = vpack.c.bf16 %v7568_v31, %v7567_v44 }
 0xaf6   : > { %8487 = vmatprep.mubr.msk.bf16.mxu0 %vm7669_vm14, %v7595_v20 }
 0xaf7   : > { %v7485_v30 = vpop.permute.xlu1 %7484  ;;  %v6683_v4 = vpop.permute.xlu0 %6682  ;;  %v7584_v32 = vld [vmem:[#allocation2 + $0xc8] sm:$0xff]  ;;  %v7569_v48 = vld [vmem:[#allocation2 + $0x50] sm:$0xff] }
 0xaf8   : > { %7554 = vst.msk [vmem:[#allocation2 + $0xd8] sm:$0xff] %vm7526_vm13, %v7485_v30  ;;  %v7603_v19 = vpack.c.bf16 %v7584_v32, %v7583_v35 }
 0xaf9   : > { %6767 = vst.msk [vmem:[#allocation2 + $0x60] sm:$0xff] %vm6754_vm9, %v6683_v4 }
 0xafa   : > { %8503 = vmatprep.mubr.msk.bf16.mxu1 %vm7669_vm14, %v7603_v19 }
 0xafb   : > { %v6685_v60 = vpop.permute.xlu1 %6684  ;;  %v6715_v29 = vpop.permute.xlu0 %6714  ;;  %v7570_v16 = vld [vmem:[#allocation2 + $0x58] sm:$0xff]  ;;  %v7585_v36 = vld [vmem:[#allocation2 + $0xd0] sm:$0xff] }
 0xafc   : > { %6768 = vst.msk [vmem:[#allocation2 + $0x68] sm:$0xff] %vm6754_vm9, %v6685_v60  ;;  %6783 = vst.msk [vmem:[#allocation2 + $0xe0] sm:$0xff] %vm6754_vm9, %v6715_v29  ;;  %v7596_v3 = vpack.c.bf16 %v7570_v16, %v7569_v48 }
 0xafe   : > { %8488 = vmatmul.mubr.msk.bf16.gmra.mxu0 %vm7669_vm14, %v7596_v3 }
 0xaff   : > { %v6717_v38 = vpop.permute.xlu1 %6716  ;;  %v6687_v0 = vpop.permute.xlu0 %6686  ;;  %v7586_v33 = vld [vmem:[#allocation2 + $0xd8] sm:$0xff] }
 0xb00   : > { %6784 = vst.msk [vmem:[#allocation2 + $0xe8] sm:$0xff] %vm6754_vm9, %v6717_v38  ;;  %6769 = vst.msk [vmem:[#allocation2 + $0x70] sm:$0xff] %vm6754_vm9, %v6687_v0  ;;  %v7604_v53 = vpack.c.bf16 %v7586_v33, %v7585_v36 }
 0xb02   : > { %8504 = vmatmul.mubr.msk.bf16.gmra.mxu1 %vm7669_vm14, %v7604_v53 }
 0xb03   : > { %v6689_v63 = vpop.permute.xlu1 %6688  ;;  %v6719_v21 = vpop.permute.xlu0 %6718 }
 0xb04   : > { %6770 = vst.msk [vmem:[#allocation2 + $0x78] sm:$0xff] %vm6754_vm9, %v6689_v63  ;;  %6785 = vst.msk [vmem:[#allocation2 + $0xf0] sm:$0xff] %vm6754_vm9, %v6719_v21 }
 0xb07   : > { %v6721_v50 = vpop.permute.xlu1 %6720  ;;  %v6876_v58 = vpop.permute.xlu0 %6875 }
 0xb08   : > { %6786 = vst.msk [vmem:[#allocation2 + $0xf8] sm:$0xff] %vm6754_vm9, %v6721_v50 }
 0xb09   : > { %6960 = vst.msk [vmem:[#allocation2 + $0x60] sm:$0xff] %vm6947_vm10, %v6876_v58 }
 0xb0b   : > { %v6878_v49 = vpop.permute.xlu1 %6877  ;;  %v6908_v41 = vpop.permute.xlu0 %6907 }
 0xb0c   : > { %6961 = vst.msk [vmem:[#allocation2 + $0x68] sm:$0xff] %vm6947_vm10, %v6878_v49  ;;  %6976 = vst.msk [vmem:[#allocation2 + $0xe0] sm:$0xff] %vm6947_vm10, %v6908_v41 }
 0xb0f   : > { %v6910_v22 = vpop.permute.xlu1 %6909  ;;  %v6880_v2 = vpop.permute.xlu0 %6879 }
 0xb10   : > { %6977 = vst.msk [vmem:[#allocation2 + $0xe8] sm:$0xff] %vm6947_vm10, %v6910_v22  ;;  %6962 = vst.msk [vmem:[#allocation2 + $0x70] sm:$0xff] %vm6947_vm10, %v6880_v2 }
 0xb13   : > { %v6882_v55 = vpop.permute.xlu1 %6881  ;;  %v6912_v27 = vpop.permute.xlu0 %6911 }
 0xb14   : > { %6963 = vst.msk [vmem:[#allocation2 + $0x78] sm:$0xff] %vm6947_vm10, %v6882_v55  ;;  %6978 = vst.msk [vmem:[#allocation2 + $0xf0] sm:$0xff] %vm6947_vm10, %v6912_v27 }
 0xb17   : > { %v6914_v8 = vpop.permute.xlu1 %6913  ;;  %v7069_v13 = vpop.permute.xlu0 %7068 }
 0xb18   : > { %6979 = vst.msk [vmem:[#allocation2 + $0xf8] sm:$0xff] %vm6947_vm10, %v6914_v8 }
 0xb19   : > { %7153 = vst.msk [vmem:[#allocation2 + $0x60] sm:$0xff] %vm7140_vm11, %v7069_v13 }
 0xb1b   : > { %v7071_v61 = vpop.permute.xlu1 %7070  ;;  %v7101_v51 = vpop.permute.xlu0 %7100 }
 0xb1c   : > { %7154 = vst.msk [vmem:[#allocation2 + $0x68] sm:$0xff] %vm7140_vm11, %v7071_v61  ;;  %7169 = vst.msk [vmem:[#allocation2 + $0xe0] sm:$0xff] %vm7140_vm11, %v7101_v51 }
 0xb1f   : > { %v7103_v1 = vpop.permute.xlu1 %7102  ;;  %v7073_v43 = vpop.permute.xlu0 %7072 }
 0xb20   : > { %7170 = vst.msk [vmem:[#allocation2 + $0xe8] sm:$0xff] %vm7140_vm11, %v7103_v1  ;;  %7155 = vst.msk [vmem:[#allocation2 + $0x70] sm:$0xff] %vm7140_vm11, %v7073_v43 }
 0xb23   : > { %v7075_v17 = vpop.permute.xlu1 %7074  ;;  %v7105_v52 = vpop.permute.xlu0 %7104 }
 0xb24   : > { %7156 = vst.msk [vmem:[#allocation2 + $0x78] sm:$0xff] %vm7140_vm11, %v7075_v17  ;;  %7171 = vst.msk [vmem:[#allocation2 + $0xf0] sm:$0xff] %vm7140_vm11, %v7105_v52 }
 0xb26   : > { %v8481_v47 = vpop.f32.mrf.mxu0 }
 0xb27   : > { %v7765_v46 = vadd.f32 %v8481_v47, %v14824_v7  ;;  %v7107_v62 = vpop.permute.xlu1 %7106  ;;  %v7262_v23 = vpop.permute.xlu0 %7261 }
 0xb28   : > { %7172 = vst.msk [vmem:[#allocation2 + $0xf8] sm:$0xff] %vm7140_vm11, %v7107_v62  ;;  %v7756_v28 = vpop.f32.mrf.mxu0 }
 0xb29   : > { %7346 = vst.msk [vmem:[#allocation2 + $0x60] sm:$0xff] %vm7333_vm12, %v7262_v23  ;;  %vm7885_vm15 = vcmp.ge.f32.partialorder %v7765_v46, 0.0  ;;  %v7924_v12 = vmul.f32 %v14831_v26, %v7765_v46  ;;  %v7757_v39 = vadd.f32 %v14824_v7, %v7756_v28 }
 0xb2a   : > { %v8482_v18 = vpop.f32.mrf.mxu0  ;;  %v8497_v45 = vpop.f32.mrf.mxu1 }
 0xb2b   : > { %v7956_v11 = vsel %vm7885_vm15, %v7765_v46, %v7924_v12  ;;  %vm7883_vm2 = vcmp.ge.f32.partialorder %v7757_v39, 0.0  ;;  %v7922_v57 = vmul.f32 %v14831_v26, %v7757_v39  ;;  %v7768_v9 = vadd.f32 %v8482_v18, %v14824_v7  ;;  %v7264_v40 = vpop.permute.xlu1 %7263  ;;  %v7294_v24 = vpop.permute.xlu0 %7293 }
 0xb2c   : > { %7989 = vst.msk [vmem:[%s14840_s20 + $0x10] sm:$0xff] %vm7986_vm1, %v7956_v11  ;;  %v7829_v6 = vadd.f32 %v8497_v45, %v14824_v7  ;;  %v7759_v15 = vpop.f32.mrf.mxu0  ;;  %v7820_v10 = vpop.f32.mrf.mxu1 }
 0xb2d   : > { %7347 = vst.msk [vmem:[#allocation2 + $0x68] sm:$0xff] %vm7333_vm12, %v7264_v40  ;;  %7362 = vst.msk [vmem:[#allocation2 + $0xe0] sm:$0xff] %vm7333_vm12, %v7294_v24  ;;  %v7954_v59 = vsel %vm7883_vm2, %v7757_v39, %v7922_v57  ;;  %vm7886_vm4 = vcmp.ge.f32.partialorder %v7768_v9, 0.0  ;;  %v7925_v42 = vmul.f32 %v14831_v26, %v7768_v9  ;;  %v7760_v5 = vadd.f32 %v14824_v7, %v7759_v15 }
 0xb2e   : > { %7987 = vst.msk [vmem:[%s14840_s20] sm:$0xff] %vm7986_vm1, %v7954_v59  ;;  %vm7901_vm5 = vcmp.ge.f32.partialorder %v7829_v6, 0.0  ;;  %v7940_v25 = vmul.f32 %v14831_v26, %v7829_v6  ;;  %v7821_v14 = vadd.f32 %v14824_v7, %v7820_v10  ;;  %v8498_v54 = vpop.f32.mrf.mxu1 }
 0xb2f   : > { %v7957_v56 = vsel %vm7886_vm4, %v7768_v9, %v7925_v42  ;;  %vm7884_vm0 = vcmp.ge.f32.partialorder %v7760_v5, 0.0  ;;  %v7923_v34 = vmul.f32 %v14831_v26, %v7760_v5  ;;  %v7832_v37 = vadd.f32 %v8498_v54, %v14824_v7  ;;  %v7296_v44 = vpop.permute.xlu1 %7295  ;;  %v7266_v31 = vpop.permute.xlu0 %7265 }
 0xb30   : > { %7990 = vst.msk [vmem:[%s14840_s20 + $0x18] sm:$0xff] %vm7986_vm1, %v7957_v56  ;;  %v7972_v20 = vsel %vm7901_vm5, %v7829_v6, %v7940_v25  ;;  %vm7899_vm6 = vcmp.ge.f32.partialorder %v7821_v14, 0.0  ;;  %v7938_v30 = vmul.f32 %v14831_v26, %v7821_v14  ;;  %v7823_v4 = vpop.f32.mrf.mxu1 }
 0xb31   : > { %7363 = vst.msk [vmem:[#allocation2 + $0xe8] sm:$0xff] %vm7333_vm12, %v7296_v44  ;;  %7348 = vst.msk [vmem:[#allocation2 + $0x70] sm:$0xff] %vm7333_vm12, %v7266_v31  ;;  %v7955_v35 = vsel %vm7884_vm0, %v7760_v5, %v7923_v34  ;;  %vm7902_vm3 = vcmp.ge.f32.partialorder %v7832_v37, 0.0  ;;  %v7941_v32 = vmul.f32 %v14831_v26, %v7832_v37  ;;  %v7824_v19 = vadd.f32 %v14824_v7, %v7823_v4 }
 0xb32   : > { %8005 = vst.msk [vmem:[%s14840_s20 + $0x90] sm:$0xff] %vm7986_vm1, %v7972_v20  ;;  %7988 = vst.msk [vmem:[%s14840_s20 + $0x8] sm:$0xff] %vm7986_vm1, %v7955_v35  ;;  %v7970_v60 = vsel %vm7899_vm6, %v7821_v14, %v7938_v30 }
 0xb33   : > { %8003 = vst.msk [vmem:[%s14840_s20 + $0x80] sm:$0xff] %vm7986_vm1, %v7970_v60  ;;  %v7973_v29 = vsel %vm7902_vm3, %v7832_v37, %v7941_v32  ;;  %vm7900_vm7 = vcmp.ge.f32.partialorder %v7824_v19, 0.0  ;;  %v7939_v48 = vmul.f32 %v14831_v26, %v7824_v19  ;;  %v7268_v16 = vpop.permute.xlu1 %7267  ;;  %v7298_v3 = vpop.permute.xlu0 %7297 }
 0xb34   : > { %8006 = vst.msk [vmem:[%s14840_s20 + $0x98] sm:$0xff] %vm7986_vm1, %v7973_v29 }
 0xb35   : > { %7349 = vst.msk [vmem:[#allocation2 + $0x78] sm:$0xff] %vm7333_vm12, %v7268_v16  ;;  %7364 = vst.msk [vmem:[#allocation2 + $0xf0] sm:$0xff] %vm7333_vm12, %v7298_v3  ;;  %v7971_v38 = vsel %vm7900_vm7, %v7824_v19, %v7939_v48 }
 0xb36   : > { %8004 = vst.msk [vmem:[%s14840_s20 + $0x88] sm:$0xff] %vm7986_vm1, %v7971_v38 }
 0xb37   : > { %v7300_v0 = vpop.permute.xlu1 %7299  ;;  %v7455_v36 = vpop.permute.xlu0 %7454 }
 0xb38   : > { %7365 = vst.msk [vmem:[#allocation2 + $0xf8] sm:$0xff] %vm7333_vm12, %v7300_v0 }
 0xb39   : > { %7539 = vst.msk [vmem:[#allocation2 + $0x60] sm:$0xff] %vm7526_vm13, %v7455_v36 }
 0xb3b   : > { %v7457_v33 = vpop.permute.xlu1 %7456  ;;  %v7487_v53 = vpop.permute.xlu0 %7486 }
 0xb3c   : > { %7540 = vst.msk [vmem:[#allocation2 + $0x68] sm:$0xff] %vm7526_vm13, %v7457_v33  ;;  %7555 = vst.msk [vmem:[#allocation2 + $0xe0] sm:$0xff] %vm7526_vm13, %v7487_v53 }
 0xb3f   : > { %v7489_v63 = vpop.permute.xlu1 %7488  ;;  %v7459_v21 = vpop.permute.xlu0 %7458 }
 0xb40   : > { %7556 = vst.msk [vmem:[#allocation2 + $0xe8] sm:$0xff] %vm7526_vm13, %v7489_v63  ;;  %7541 = vst.msk [vmem:[#allocation2 + $0x70] sm:$0xff] %vm7526_vm13, %v7459_v21  ;;  %v7571_v49 = vld [vmem:[#allocation2 + $0x60] sm:$0xff] }
 0xb43   : > { %v7461_v50 = vpop.permute.xlu1 %7460  ;;  %v7491_v58 = vpop.permute.xlu0 %7490  ;;  %v7572_v41 = vld [vmem:[#allocation2 + $0x68] sm:$0xff]  ;;  %v7587_v55 = vld [vmem:[#allocation2 + $0xe0] sm:$0xff] }
 0xb44   : > { %7542 = vst.msk [vmem:[#allocation2 + $0x78] sm:$0xff] %vm7526_vm13, %v7461_v50  ;;  %7557 = vst.msk [vmem:[#allocation2 + $0xf0] sm:$0xff] %vm7526_vm13, %v7491_v58  ;;  %v7597_v22 = vpack.c.bf16 %v7572_v41, %v7571_v49 }
 0xb46   : > { %8491 = vmatprep.mubr.msk.bf16.mxu0 %vm7669_vm14, %v7597_v22 }
 0xb47   : > { %v7493_v2 = vpop.permute.xlu1 %7492  ;;  %v7588_v27 = vld [vmem:[#allocation2 + $0xe8] sm:$0xff]  ;;  %v7573_v13 = vld [vmem:[#allocation2 + $0x70] sm:$0xff] }
 0xb48   : > { %7558 = vst.msk [vmem:[#allocation2 + $0xf8] sm:$0xff] %vm7526_vm13, %v7493_v2  ;;  %v7605_v8 = vpack.c.bf16 %v7588_v27, %v7587_v55 }
 0xb4a   : > { %8507 = vmatprep.mubr.msk.bf16.mxu1 %vm7669_vm14, %v7605_v8 }
 0xb4b   : > { %v7574_v61 = vld [vmem:[#allocation2 + $0x78] sm:$0xff]  ;;  %v7589_v1 = vld [vmem:[#allocation2 + $0xf0] sm:$0xff] }
 0xb4c   : > { %v7598_v51 = vpack.c.bf16 %v7574_v61, %v7573_v13 }
 0xb4e   : > { %8492 = vmatmul.mubr.msk.bf16.gmra.mxu0 %vm7669_vm14, %v7598_v51 }
 0xb4f   : > { %v7590_v43 = vld [vmem:[#allocation2 + $0xf8] sm:$0xff] }
 0xb50   : > { %v7606_v17 = vpack.c.bf16 %v7590_v43, %v7589_v1 }
 0xb52   : > { %8508 = vmatmul.mubr.msk.bf16.gmra.mxu1 %vm7669_vm14, %v7606_v17 }
 0xb6e   : > { %v8485_v52 = vpop.f32.mrf.mxu0 }
 0xb6f   : > { %v7781_v47 = vadd.f32 %v8485_v52, %v14824_v7 }
 0xb70   : > { %v7772_v46 = vpop.f32.mrf.mxu0 }
 0xb71   : > { %vm7889_vm8 = vcmp.ge.f32.partialorder %v7781_v47, 0.0  ;;  %v7928_v62 = vmul.f32 %v14831_v26, %v7781_v47  ;;  %v7773_v23 = vadd.f32 %v14824_v7, %v7772_v46 }
 0xb72   : > { %v8486_v28 = vpop.f32.mrf.mxu0  ;;  %v8501_v12 = vpop.f32.mrf.mxu1 }
 0xb73   : > { %v7960_v39 = vsel %vm7889_vm8, %v7781_v47, %v7928_v62  ;;  %vm7887_vm9 = vcmp.ge.f32.partialorder %v7773_v23, 0.0  ;;  %v7926_v18 = vmul.f32 %v14831_v26, %v7773_v23  ;;  %v7784_v45 = vadd.f32 %v8486_v28, %v14824_v7 }
 0xb74   : > { %7993 = vst.msk [vmem:[%s14840_s20 + $0x30] sm:$0xff] %vm7986_vm1, %v7960_v39  ;;  %v7845_v11 = vadd.f32 %v8501_v12, %v14824_v7  ;;  %v7775_v57 = vpop.f32.mrf.mxu0  ;;  %v7836_v9 = vpop.f32.mrf.mxu1 }
 0xb75   : > { %v7958_v40 = vsel %vm7887_vm9, %v7773_v23, %v7926_v18  ;;  %vm7890_vm10 = vcmp.ge.f32.partialorder %v7784_v45, 0.0  ;;  %v7929_v24 = vmul.f32 %v14831_v26, %v7784_v45  ;;  %v7776_v6 = vadd.f32 %v14824_v7, %v7775_v57 }
 0xb76   : > { %7991 = vst.msk [vmem:[%s14840_s20 + $0x20] sm:$0xff] %vm7986_vm1, %v7958_v40  ;;  %vm7905_vm11 = vcmp.ge.f32.partialorder %v7845_v11, 0.0  ;;  %v7944_v15 = vmul.f32 %v14831_v26, %v7845_v11  ;;  %v7837_v10 = vadd.f32 %v14824_v7, %v7836_v9  ;;  %v8502_v59 = vpop.f32.mrf.mxu1 }
 0xb77   : > { %v7961_v42 = vsel %vm7890_vm10, %v7784_v45, %v7929_v24  ;;  %vm7888_vm12 = vcmp.ge.f32.partialorder %v7776_v6, 0.0  ;;  %v7927_v5 = vmul.f32 %v14831_v26, %v7776_v6  ;;  %v7848_v25 = vadd.f32 %v8502_v59, %v14824_v7 }
 0xb78   : > { %7994 = vst.msk [vmem:[%s14840_s20 + $0x38] sm:$0xff] %vm7986_vm1, %v7961_v42  ;;  %v7976_v14 = vsel %vm7905_vm11, %v7845_v11, %v7944_v15  ;;  %vm7903_vm13 = vcmp.ge.f32.partialorder %v7837_v10, 0.0  ;;  %v7942_v54 = vmul.f32 %v14831_v26, %v7837_v10  ;;  %v7839_v56 = vpop.f32.mrf.mxu1 }
 0xb79   : > { %8009 = vst.msk [vmem:[%s14840_s20 + $0xb0] sm:$0xff] %vm7986_vm1, %v7976_v14  ;;  %v7959_v34 = vsel %vm7888_vm12, %v7776_v6, %v7927_v5  ;;  %vm7906_vm14 = vcmp.ge.f32.partialorder %v7848_v25, 0.0  ;;  %v7945_v37 = vmul.f32 %v14831_v26, %v7848_v25  ;;  %v7840_v44 = vadd.f32 %v14824_v7, %v7839_v56 }
 0xb7a   : > { %7992 = vst.msk [vmem:[%s14840_s20 + $0x28] sm:$0xff] %vm7986_vm1, %v7959_v34  ;;  %v7974_v31 = vsel %vm7903_vm13, %v7837_v10, %v7942_v54 }
 0xb7b   : > { %8007 = vst.msk [vmem:[%s14840_s20 + $0xa0] sm:$0xff] %vm7986_vm1, %v7974_v31  ;;  %v7977_v20 = vsel %vm7906_vm14, %v7848_v25, %v7945_v37  ;;  %vm7904_vm15 = vcmp.ge.f32.partialorder %v7840_v44, 0.0  ;;  %v7943_v30 = vmul.f32 %v14831_v26, %v7840_v44 }
 0xb7c   : > { %8010 = vst.msk [vmem:[%s14840_s20 + $0xb8] sm:$0xff] %vm7986_vm1, %v7977_v20 }
 0xb7d   : > { %v7975_v4 = vsel %vm7904_vm15, %v7840_v44, %v7943_v30 }
 0xb7e   : > { %8008 = vst.msk [vmem:[%s14840_s20 + $0xa8] sm:$0xff] %vm7986_vm1, %v7975_v4 }
 0xbbe   : > { %v8489_v35 = vpop.f32.mrf.mxu0 }
 0xbbf   : > { %v7797_v32 = vadd.f32 %v8489_v35, %v14824_v7 }
 0xbc0   : > { %v7788_v19 = vpop.f32.mrf.mxu0 }
 0xbc1   : > { %vm7893_vm2 = vcmp.ge.f32.partialorder %v7797_v32, 0.0  ;;  %v7932_v60 = vmul.f32 %v14831_v26, %v7797_v32  ;;  %v7789_v29 = vadd.f32 %v14824_v7, %v7788_v19 }
 0xbc2   : > { %v8490_v48 = vpop.f32.mrf.mxu0  ;;  %v8505_v16 = vpop.f32.mrf.mxu1 }
 0xbc3   : > { %v7964_v3 = vsel %vm7893_vm2, %v7797_v32, %v7932_v60  ;;  %vm7891_vm4 = vcmp.ge.f32.partialorder %v7789_v29, 0.0  ;;  %v7930_v38 = vmul.f32 %v14831_v26, %v7789_v29  ;;  %v7800_v0 = vadd.f32 %v8490_v48, %v14824_v7 }
 0xbc4   : > { %7997 = vst.msk [vmem:[%s14840_s20 + $0x50] sm:$0xff] %vm7986_vm1, %v7964_v3  ;;  %v7861_v36 = vadd.f32 %v8505_v16, %v14824_v7  ;;  %v7791_v33 = vpop.f32.mrf.mxu0  ;;  %v7852_v53 = vpop.f32.mrf.mxu1 }
 0xbc5   : > { %v7962_v63 = vsel %vm7891_vm4, %v7789_v29, %v7930_v38  ;;  %vm7894_vm5 = vcmp.ge.f32.partialorder %v7800_v0, 0.0  ;;  %v7933_v21 = vmul.f32 %v14831_v26, %v7800_v0  ;;  %v7792_v50 = vadd.f32 %v14824_v7, %v7791_v33 }
 0xbc6   : > { %7995 = vst.msk [vmem:[%s14840_s20 + $0x40] sm:$0xff] %vm7986_vm1, %v7962_v63  ;;  %vm7909_vm0 = vcmp.ge.f32.partialorder %v7861_v36, 0.0  ;;  %v7948_v58 = vmul.f32 %v14831_v26, %v7861_v36  ;;  %v7853_v49 = vadd.f32 %v14824_v7, %v7852_v53  ;;  %v8506_v41 = vpop.f32.mrf.mxu1 }
 0xbc7   : > { %v7965_v22 = vsel %vm7894_vm5, %v7800_v0, %v7933_v21  ;;  %vm7892_vm6 = vcmp.ge.f32.partialorder %v7792_v50, 0.0  ;;  %v7931_v2 = vmul.f32 %v14831_v26, %v7792_v50  ;;  %v7864_v55 = vadd.f32 %v8506_v41, %v14824_v7 }
 0xbc8   : > { %7998 = vst.msk [vmem:[%s14840_s20 + $0x58] sm:$0xff] %vm7986_vm1, %v7965_v22  ;;  %v7980_v27 = vsel %vm7909_vm0, %v7861_v36, %v7948_v58  ;;  %vm7907_vm3 = vcmp.ge.f32.partialorder %v7853_v49, 0.0  ;;  %v7946_v8 = vmul.f32 %v14831_v26, %v7853_v49  ;;  %v7855_v13 = vpop.f32.mrf.mxu1 }
 0xbc9   : > { %8013 = vst.msk [vmem:[%s14840_s20 + $0xd0] sm:$0xff] %vm7986_vm1, %v7980_v27  ;;  %v7963_v61 = vsel %vm7892_vm6, %v7792_v50, %v7931_v2  ;;  %vm7910_vm7 = vcmp.ge.f32.partialorder %v7864_v55, 0.0  ;;  %v7949_v51 = vmul.f32 %v14831_v26, %v7864_v55  ;;  %v7856_v1 = vadd.f32 %v14824_v7, %v7855_v13 }
 0xbca   : > { %7996 = vst.msk [vmem:[%s14840_s20 + $0x48] sm:$0xff] %vm7986_vm1, %v7963_v61  ;;  %v7978_v43 = vsel %vm7907_vm3, %v7853_v49, %v7946_v8 }
 0xbcb   : > { %8011 = vst.msk [vmem:[%s14840_s20 + $0xc0] sm:$0xff] %vm7986_vm1, %v7978_v43  ;;  %v7981_v17 = vsel %vm7910_vm7, %v7864_v55, %v7949_v51  ;;  %vm7908_vm8 = vcmp.ge.f32.partialorder %v7856_v1, 0.0  ;;  %v7947_v52 = vmul.f32 %v14831_v26, %v7856_v1 }
 0xbcc   : > { %8014 = vst.msk [vmem:[%s14840_s20 + $0xd8] sm:$0xff] %vm7986_vm1, %v7981_v17 }
 0xbcd   : > { %v7979_v47 = vsel %vm7908_vm8, %v7856_v1, %v7947_v52 }
 0xbce   : > { %8012 = vst.msk [vmem:[%s14840_s20 + $0xc8] sm:$0xff] %vm7986_vm1, %v7979_v47 }
 0xc0e   : > { %v8493_v46 = vpop.f32.mrf.mxu0 }
 0xc0f   : > { %v7813_v62 = vadd.f32 %v8493_v46, %v14824_v7 }
 0xc10   : > { %v7804_v23 = vpop.f32.mrf.mxu0 }
 0xc11   : > { %vm7897_vm9 = vcmp.ge.f32.partialorder %v7813_v62, 0.0  ;;  %v7936_v28 = vmul.f32 %v14831_v26, %v7813_v62  ;;  %v7805_v12 = vadd.f32 %v14824_v7, %v7804_v23 }
 0xc12   : > { %v8494_v39 = vpop.f32.mrf.mxu0  ;;  %v8509_v18 = vpop.f32.mrf.mxu1 }
 0xc13   : > { %v7968_v45 = vsel %vm7897_vm9, %v7813_v62, %v7936_v28  ;;  %vm7895_vm10 = vcmp.ge.f32.partialorder %v7805_v12, 0.0  ;;  %v7934_v11 = vmul.f32 %v14831_v26, %v7805_v12  ;;  %v7816_v57 = vadd.f32 %v8494_v39, %v14824_v7 }
 0xc14   : > { %8001 = vst.msk [vmem:[%s14840_s20 + $0x70] sm:$0xff] %vm7986_vm1, %v7968_v45  ;;  %v7877_v9 = vadd.f32 %v8509_v18, %v14824_v7  ;;  %v7807_v40 = vpop.f32.mrf.mxu0  ;;  %v7868_v24 = vpop.f32.mrf.mxu1 }
 0xc15   : > { %v7966_v6 = vsel %vm7895_vm10, %v7805_v12, %v7934_v11  ;;  %vm7898_vm11 = vcmp.ge.f32.partialorder %v7816_v57, 0.0  ;;  %v7937_v15 = vmul.f32 %v14831_v26, %v7816_v57  ;;  %v7808_v10 = vadd.f32 %v14824_v7, %v7807_v40 }
 0xc16   : > { %7999 = vst.msk [vmem:[%s14840_s20 + $0x60] sm:$0xff] %vm7986_vm1, %v7966_v6  ;;  %vm7913_vm12 = vcmp.ge.f32.partialorder %v7877_v9, 0.0  ;;  %v7952_v59 = vmul.f32 %v14831_v26, %v7877_v9  ;;  %v7869_v42 = vadd.f32 %v14824_v7, %v7868_v24  ;;  %v8510_v5 = vpop.f32.mrf.mxu1 }
 0xc17   : > { %v7969_v25 = vsel %vm7898_vm11, %v7816_v57, %v7937_v15  ;;  %vm7896_vm13 = vcmp.ge.f32.partialorder %v7808_v10, 0.0  ;;  %v7935_v14 = vmul.f32 %v14831_v26, %v7808_v10  ;;  %v7880_v54 = vadd.f32 %v8510_v5, %v14824_v7 }
 0xc18   : > { %8002 = vst.msk [vmem:[%s14840_s20 + $0x78] sm:$0xff] %vm7986_vm1, %v7969_v25  ;;  %v7984_v56 = vsel %vm7913_vm12, %v7877_v9, %v7952_v59  ;;  %vm7911_vm14 = vcmp.ge.f32.partialorder %v7869_v42, 0.0  ;;  %v7950_v34 = vmul.f32 %v14831_v26, %v7869_v42  ;;  %v7871_v37 = vpop.f32.mrf.mxu1 }
 0xc19   : > { %8017 = vst.msk [vmem:[%s14840_s20 + $0xf0] sm:$0xff] %vm7986_vm1, %v7984_v56  ;;  %v7967_v44 = vsel %vm7896_vm13, %v7808_v10, %v7935_v14  ;;  %vm7914_vm15 = vcmp.ge.f32.partialorder %v7880_v54, 0.0  ;;  %v7953_v31 = vmul.f32 %v14831_v26, %v7880_v54  ;;  %v7872_v20 = vadd.f32 %v14824_v7, %v7871_v37 }
 0xc1a   : > { %8000 = vst.msk [vmem:[%s14840_s20 + $0x68] sm:$0xff] %vm7986_vm1, %v7967_v44  ;;  %v7982_v30 = vsel %vm7911_vm14, %v7869_v42, %v7950_v34 }
 0xc1b   : > { %8015 = vst.msk [vmem:[%s14840_s20 + $0xe0] sm:$0xff] %vm7986_vm1, %v7982_v30  ;;  %v7985_v4 = vsel %vm7914_vm15, %v7880_v54, %v7953_v31  ;;  %vm7912_vm2 = vcmp.ge.f32.partialorder %v7872_v20, 0.0  ;;  %v7951_v35 = vmul.f32 %v14831_v26, %v7872_v20 }
 0xc1c   : > { %8018 = vst.msk [vmem:[%s14840_s20 + $0xf8] sm:$0xff] %vm7986_vm1, %v7985_v4 }
 0xc1d   : > { %v7983_v7 = vsel %vm7912_vm2, %v7872_v20, %v7951_v35 }
 0xc1e   : > { %8016 = vst.msk [vmem:[%s14840_s20 + $0xe8] sm:$0xff] %vm7986_vm1, %v7983_v7 }
 0xc1f   : > { %8737 = shalt.err (!%p8734_p10)
}
 0xc20   : > { %s8738_s10 = scalar_lea.hbm %s14989_s17, 4096  ;;  %s8742_s21 = scalar_lea.hbm %s15058_s7, 131072 }
 0xc21   : > { %p8739_p11 = scmp.ne.s32.totalorder %s14989_s17, %s8738_s10  ;;  %p8743_p0 = scmp.lt.s32.totalorder %s14989_s17, %s15058_s7 }
 0xc22   : > { %p8744_p1 = scmp.lt.s32.totalorder %s8742_s21, %s8738_s10 }
 0xc23   : > { %p8740_p12 = pnand %p8739_p11, %p8946_p3 }
 0xc24   : > { %p8745_p2 = por %p8744_p1, %p8743_p0 }
 0xc25   : > { %p8741_p13 = pneg %p8740_p12 }
 0xc27   : > { %p8746_p4 = pnand %p8745_p2, %p8741_p13 }
 0xc29   : > { %8749 = shalt.err (!%p8746_p4)
}
 0xc2a   : > { %s8854_s22 = smov 128   ;;  %s17415_s27 = smov 8  }
 0xc2b   : > { %8528 = dma.vmem_to_hbm [thread:$0]  (%p8946_p3), %s14993_s16, 4096, %s14989_s17, %s14999_s18, %s8854_s22, %s8854_s22, %s17415_s27  }
 0xc2c PF: > { %p8534_p5 = scmp.ge.s32.totalorder %s8816_s8, 2  ;;  %s8050_s28 = sand.u32 1, %s8788_s24  }
 0xc2d   : > { %s8051_s9 = scalar_lea.sflag [#allocation4], %s8050_s28 }
 0xc2e   : > { %p8531_p6 = pnand %p8534_p5, %p8955_p8 }
 0xc30   : > { %p8532_p7 = pneg %p8531_p6 }
 0xc32   : > { %8783 = dma.done.wait (%p8532_p7), %s8051_s9, 4096  }
 0xc33   : > { %8785 = vsyncadd (%p8532_p7), %s8051_s9, 4294963200  ;;  %s20_s8 = sadd.s32 1, %s8816_s8   ;;  %s17416_s24 = smov %s8792_s25 }
 0xc34   : > { %p17_p9 = scmp.ge.s32.totalorder %s20_s8, 34   ;;  %s17417_s25 = smov %s8796_s26 }
 0xc35   : > { %s17418_s26 = smov %s8964_s19  ;;  %s17419_s27 = smov %s8808_s29 }
 0xc36   : > { %s17420_s28 = smov %s8812_s30  ;;  %s17421_s29 = smov %s17424_s11 }
 0xc37   : > { %s17422_s30 = smov %s17428_s12  ;;  %19 = sbr.rel (!%p17_p9) target bundleno = 5 (0x5), region = 89 }
 0xc3c   :  { %8056 = vsyncpa [#allocation4], 1 }
 0xc3d   :  { %8058 = vsyncpa [#allocation4 + $0x1], 1 }

</bundles_post_ra>
